<compile_context>
chip_gen: v7x
topology: tpu7x:2x2x1
jax: 0.10.0
libtpu: 0.0.40
codegen_flags: <defaults>
</compile_context>

<pallas_src>
import functools

import jax
import jax.numpy as jnp
from jax.experimental import pallas as pl
from jax.experimental.pallas import tpu as pltpu


def _act(name, x):
    if name == "ReLU":
        return jnp.maximum(x, 0.0)
    if name == "Tanh":
        return jnp.tanh(x)
    if name == "Sigmoid":
        return jax.nn.sigmoid(x)
    if name == "Identity":
        return x
    raise ValueError(f"unsupported activation: {name}")


# --------------------------------------------------------------------------------------
# Fused BasicBlock body (pure value -> value, runs inside the single kernel).
# Activation layout: time-major 2D (B*L, C) with row = l*B + b, so a time shift is a pure
# (static) row shift with no cross-batch contamination.
# --------------------------------------------------------------------------------------
def _basic_block_body(hid, h0, wconv, shiftc, wih, bih, whh, bhh, scale_r, shift_r,
                      *, B, L, H, K, cnn_act, rnn_act):
    BL = B * L
    P = (K - 1) // 2
    C = 2 * H

    # ---- Conv1d ('same', stride=1) as a single im2col matmul (register-built taps) ----
    zpad = jnp.zeros((P * B, C), jnp.float32)
    xp = jnp.concatenate([zpad, hid, zpad], axis=0)                 # ((L+2P)*B, C)
    im2col = jnp.concatenate([xp[k * B:k * B + BL, :] for k in range(K)], axis=-1)
    conv = jnp.dot(im2col.astype(jnp.bfloat16), wconv,
                   preferred_element_type=jnp.float32)
    a = _act(cnn_act, conv + shiftc)                                # (BL, C) f32

    # ---- GRU input gates for BOTH directions in one matmul ----------------------------
    # column order: [r_f z_f n_f | r_b z_b n_b], each H wide.
    gx = jnp.dot(a.astype(jnp.bfloat16), wih,
                 preferred_element_type=jnp.float32) + bih          # (BL, 6H) register value

    # ---- fused bidirectional recurrence (fully unrolled, register accumulation) -------
    h2 = h0                                                         # (B, 2H) f32
    hf_list = [None] * L
    hb_list = [None] * L
    for s in range(L):
        gf = gx[s * B:(s + 1) * B, :]                 # fwd input gates at time s
        gb = gx[(L - 1 - s) * B:(L - s) * B, :]       # bwd input gates at time L-1-s
        gh = jnp.dot(h2.astype(jnp.bfloat16), whh,    # bf16 MXU op on the critical path
                     preferred_element_type=jnp.float32) + bhh
        hf, hb = h2[:, :H], h2[:, H:]
        # forward direction (PyTorch gate order r, z, n)
        rf = jax.nn.sigmoid(gf[:, 0:H] + gh[:, 0:H])
        zf = jax.nn.sigmoid(gf[:, H:2 * H] + gh[:, H:2 * H])
        nf = jnp.tanh(gf[:, 2 * H:3 * H] + rf * gh[:, 2 * H:3 * H])
        hf_n = (1.0 - zf) * nf + zf * hf
        # backward direction
        rb = jax.nn.sigmoid(gb[:, 3 * H:4 * H] + gh[:, 3 * H:4 * H])
        zb = jax.nn.sigmoid(gb[:, 4 * H:5 * H] + gh[:, 4 * H:5 * H])
        nb = jnp.tanh(gb[:, 5 * H:6 * H] + rb * gh[:, 5 * H:6 * H])
        hb_n = (1.0 - zb) * nb + zb * hb
        hf_list[s] = hf_n              # fwd output belongs to time s
        hb_list[L - 1 - s] = hb_n      # bwd output belongs to time L-1-s
        h2 = jnp.concatenate([hf_n, hb_n], axis=-1)

    hcat = jnp.concatenate([jnp.concatenate(hf_list, axis=0),
                            jnp.concatenate(hb_list, axis=0)], axis=-1)   # (BL, 2H)

    # ---- rnn BN (eval, per-channel affine) + activation; Dropout = identity (eval) ----
    return _act(rnn_act, hcat * scale_r + shift_r)


# --------------------------------------------------------------------------------------
# The single fused Encoder kernel: fc+bn+act followed by n_blocks fused BasicBlocks.
# --------------------------------------------------------------------------------------
def _encoder_kernel(*refs, B, L, H, K, n_blocks, fc_act, cnn_act, rnn_act):
    x_ref, h0_ref, wfc_ref, sfc_ref = refs[0], refs[1], refs[2], refs[3]
    o_ref = refs[-1]
    blk_refs = refs[4:-1]                     # n_blocks groups of 8 weight refs

    # entry Linear + folded eval-BN + fc_act (one MXU matmul)
    hid = _act(fc_act,
               jnp.dot(x_ref[...].astype(jnp.bfloat16), wfc_ref[...],
                       preferred_element_type=jnp.float32) + sfc_ref[...])   # (BL, C)

    h0 = h0_ref[...].astype(jnp.float32)      # (B, 2H)  [fwd | bwd], reused by every block

    for b in range(n_blocks):
        (wconv, shiftc, wih, bih, whh, bhh, scale_r, shift_r) = blk_refs[8 * b:8 * (b + 1)]
        hid = _basic_block_body(
            hid, h0, wconv[...], shiftc[...], wih[...], bih[...],
            whh[...], bhh[...], scale_r[...], shift_r[...],
            B=B, L=L, H=H, K=K, cnn_act=cnn_act, rnn_act=rnn_act)

    o_ref[...] = hid.astype(o_ref.dtype)


# --------------------------------------------------------------------------------------
# One-time parameter folding / packing (OUTSIDE the jitted forward path).
# --------------------------------------------------------------------------------------
def _bn_fold(bn, eps=1e-5):
    scale = bn["gamma"] / jnp.sqrt(bn["var"] + eps)
    shift = bn["beta"] - bn["mean"] * scale
    return scale, shift


def _pack_block_params(p, H, K, C):
    # Conv1d + cnn_bn: fold BN scale into weights, conv bias into the shift.
    sc, sb = _bn_fold(p["cnn_bn"])
    w_kio = jnp.transpose(p["conv_w"], (2, 1, 0)) * sc[None, None, :]   # (K, Cin, Cout)
    w_conv = w_kio.reshape(K * C, C).astype(jnp.bfloat16)               # im2col weight
    shift_c = (p["conv_b"] * sc + sb).reshape(1, C)
    # GRU: pack both directions.  Column order [r_f z_f n_f | r_b z_b n_b].
    gf, gb = p["gru"][0], p["gru"][1]
    wih = jnp.concatenate([gf["w_ih"].T, gb["w_ih"].T], axis=1).astype(jnp.bfloat16)  # (C,6H)
    bih = jnp.concatenate([gf["b_ih"], gb["b_ih"]]).reshape(1, 6 * H)
    z = jnp.zeros((H, 3 * H), jnp.float32)
    whh = jnp.concatenate(
        [jnp.concatenate([gf["w_hh"].T, z], axis=1),
         jnp.concatenate([z, gb["w_hh"].T], axis=1)],
        axis=0).astype(jnp.bfloat16)                                    # (2H, 6H) block-diag
    bhh = jnp.concatenate([gf["b_hh"], gb["b_hh"]]).reshape(1, 6 * H)
    # rnn_bn (eval): per-channel affine after the GRU.
    sr, shr = _bn_fold(p["rnn_bn"])
    return [w_conv, shift_c, wih, bih, whh, bhh, sr.reshape(1, C), shr.reshape(1, C)]


def prepare_params(params, cfg):
    """Fold eval-BN into weights and pack/cast everything once; returns a flat tuple."""
    H = cfg["hidden_size"]
    C = H * cfg["num_directions"]
    K = cfg["kernel_size"]
    scale, sb = _bn_fold(params["bn"])
    w_fc = (params["fc_w"].T * scale[None, :]).astype(jnp.bfloat16)     # (Fin, C)
    shift_fc = (params["fc_b"] * scale + sb).reshape(1, C)
    packed = [w_fc, shift_fc]
    for p in params["blocks"]:
        packed.extend(_pack_block_params(p, H, K, C))
    return tuple(packed)


# --------------------------------------------------------------------------------------
# Forward wrapper: only input/output layout glue + one pallas_call.
# --------------------------------------------------------------------------------------
def encoder_forward(packed, sequence, h0, cfg):
    B, L, Fin = sequence.shape
    H = cfg["hidden_size"]
    C = H * cfg["num_directions"]
    K = cfg["kernel_size"]
    n_blocks = cfg["num_basic_blocks"]

    # time-major 2D layout: row = l*B + b
    x2d = jnp.transpose(sequence, (1, 0, 2)).reshape(L * B, Fin)
    # h0.permute(1,0,2): direction-major; pack as (B, 2H) = [fwd | bwd]
    h0p = jnp.concatenate([h0[:, 0, :], h0[:, 1, :]], axis=-1)

    vmem = pl.BlockSpec(memory_space=pltpu.MemorySpace.VMEM)
    n_in = 2 + len(packed)
    out2d = pl.pallas_call(
        functools.partial(_encoder_kernel, B=B, L=L, H=H, K=K, n_blocks=n_blocks,
                          fc_act=cfg["fc_act_fn"], cnn_act=cfg["cnn_act_fn"],
                          rnn_act=cfg["rnn_act_fn"]),
        out_shape=jax.ShapeDtypeStruct((L * B, C), jnp.float32),
        in_specs=[vmem] * n_in,
        out_specs=vmem,
    )(x2d, h0p, *packed)

    return jnp.transpose(out2d.reshape(L, B, C), (1, 0, 2))            # (B, L, C)


# --------------------------------------------------------------------------------------
# Pure-JAX reference (eval mode), mirrors the PyTorch module step by step.
# --------------------------------------------------------------------------------------
def encoder_reference(params, sequence, h0, cfg):
    eps = 1e-5
    H = cfg["hidden_size"]
    K = cfg["kernel_size"]
    P = K // 2

    def bn(x, p):
        return (x - p["mean"]) / jnp.sqrt(p["var"] + eps) * p["gamma"] + p["beta"]

    hid = sequence @ params["fc_w"].T + params["fc_b"]
    hid = _act(cfg["fc_act_fn"], bn(hid, params["bn"]))
    h0_f, h0_b = h0[:, 0, :], h0[:, 1, :]

    def gru_dir(x_seq, w, h_init, reverse):
        T = x_seq.shape[1]
        h = h_init
        hs = []
        ts = range(T - 1, -1, -1) if reverse else range(T)
        for t in ts:
            xt = x_seq[:, t, :]
            gi = xt @ w["w_ih"].T + w["b_ih"]
            gh = h @ w["w_hh"].T + w["b_hh"]
            r = jax.nn.sigmoid(gi[:, :H] + gh[:, :H])
            z = jax.nn.sigmoid(gi[:, H:2 * H] + gh[:, H:2 * H])
            n = jnp.tanh(gi[:, 2 * H:] + r * gh[:, 2 * H:])
            h = (1.0 - z) * n + z * h
            hs.append(h)
        if reverse:
            hs = hs[::-1]
        return jnp.stack(hs, axis=1)                                   # (B, T, H)

    for p in params["blocks"]:
        Lcur = hid.shape[1]
        xpad = jnp.pad(hid, ((0, 0), (P, P), (0, 0)))
        taps = jnp.stack([xpad[:, k:k + Lcur, :] for k in range(K)], axis=2)  # (B,L,K,Cin)
        conv = jnp.einsum("btki,oik->bto", taps, p["conv_w"]) + p["conv_b"]
        a = _act(cfg["cnn_act_fn"], bn(conv, p["cnn_bn"]))
        of = gru_dir(a, p["gru"][0], h0_f, reverse=False)
        ob = gru_dir(a, p["gru"][1], h0_b, reverse=True)
        g = jnp.concatenate([of, ob], axis=-1)
        hid = _act(cfg["rnn_act_fn"], bn(g, p["rnn_bn"]))              # dropout=identity (eval)
    return hid


# --------------------------------------------------------------------------------------
# Deterministic parameter construction (mirrors the PyTorch module's shapes).
# --------------------------------------------------------------------------------------
def init_params(key, cfg):
    Fin = cfg["fasta_size"] + cfg["input_size"]
    C = cfg["hidden_size"] * cfg["num_directions"]
    H = cfg["hidden_size"]
    K = cfg["kernel_size"]
    keys = iter(jax.random.split(key, 256))

    def nrm(shape, s=0.1):
        return s * jax.random.normal(next(keys), shape, jnp.float32)

    def bn_params():
        return {"gamma": 1.0 + nrm((C,), 0.05),
                "beta": nrm((C,), 0.05),
                "mean": nrm((C,), 0.05),
                "var": 0.5 + jax.random.uniform(next(keys), (C,), jnp.float32)}

    params = {"fc_w": nrm((C, Fin)), "fc_b": nrm((C,)), "bn": bn_params(), "blocks": []}
    for _ in range(cfg["num_basic_blocks"]):
        params["blocks"].append({
            "conv_w": nrm((C, C, K)), "conv_b": nrm((C,)),
            "cnn_bn": bn_params(),
            "gru": [{"w_ih": nrm((3 * H, C)), "w_hh": nrm((3 * H, H)),
                     "b_ih": nrm((3 * H,)), "b_hh": nrm((3 * H,))}
                    for _ in range(cfg["num_directions"])],
            "rnn_bn": bn_params(),
        })
    return params


if __name__ == "__main__":
    cfg = dict(fasta_size=4, input_size=6, hidden_size=16, fc_act_fn="ReLU",
               num_basic_blocks=2, cnn_act_fn="ReLU", kernel_size=5, stride=1,
               dropout=0.1, rnn_act_fn="Tanh", num_directions=2)
    assert cfg["num_directions"] == 2, "bidirectional GRU assumed"
    assert cfg["stride"] == 1 and cfg["kernel_size"] % 2 == 1, "'same' conv assumed"

    B, L = 2, 16
    key = jax.random.PRNGKey(0)
    kp, ks, kh = jax.random.split(key, 3)
    params = init_params(kp, cfg)
    sequence = jax.random.normal(ks, (B, L, cfg["fasta_size"] + cfg["input_size"]),
                                 jnp.float32)
    h0 = jax.random.normal(kh, (B, cfg["num_directions"], cfg["hidden_size"]),
                           jnp.float32)

    packed = prepare_params(params, cfg)          # one-time packing, outside the hot path
    fwd = jax.jit(functools.partial(encoder_forward, cfg=cfg))
    out = jax.block_until_ready(fwd(packed, sequence, h0))

    C = cfg["hidden_size"] * cfg["num_directions"]
    assert out.shape == (B, L, C), out.shape
    assert bool(jnp.all(jnp.isfinite(out)))

    ref = jax.jit(functools.partial(encoder_reference, cfg=cfg))(params, sequence, h0)
    max_err = float(jnp.max(jnp.abs(out - ref)))
    assert max_err < 1e-1, f"mismatch vs reference: {max_err}"   # loose tol: bf16 matmuls
    print("KERNEL_OK")
</pallas_src>

<mosaic_0001>
module attributes {stable_mosaic.version = 11 : i64} {
  func.func @_encoder_kernel(%arg0: memref<32x10xf32, #tpu.memory_space<vmem>>, %arg1: memref<2x32xf32, #tpu.memory_space<vmem>>, %arg2: memref<10x32xbf16, #tpu.memory_space<vmem>>, %arg3: memref<1x32xf32, #tpu.memory_space<vmem>>, %arg4: memref<160x32xbf16, #tpu.memory_space<vmem>>, %arg5: memref<1x32xf32, #tpu.memory_space<vmem>>, %arg6: memref<32x96xbf16, #tpu.memory_space<vmem>>, %arg7: memref<1x96xf32, #tpu.memory_space<vmem>>, %arg8: memref<32x96xbf16, #tpu.memory_space<vmem>>, %arg9: memref<1x96xf32, #tpu.memory_space<vmem>>, %arg10: memref<1x32xf32, #tpu.memory_space<vmem>>, %arg11: memref<1x32xf32, #tpu.memory_space<vmem>>, %arg12: memref<160x32xbf16, #tpu.memory_space<vmem>>, %arg13: memref<1x32xf32, #tpu.memory_space<vmem>>, %arg14: memref<32x96xbf16, #tpu.memory_space<vmem>>, %arg15: memref<1x96xf32, #tpu.memory_space<vmem>>, %arg16: memref<32x96xbf16, #tpu.memory_space<vmem>>, %arg17: memref<1x96xf32, #tpu.memory_space<vmem>>, %arg18: memref<1x32xf32, #tpu.memory_space<vmem>>, %arg19: memref<1x32xf32, #tpu.memory_space<vmem>>, %arg20: memref<32x32xf32, #tpu.memory_space<vmem>>) attributes {dimension_semantics = [], scalar_prefetch = 0 : i64, scratch_operands = 0 : i64, tpu.core_type = #tpu.core_type<tc>} {
    %c0 = arith.constant 0 : index
    %c0_0 = arith.constant 0 : index
    %0 = vector.load %arg0[%c0, %c0_0] : memref<32x10xf32, #tpu.memory_space<vmem>>, vector<32x10xf32>
    %1 = arith.truncf %0 : vector<32x10xf32> to vector<32x10xbf16>
    %c0_1 = arith.constant 0 : index
    %c0_2 = arith.constant 0 : index
    %2 = vector.load %arg2[%c0_1, %c0_2] : memref<10x32xbf16, #tpu.memory_space<vmem>>, vector<10x32xbf16>
    %cst = arith.constant dense<0.000000e+00> : vector<32x32xf32>
    %3 = tpu.matmul %1, %2, %cst {dimension_numbers = #tpu.dot_dimension_numbers<[1], [0], [0], [1], [0, 0, 1, 1], [], []>} : vector<32x10xbf16>, vector<10x32xbf16>, vector<32x32xf32> -> vector<32x32xf32>
    %c0_3 = arith.constant 0 : index
    %c0_4 = arith.constant 0 : index
    %4 = vector.load %arg3[%c0_3, %c0_4] : memref<1x32xf32, #tpu.memory_space<vmem>>, vector<1x32xf32>
    %5 = vector.broadcast %4 : vector<1x32xf32> to vector<32x32xf32>
    %6 = arith.addf %3, %5 : vector<32x32xf32>
    %cst_5 = arith.constant 0.000000e+00 : f32
    %7 = vector.broadcast %cst_5 : f32 to vector<32x32xf32>
    %8 = arith.maximumf %6, %7 : vector<32x32xf32>
    %c0_6 = arith.constant 0 : index
    %c0_7 = arith.constant 0 : index
    %9 = vector.load %arg1[%c0_6, %c0_7] : memref<2x32xf32, #tpu.memory_space<vmem>>, vector<2x32xf32>
    %c0_8 = arith.constant 0 : index
    %c0_9 = arith.constant 0 : index
    %10 = vector.load %arg4[%c0_8, %c0_9] : memref<160x32xbf16, #tpu.memory_space<vmem>>, vector<160x32xbf16>
    %c0_10 = arith.constant 0 : index
    %c0_11 = arith.constant 0 : index
    %11 = vector.load %arg5[%c0_10, %c0_11] : memref<1x32xf32, #tpu.memory_space<vmem>>, vector<1x32xf32>
    %c0_12 = arith.constant 0 : index
    %c0_13 = arith.constant 0 : index
    %12 = vector.load %arg6[%c0_12, %c0_13] : memref<32x96xbf16, #tpu.memory_space<vmem>>, vector<32x96xbf16>
    %c0_14 = arith.constant 0 : index
    %c0_15 = arith.constant 0 : index
    %13 = vector.load %arg7[%c0_14, %c0_15] : memref<1x96xf32, #tpu.memory_space<vmem>>, vector<1x96xf32>
    %c0_16 = arith.constant 0 : index
    %c0_17 = arith.constant 0 : index
    %14 = vector.load %arg8[%c0_16, %c0_17] : memref<32x96xbf16, #tpu.memory_space<vmem>>, vector<32x96xbf16>
    %c0_18 = arith.constant 0 : index
    %c0_19 = arith.constant 0 : index
    %15 = vector.load %arg9[%c0_18, %c0_19] : memref<1x96xf32, #tpu.memory_space<vmem>>, vector<1x96xf32>
    %c0_20 = arith.constant 0 : index
    %c0_21 = arith.constant 0 : index
    %16 = vector.load %arg10[%c0_20, %c0_21] : memref<1x32xf32, #tpu.memory_space<vmem>>, vector<1x32xf32>
    %c0_22 = arith.constant 0 : index
    %c0_23 = arith.constant 0 : index
    %17 = vector.load %arg11[%c0_22, %c0_23] : memref<1x32xf32, #tpu.memory_space<vmem>>, vector<1x32xf32>
    %cst_24 = arith.constant 0.000000e+00 : f32
    %18 = vector.broadcast %cst_24 : f32 to vector<4x32xf32>
    %19 = tpu.concatenate %18, %8, %18 in 0 : vector<4x32xf32>, vector<32x32xf32>, vector<4x32xf32> -> vector<40x32xf32>
    %20 = vector.extract_strided_slice %19 {offsets = [0, 0], sizes = [32, 32], strides = [1, 1]} : vector<40x32xf32> to vector<32x32xf32>
    %21 = vector.extract_strided_slice %19 {offsets = [2, 0], sizes = [32, 32], strides = [1, 1]} : vector<40x32xf32> to vector<32x32xf32>
    %22 = vector.extract_strided_slice %19 {offsets = [4, 0], sizes = [32, 32], strides = [1, 1]} : vector<40x32xf32> to vector<32x32xf32>
    %23 = vector.extract_strided_slice %19 {offsets = [6, 0], sizes = [32, 32], strides = [1, 1]} : vector<40x32xf32> to vector<32x32xf32>
    %24 = vector.extract_strided_slice %19 {offsets = [8, 0], sizes = [32, 32], strides = [1, 1]} : vector<40x32xf32> to vector<32x32xf32>
    %25 = tpu.concatenate %20, %21, %22, %23, %24 in 1 : vector<32x32xf32>, vector<32x32xf32>, vector<32x32xf32>, vector<32x32xf32>, vector<32x32xf32> -> vector<32x160xf32>
    %26 = arith.truncf %25 : vector<32x160xf32> to vector<32x160xbf16>
    %cst_25 = arith.constant dense<0.000000e+00> : vector<32x32xf32>
    %27 = tpu.matmul %26, %10, %cst_25 {dimension_numbers = #tpu.dot_dimension_numbers<[1], [0], [0], [1], [0, 0, 1, 1], [], []>} : vector<32x160xbf16>, vector<160x32xbf16>, vector<32x32xf32> -> vector<32x32xf32>
    %28 = vector.broadcast %11 : vector<1x32xf32> to vector<32x32xf32>
    %29 = arith.addf %27, %28 : vector<32x32xf32>
    %cst_26 = arith.constant 0.000000e+00 : f32
    %30 = vector.broadcast %cst_26 : f32 to vector<32x32xf32>
    %31 = arith.maximumf %29, %30 : vector<32x32xf32>
    %32 = arith.truncf %31 : vector<32x32xf32> to vector<32x32xbf16>
    %cst_27 = arith.constant dense<0.000000e+00> : vector<32x96xf32>
    %33 = tpu.matmul %32, %12, %cst_27 {dimension_numbers = #tpu.dot_dimension_numbers<[1], [0], [0], [1], [0, 0, 1, 1], [], []>} : vector<32x32xbf16>, vector<32x96xbf16>, vector<32x96xf32> -> vector<32x96xf32>
    %34 = vector.broadcast %13 : vector<1x96xf32> to vector<32x96xf32>
    %35 = arith.addf %33, %34 : vector<32x96xf32>
    %36 = vector.extract_strided_slice %35 {offsets = [0, 0], sizes = [2, 96], strides = [1, 1]} : vector<32x96xf32> to vector<2x96xf32>
    %37 = vector.extract_strided_slice %35 {offsets = [30, 0], sizes = [2, 96], strides = [1, 1]} : vector<32x96xf32> to vector<2x96xf32>
    %38 = arith.truncf %9 : vector<2x32xf32> to vector<2x32xbf16>
    %cst_28 = arith.constant dense<0.000000e+00> : vector<2x96xf32>
    %39 = tpu.matmul %38, %14, %cst_28 {dimension_numbers = #tpu.dot_dimension_numbers<[1], [0], [0], [1], [0, 0, 1, 1], [], []>} : vector<2x32xbf16>, vector<32x96xbf16>, vector<2x96xf32> -> vector<2x96xf32>
    %40 = vector.broadcast %15 : vector<1x96xf32> to vector<2x96xf32>
    %41 = arith.addf %39, %40 : vector<2x96xf32>
    %42 = vector.extract_strided_slice %9 {offsets = [0, 0], sizes = [2, 16], strides = [1, 1]} : vector<2x32xf32> to vector<2x16xf32>
    %43 = vector.extract_strided_slice %9 {offsets = [0, 16], sizes = [2, 16], strides = [1, 1]} : vector<2x32xf32> to vector<2x16xf32>
    %44 = vector.extract_strided_slice %36 {offsets = [0, 0], sizes = [2, 16], strides = [1, 1]} : vector<2x96xf32> to vector<2x16xf32>
    %45 = vector.extract_strided_slice %41 {offsets = [0, 0], sizes = [2, 16], strides = [1, 1]} : vector<2x96xf32> to vector<2x16xf32>
    %46 = arith.addf %44, %45 : vector<2x16xf32>
    %47 = arith.negf %46 : vector<2x16xf32>
    %48 = math.exp %47 : vector<2x16xf32>
    %cst_29 = arith.constant 1.000000e+00 : f32
    %49 = vector.broadcast %cst_29 : f32 to vector<2x16xf32>
    %50 = arith.addf %49, %48 : vector<2x16xf32>
    %51 = arith.divf %49, %50 : vector<2x16xf32>
    %52 = vector.extract_strided_slice %36 {offsets = [0, 16], sizes = [2, 16], strides = [1, 1]} : vector<2x96xf32> to vector<2x16xf32>
    %53 = vector.extract_strided_slice %41 {offsets = [0, 16], sizes = [2, 16], strides = [1, 1]} : vector<2x96xf32> to vector<2x16xf32>
    %54 = arith.addf %52, %53 : vector<2x16xf32>
    %55 = arith.negf %54 : vector<2x16xf32>
    %56 = math.exp %55 : vector<2x16xf32>
    %cst_30 = arith.constant 1.000000e+00 : f32
    %57 = vector.broadcast %cst_30 : f32 to vector<2x16xf32>
    %58 = arith.addf %57, %56 : vector<2x16xf32>
    %59 = arith.divf %57, %58 : vector<2x16xf32>
    %60 = vector.extract_strided_slice %36 {offsets = [0, 32], sizes = [2, 16], strides = [1, 1]} : vector<2x96xf32> to vector<2x16xf32>
    %61 = vector.extract_strided_slice %41 {offsets = [0, 32], sizes = [2, 16], strides = [1, 1]} : vector<2x96xf32> to vector<2x16xf32>
    %62 = arith.mulf %51, %61 : vector<2x16xf32>
    %63 = arith.addf %60, %62 : vector<2x16xf32>
    %64 = math.tanh %63 : vector<2x16xf32>
    %cst_31 = arith.constant 1.000000e+00 : f32
    %65 = vector.broadcast %cst_31 : f32 to vector<2x16xf32>
    %66 = arith.subf %65, %59 : vector<2x16xf32>
    %67 = arith.mulf %66, %64 : vector<2x16xf32>
    %68 = arith.mulf %59, %42 : vector<2x16xf32>
    %69 = arith.addf %67, %68 : vector<2x16xf32>
    %70 = vector.extract_strided_slice %37 {offsets = [0, 48], sizes = [2, 16], strides = [1, 1]} : vector<2x96xf32> to vector<2x16xf32>
    %71 = vector.extract_strided_slice %41 {offsets = [0, 48], sizes = [2, 16], strides = [1, 1]} : vector<2x96xf32> to vector<2x16xf32>
    %72 = arith.addf %70, %71 : vector<2x16xf32>
    %73 = arith.negf %72 : vector<2x16xf32>
    %74 = math.exp %73 : vector<2x16xf32>
    %cst_32 = arith.constant 1.000000e+00 : f32
    %75 = vector.broadcast %cst_32 : f32 to vector<2x16xf32>
    %76 = arith.addf %75, %74 : vector<2x16xf32>
    %77 = arith.divf %75, %76 : vector<2x16xf32>
    %78 = vector.extract_strided_slice %37 {offsets = [0, 64], sizes = [2, 16], strides = [1, 1]} : vector<2x96xf32> to vector<2x16xf32>
    %79 = vector.extract_strided_slice %41 {offsets = [0, 64], sizes = [2, 16], strides = [1, 1]} : vector<2x96xf32> to vector<2x16xf32>
    %80 = arith.addf %78, %79 : vector<2x16xf32>
    %81 = arith.negf %80 : vector<2x16xf32>
    %82 = math.exp %81 : vector<2x16xf32>
    %cst_33 = arith.constant 1.000000e+00 : f32
    %83 = vector.broadcast %cst_33 : f32 to vector<2x16xf32>
    %84 = arith.addf %83, %82 : vector<2x16xf32>
    %85 = arith.divf %83, %84 : vector<2x16xf32>
    %86 = vector.extract_strided_slice %37 {offsets = [0, 80], sizes = [2, 16], strides = [1, 1]} : vector<2x96xf32> to vector<2x16xf32>
    %87 = vector.extract_strided_slice %41 {offsets = [0, 80], sizes = [2, 16], strides = [1, 1]} : vector<2x96xf32> to vector<2x16xf32>
    %88 = arith.mulf %77, %87 : vector<2x16xf32>
    %89 = arith.addf %86, %88 : vector<2x16xf32>
    %90 = math.tanh %89 : vector<2x16xf32>
    %cst_34 = arith.constant 1.000000e+00 : f32
    %91 = vector.broadcast %cst_34 : f32 to vector<2x16xf32>
    %92 = arith.subf %91, %85 : vector<2x16xf32>
    %93 = arith.mulf %92, %90 : vector<2x16xf32>
    %94 = arith.mulf %85, %43 : vector<2x16xf32>
    %95 = arith.addf %93, %94 : vector<2x16xf32>
    %96 = tpu.concatenate %69, %95 in 1 : vector<2x16xf32>, vector<2x16xf32> -> vector<2x32xf32>
    %97 = vector.extract_strided_slice %35 {offsets = [2, 0], sizes = [2, 96], strides = [1, 1]} : vector<32x96xf32> to vector<2x96xf32>
    %98 = vector.extract_strided_slice %35 {offsets = [28, 0], sizes = [2, 96], strides = [1, 1]} : vector<32x96xf32> to vector<2x96xf32>
    %99 = arith.truncf %96 : vector<2x32xf32> to vector<2x32xbf16>
    %cst_35 = arith.constant dense<0.000000e+00> : vector<2x96xf32>
    %100 = tpu.matmul %99, %14, %cst_35 {dimension_numbers = #tpu.dot_dimension_numbers<[1], [0], [0], [1], [0, 0, 1, 1], [], []>} : vector<2x32xbf16>, vector<32x96xbf16>, vector<2x96xf32> -> vector<2x96xf32>
    %101 = vector.broadcast %15 : vector<1x96xf32> to vector<2x96xf32>
    %102 = arith.addf %100, %101 : vector<2x96xf32>
    %103 = vector.extract_strided_slice %96 {offsets = [0, 0], sizes = [2, 16], strides = [1, 1]} : vector<2x32xf32> to vector<2x16xf32>
    %104 = vector.extract_strided_slice %96 {offsets = [0, 16], sizes = [2, 16], strides = [1, 1]} : vector<2x32xf32> to vector<2x16xf32>
    %105 = vector.extract_strided_slice %97 {offsets = [0, 0], sizes = [2, 16], strides = [1, 1]} : vector<2x96xf32> to vector<2x16xf32>
    %106 = vector.extract_strided_slice %102 {offsets = [0, 0], sizes = [2, 16], strides = [1, 1]} : vector<2x96xf32> to vector<2x16xf32>
    %107 = arith.addf %105, %106 : vector<2x16xf32>
    %108 = arith.negf %107 : vector<2x16xf32>
    %109 = math.exp %108 : vector<2x16xf32>
    %cst_36 = arith.constant 1.000000e+00 : f32
    %110 = vector.broadcast %cst_36 : f32 to vector<2x16xf32>
    %111 = arith.addf %110, %109 : vector<2x16xf32>
    %112 = arith.divf %110, %111 : vector<2x16xf32>
    %113 = vector.extract_strided_slice %97 {offsets = [0, 16], sizes = [2, 16], strides = [1, 1]} : vector<2x96xf32> to vector<2x16xf32>
    %114 = vector.extract_strided_slice %102 {offsets = [0, 16], sizes = [2, 16], strides = [1, 1]} : vector<2x96xf32> to vector<2x16xf32>
    %115 = arith.addf %113, %114 : vector<2x16xf32>
    %116 = arith.negf %115 : vector<2x16xf32>
    %117 = math.exp %116 : vector<2x16xf32>
    %cst_37 = arith.constant 1.000000e+00 : f32
    %118 = vector.broadcast %cst_37 : f32 to vector<2x16xf32>
    %119 = arith.addf %118, %117 : vector<2x16xf32>
    %120 = arith.divf %118, %119 : vector<2x16xf32>
    %121 = vector.extract_strided_slice %97 {offsets = [0, 32], sizes = [2, 16], strides = [1, 1]} : vector<2x96xf32> to vector<2x16xf32>
    %122 = vector.extract_strided_slice %102 {offsets = [0, 32], sizes = [2, 16], strides = [1, 1]} : vector<2x96xf32> to vector<2x16xf32>
    %123 = arith.mulf %112, %122 : vector<2x16xf32>
    %124 = arith.addf %121, %123 : vector<2x16xf32>
    %125 = math.tanh %124 : vector<2x16xf32>
    %cst_38 = arith.constant 1.000000e+00 : f32
    %126 = vector.broadcast %cst_38 : f32 to vector<2x16xf32>
    %127 = arith.subf %126, %120 : vector<2x16xf32>
    %128 = arith.mulf %127, %125 : vector<2x16xf32>
    %129 = arith.mulf %120, %103 : vector<2x16xf32>
    %130 = arith.addf %128, %129 : vector<2x16xf32>
    %131 = vector.extract_strided_slice %98 {offsets = [0, 48], sizes = [2, 16], strides = [1, 1]} : vector<2x96xf32> to vector<2x16xf32>
    %132 = vector.extract_strided_slice %102 {offsets = [0, 48], sizes = [2, 16], strides = [1, 1]} : vector<2x96xf32> to vector<2x16xf32>
    %133 = arith.addf %131, %132 : vector<2x16xf32>
    %134 = arith.negf %133 : vector<2x16xf32>
    %135 = math.exp %134 : vector<2x16xf32>
    %cst_39 = arith.constant 1.000000e+00 : f32
    %136 = vector.broadcast %cst_39 : f32 to vector<2x16xf32>
    %137 = arith.addf %136, %135 : vector<2x16xf32>
    %138 = arith.divf %136, %137 : vector<2x16xf32>
    %139 = vector.extract_strided_slice %98 {offsets = [0, 64], sizes = [2, 16], strides = [1, 1]} : vector<2x96xf32> to vector<2x16xf32>
    %140 = vector.extract_strided_slice %102 {offsets = [0, 64], sizes = [2, 16], strides = [1, 1]} : vector<2x96xf32> to vector<2x16xf32>
    %141 = arith.addf %139, %140 : vector<2x16xf32>
    %142 = arith.negf %141 : vector<2x16xf32>
    %143 = math.exp %142 : vector<2x16xf32>
    %cst_40 = arith.constant 1.000000e+00 : f32
    %144 = vector.broadcast %cst_40 : f32 to vector<2x16xf32>
    %145 = arith.addf %144, %143 : vector<2x16xf32>
    %146 = arith.divf %144, %145 : vector<2x16xf32>
    %147 = vector.extract_strided_slice %98 {offsets = [0, 80], sizes = [2, 16], strides = [1, 1]} : vector<2x96xf32> to vector<2x16xf32>
    %148 = vector.extract_strided_slice %102 {offsets = [0, 80], sizes = [2, 16], strides = [1, 1]} : vector<2x96xf32> to vector<2x16xf32>
    %149 = arith.mulf %138, %148 : vector<2x16xf32>
    %150 = arith.addf %147, %149 : vector<2x16xf32>
    %151 = math.tanh %150 : vector<2x16xf32>
    %cst_41 = arith.constant 1.000000e+00 : f32
    %152 = vector.broadcast %cst_41 : f32 to vector<2x16xf32>
    %153 = arith.subf %152, %146 : vector<2x16xf32>
    %154 = arith.mulf %153, %151 : vector<2x16xf32>
    %155 = arith.mulf %146, %104 : vector<2x16xf32>
    %156 = arith.addf %154, %155 : vector<2x16xf32>
    %157 = tpu.concatenate %130, %156 in 1 : vector<2x16xf32>, vector<2x16xf32> -> vector<2x32xf32>
    %158 = vector.extract_strided_slice %35 {offsets = [4, 0], sizes = [2, 96], strides = [1, 1]} : vector<32x96xf32> to vector<2x96xf32>
    %159 = vector.extract_strided_slice %35 {offsets = [26, 0], sizes = [2, 96], strides = [1, 1]} : vector<32x96xf32> to vector<2x96xf32>
    %160 = arith.truncf %157 : vector<2x32xf32> to vector<2x32xbf16>
    %cst_42 = arith.constant dense<0.000000e+00> : vector<2x96xf32>
    %161 = tpu.matmul %160, %14, %cst_42 {dimension_numbers = #tpu.dot_dimension_numbers<[1], [0], [0], [1], [0, 0, 1, 1], [], []>} : vector<2x32xbf16>, vector<32x96xbf16>, vector<2x96xf32> -> vector<2x96xf32>
    %162 = vector.broadcast %15 : vector<1x96xf32> to vector<2x96xf32>
    %163 = arith.addf %161, %162 : vector<2x96xf32>
    %164 = vector.extract_strided_slice %157 {offsets = [0, 0], sizes = [2, 16], strides = [1, 1]} : vector<2x32xf32> to vector<2x16xf32>
    %165 = vector.extract_strided_slice %157 {offsets = [0, 16], sizes = [2, 16], strides = [1, 1]} : vector<2x32xf32> to vector<2x16xf32>
    %166 = vector.extract_strided_slice %158 {offsets = [0, 0], sizes = [2, 16], strides = [1, 1]} : vector<2x96xf32> to vector<2x16xf32>
    %167 = vector.extract_strided_slice %163 {offsets = [0, 0], sizes = [2, 16], strides = [1, 1]} : vector<2x96xf32> to vector<2x16xf32>
    %168 = arith.addf %166, %167 : vector<2x16xf32>
    %169 = arith.negf %168 : vector<2x16xf32>
    %170 = math.exp %169 : vector<2x16xf32>
    %cst_43 = arith.constant 1.000000e+00 : f32
    %171 = vector.broadcast %cst_43 : f32 to vector<2x16xf32>
    %172 = arith.addf %171, %170 : vector<2x16xf32>
    %173 = arith.divf %171, %172 : vector<2x16xf32>
    %174 = vector.extract_strided_slice %158 {offsets = [0, 16], sizes = [2, 16], strides = [1, 1]} : vector<2x96xf32> to vector<2x16xf32>
    %175 = vector.extract_strided_slice %163 {offsets = [0, 16], sizes = [2, 16], strides = [1, 1]} : vector<2x96xf32> to vector<2x16xf32>
    %176 = arith.addf %174, %175 : vector<2x16xf32>
    %177 = arith.negf %176 : vector<2x16xf32>
    %178 = math.exp %177 : vector<2x16xf32>
    %cst_44 = arith.constant 1.000000e+00 : f32
    %179 = vector.broadcast %cst_44 : f32 to vector<2x16xf32>
    %180 = arith.addf %179, %178 : vector<2x16xf32>
    %181 = arith.divf %179, %180 : vector<2x16xf32>
    %182 = vector.extract_strided_slice %158 {offsets = [0, 32], sizes = [2, 16], strides = [1, 1]} : vector<2x96xf32> to vector<2x16xf32>
    %183 = vector.extract_strided_slice %163 {offsets = [0, 32], sizes = [2, 16], strides = [1, 1]} : vector<2x96xf32> to vector<2x16xf32>
    %184 = arith.mulf %173, %183 : vector<2x16xf32>
    %185 = arith.addf %182, %184 : vector<2x16xf32>
    %186 = math.tanh %185 : vector<2x16xf32>
    %cst_45 = arith.constant 1.000000e+00 : f32
    %187 = vector.broadcast %cst_45 : f32 to vector<2x16xf32>
    %188 = arith.subf %187, %181 : vector<2x16xf32>
    %189 = arith.mulf %188, %186 : vector<2x16xf32>
    %190 = arith.mulf %181, %164 : vector<2x16xf32>
    %191 = arith.addf %189, %190 : vector<2x16xf32>
    %192 = vector.extract_strided_slice %159 {offsets = [0, 48], sizes = [2, 16], strides = [1, 1]} : vector<2x96xf32> to vector<2x16xf32>
    %193 = vector.extract_strided_slice %163 {offsets = [0, 48], sizes = [2, 16], strides = [1, 1]} : vector<2x96xf32> to vector<2x16xf32>
    %194 = arith.addf %192, %193 : vector<2x16xf32>
    %195 = arith.negf %194 : vector<2x16xf32>
    %196 = math.exp %195 : vector<2x16xf32>
    %cst_46 = arith.constant 1.000000e+00 : f32
    %197 = vector.broadcast %cst_46 : f32 to vector<2x16xf32>
    %198 = arith.addf %197, %196 : vector<2x16xf32>
    %199 = arith.divf %197, %198 : vector<2x16xf32>
    %200 = vector.extract_strided_slice %159 {offsets = [0, 64], sizes = [2, 16], strides = [1, 1]} : vector<2x96xf32> to vector<2x16xf32>
    %201 = vector.extract_strided_slice %163 {offsets = [0, 64], sizes = [2, 16], strides = [1, 1]} : vector<2x96xf32> to vector<2x16xf32>
    %202 = arith.addf %200, %201 : vector<2x16xf32>
    %203 = arith.negf %202 : vector<2x16xf32>
    %204 = math.exp %203 : vector<2x16xf32>
    %cst_47 = arith.constant 1.000000e+00 : f32
    %205 = vector.broadcast %cst_47 : f32 to vector<2x16xf32>
    %206 = arith.addf %205, %204 : vector<2x16xf32>
    %207 = arith.divf %205, %206 : vector<2x16xf32>
    %208 = vector.extract_strided_slice %159 {offsets = [0, 80], sizes = [2, 16], strides = [1, 1]} : vector<2x96xf32> to vector<2x16xf32>
    %209 = vector.extract_strided_slice %163 {offsets = [0, 80], sizes = [2, 16], strides = [1, 1]} : vector<2x96xf32> to vector<2x16xf32>
    %210 = arith.mulf %199, %209 : vector<2x16xf32>
    %211 = arith.addf %208, %210 : vector<2x16xf32>
    %212 = math.tanh %211 : vector<2x16xf32>
    %cst_48 = arith.constant 1.000000e+00 : f32
    %213 = vector.broadcast %cst_48 : f32 to vector<2x16xf32>
    %214 = arith.subf %213, %207 : vector<2x16xf32>
    %215 = arith.mulf %214, %212 : vector<2x16xf32>
    %216 = arith.mulf %207, %165 : vector<2x16xf32>
    %217 = arith.addf %215, %216 : vector<2x16xf32>
    %218 = tpu.concatenate %191, %217 in 1 : vector<2x16xf32>, vector<2x16xf32> -> vector<2x32xf32>
    %219 = vector.extract_strided_slice %35 {offsets = [6, 0], sizes = [2, 96], strides = [1, 1]} : vector<32x96xf32> to vector<2x96xf32>
    %220 = vector.extract_strided_slice %35 {offsets = [24, 0], sizes = [2, 96], strides = [1, 1]} : vector<32x96xf32> to vector<2x96xf32>
    %221 = arith.truncf %218 : vector<2x32xf32> to vector<2x32xbf16>
    %cst_49 = arith.constant dense<0.000000e+00> : vector<2x96xf32>
    %222 = tpu.matmul %221, %14, %cst_49 {dimension_numbers = #tpu.dot_dimension_numbers<[1], [0], [0], [1], [0, 0, 1, 1], [], []>} : vector<2x32xbf16>, vector<32x96xbf16>, vector<2x96xf32> -> vector<2x96xf32>
    %223 = vector.broadcast %15 : vector<1x96xf32> to vector<2x96xf32>
    %224 = arith.addf %222, %223 : vector<2x96xf32>
    %225 = vector.extract_strided_slice %218 {offsets = [0, 0], sizes = [2, 16], strides = [1, 1]} : vector<2x32xf32> to vector<2x16xf32>
    %226 = vector.extract_strided_slice %218 {offsets = [0, 16], sizes = [2, 16], strides = [1, 1]} : vector<2x32xf32> to vector<2x16xf32>
    %227 = vector.extract_strided_slice %219 {offsets = [0, 0], sizes = [2, 16], strides = [1, 1]} : vector<2x96xf32> to vector<2x16xf32>
    %228 = vector.extract_strided_slice %224 {offsets = [0, 0], sizes = [2, 16], strides = [1, 1]} : vector<2x96xf32> to vector<2x16xf32>
    %229 = arith.addf %227, %228 : vector<2x16xf32>
    %230 = arith.negf %229 : vector<2x16xf32>
    %231 = math.exp %230 : vector<2x16xf32>
    %cst_50 = arith.constant 1.000000e+00 : f32
    %232 = vector.broadcast %cst_50 : f32 to vector<2x16xf32>
    %233 = arith.addf %232, %231 : vector<2x16xf32>
    %234 = arith.divf %232, %233 : vector<2x16xf32>
    %235 = vector.extract_strided_slice %219 {offsets = [0, 16], sizes = [2, 16], strides = [1, 1]} : vector<2x96xf32> to vector<2x16xf32>
    %236 = vector.extract_strided_slice %224 {offsets = [0, 16], sizes = [2, 16], strides = [1, 1]} : vector<2x96xf32> to vector<2x16xf32>
    %237 = arith.addf %235, %236 : vector<2x16xf32>
    %238 = arith.negf %237 : vector<2x16xf32>
    %239 = math.exp %238 : vector<2x16xf32>
    %cst_51 = arith.constant 1.000000e+00 : f32
    %240 = vector.broadcast %cst_51 : f32 to vector<2x16xf32>
    %241 = arith.addf %240, %239 : vector<2x16xf32>
    %242 = arith.divf %240, %241 : vector<2x16xf32>
    %243 = vector.extract_strided_slice %219 {offsets = [0, 32], sizes = [2, 16], strides = [1, 1]} : vector<2x96xf32> to vector<2x16xf32>
    %244 = vector.extract_strided_slice %224 {offsets = [0, 32], sizes = [2, 16], strides = [1, 1]} : vector<2x96xf32> to vector<2x16xf32>
    %245 = arith.mulf %234, %244 : vector<2x16xf32>
    %246 = arith.addf %243, %245 : vector<2x16xf32>
    %247 = math.tanh %246 : vector<2x16xf32>
    %cst_52 = arith.constant 1.000000e+00 : f32
    %248 = vector.broadcast %cst_52 : f32 to vector<2x16xf32>
    %249 = arith.subf %248, %242 : vector<2x16xf32>
    %250 = arith.mulf %249, %247 : vector<2x16xf32>
    %251 = arith.mulf %242, %225 : vector<2x16xf32>
    %252 = arith.addf %250, %251 : vector<2x16xf32>
    %253 = vector.extract_strided_slice %220 {offsets = [0, 48], sizes = [2, 16], strides = [1, 1]} : vector<2x96xf32> to vector<2x16xf32>
    %254 = vector.extract_strided_slice %224 {offsets = [0, 48], sizes = [2, 16], strides = [1, 1]} : vector<2x96xf32> to vector<2x16xf32>
    %255 = arith.addf %253, %254 : vector<2x16xf32>
    %256 = arith.negf %255 : vector<2x16xf32>
    %257 = math.exp %256 : vector<2x16xf32>
    %cst_53 = arith.constant 1.000000e+00 : f32
    %258 = vector.broadcast %cst_53 : f32 to vector<2x16xf32>
    %259 = arith.addf %258, %257 : vector<2x16xf32>
    %260 = arith.divf %258, %259 : vector<2x16xf32>
    %261 = vector.extract_strided_slice %220 {offsets = [0, 64], sizes = [2, 16], strides = [1, 1]} : vector<2x96xf32> to vector<2x16xf32>
    %262 = vector.extract_strided_slice %224 {offsets = [0, 64], sizes = [2, 16], strides = [1, 1]} : vector<2x96xf32> to vector<2x16xf32>
    %263 = arith.addf %261, %262 : vector<2x16xf32>
    %264 = arith.negf %263 : vector<2x16xf32>
    %265 = math.exp %264 : vector<2x16xf32>
    %cst_54 = arith.constant 1.000000e+00 : f32
    %266 = vector.broadcast %cst_54 : f32 to vector<2x16xf32>
    %267 = arith.addf %266, %265 : vector<2x16xf32>
    %268 = arith.divf %266, %267 : vector<2x16xf32>
    %269 = vector.extract_strided_slice %220 {offsets = [0, 80], sizes = [2, 16], strides = [1, 1]} : vector<2x96xf32> to vector<2x16xf32>
    %270 = vector.extract_strided_slice %224 {offsets = [0, 80], sizes = [2, 16], strides = [1, 1]} : vector<2x96xf32> to vector<2x16xf32>
    %271 = arith.mulf %260, %270 : vector<2x16xf32>
    %272 = arith.addf %269, %271 : vector<2x16xf32>
    %273 = math.tanh %272 : vector<2x16xf32>
    %cst_55 = arith.constant 1.000000e+00 : f32
    %274 = vector.broadcast %cst_55 : f32 to vector<2x16xf32>
    %275 = arith.subf %274, %268 : vector<2x16xf32>
    %276 = arith.mulf %275, %273 : vector<2x16xf32>
    %277 = arith.mulf %268, %226 : vector<2x16xf32>
    %278 = arith.addf %276, %277 : vector<2x16xf32>
    %279 = tpu.concatenate %252, %278 in 1 : vector<2x16xf32>, vector<2x16xf32> -> vector<2x32xf32>
    %280 = vector.extract_strided_slice %35 {offsets = [8, 0], sizes = [2, 96], strides = [1, 1]} : vector<32x96xf32> to vector<2x96xf32>
    %281 = vector.extract_strided_slice %35 {offsets = [22, 0], sizes = [2, 96], strides = [1, 1]} : vector<32x96xf32> to vector<2x96xf32>
    %282 = arith.truncf %279 : vector<2x32xf32> to vector<2x32xbf16>
    %cst_56 = arith.constant dense<0.000000e+00> : vector<2x96xf32>
    %283 = tpu.matmul %282, %14, %cst_56 {dimension_numbers = #tpu.dot_dimension_numbers<[1], [0], [0], [1], [0, 0, 1, 1], [], []>} : vector<2x32xbf16>, vector<32x96xbf16>, vector<2x96xf32> -> vector<2x96xf32>
    %284 = vector.broadcast %15 : vector<1x96xf32> to vector<2x96xf32>
    %285 = arith.addf %283, %284 : vector<2x96xf32>
    %286 = vector.extract_strided_slice %279 {offsets = [0, 0], sizes = [2, 16], strides = [1, 1]} : vector<2x32xf32> to vector<2x16xf32>
    %287 = vector.extract_strided_slice %279 {offsets = [0, 16], sizes = [2, 16], strides = [1, 1]} : vector<2x32xf32> to vector<2x16xf32>
    %288 = vector.extract_strided_slice %280 {offsets = [0, 0], sizes = [2, 16], strides = [1, 1]} : vector<2x96xf32> to vector<2x16xf32>
    %289 = vector.extract_strided_slice %285 {offsets = [0, 0], sizes = [2, 16], strides = [1, 1]} : vector<2x96xf32> to vector<2x16xf32>
    %290 = arith.addf %288, %289 : vector<2x16xf32>
    %291 = arith.negf %290 : vector<2x16xf32>
    %292 = math.exp %291 : vector<2x16xf32>
    %cst_57 = arith.constant 1.000000e+00 : f32
    %293 = vector.broadcast %cst_57 : f32 to vector<2x16xf32>
    %294 = arith.addf %293, %292 : vector<2x16xf32>
    %295 = arith.divf %293, %294 : vector<2x16xf32>
    %296 = vector.extract_strided_slice %280 {offsets = [0, 16], sizes = [2, 16], strides = [1, 1]} : vector<2x96xf32> to vector<2x16xf32>
    %297 = vector.extract_strided_slice %285 {offsets = [0, 16], sizes = [2, 16], strides = [1, 1]} : vector<2x96xf32> to vector<2x16xf32>
    %298 = arith.addf %296, %297 : vector<2x16xf32>
    %299 = arith.negf %298 : vector<2x16xf32>
    %300 = math.exp %299 : vector<2x16xf32>
    %cst_58 = arith.constant 1.000000e+00 : f32
    %301 = vector.broadcast %cst_58 : f32 to vector<2x16xf32>
    %302 = arith.addf %301, %300 : vector<2x16xf32>
    %303 = arith.divf %301, %302 : vector<2x16xf32>
    %304 = vector.extract_strided_slice %280 {offsets = [0, 32], sizes = [2, 16], strides = [1, 1]} : vector<2x96xf32> to vector<2x16xf32>
    %305 = vector.extract_strided_slice %285 {offsets = [0, 32], sizes = [2, 16], strides = [1, 1]} : vector<2x96xf32> to vector<2x16xf32>
    %306 = arith.mulf %295, %305 : vector<2x16xf32>
    %307 = arith.addf %304, %306 : vector<2x16xf32>
    %308 = math.tanh %307 : vector<2x16xf32>
    %cst_59 = arith.constant 1.000000e+00 : f32
    %309 = vector.broadcast %cst_59 : f32 to vector<2x16xf32>
    %310 = arith.subf %309, %303 : vector<2x16xf32>
    %311 = arith.mulf %310, %308 : vector<2x16xf32>
    %312 = arith.mulf %303, %286 : vector<2x16xf32>
    %313 = arith.addf %311, %312 : vector<2x16xf32>
    %314 = vector.extract_strided_slice %281 {offsets = [0, 48], sizes = [2, 16], strides = [1, 1]} : vector<2x96xf32> to vector<2x16xf32>
    %315 = vector.extract_strided_slice %285 {offsets = [0, 48], sizes = [2, 16], strides = [1, 1]} : vector<2x96xf32> to vector<2x16xf32>
    %316 = arith.addf %314, %315 : vector<2x16xf32>
    %317 = arith.negf %316 : vector<2x16xf32>
    %318 = math.exp %317 : vector<2x16xf32>
    %cst_60 = arith.constant 1.000000e+00 : f32
    %319 = vector.broadcast %cst_60 : f32 to vector<2x16xf32>
    %320 = arith.addf %319, %318 : vector<2x16xf32>
    %321 = arith.divf %319, %320 : vector<2x16xf32>
    %322 = vector.extract_strided_slice %281 {offsets = [0, 64], sizes = [2, 16], strides = [1, 1]} : vector<2x96xf32> to vector<2x16xf32>
    %323 = vector.extract_strided_slice %285 {offsets = [0, 64], sizes = [2, 16], strides = [1, 1]} : vector<2x96xf32> to vector<2x16xf32>
    %324 = arith.addf %322, %323 : vector<2x16xf32>
    %325 = arith.negf %324 : vector<2x16xf32>
    %326 = math.exp %325 : vector<2x16xf32>
    %cst_61 = arith.constant 1.000000e+00 : f32
    %327 = vector.broadcast %cst_61 : f32 to vector<2x16xf32>
    %328 = arith.addf %327, %326 : vector<2x16xf32>
    %329 = arith.divf %327, %328 : vector<2x16xf32>
    %330 = vector.extract_strided_slice %281 {offsets = [0, 80], sizes = [2, 16], strides = [1, 1]} : vector<2x96xf32> to vector<2x16xf32>
    %331 = vector.extract_strided_slice %285 {offsets = [0, 80], sizes = [2, 16], strides = [1, 1]} : vector<2x96xf32> to vector<2x16xf32>
    %332 = arith.mulf %321, %331 : vector<2x16xf32>
    %333 = arith.addf %330, %332 : vector<2x16xf32>
    %334 = math.tanh %333 : vector<2x16xf32>
    %cst_62 = arith.constant 1.000000e+00 : f32
    %335 = vector.broadcast %cst_62 : f32 to vector<2x16xf32>
    %336 = arith.subf %335, %329 : vector<2x16xf32>
    %337 = arith.mulf %336, %334 : vector<2x16xf32>
    %338 = arith.mulf %329, %287 : vector<2x16xf32>
    %339 = arith.addf %337, %338 : vector<2x16xf32>
    %340 = tpu.concatenate %313, %339 in 1 : vector<2x16xf32>, vector<2x16xf32> -> vector<2x32xf32>
    %341 = vector.extract_strided_slice %35 {offsets = [10, 0], sizes = [2, 96], strides = [1, 1]} : vector<32x96xf32> to vector<2x96xf32>
    %342 = vector.extract_strided_slice %35 {offsets = [20, 0], sizes = [2, 96], strides = [1, 1]} : vector<32x96xf32> to vector<2x96xf32>
    %343 = arith.truncf %340 : vector<2x32xf32> to vector<2x32xbf16>
    %cst_63 = arith.constant dense<0.000000e+00> : vector<2x96xf32>
    %344 = tpu.matmul %343, %14, %cst_63 {dimension_numbers = #tpu.dot_dimension_numbers<[1], [0], [0], [1], [0, 0, 1, 1], [], []>} : vector<2x32xbf16>, vector<32x96xbf16>, vector<2x96xf32> -> vector<2x96xf32>
    %345 = vector.broadcast %15 : vector<1x96xf32> to vector<2x96xf32>
    %346 = arith.addf %344, %345 : vector<2x96xf32>
    %347 = vector.extract_strided_slice %340 {offsets = [0, 0], sizes = [2, 16], strides = [1, 1]} : vector<2x32xf32> to vector<2x16xf32>
    %348 = vector.extract_strided_slice %340 {offsets = [0, 16], sizes = [2, 16], strides = [1, 1]} : vector<2x32xf32> to vector<2x16xf32>
    %349 = vector.extract_strided_slice %341 {offsets = [0, 0], sizes = [2, 16], strides = [1, 1]} : vector<2x96xf32> to vector<2x16xf32>
    %350 = vector.extract_strided_slice %346 {offsets = [0, 0], sizes = [2, 16], strides = [1, 1]} : vector<2x96xf32> to vector<2x16xf32>
    %351 = arith.addf %349, %350 : vector<2x16xf32>
    %352 = arith.negf %351 : vector<2x16xf32>
    %353 = math.exp %352 : vector<2x16xf32>
    %cst_64 = arith.constant 1.000000e+00 : f32
    %354 = vector.broadcast %cst_64 : f32 to vector<2x16xf32>
    %355 = arith.addf %354, %353 : vector<2x16xf32>
    %356 = arith.divf %354, %355 : vector<2x16xf32>
    %357 = vector.extract_strided_slice %341 {offsets = [0, 16], sizes = [2, 16], strides = [1, 1]} : vector<2x96xf32> to vector<2x16xf32>
    %358 = vector.extract_strided_slice %346 {offsets = [0, 16], sizes = [2, 16], strides = [1, 1]} : vector<2x96xf32> to vector<2x16xf32>
    %359 = arith.addf %357, %358 : vector<2x16xf32>
    %360 = arith.negf %359 : vector<2x16xf32>
    %361 = math.exp %360 : vector<2x16xf32>
    %cst_65 = arith.constant 1.000000e+00 : f32
    %362 = vector.broadcast %cst_65 : f32 to vector<2x16xf32>
    %363 = arith.addf %362, %361 : vector<2x16xf32>
    %364 = arith.divf %362, %363 : vector<2x16xf32>
    %365 = vector.extract_strided_slice %341 {offsets = [0, 32], sizes = [2, 16], strides = [1, 1]} : vector<2x96xf32> to vector<2x16xf32>
    %366 = vector.extract_strided_slice %346 {offsets = [0, 32], sizes = [2, 16], strides = [1, 1]} : vector<2x96xf32> to vector<2x16xf32>
    %367 = arith.mulf %356, %366 : vector<2x16xf32>
    %368 = arith.addf %365, %367 : vector<2x16xf32>
    %369 = math.tanh %368 : vector<2x16xf32>
    %cst_66 = arith.constant 1.000000e+00 : f32
    %370 = vector.broadcast %cst_66 : f32 to vector<2x16xf32>
    %371 = arith.subf %370, %364 : vector<2x16xf32>
    %372 = arith.mulf %371, %369 : vector<2x16xf32>
    %373 = arith.mulf %364, %347 : vector<2x16xf32>
    %374 = arith.addf %372, %373 : vector<2x16xf32>
    %375 = vector.extract_strided_slice %342 {offsets = [0, 48], sizes = [2, 16], strides = [1, 1]} : vector<2x96xf32> to vector<2x16xf32>
    %376 = vector.extract_strided_slice %346 {offsets = [0, 48], sizes = [2, 16], strides = [1, 1]} : vector<2x96xf32> to vector<2x16xf32>
    %377 = arith.addf %375, %376 : vector<2x16xf32>
    %378 = arith.negf %377 : vector<2x16xf32>
    %379 = math.exp %378 : vector<2x16xf32>
    %cst_67 = arith.constant 1.000000e+00 : f32
    %380 = vector.broadcast %cst_67 : f32 to vector<2x16xf32>
    %381 = arith.addf %380, %379 : vector<2x16xf32>
    %382 = arith.divf %380, %381 : vector<2x16xf32>
    %383 = vector.extract_strided_slice %342 {offsets = [0, 64], sizes = [2, 16], strides = [1, 1]} : vector<2x96xf32> to vector<2x16xf32>
    %384 = vector.extract_strided_slice %346 {offsets = [0, 64], sizes = [2, 16], strides = [1, 1]} : vector<2x96xf32> to vector<2x16xf32>
    %385 = arith.addf %383, %384 : vector<2x16xf32>
    %386 = arith.negf %385 : vector<2x16xf32>
    %387 = math.exp %386 : vector<2x16xf32>
    %cst_68 = arith.constant 1.000000e+00 : f32
    %388 = vector.broadcast %cst_68 : f32 to vector<2x16xf32>
    %389 = arith.addf %388, %387 : vector<2x16xf32>
    %390 = arith.divf %388, %389 : vector<2x16xf32>
    %391 = vector.extract_strided_slice %342 {offsets = [0, 80], sizes = [2, 16], strides = [1, 1]} : vector<2x96xf32> to vector<2x16xf32>
    %392 = vector.extract_strided_slice %346 {offsets = [0, 80], sizes = [2, 16], strides = [1, 1]} : vector<2x96xf32> to vector<2x16xf32>
    %393 = arith.mulf %382, %392 : vector<2x16xf32>
    %394 = arith.addf %391, %393 : vector<2x16xf32>
    %395 = math.tanh %394 : vector<2x16xf32>
    %cst_69 = arith.constant 1.000000e+00 : f32
    %396 = vector.broadcast %cst_69 : f32 to vector<2x16xf32>
    %397 = arith.subf %396, %390 : vector<2x16xf32>
    %398 = arith.mulf %397, %395 : vector<2x16xf32>
    %399 = arith.mulf %390, %348 : vector<2x16xf32>
    %400 = arith.addf %398, %399 : vector<2x16xf32>
    %401 = tpu.concatenate %374, %400 in 1 : vector<2x16xf32>, vector<2x16xf32> -> vector<2x32xf32>
    %402 = vector.extract_strided_slice %35 {offsets = [12, 0], sizes = [2, 96], strides = [1, 1]} : vector<32x96xf32> to vector<2x96xf32>
    %403 = vector.extract_strided_slice %35 {offsets = [18, 0], sizes = [2, 96], strides = [1, 1]} : vector<32x96xf32> to vector<2x96xf32>
    %404 = arith.truncf %401 : vector<2x32xf32> to vector<2x32xbf16>
    %cst_70 = arith.constant dense<0.000000e+00> : vector<2x96xf32>
    %405 = tpu.matmul %404, %14, %cst_70 {dimension_numbers = #tpu.dot_dimension_numbers<[1], [0], [0], [1], [0, 0, 1, 1], [], []>} : vector<2x32xbf16>, vector<32x96xbf16>, vector<2x96xf32> -> vector<2x96xf32>
    %406 = vector.broadcast %15 : vector<1x96xf32> to vector<2x96xf32>
    %407 = arith.addf %405, %406 : vector<2x96xf32>
    %408 = vector.extract_strided_slice %401 {offsets = [0, 0], sizes = [2, 16], strides = [1, 1]} : vector<2x32xf32> to vector<2x16xf32>
    %409 = vector.extract_strided_slice %401 {offsets = [0, 16], sizes = [2, 16], strides = [1, 1]} : vector<2x32xf32> to vector<2x16xf32>
    %410 = vector.extract_strided_slice %402 {offsets = [0, 0], sizes = [2, 16], strides = [1, 1]} : vector<2x96xf32> to vector<2x16xf32>
    %411 = vector.extract_strided_slice %407 {offsets = [0, 0], sizes = [2, 16], strides = [1, 1]} : vector<2x96xf32> to vector<2x16xf32>
    %412 = arith.addf %410, %411 : vector<2x16xf32>
    %413 = arith.negf %412 : vector<2x16xf32>
    %414 = math.exp %413 : vector<2x16xf32>
    %cst_71 = arith.constant 1.000000e+00 : f32
    %415 = vector.broadcast %cst_71 : f32 to vector<2x16xf32>
    %416 = arith.addf %415, %414 : vector<2x16xf32>
    %417 = arith.divf %415, %416 : vector<2x16xf32>
    %418 = vector.extract_strided_slice %402 {offsets = [0, 16], sizes = [2, 16], strides = [1, 1]} : vector<2x96xf32> to vector<2x16xf32>
    %419 = vector.extract_strided_slice %407 {offsets = [0, 16], sizes = [2, 16], strides = [1, 1]} : vector<2x96xf32> to vector<2x16xf32>
    %420 = arith.addf %418, %419 : vector<2x16xf32>
    %421 = arith.negf %420 : vector<2x16xf32>
    %422 = math.exp %421 : vector<2x16xf32>
    %cst_72 = arith.constant 1.000000e+00 : f32
    %423 = vector.broadcast %cst_72 : f32 to vector<2x16xf32>
    %424 = arith.addf %423, %422 : vector<2x16xf32>
    %425 = arith.divf %423, %424 : vector<2x16xf32>
    %426 = vector.extract_strided_slice %402 {offsets = [0, 32], sizes = [2, 16], strides = [1, 1]} : vector<2x96xf32> to vector<2x16xf32>
    %427 = vector.extract_strided_slice %407 {offsets = [0, 32], sizes = [2, 16], strides = [1, 1]} : vector<2x96xf32> to vector<2x16xf32>
    %428 = arith.mulf %417, %427 : vector<2x16xf32>
    %429 = arith.addf %426, %428 : vector<2x16xf32>
    %430 = math.tanh %429 : vector<2x16xf32>
    %cst_73 = arith.constant 1.000000e+00 : f32
    %431 = vector.broadcast %cst_73 : f32 to vector<2x16xf32>
    %432 = arith.subf %431, %425 : vector<2x16xf32>
    %433 = arith.mulf %432, %430 : vector<2x16xf32>
    %434 = arith.mulf %425, %408 : vector<2x16xf32>
    %435 = arith.addf %433, %434 : vector<2x16xf32>
    %436 = vector.extract_strided_slice %403 {offsets = [0, 48], sizes = [2, 16], strides = [1, 1]} : vector<2x96xf32> to vector<2x16xf32>
    %437 = vector.extract_strided_slice %407 {offsets = [0, 48], sizes = [2, 16], strides = [1, 1]} : vector<2x96xf32> to vector<2x16xf32>
    %438 = arith.addf %436, %437 : vector<2x16xf32>
    %439 = arith.negf %438 : vector<2x16xf32>
    %440 = math.exp %439 : vector<2x16xf32>
    %cst_74 = arith.constant 1.000000e+00 : f32
    %441 = vector.broadcast %cst_74 : f32 to vector<2x16xf32>
    %442 = arith.addf %441, %440 : vector<2x16xf32>
    %443 = arith.divf %441, %442 : vector<2x16xf32>
    %444 = vector.extract_strided_slice %403 {offsets = [0, 64], sizes = [2, 16], strides = [1, 1]} : vector<2x96xf32> to vector<2x16xf32>
    %445 = vector.extract_strided_slice %407 {offsets = [0, 64], sizes = [2, 16], strides = [1, 1]} : vector<2x96xf32> to vector<2x16xf32>
    %446 = arith.addf %444, %445 : vector<2x16xf32>
    %447 = arith.negf %446 : vector<2x16xf32>
    %448 = math.exp %447 : vector<2x16xf32>
    %cst_75 = arith.constant 1.000000e+00 : f32
    %449 = vector.broadcast %cst_75 : f32 to vector<2x16xf32>
    %450 = arith.addf %449, %448 : vector<2x16xf32>
    %451 = arith.divf %449, %450 : vector<2x16xf32>
    %452 = vector.extract_strided_slice %403 {offsets = [0, 80], sizes = [2, 16], strides = [1, 1]} : vector<2x96xf32> to vector<2x16xf32>
    %453 = vector.extract_strided_slice %407 {offsets = [0, 80], sizes = [2, 16], strides = [1, 1]} : vector<2x96xf32> to vector<2x16xf32>
    %454 = arith.mulf %443, %453 : vector<2x16xf32>
    %455 = arith.addf %452, %454 : vector<2x16xf32>
    %456 = math.tanh %455 : vector<2x16xf32>
    %cst_76 = arith.constant 1.000000e+00 : f32
    %457 = vector.broadcast %cst_76 : f32 to vector<2x16xf32>
    %458 = arith.subf %457, %451 : vector<2x16xf32>
    %459 = arith.mulf %458, %456 : vector<2x16xf32>
    %460 = arith.mulf %451, %409 : vector<2x16xf32>
    %461 = arith.addf %459, %460 : vector<2x16xf32>
    %462 = tpu.concatenate %435, %461 in 1 : vector<2x16xf32>, vector<2x16xf32> -> vector<2x32xf32>
    %463 = vector.extract_strided_slice %35 {offsets = [14, 0], sizes = [2, 96], strides = [1, 1]} : vector<32x96xf32> to vector<2x96xf32>
    %464 = vector.extract_strided_slice %35 {offsets = [16, 0], sizes = [2, 96], strides = [1, 1]} : vector<32x96xf32> to vector<2x96xf32>
    %465 = arith.truncf %462 : vector<2x32xf32> to vector<2x32xbf16>
    %cst_77 = arith.constant dense<0.000000e+00> : vector<2x96xf32>
    %466 = tpu.matmul %465, %14, %cst_77 {dimension_numbers = #tpu.dot_dimension_numbers<[1], [0], [0], [1], [0, 0, 1, 1], [], []>} : vector<2x32xbf16>, vector<32x96xbf16>, vector<2x96xf32> -> vector<2x96xf32>
    %467 = vector.broadcast %15 : vector<1x96xf32> to vector<2x96xf32>
    %468 = arith.addf %466, %467 : vector<2x96xf32>
    %469 = vector.extract_strided_slice %462 {offsets = [0, 0], sizes = [2, 16], strides = [1, 1]} : vector<2x32xf32> to vector<2x16xf32>
    %470 = vector.extract_strided_slice %462 {offsets = [0, 16], sizes = [2, 16], strides = [1, 1]} : vector<2x32xf32> to vector<2x16xf32>
    %471 = vector.extract_strided_slice %463 {offsets = [0, 0], sizes = [2, 16], strides = [1, 1]} : vector<2x96xf32> to vector<2x16xf32>
    %472 = vector.extract_strided_slice %468 {offsets = [0, 0], sizes = [2, 16], strides = [1, 1]} : vector<2x96xf32> to vector<2x16xf32>
    %473 = arith.addf %471, %472 : vector<2x16xf32>
    %474 = arith.negf %473 : vector<2x16xf32>
    %475 = math.exp %474 : vector<2x16xf32>
    %cst_78 = arith.constant 1.000000e+00 : f32
    %476 = vector.broadcast %cst_78 : f32 to vector<2x16xf32>
    %477 = arith.addf %476, %475 : vector<2x16xf32>
    %478 = arith.divf %476, %477 : vector<2x16xf32>
    %479 = vector.extract_strided_slice %463 {offsets = [0, 16], sizes = [2, 16], strides = [1, 1]} : vector<2x96xf32> to vector<2x16xf32>
    %480 = vector.extract_strided_slice %468 {offsets = [0, 16], sizes = [2, 16], strides = [1, 1]} : vector<2x96xf32> to vector<2x16xf32>
    %481 = arith.addf %479, %480 : vector<2x16xf32>
    %482 = arith.negf %481 : vector<2x16xf32>
    %483 = math.exp %482 : vector<2x16xf32>
    %cst_79 = arith.constant 1.000000e+00 : f32
    %484 = vector.broadcast %cst_79 : f32 to vector<2x16xf32>
    %485 = arith.addf %484, %483 : vector<2x16xf32>
    %486 = arith.divf %484, %485 : vector<2x16xf32>
    %487 = vector.extract_strided_slice %463 {offsets = [0, 32], sizes = [2, 16], strides = [1, 1]} : vector<2x96xf32> to vector<2x16xf32>
    %488 = vector.extract_strided_slice %468 {offsets = [0, 32], sizes = [2, 16], strides = [1, 1]} : vector<2x96xf32> to vector<2x16xf32>
    %489 = arith.mulf %478, %488 : vector<2x16xf32>
    %490 = arith.addf %487, %489 : vector<2x16xf32>
    %491 = math.tanh %490 : vector<2x16xf32>
    %cst_80 = arith.constant 1.000000e+00 : f32
    %492 = vector.broadcast %cst_80 : f32 to vector<2x16xf32>
    %493 = arith.subf %492, %486 : vector<2x16xf32>
    %494 = arith.mulf %493, %491 : vector<2x16xf32>
    %495 = arith.mulf %486, %469 : vector<2x16xf32>
    %496 = arith.addf %494, %495 : vector<2x16xf32>
    %497 = vector.extract_strided_slice %464 {offsets = [0, 48], sizes = [2, 16], strides = [1, 1]} : vector<2x96xf32> to vector<2x16xf32>
    %498 = vector.extract_strided_slice %468 {offsets = [0, 48], sizes = [2, 16], strides = [1, 1]} : vector<2x96xf32> to vector<2x16xf32>
    %499 = arith.addf %497, %498 : vector<2x16xf32>
    %500 = arith.negf %499 : vector<2x16xf32>
    %501 = math.exp %500 : vector<2x16xf32>
    %cst_81 = arith.constant 1.000000e+00 : f32
    %502 = vector.broadcast %cst_81 : f32 to vector<2x16xf32>
    %503 = arith.addf %502, %501 : vector<2x16xf32>
    %504 = arith.divf %502, %503 : vector<2x16xf32>
    %505 = vector.extract_strided_slice %464 {offsets = [0, 64], sizes = [2, 16], strides = [1, 1]} : vector<2x96xf32> to vector<2x16xf32>
    %506 = vector.extract_strided_slice %468 {offsets = [0, 64], sizes = [2, 16], strides = [1, 1]} : vector<2x96xf32> to vector<2x16xf32>
    %507 = arith.addf %505, %506 : vector<2x16xf32>
    %508 = arith.negf %507 : vector<2x16xf32>
    %509 = math.exp %508 : vector<2x16xf32>
    %cst_82 = arith.constant 1.000000e+00 : f32
    %510 = vector.broadcast %cst_82 : f32 to vector<2x16xf32>
    %511 = arith.addf %510, %509 : vector<2x16xf32>
    %512 = arith.divf %510, %511 : vector<2x16xf32>
    %513 = vector.extract_strided_slice %464 {offsets = [0, 80], sizes = [2, 16], strides = [1, 1]} : vector<2x96xf32> to vector<2x16xf32>
    %514 = vector.extract_strided_slice %468 {offsets = [0, 80], sizes = [2, 16], strides = [1, 1]} : vector<2x96xf32> to vector<2x16xf32>
    %515 = arith.mulf %504, %514 : vector<2x16xf32>
    %516 = arith.addf %513, %515 : vector<2x16xf32>
    %517 = math.tanh %516 : vector<2x16xf32>
    %cst_83 = arith.constant 1.000000e+00 : f32
    %518 = vector.broadcast %cst_83 : f32 to vector<2x16xf32>
    %519 = arith.subf %518, %512 : vector<2x16xf32>
    %520 = arith.mulf %519, %517 : vector<2x16xf32>
    %521 = arith.mulf %512, %470 : vector<2x16xf32>
    %522 = arith.addf %520, %521 : vector<2x16xf32>
    %523 = tpu.concatenate %496, %522 in 1 : vector<2x16xf32>, vector<2x16xf32> -> vector<2x32xf32>
    %524 = vector.extract_strided_slice %35 {offsets = [16, 0], sizes = [2, 96], strides = [1, 1]} : vector<32x96xf32> to vector<2x96xf32>
    %525 = vector.extract_strided_slice %35 {offsets = [14, 0], sizes = [2, 96], strides = [1, 1]} : vector<32x96xf32> to vector<2x96xf32>
    %526 = arith.truncf %523 : vector<2x32xf32> to vector<2x32xbf16>
    %cst_84 = arith.constant dense<0.000000e+00> : vector<2x96xf32>
    %527 = tpu.matmul %526, %14, %cst_84 {dimension_numbers = #tpu.dot_dimension_numbers<[1], [0], [0], [1], [0, 0, 1, 1], [], []>} : vector<2x32xbf16>, vector<32x96xbf16>, vector<2x96xf32> -> vector<2x96xf32>
    %528 = vector.broadcast %15 : vector<1x96xf32> to vector<2x96xf32>
    %529 = arith.addf %527, %528 : vector<2x96xf32>
    %530 = vector.extract_strided_slice %523 {offsets = [0, 0], sizes = [2, 16], strides = [1, 1]} : vector<2x32xf32> to vector<2x16xf32>
    %531 = vector.extract_strided_slice %523 {offsets = [0, 16], sizes = [2, 16], strides = [1, 1]} : vector<2x32xf32> to vector<2x16xf32>
    %532 = vector.extract_strided_slice %524 {offsets = [0, 0], sizes = [2, 16], strides = [1, 1]} : vector<2x96xf32> to vector<2x16xf32>
    %533 = vector.extract_strided_slice %529 {offsets = [0, 0], sizes = [2, 16], strides = [1, 1]} : vector<2x96xf32> to vector<2x16xf32>
    %534 = arith.addf %532, %533 : vector<2x16xf32>
    %535 = arith.negf %534 : vector<2x16xf32>
    %536 = math.exp %535 : vector<2x16xf32>
    %cst_85 = arith.constant 1.000000e+00 : f32
    %537 = vector.broadcast %cst_85 : f32 to vector<2x16xf32>
    %538 = arith.addf %537, %536 : vector<2x16xf32>
    %539 = arith.divf %537, %538 : vector<2x16xf32>
    %540 = vector.extract_strided_slice %524 {offsets = [0, 16], sizes = [2, 16], strides = [1, 1]} : vector<2x96xf32> to vector<2x16xf32>
    %541 = vector.extract_strided_slice %529 {offsets = [0, 16], sizes = [2, 16], strides = [1, 1]} : vector<2x96xf32> to vector<2x16xf32>
    %542 = arith.addf %540, %541 : vector<2x16xf32>
    %543 = arith.negf %542 : vector<2x16xf32>
    %544 = math.exp %543 : vector<2x16xf32>
    %cst_86 = arith.constant 1.000000e+00 : f32
    %545 = vector.broadcast %cst_86 : f32 to vector<2x16xf32>
    %546 = arith.addf %545, %544 : vector<2x16xf32>
    %547 = arith.divf %545, %546 : vector<2x16xf32>
    %548 = vector.extract_strided_slice %524 {offsets = [0, 32], sizes = [2, 16], strides = [1, 1]} : vector<2x96xf32> to vector<2x16xf32>
    %549 = vector.extract_strided_slice %529 {offsets = [0, 32], sizes = [2, 16], strides = [1, 1]} : vector<2x96xf32> to vector<2x16xf32>
    %550 = arith.mulf %539, %549 : vector<2x16xf32>
    %551 = arith.addf %548, %550 : vector<2x16xf32>
    %552 = math.tanh %551 : vector<2x16xf32>
    %cst_87 = arith.constant 1.000000e+00 : f32
    %553 = vector.broadcast %cst_87 : f32 to vector<2x16xf32>
    %554 = arith.subf %553, %547 : vector<2x16xf32>
    %555 = arith.mulf %554, %552 : vector<2x16xf32>
    %556 = arith.mulf %547, %530 : vector<2x16xf32>
    %557 = arith.addf %555, %556 : vector<2x16xf32>
    %558 = vector.extract_strided_slice %525 {offsets = [0, 48], sizes = [2, 16], strides = [1, 1]} : vector<2x96xf32> to vector<2x16xf32>
    %559 = vector.extract_strided_slice %529 {offsets = [0, 48], sizes = [2, 16], strides = [1, 1]} : vector<2x96xf32> to vector<2x16xf32>
    %560 = arith.addf %558, %559 : vector<2x16xf32>
    %561 = arith.negf %560 : vector<2x16xf32>
    %562 = math.exp %561 : vector<2x16xf32>
    %cst_88 = arith.constant 1.000000e+00 : f32
    %563 = vector.broadcast %cst_88 : f32 to vector<2x16xf32>
    %564 = arith.addf %563, %562 : vector<2x16xf32>
    %565 = arith.divf %563, %564 : vector<2x16xf32>
    %566 = vector.extract_strided_slice %525 {offsets = [0, 64], sizes = [2, 16], strides = [1, 1]} : vector<2x96xf32> to vector<2x16xf32>
    %567 = vector.extract_strided_slice %529 {offsets = [0, 64], sizes = [2, 16], strides = [1, 1]} : vector<2x96xf32> to vector<2x16xf32>
    %568 = arith.addf %566, %567 : vector<2x16xf32>
    %569 = arith.negf %568 : vector<2x16xf32>
    %570 = math.exp %569 : vector<2x16xf32>
    %cst_89 = arith.constant 1.000000e+00 : f32
    %571 = vector.broadcast %cst_89 : f32 to vector<2x16xf32>
    %572 = arith.addf %571, %570 : vector<2x16xf32>
    %573 = arith.divf %571, %572 : vector<2x16xf32>
    %574 = vector.extract_strided_slice %525 {offsets = [0, 80], sizes = [2, 16], strides = [1, 1]} : vector<2x96xf32> to vector<2x16xf32>
    %575 = vector.extract_strided_slice %529 {offsets = [0, 80], sizes = [2, 16], strides = [1, 1]} : vector<2x96xf32> to vector<2x16xf32>
    %576 = arith.mulf %565, %575 : vector<2x16xf32>
    %577 = arith.addf %574, %576 : vector<2x16xf32>
    %578 = math.tanh %577 : vector<2x16xf32>
    %cst_90 = arith.constant 1.000000e+00 : f32
    %579 = vector.broadcast %cst_90 : f32 to vector<2x16xf32>
    %580 = arith.subf %579, %573 : vector<2x16xf32>
    %581 = arith.mulf %580, %578 : vector<2x16xf32>
    %582 = arith.mulf %573, %531 : vector<2x16xf32>
    %583 = arith.addf %581, %582 : vector<2x16xf32>
    %584 = tpu.concatenate %557, %583 in 1 : vector<2x16xf32>, vector<2x16xf32> -> vector<2x32xf32>
    %585 = vector.extract_strided_slice %35 {offsets = [18, 0], sizes = [2, 96], strides = [1, 1]} : vector<32x96xf32> to vector<2x96xf32>
    %586 = vector.extract_strided_slice %35 {offsets = [12, 0], sizes = [2, 96], strides = [1, 1]} : vector<32x96xf32> to vector<2x96xf32>
    %587 = arith.truncf %584 : vector<2x32xf32> to vector<2x32xbf16>
    %cst_91 = arith.constant dense<0.000000e+00> : vector<2x96xf32>
    %588 = tpu.matmul %587, %14, %cst_91 {dimension_numbers = #tpu.dot_dimension_numbers<[1], [0], [0], [1], [0, 0, 1, 1], [], []>} : vector<2x32xbf16>, vector<32x96xbf16>, vector<2x96xf32> -> vector<2x96xf32>
    %589 = vector.broadcast %15 : vector<1x96xf32> to vector<2x96xf32>
    %590 = arith.addf %588, %589 : vector<2x96xf32>
    %591 = vector.extract_strided_slice %584 {offsets = [0, 0], sizes = [2, 16], strides = [1, 1]} : vector<2x32xf32> to vector<2x16xf32>
    %592 = vector.extract_strided_slice %584 {offsets = [0, 16], sizes = [2, 16], strides = [1, 1]} : vector<2x32xf32> to vector<2x16xf32>
    %593 = vector.extract_strided_slice %585 {offsets = [0, 0], sizes = [2, 16], strides = [1, 1]} : vector<2x96xf32> to vector<2x16xf32>
    %594 = vector.extract_strided_slice %590 {offsets = [0, 0], sizes = [2, 16], strides = [1, 1]} : vector<2x96xf32> to vector<2x16xf32>
    %595 = arith.addf %593, %594 : vector<2x16xf32>
    %596 = arith.negf %595 : vector<2x16xf32>
    %597 = math.exp %596 : vector<2x16xf32>
    %cst_92 = arith.constant 1.000000e+00 : f32
    %598 = vector.broadcast %cst_92 : f32 to vector<2x16xf32>
    %599 = arith.addf %598, %597 : vector<2x16xf32>
    %600 = arith.divf %598, %599 : vector<2x16xf32>
    %601 = vector.extract_strided_slice %585 {offsets = [0, 16], sizes = [2, 16], strides = [1, 1]} : vector<2x96xf32> to vector<2x16xf32>
    %602 = vector.extract_strided_slice %590 {offsets = [0, 16], sizes = [2, 16], strides = [1, 1]} : vector<2x96xf32> to vector<2x16xf32>
    %603 = arith.addf %601, %602 : vector<2x16xf32>
    %604 = arith.negf %603 : vector<2x16xf32>
    %605 = math.exp %604 : vector<2x16xf32>
    %cst_93 = arith.constant 1.000000e+00 : f32
    %606 = vector.broadcast %cst_93 : f32 to vector<2x16xf32>
    %607 = arith.addf %606, %605 : vector<2x16xf32>
    %608 = arith.divf %606, %607 : vector<2x16xf32>
    %609 = vector.extract_strided_slice %585 {offsets = [0, 32], sizes = [2, 16], strides = [1, 1]} : vector<2x96xf32> to vector<2x16xf32>
    %610 = vector.extract_strided_slice %590 {offsets = [0, 32], sizes = [2, 16], strides = [1, 1]} : vector<2x96xf32> to vector<2x16xf32>
    %611 = arith.mulf %600, %610 : vector<2x16xf32>
    %612 = arith.addf %609, %611 : vector<2x16xf32>
    %613 = math.tanh %612 : vector<2x16xf32>
    %cst_94 = arith.constant 1.000000e+00 : f32
    %614 = vector.broadcast %cst_94 : f32 to vector<2x16xf32>
    %615 = arith.subf %614, %608 : vector<2x16xf32>
    %616 = arith.mulf %615, %613 : vector<2x16xf32>
    %617 = arith.mulf %608, %591 : vector<2x16xf32>
    %618 = arith.addf %616, %617 : vector<2x16xf32>
    %619 = vector.extract_strided_slice %586 {offsets = [0, 48], sizes = [2, 16], strides = [1, 1]} : vector<2x96xf32> to vector<2x16xf32>
    %620 = vector.extract_strided_slice %590 {offsets = [0, 48], sizes = [2, 16], strides = [1, 1]} : vector<2x96xf32> to vector<2x16xf32>
    %621 = arith.addf %619, %620 : vector<2x16xf32>
    %622 = arith.negf %621 : vector<2x16xf32>
    %623 = math.exp %622 : vector<2x16xf32>
    %cst_95 = arith.constant 1.000000e+00 : f32
    %624 = vector.broadcast %cst_95 : f32 to vector<2x16xf32>
    %625 = arith.addf %624, %623 : vector<2x16xf32>
    %626 = arith.divf %624, %625 : vector<2x16xf32>
    %627 = vector.extract_strided_slice %586 {offsets = [0, 64], sizes = [2, 16], strides = [1, 1]} : vector<2x96xf32> to vector<2x16xf32>
    %628 = vector.extract_strided_slice %590 {offsets = [0, 64], sizes = [2, 16], strides = [1, 1]} : vector<2x96xf32> to vector<2x16xf32>
    %629 = arith.addf %627, %628 : vector<2x16xf32>
    %630 = arith.negf %629 : vector<2x16xf32>
    %631 = math.exp %630 : vector<2x16xf32>
    %cst_96 = arith.constant 1.000000e+00 : f32
    %632 = vector.broadcast %cst_96 : f32 to vector<2x16xf32>
    %633 = arith.addf %632, %631 : vector<2x16xf32>
    %634 = arith.divf %632, %633 : vector<2x16xf32>
    %635 = vector.extract_strided_slice %586 {offsets = [0, 80], sizes = [2, 16], strides = [1, 1]} : vector<2x96xf32> to vector<2x16xf32>
    %636 = vector.extract_strided_slice %590 {offsets = [0, 80], sizes = [2, 16], strides = [1, 1]} : vector<2x96xf32> to vector<2x16xf32>
    %637 = arith.mulf %626, %636 : vector<2x16xf32>
    %638 = arith.addf %635, %637 : vector<2x16xf32>
    %639 = math.tanh %638 : vector<2x16xf32>
    %cst_97 = arith.constant 1.000000e+00 : f32
    %640 = vector.broadcast %cst_97 : f32 to vector<2x16xf32>
    %641 = arith.subf %640, %634 : vector<2x16xf32>
    %642 = arith.mulf %641, %639 : vector<2x16xf32>
    %643 = arith.mulf %634, %592 : vector<2x16xf32>
    %644 = arith.addf %642, %643 : vector<2x16xf32>
    %645 = tpu.concatenate %618, %644 in 1 : vector<2x16xf32>, vector<2x16xf32> -> vector<2x32xf32>
    %646 = vector.extract_strided_slice %35 {offsets = [20, 0], sizes = [2, 96], strides = [1, 1]} : vector<32x96xf32> to vector<2x96xf32>
    %647 = vector.extract_strided_slice %35 {offsets = [10, 0], sizes = [2, 96], strides = [1, 1]} : vector<32x96xf32> to vector<2x96xf32>
    %648 = arith.truncf %645 : vector<2x32xf32> to vector<2x32xbf16>
    %cst_98 = arith.constant dense<0.000000e+00> : vector<2x96xf32>
    %649 = tpu.matmul %648, %14, %cst_98 {dimension_numbers = #tpu.dot_dimension_numbers<[1], [0], [0], [1], [0, 0, 1, 1], [], []>} : vector<2x32xbf16>, vector<32x96xbf16>, vector<2x96xf32> -> vector<2x96xf32>
    %650 = vector.broadcast %15 : vector<1x96xf32> to vector<2x96xf32>
    %651 = arith.addf %649, %650 : vector<2x96xf32>
    %652 = vector.extract_strided_slice %645 {offsets = [0, 0], sizes = [2, 16], strides = [1, 1]} : vector<2x32xf32> to vector<2x16xf32>
    %653 = vector.extract_strided_slice %645 {offsets = [0, 16], sizes = [2, 16], strides = [1, 1]} : vector<2x32xf32> to vector<2x16xf32>
    %654 = vector.extract_strided_slice %646 {offsets = [0, 0], sizes = [2, 16], strides = [1, 1]} : vector<2x96xf32> to vector<2x16xf32>
    %655 = vector.extract_strided_slice %651 {offsets = [0, 0], sizes = [2, 16], strides = [1, 1]} : vector<2x96xf32> to vector<2x16xf32>
    %656 = arith.addf %654, %655 : vector<2x16xf32>
    %657 = arith.negf %656 : vector<2x16xf32>
    %658 = math.exp %657 : vector<2x16xf32>
    %cst_99 = arith.constant 1.000000e+00 : f32
    %659 = vector.broadcast %cst_99 : f32 to vector<2x16xf32>
    %660 = arith.addf %659, %658 : vector<2x16xf32>
    %661 = arith.divf %659, %660 : vector<2x16xf32>
    %662 = vector.extract_strided_slice %646 {offsets = [0, 16], sizes = [2, 16], strides = [1, 1]} : vector<2x96xf32> to vector<2x16xf32>
    %663 = vector.extract_strided_slice %651 {offsets = [0, 16], sizes = [2, 16], strides = [1, 1]} : vector<2x96xf32> to vector<2x16xf32>
    %664 = arith.addf %662, %663 : vector<2x16xf32>
    %665 = arith.negf %664 : vector<2x16xf32>
    %666 = math.exp %665 : vector<2x16xf32>
    %cst_100 = arith.constant 1.000000e+00 : f32
    %667 = vector.broadcast %cst_100 : f32 to vector<2x16xf32>
    %668 = arith.addf %667, %666 : vector<2x16xf32>
    %669 = arith.divf %667, %668 : vector<2x16xf32>
    %670 = vector.extract_strided_slice %646 {offsets = [0, 32], sizes = [2, 16], strides = [1, 1]} : vector<2x96xf32> to vector<2x16xf32>
    %671 = vector.extract_strided_slice %651 {offsets = [0, 32], sizes = [2, 16], strides = [1, 1]} : vector<2x96xf32> to vector<2x16xf32>
    %672 = arith.mulf %661, %671 : vector<2x16xf32>
    %673 = arith.addf %670, %672 : vector<2x16xf32>
    %674 = math.tanh %673 : vector<2x16xf32>
    %cst_101 = arith.constant 1.000000e+00 : f32
    %675 = vector.broadcast %cst_101 : f32 to vector<2x16xf32>
    %676 = arith.subf %675, %669 : vector<2x16xf32>
    %677 = arith.mulf %676, %674 : vector<2x16xf32>
    %678 = arith.mulf %669, %652 : vector<2x16xf32>
    %679 = arith.addf %677, %678 : vector<2x16xf32>
    %680 = vector.extract_strided_slice %647 {offsets = [0, 48], sizes = [2, 16], strides = [1, 1]} : vector<2x96xf32> to vector<2x16xf32>
    %681 = vector.extract_strided_slice %651 {offsets = [0, 48], sizes = [2, 16], strides = [1, 1]} : vector<2x96xf32> to vector<2x16xf32>
    %682 = arith.addf %680, %681 : vector<2x16xf32>
    %683 = arith.negf %682 : vector<2x16xf32>
    %684 = math.exp %683 : vector<2x16xf32>
    %cst_102 = arith.constant 1.000000e+00 : f32
    %685 = vector.broadcast %cst_102 : f32 to vector<2x16xf32>
    %686 = arith.addf %685, %684 : vector<2x16xf32>
    %687 = arith.divf %685, %686 : vector<2x16xf32>
    %688 = vector.extract_strided_slice %647 {offsets = [0, 64], sizes = [2, 16], strides = [1, 1]} : vector<2x96xf32> to vector<2x16xf32>
    %689 = vector.extract_strided_slice %651 {offsets = [0, 64], sizes = [2, 16], strides = [1, 1]} : vector<2x96xf32> to vector<2x16xf32>
    %690 = arith.addf %688, %689 : vector<2x16xf32>
    %691 = arith.negf %690 : vector<2x16xf32>
    %692 = math.exp %691 : vector<2x16xf32>
    %cst_103 = arith.constant 1.000000e+00 : f32
    %693 = vector.broadcast %cst_103 : f32 to vector<2x16xf32>
    %694 = arith.addf %693, %692 : vector<2x16xf32>
    %695 = arith.divf %693, %694 : vector<2x16xf32>
    %696 = vector.extract_strided_slice %647 {offsets = [0, 80], sizes = [2, 16], strides = [1, 1]} : vector<2x96xf32> to vector<2x16xf32>
    %697 = vector.extract_strided_slice %651 {offsets = [0, 80], sizes = [2, 16], strides = [1, 1]} : vector<2x96xf32> to vector<2x16xf32>
    %698 = arith.mulf %687, %697 : vector<2x16xf32>
    %699 = arith.addf %696, %698 : vector<2x16xf32>
    %700 = math.tanh %699 : vector<2x16xf32>
    %cst_104 = arith.constant 1.000000e+00 : f32
    %701 = vector.broadcast %cst_104 : f32 to vector<2x16xf32>
    %702 = arith.subf %701, %695 : vector<2x16xf32>
    %703 = arith.mulf %702, %700 : vector<2x16xf32>
    %704 = arith.mulf %695, %653 : vector<2x16xf32>
    %705 = arith.addf %703, %704 : vector<2x16xf32>
    %706 = tpu.concatenate %679, %705 in 1 : vector<2x16xf32>, vector<2x16xf32> -> vector<2x32xf32>
    %707 = vector.extract_strided_slice %35 {offsets = [22, 0], sizes = [2, 96], strides = [1, 1]} : vector<32x96xf32> to vector<2x96xf32>
    %708 = vector.extract_strided_slice %35 {offsets = [8, 0], sizes = [2, 96], strides = [1, 1]} : vector<32x96xf32> to vector<2x96xf32>
    %709 = arith.truncf %706 : vector<2x32xf32> to vector<2x32xbf16>
    %cst_105 = arith.constant dense<0.000000e+00> : vector<2x96xf32>
    %710 = tpu.matmul %709, %14, %cst_105 {dimension_numbers = #tpu.dot_dimension_numbers<[1], [0], [0], [1], [0, 0, 1, 1], [], []>} : vector<2x32xbf16>, vector<32x96xbf16>, vector<2x96xf32> -> vector<2x96xf32>
    %711 = vector.broadcast %15 : vector<1x96xf32> to vector<2x96xf32>
    %712 = arith.addf %710, %711 : vector<2x96xf32>
    %713 = vector.extract_strided_slice %706 {offsets = [0, 0], sizes = [2, 16], strides = [1, 1]} : vector<2x32xf32> to vector<2x16xf32>
    %714 = vector.extract_strided_slice %706 {offsets = [0, 16], sizes = [2, 16], strides = [1, 1]} : vector<2x32xf32> to vector<2x16xf32>
    %715 = vector.extract_strided_slice %707 {offsets = [0, 0], sizes = [2, 16], strides = [1, 1]} : vector<2x96xf32> to vector<2x16xf32>
    %716 = vector.extract_strided_slice %712 {offsets = [0, 0], sizes = [2, 16], strides = [1, 1]} : vector<2x96xf32> to vector<2x16xf32>
    %717 = arith.addf %715, %716 : vector<2x16xf32>
    %718 = arith.negf %717 : vector<2x16xf32>
    %719 = math.exp %718 : vector<2x16xf32>
    %cst_106 = arith.constant 1.000000e+00 : f32
    %720 = vector.broadcast %cst_106 : f32 to vector<2x16xf32>
    %721 = arith.addf %720, %719 : vector<2x16xf32>
    %722 = arith.divf %720, %721 : vector<2x16xf32>
    %723 = vector.extract_strided_slice %707 {offsets = [0, 16], sizes = [2, 16], strides = [1, 1]} : vector<2x96xf32> to vector<2x16xf32>
    %724 = vector.extract_strided_slice %712 {offsets = [0, 16], sizes = [2, 16], strides = [1, 1]} : vector<2x96xf32> to vector<2x16xf32>
    %725 = arith.addf %723, %724 : vector<2x16xf32>
    %726 = arith.negf %725 : vector<2x16xf32>
    %727 = math.exp %726 : vector<2x16xf32>
    %cst_107 = arith.constant 1.000000e+00 : f32
    %728 = vector.broadcast %cst_107 : f32 to vector<2x16xf32>
    %729 = arith.addf %728, %727 : vector<2x16xf32>
    %730 = arith.divf %728, %729 : vector<2x16xf32>
    %731 = vector.extract_strided_slice %707 {offsets = [0, 32], sizes = [2, 16], strides = [1, 1]} : vector<2x96xf32> to vector<2x16xf32>
    %732 = vector.extract_strided_slice %712 {offsets = [0, 32], sizes = [2, 16], strides = [1, 1]} : vector<2x96xf32> to vector<2x16xf32>
    %733 = arith.mulf %722, %732 : vector<2x16xf32>
    %734 = arith.addf %731, %733 : vector<2x16xf32>
    %735 = math.tanh %734 : vector<2x16xf32>
    %cst_108 = arith.constant 1.000000e+00 : f32
    %736 = vector.broadcast %cst_108 : f32 to vector<2x16xf32>
    %737 = arith.subf %736, %730 : vector<2x16xf32>
    %738 = arith.mulf %737, %735 : vector<2x16xf32>
    %739 = arith.mulf %730, %713 : vector<2x16xf32>
    %740 = arith.addf %738, %739 : vector<2x16xf32>
    %741 = vector.extract_strided_slice %708 {offsets = [0, 48], sizes = [2, 16], strides = [1, 1]} : vector<2x96xf32> to vector<2x16xf32>
    %742 = vector.extract_strided_slice %712 {offsets = [0, 48], sizes = [2, 16], strides = [1, 1]} : vector<2x96xf32> to vector<2x16xf32>
    %743 = arith.addf %741, %742 : vector<2x16xf32>
    %744 = arith.negf %743 : vector<2x16xf32>
    %745 = math.exp %744 : vector<2x16xf32>
    %cst_109 = arith.constant 1.000000e+00 : f32
    %746 = vector.broadcast %cst_109 : f32 to vector<2x16xf32>
    %747 = arith.addf %746, %745 : vector<2x16xf32>
    %748 = arith.divf %746, %747 : vector<2x16xf32>
    %749 = vector.extract_strided_slice %708 {offsets = [0, 64], sizes = [2, 16], strides = [1, 1]} : vector<2x96xf32> to vector<2x16xf32>
    %750 = vector.extract_strided_slice %712 {offsets = [0, 64], sizes = [2, 16], strides = [1, 1]} : vector<2x96xf32> to vector<2x16xf32>
    %751 = arith.addf %749, %750 : vector<2x16xf32>
    %752 = arith.negf %751 : vector<2x16xf32>
    %753 = math.exp %752 : vector<2x16xf32>
    %cst_110 = arith.constant 1.000000e+00 : f32
    %754 = vector.broadcast %cst_110 : f32 to vector<2x16xf32>
    %755 = arith.addf %754, %753 : vector<2x16xf32>
    %756 = arith.divf %754, %755 : vector<2x16xf32>
    %757 = vector.extract_strided_slice %708 {offsets = [0, 80], sizes = [2, 16], strides = [1, 1]} : vector<2x96xf32> to vector<2x16xf32>
    %758 = vector.extract_strided_slice %712 {offsets = [0, 80], sizes = [2, 16], strides = [1, 1]} : vector<2x96xf32> to vector<2x16xf32>
    %759 = arith.mulf %748, %758 : vector<2x16xf32>
    %760 = arith.addf %757, %759 : vector<2x16xf32>
    %761 = math.tanh %760 : vector<2x16xf32>
    %cst_111 = arith.constant 1.000000e+00 : f32
    %762 = vector.broadcast %cst_111 : f32 to vector<2x16xf32>
    %763 = arith.subf %762, %756 : vector<2x16xf32>
    %764 = arith.mulf %763, %761 : vector<2x16xf32>
    %765 = arith.mulf %756, %714 : vector<2x16xf32>
    %766 = arith.addf %764, %765 : vector<2x16xf32>
    %767 = tpu.concatenate %740, %766 in 1 : vector<2x16xf32>, vector<2x16xf32> -> vector<2x32xf32>
    %768 = vector.extract_strided_slice %35 {offsets = [24, 0], sizes = [2, 96], strides = [1, 1]} : vector<32x96xf32> to vector<2x96xf32>
    %769 = vector.extract_strided_slice %35 {offsets = [6, 0], sizes = [2, 96], strides = [1, 1]} : vector<32x96xf32> to vector<2x96xf32>
    %770 = arith.truncf %767 : vector<2x32xf32> to vector<2x32xbf16>
    %cst_112 = arith.constant dense<0.000000e+00> : vector<2x96xf32>
    %771 = tpu.matmul %770, %14, %cst_112 {dimension_numbers = #tpu.dot_dimension_numbers<[1], [0], [0], [1], [0, 0, 1, 1], [], []>} : vector<2x32xbf16>, vector<32x96xbf16>, vector<2x96xf32> -> vector<2x96xf32>
    %772 = vector.broadcast %15 : vector<1x96xf32> to vector<2x96xf32>
    %773 = arith.addf %771, %772 : vector<2x96xf32>
    %774 = vector.extract_strided_slice %767 {offsets = [0, 0], sizes = [2, 16], strides = [1, 1]} : vector<2x32xf32> to vector<2x16xf32>
    %775 = vector.extract_strided_slice %767 {offsets = [0, 16], sizes = [2, 16], strides = [1, 1]} : vector<2x32xf32> to vector<2x16xf32>
    %776 = vector.extract_strided_slice %768 {offsets = [0, 0], sizes = [2, 16], strides = [1, 1]} : vector<2x96xf32> to vector<2x16xf32>
    %777 = vector.extract_strided_slice %773 {offsets = [0, 0], sizes = [2, 16], strides = [1, 1]} : vector<2x96xf32> to vector<2x16xf32>
    %778 = arith.addf %776, %777 : vector<2x16xf32>
    %779 = arith.negf %778 : vector<2x16xf32>
    %780 = math.exp %779 : vector<2x16xf32>
    %cst_113 = arith.constant 1.000000e+00 : f32
    %781 = vector.broadcast %cst_113 : f32 to vector<2x16xf32>
    %782 = arith.addf %781, %780 : vector<2x16xf32>
    %783 = arith.divf %781, %782 : vector<2x16xf32>
    %784 = vector.extract_strided_slice %768 {offsets = [0, 16], sizes = [2, 16], strides = [1, 1]} : vector<2x96xf32> to vector<2x16xf32>
    %785 = vector.extract_strided_slice %773 {offsets = [0, 16], sizes = [2, 16], strides = [1, 1]} : vector<2x96xf32> to vector<2x16xf32>
    %786 = arith.addf %784, %785 : vector<2x16xf32>
    %787 = arith.negf %786 : vector<2x16xf32>
    %788 = math.exp %787 : vector<2x16xf32>
    %cst_114 = arith.constant 1.000000e+00 : f32
    %789 = vector.broadcast %cst_114 : f32 to vector<2x16xf32>
    %790 = arith.addf %789, %788 : vector<2x16xf32>
    %791 = arith.divf %789, %790 : vector<2x16xf32>
    %792 = vector.extract_strided_slice %768 {offsets = [0, 32], sizes = [2, 16], strides = [1, 1]} : vector<2x96xf32> to vector<2x16xf32>
    %793 = vector.extract_strided_slice %773 {offsets = [0, 32], sizes = [2, 16], strides = [1, 1]} : vector<2x96xf32> to vector<2x16xf32>
    %794 = arith.mulf %783, %793 : vector<2x16xf32>
    %795 = arith.addf %792, %794 : vector<2x16xf32>
    %796 = math.tanh %795 : vector<2x16xf32>
    %cst_115 = arith.constant 1.000000e+00 : f32
    %797 = vector.broadcast %cst_115 : f32 to vector<2x16xf32>
    %798 = arith.subf %797, %791 : vector<2x16xf32>
    %799 = arith.mulf %798, %796 : vector<2x16xf32>
    %800 = arith.mulf %791, %774 : vector<2x16xf32>
    %801 = arith.addf %799, %800 : vector<2x16xf32>
    %802 = vector.extract_strided_slice %769 {offsets = [0, 48], sizes = [2, 16], strides = [1, 1]} : vector<2x96xf32> to vector<2x16xf32>
    %803 = vector.extract_strided_slice %773 {offsets = [0, 48], sizes = [2, 16], strides = [1, 1]} : vector<2x96xf32> to vector<2x16xf32>
    %804 = arith.addf %802, %803 : vector<2x16xf32>
    %805 = arith.negf %804 : vector<2x16xf32>
    %806 = math.exp %805 : vector<2x16xf32>
    %cst_116 = arith.constant 1.000000e+00 : f32
    %807 = vector.broadcast %cst_116 : f32 to vector<2x16xf32>
    %808 = arith.addf %807, %806 : vector<2x16xf32>
    %809 = arith.divf %807, %808 : vector<2x16xf32>
    %810 = vector.extract_strided_slice %769 {offsets = [0, 64], sizes = [2, 16], strides = [1, 1]} : vector<2x96xf32> to vector<2x16xf32>
    %811 = vector.extract_strided_slice %773 {offsets = [0, 64], sizes = [2, 16], strides = [1, 1]} : vector<2x96xf32> to vector<2x16xf32>
    %812 = arith.addf %810, %811 : vector<2x16xf32>
    %813 = arith.negf %812 : vector<2x16xf32>
    %814 = math.exp %813 : vector<2x16xf32>
    %cst_117 = arith.constant 1.000000e+00 : f32
    %815 = vector.broadcast %cst_117 : f32 to vector<2x16xf32>
    %816 = arith.addf %815, %814 : vector<2x16xf32>
    %817 = arith.divf %815, %816 : vector<2x16xf32>
    %818 = vector.extract_strided_slice %769 {offsets = [0, 80], sizes = [2, 16], strides = [1, 1]} : vector<2x96xf32> to vector<2x16xf32>
    %819 = vector.extract_strided_slice %773 {offsets = [0, 80], sizes = [2, 16], strides = [1, 1]} : vector<2x96xf32> to vector<2x16xf32>
    %820 = arith.mulf %809, %819 : vector<2x16xf32>
    %821 = arith.addf %818, %820 : vector<2x16xf32>
    %822 = math.tanh %821 : vector<2x16xf32>
    %cst_118 = arith.constant 1.000000e+00 : f32
    %823 = vector.broadcast %cst_118 : f32 to vector<2x16xf32>
    %824 = arith.subf %823, %817 : vector<2x16xf32>
    %825 = arith.mulf %824, %822 : vector<2x16xf32>
    %826 = arith.mulf %817, %775 : vector<2x16xf32>
    %827 = arith.addf %825, %826 : vector<2x16xf32>
    %828 = tpu.concatenate %801, %827 in 1 : vector<2x16xf32>, vector<2x16xf32> -> vector<2x32xf32>
    %829 = vector.extract_strided_slice %35 {offsets = [26, 0], sizes = [2, 96], strides = [1, 1]} : vector<32x96xf32> to vector<2x96xf32>
    %830 = vector.extract_strided_slice %35 {offsets = [4, 0], sizes = [2, 96], strides = [1, 1]} : vector<32x96xf32> to vector<2x96xf32>
    %831 = arith.truncf %828 : vector<2x32xf32> to vector<2x32xbf16>
    %cst_119 = arith.constant dense<0.000000e+00> : vector<2x96xf32>
    %832 = tpu.matmul %831, %14, %cst_119 {dimension_numbers = #tpu.dot_dimension_numbers<[1], [0], [0], [1], [0, 0, 1, 1], [], []>} : vector<2x32xbf16>, vector<32x96xbf16>, vector<2x96xf32> -> vector<2x96xf32>
    %833 = vector.broadcast %15 : vector<1x96xf32> to vector<2x96xf32>
    %834 = arith.addf %832, %833 : vector<2x96xf32>
    %835 = vector.extract_strided_slice %828 {offsets = [0, 0], sizes = [2, 16], strides = [1, 1]} : vector<2x32xf32> to vector<2x16xf32>
    %836 = vector.extract_strided_slice %828 {offsets = [0, 16], sizes = [2, 16], strides = [1, 1]} : vector<2x32xf32> to vector<2x16xf32>
    %837 = vector.extract_strided_slice %829 {offsets = [0, 0], sizes = [2, 16], strides = [1, 1]} : vector<2x96xf32> to vector<2x16xf32>
    %838 = vector.extract_strided_slice %834 {offsets = [0, 0], sizes = [2, 16], strides = [1, 1]} : vector<2x96xf32> to vector<2x16xf32>
    %839 = arith.addf %837, %838 : vector<2x16xf32>
    %840 = arith.negf %839 : vector<2x16xf32>
    %841 = math.exp %840 : vector<2x16xf32>
    %cst_120 = arith.constant 1.000000e+00 : f32
    %842 = vector.broadcast %cst_120 : f32 to vector<2x16xf32>
    %843 = arith.addf %842, %841 : vector<2x16xf32>
    %844 = arith.divf %842, %843 : vector<2x16xf32>
    %845 = vector.extract_strided_slice %829 {offsets = [0, 16], sizes = [2, 16], strides = [1, 1]} : vector<2x96xf32> to vector<2x16xf32>
    %846 = vector.extract_strided_slice %834 {offsets = [0, 16], sizes = [2, 16], strides = [1, 1]} : vector<2x96xf32> to vector<2x16xf32>
    %847 = arith.addf %845, %846 : vector<2x16xf32>
    %848 = arith.negf %847 : vector<2x16xf32>
    %849 = math.exp %848 : vector<2x16xf32>
    %cst_121 = arith.constant 1.000000e+00 : f32
    %850 = vector.broadcast %cst_121 : f32 to vector<2x16xf32>
    %851 = arith.addf %850, %849 : vector<2x16xf32>
    %852 = arith.divf %850, %851 : vector<2x16xf32>
    %853 = vector.extract_strided_slice %829 {offsets = [0, 32], sizes = [2, 16], strides = [1, 1]} : vector<2x96xf32> to vector<2x16xf32>
    %854 = vector.extract_strided_slice %834 {offsets = [0, 32], sizes = [2, 16], strides = [1, 1]} : vector<2x96xf32> to vector<2x16xf32>
    %855 = arith.mulf %844, %854 : vector<2x16xf32>
    %856 = arith.addf %853, %855 : vector<2x16xf32>
    %857 = math.tanh %856 : vector<2x16xf32>
    %cst_122 = arith.constant 1.000000e+00 : f32
    %858 = vector.broadcast %cst_122 : f32 to vector<2x16xf32>
    %859 = arith.subf %858, %852 : vector<2x16xf32>
    %860 = arith.mulf %859, %857 : vector<2x16xf32>
    %861 = arith.mulf %852, %835 : vector<2x16xf32>
    %862 = arith.addf %860, %861 : vector<2x16xf32>
    %863 = vector.extract_strided_slice %830 {offsets = [0, 48], sizes = [2, 16], strides = [1, 1]} : vector<2x96xf32> to vector<2x16xf32>
    %864 = vector.extract_strided_slice %834 {offsets = [0, 48], sizes = [2, 16], strides = [1, 1]} : vector<2x96xf32> to vector<2x16xf32>
    %865 = arith.addf %863, %864 : vector<2x16xf32>
    %866 = arith.negf %865 : vector<2x16xf32>
    %867 = math.exp %866 : vector<2x16xf32>
    %cst_123 = arith.constant 1.000000e+00 : f32
    %868 = vector.broadcast %cst_123 : f32 to vector<2x16xf32>
    %869 = arith.addf %868, %867 : vector<2x16xf32>
    %870 = arith.divf %868, %869 : vector<2x16xf32>
    %871 = vector.extract_strided_slice %830 {offsets = [0, 64], sizes = [2, 16], strides = [1, 1]} : vector<2x96xf32> to vector<2x16xf32>
    %872 = vector.extract_strided_slice %834 {offsets = [0, 64], sizes = [2, 16], strides = [1, 1]} : vector<2x96xf32> to vector<2x16xf32>
    %873 = arith.addf %871, %872 : vector<2x16xf32>
    %874 = arith.negf %873 : vector<2x16xf32>
    %875 = math.exp %874 : vector<2x16xf32>
    %cst_124 = arith.constant 1.000000e+00 : f32
    %876 = vector.broadcast %cst_124 : f32 to vector<2x16xf32>
    %877 = arith.addf %876, %875 : vector<2x16xf32>
    %878 = arith.divf %876, %877 : vector<2x16xf32>
    %879 = vector.extract_strided_slice %830 {offsets = [0, 80], sizes = [2, 16], strides = [1, 1]} : vector<2x96xf32> to vector<2x16xf32>
    %880 = vector.extract_strided_slice %834 {offsets = [0, 80], sizes = [2, 16], strides = [1, 1]} : vector<2x96xf32> to vector<2x16xf32>
    %881 = arith.mulf %870, %880 : vector<2x16xf32>
    %882 = arith.addf %879, %881 : vector<2x16xf32>
    %883 = math.tanh %882 : vector<2x16xf32>
    %cst_125 = arith.constant 1.000000e+00 : f32
    %884 = vector.broadcast %cst_125 : f32 to vector<2x16xf32>
    %885 = arith.subf %884, %878 : vector<2x16xf32>
    %886 = arith.mulf %885, %883 : vector<2x16xf32>
    %887 = arith.mulf %878, %836 : vector<2x16xf32>
    %888 = arith.addf %886, %887 : vector<2x16xf32>
    %889 = tpu.concatenate %862, %888 in 1 : vector<2x16xf32>, vector<2x16xf32> -> vector<2x32xf32>
    %890 = vector.extract_strided_slice %35 {offsets = [28, 0], sizes = [2, 96], strides = [1, 1]} : vector<32x96xf32> to vector<2x96xf32>
    %891 = vector.extract_strided_slice %35 {offsets = [2, 0], sizes = [2, 96], strides = [1, 1]} : vector<32x96xf32> to vector<2x96xf32>
    %892 = arith.truncf %889 : vector<2x32xf32> to vector<2x32xbf16>
    %cst_126 = arith.constant dense<0.000000e+00> : vector<2x96xf32>
    %893 = tpu.matmul %892, %14, %cst_126 {dimension_numbers = #tpu.dot_dimension_numbers<[1], [0], [0], [1], [0, 0, 1, 1], [], []>} : vector<2x32xbf16>, vector<32x96xbf16>, vector<2x96xf32> -> vector<2x96xf32>
    %894 = vector.broadcast %15 : vector<1x96xf32> to vector<2x96xf32>
    %895 = arith.addf %893, %894 : vector<2x96xf32>
    %896 = vector.extract_strided_slice %889 {offsets = [0, 0], sizes = [2, 16], strides = [1, 1]} : vector<2x32xf32> to vector<2x16xf32>
    %897 = vector.extract_strided_slice %889 {offsets = [0, 16], sizes = [2, 16], strides = [1, 1]} : vector<2x32xf32> to vector<2x16xf32>
    %898 = vector.extract_strided_slice %890 {offsets = [0, 0], sizes = [2, 16], strides = [1, 1]} : vector<2x96xf32> to vector<2x16xf32>
    %899 = vector.extract_strided_slice %895 {offsets = [0, 0], sizes = [2, 16], strides = [1, 1]} : vector<2x96xf32> to vector<2x16xf32>
    %900 = arith.addf %898, %899 : vector<2x16xf32>
    %901 = arith.negf %900 : vector<2x16xf32>
    %902 = math.exp %901 : vector<2x16xf32>
    %cst_127 = arith.constant 1.000000e+00 : f32
    %903 = vector.broadcast %cst_127 : f32 to vector<2x16xf32>
    %904 = arith.addf %903, %902 : vector<2x16xf32>
    %905 = arith.divf %903, %904 : vector<2x16xf32>
    %906 = vector.extract_strided_slice %890 {offsets = [0, 16], sizes = [2, 16], strides = [1, 1]} : vector<2x96xf32> to vector<2x16xf32>
    %907 = vector.extract_strided_slice %895 {offsets = [0, 16], sizes = [2, 16], strides = [1, 1]} : vector<2x96xf32> to vector<2x16xf32>
    %908 = arith.addf %906, %907 : vector<2x16xf32>
    %909 = arith.negf %908 : vector<2x16xf32>
    %910 = math.exp %909 : vector<2x16xf32>
    %cst_128 = arith.constant 1.000000e+00 : f32
    %911 = vector.broadcast %cst_128 : f32 to vector<2x16xf32>
    %912 = arith.addf %911, %910 : vector<2x16xf32>
    %913 = arith.divf %911, %912 : vector<2x16xf32>
    %914 = vector.extract_strided_slice %890 {offsets = [0, 32], sizes = [2, 16], strides = [1, 1]} : vector<2x96xf32> to vector<2x16xf32>
    %915 = vector.extract_strided_slice %895 {offsets = [0, 32], sizes = [2, 16], strides = [1, 1]} : vector<2x96xf32> to vector<2x16xf32>
    %916 = arith.mulf %905, %915 : vector<2x16xf32>
    %917 = arith.addf %914, %916 : vector<2x16xf32>
    %918 = math.tanh %917 : vector<2x16xf32>
    %cst_129 = arith.constant 1.000000e+00 : f32
    %919 = vector.broadcast %cst_129 : f32 to vector<2x16xf32>
    %920 = arith.subf %919, %913 : vector<2x16xf32>
    %921 = arith.mulf %920, %918 : vector<2x16xf32>
    %922 = arith.mulf %913, %896 : vector<2x16xf32>
    %923 = arith.addf %921, %922 : vector<2x16xf32>
    %924 = vector.extract_strided_slice %891 {offsets = [0, 48], sizes = [2, 16], strides = [1, 1]} : vector<2x96xf32> to vector<2x16xf32>
    %925 = vector.extract_strided_slice %895 {offsets = [0, 48], sizes = [2, 16], strides = [1, 1]} : vector<2x96xf32> to vector<2x16xf32>
    %926 = arith.addf %924, %925 : vector<2x16xf32>
    %927 = arith.negf %926 : vector<2x16xf32>
    %928 = math.exp %927 : vector<2x16xf32>
    %cst_130 = arith.constant 1.000000e+00 : f32
    %929 = vector.broadcast %cst_130 : f32 to vector<2x16xf32>
    %930 = arith.addf %929, %928 : vector<2x16xf32>
    %931 = arith.divf %929, %930 : vector<2x16xf32>
    %932 = vector.extract_strided_slice %891 {offsets = [0, 64], sizes = [2, 16], strides = [1, 1]} : vector<2x96xf32> to vector<2x16xf32>
    %933 = vector.extract_strided_slice %895 {offsets = [0, 64], sizes = [2, 16], strides = [1, 1]} : vector<2x96xf32> to vector<2x16xf32>
    %934 = arith.addf %932, %933 : vector<2x16xf32>
    %935 = arith.negf %934 : vector<2x16xf32>
    %936 = math.exp %935 : vector<2x16xf32>
    %cst_131 = arith.constant 1.000000e+00 : f32
    %937 = vector.broadcast %cst_131 : f32 to vector<2x16xf32>
    %938 = arith.addf %937, %936 : vector<2x16xf32>
    %939 = arith.divf %937, %938 : vector<2x16xf32>
    %940 = vector.extract_strided_slice %891 {offsets = [0, 80], sizes = [2, 16], strides = [1, 1]} : vector<2x96xf32> to vector<2x16xf32>
    %941 = vector.extract_strided_slice %895 {offsets = [0, 80], sizes = [2, 16], strides = [1, 1]} : vector<2x96xf32> to vector<2x16xf32>
    %942 = arith.mulf %931, %941 : vector<2x16xf32>
    %943 = arith.addf %940, %942 : vector<2x16xf32>
    %944 = math.tanh %943 : vector<2x16xf32>
    %cst_132 = arith.constant 1.000000e+00 : f32
    %945 = vector.broadcast %cst_132 : f32 to vector<2x16xf32>
    %946 = arith.subf %945, %939 : vector<2x16xf32>
    %947 = arith.mulf %946, %944 : vector<2x16xf32>
    %948 = arith.mulf %939, %897 : vector<2x16xf32>
    %949 = arith.addf %947, %948 : vector<2x16xf32>
    %950 = tpu.concatenate %923, %949 in 1 : vector<2x16xf32>, vector<2x16xf32> -> vector<2x32xf32>
    %951 = vector.extract_strided_slice %35 {offsets = [30, 0], sizes = [2, 96], strides = [1, 1]} : vector<32x96xf32> to vector<2x96xf32>
    %952 = vector.extract_strided_slice %35 {offsets = [0, 0], sizes = [2, 96], strides = [1, 1]} : vector<32x96xf32> to vector<2x96xf32>
    %953 = arith.truncf %950 : vector<2x32xf32> to vector<2x32xbf16>
    %cst_133 = arith.constant dense<0.000000e+00> : vector<2x96xf32>
    %954 = tpu.matmul %953, %14, %cst_133 {dimension_numbers = #tpu.dot_dimension_numbers<[1], [0], [0], [1], [0, 0, 1, 1], [], []>} : vector<2x32xbf16>, vector<32x96xbf16>, vector<2x96xf32> -> vector<2x96xf32>
    %955 = vector.broadcast %15 : vector<1x96xf32> to vector<2x96xf32>
    %956 = arith.addf %954, %955 : vector<2x96xf32>
    %957 = vector.extract_strided_slice %950 {offsets = [0, 0], sizes = [2, 16], strides = [1, 1]} : vector<2x32xf32> to vector<2x16xf32>
    %958 = vector.extract_strided_slice %950 {offsets = [0, 16], sizes = [2, 16], strides = [1, 1]} : vector<2x32xf32> to vector<2x16xf32>
    %959 = vector.extract_strided_slice %951 {offsets = [0, 0], sizes = [2, 16], strides = [1, 1]} : vector<2x96xf32> to vector<2x16xf32>
    %960 = vector.extract_strided_slice %956 {offsets = [0, 0], sizes = [2, 16], strides = [1, 1]} : vector<2x96xf32> to vector<2x16xf32>
    %961 = arith.addf %959, %960 : vector<2x16xf32>
    %962 = arith.negf %961 : vector<2x16xf32>
    %963 = math.exp %962 : vector<2x16xf32>
    %cst_134 = arith.constant 1.000000e+00 : f32
    %964 = vector.broadcast %cst_134 : f32 to vector<2x16xf32>
    %965 = arith.addf %964, %963 : vector<2x16xf32>
    %966 = arith.divf %964, %965 : vector<2x16xf32>
    %967 = vector.extract_strided_slice %951 {offsets = [0, 16], sizes = [2, 16], strides = [1, 1]} : vector<2x96xf32> to vector<2x16xf32>
    %968 = vector.extract_strided_slice %956 {offsets = [0, 16], sizes = [2, 16], strides = [1, 1]} : vector<2x96xf32> to vector<2x16xf32>
    %969 = arith.addf %967, %968 : vector<2x16xf32>
    %970 = arith.negf %969 : vector<2x16xf32>
    %971 = math.exp %970 : vector<2x16xf32>
    %cst_135 = arith.constant 1.000000e+00 : f32
    %972 = vector.broadcast %cst_135 : f32 to vector<2x16xf32>
    %973 = arith.addf %972, %971 : vector<2x16xf32>
    %974 = arith.divf %972, %973 : vector<2x16xf32>
    %975 = vector.extract_strided_slice %951 {offsets = [0, 32], sizes = [2, 16], strides = [1, 1]} : vector<2x96xf32> to vector<2x16xf32>
    %976 = vector.extract_strided_slice %956 {offsets = [0, 32], sizes = [2, 16], strides = [1, 1]} : vector<2x96xf32> to vector<2x16xf32>
    %977 = arith.mulf %966, %976 : vector<2x16xf32>
    %978 = arith.addf %975, %977 : vector<2x16xf32>
    %979 = math.tanh %978 : vector<2x16xf32>
    %cst_136 = arith.constant 1.000000e+00 : f32
    %980 = vector.broadcast %cst_136 : f32 to vector<2x16xf32>
    %981 = arith.subf %980, %974 : vector<2x16xf32>
    %982 = arith.mulf %981, %979 : vector<2x16xf32>
    %983 = arith.mulf %974, %957 : vector<2x16xf32>
    %984 = arith.addf %982, %983 : vector<2x16xf32>
    %985 = vector.extract_strided_slice %952 {offsets = [0, 48], sizes = [2, 16], strides = [1, 1]} : vector<2x96xf32> to vector<2x16xf32>
    %986 = vector.extract_strided_slice %956 {offsets = [0, 48], sizes = [2, 16], strides = [1, 1]} : vector<2x96xf32> to vector<2x16xf32>
    %987 = arith.addf %985, %986 : vector<2x16xf32>
    %988 = arith.negf %987 : vector<2x16xf32>
    %989 = math.exp %988 : vector<2x16xf32>
    %cst_137 = arith.constant 1.000000e+00 : f32
    %990 = vector.broadcast %cst_137 : f32 to vector<2x16xf32>
    %991 = arith.addf %990, %989 : vector<2x16xf32>
    %992 = arith.divf %990, %991 : vector<2x16xf32>
    %993 = vector.extract_strided_slice %952 {offsets = [0, 64], sizes = [2, 16], strides = [1, 1]} : vector<2x96xf32> to vector<2x16xf32>
    %994 = vector.extract_strided_slice %956 {offsets = [0, 64], sizes = [2, 16], strides = [1, 1]} : vector<2x96xf32> to vector<2x16xf32>
    %995 = arith.addf %993, %994 : vector<2x16xf32>
    %996 = arith.negf %995 : vector<2x16xf32>
    %997 = math.exp %996 : vector<2x16xf32>
    %cst_138 = arith.constant 1.000000e+00 : f32
    %998 = vector.broadcast %cst_138 : f32 to vector<2x16xf32>
    %999 = arith.addf %998, %997 : vector<2x16xf32>
    %1000 = arith.divf %998, %999 : vector<2x16xf32>
    %1001 = vector.extract_strided_slice %952 {offsets = [0, 80], sizes = [2, 16], strides = [1, 1]} : vector<2x96xf32> to vector<2x16xf32>
    %1002 = vector.extract_strided_slice %956 {offsets = [0, 80], sizes = [2, 16], strides = [1, 1]} : vector<2x96xf32> to vector<2x16xf32>
    %1003 = arith.mulf %992, %1002 : vector<2x16xf32>
    %1004 = arith.addf %1001, %1003 : vector<2x16xf32>
    %1005 = math.tanh %1004 : vector<2x16xf32>
    %cst_139 = arith.constant 1.000000e+00 : f32
    %1006 = vector.broadcast %cst_139 : f32 to vector<2x16xf32>
    %1007 = arith.subf %1006, %1000 : vector<2x16xf32>
    %1008 = arith.mulf %1007, %1005 : vector<2x16xf32>
    %1009 = arith.mulf %1000, %958 : vector<2x16xf32>
    %1010 = arith.addf %1008, %1009 : vector<2x16xf32>
    %1011 = tpu.concatenate %69, %130, %191, %252, %313, %374, %435, %496, %557, %618, %679, %740, %801, %862, %923, %984 in 0 : vector<2x16xf32>, vector<2x16xf32>, vector<2x16xf32>, vector<2x16xf32>, vector<2x16xf32>, vector<2x16xf32>, vector<2x16xf32>, vector<2x16xf32>, vector<2x16xf32>, vector<2x16xf32>, vector<2x16xf32>, vector<2x16xf32>, vector<2x16xf32>, vector<2x16xf32>, vector<2x16xf32>, vector<2x16xf32> -> vector<32x16xf32>
    %1012 = tpu.concatenate %1010, %949, %888, %827, %766, %705, %644, %583, %522, %461, %400, %339, %278, %217, %156, %95 in 0 : vector<2x16xf32>, vector<2x16xf32>, vector<2x16xf32>, vector<2x16xf32>, vector<2x16xf32>, vector<2x16xf32>, vector<2x16xf32>, vector<2x16xf32>, vector<2x16xf32>, vector<2x16xf32>, vector<2x16xf32>, vector<2x16xf32>, vector<2x16xf32>, vector<2x16xf32>, vector<2x16xf32>, vector<2x16xf32> -> vector<32x16xf32>
    %1013 = tpu.concatenate %1011, %1012 in 1 : vector<32x16xf32>, vector<32x16xf32> -> vector<32x32xf32>
    %1014 = vector.broadcast %16 : vector<1x32xf32> to vector<32x32xf32>
    %1015 = arith.mulf %1013, %1014 : vector<32x32xf32>
    %1016 = vector.broadcast %17 : vector<1x32xf32> to vector<32x32xf32>
    %1017 = arith.addf %1015, %1016 : vector<32x32xf32>
    %1018 = math.tanh %1017 : vector<32x32xf32>
    %c0_140 = arith.constant 0 : index
    %c0_141 = arith.constant 0 : index
    %1019 = vector.load %arg12[%c0_140, %c0_141] : memref<160x32xbf16, #tpu.memory_space<vmem>>, vector<160x32xbf16>
    %c0_142 = arith.constant 0 : index
    %c0_143 = arith.constant 0 : index
    %1020 = vector.load %arg13[%c0_142, %c0_143] : memref<1x32xf32, #tpu.memory_space<vmem>>, vector<1x32xf32>
    %c0_144 = arith.constant 0 : index
    %c0_145 = arith.constant 0 : index
    %1021 = vector.load %arg14[%c0_144, %c0_145] : memref<32x96xbf16, #tpu.memory_space<vmem>>, vector<32x96xbf16>
    %c0_146 = arith.constant 0 : index
    %c0_147 = arith.constant 0 : index
    %1022 = vector.load %arg15[%c0_146, %c0_147] : memref<1x96xf32, #tpu.memory_space<vmem>>, vector<1x96xf32>
    %c0_148 = arith.constant 0 : index
    %c0_149 = arith.constant 0 : index
    %1023 = vector.load %arg16[%c0_148, %c0_149] : memref<32x96xbf16, #tpu.memory_space<vmem>>, vector<32x96xbf16>
    %c0_150 = arith.constant 0 : index
    %c0_151 = arith.constant 0 : index
    %1024 = vector.load %arg17[%c0_150, %c0_151] : memref<1x96xf32, #tpu.memory_space<vmem>>, vector<1x96xf32>
    %c0_152 = arith.constant 0 : index
    %c0_153 = arith.constant 0 : index
    %1025 = vector.load %arg18[%c0_152, %c0_153] : memref<1x32xf32, #tpu.memory_space<vmem>>, vector<1x32xf32>
    %c0_154 = arith.constant 0 : index
    %c0_155 = arith.constant 0 : index
    %1026 = vector.load %arg19[%c0_154, %c0_155] : memref<1x32xf32, #tpu.memory_space<vmem>>, vector<1x32xf32>
    %cst_156 = arith.constant 0.000000e+00 : f32
    %1027 = vector.broadcast %cst_156 : f32 to vector<4x32xf32>
    %1028 = tpu.concatenate %1027, %1018, %1027 in 0 : vector<4x32xf32>, vector<32x32xf32>, vector<4x32xf32> -> vector<40x32xf32>
    %1029 = vector.extract_strided_slice %1028 {offsets = [0, 0], sizes = [32, 32], strides = [1, 1]} : vector<40x32xf32> to vector<32x32xf32>
    %1030 = vector.extract_strided_slice %1028 {offsets = [2, 0], sizes = [32, 32], strides = [1, 1]} : vector<40x32xf32> to vector<32x32xf32>
    %1031 = vector.extract_strided_slice %1028 {offsets = [4, 0], sizes = [32, 32], strides = [1, 1]} : vector<40x32xf32> to vector<32x32xf32>
    %1032 = vector.extract_strided_slice %1028 {offsets = [6, 0], sizes = [32, 32], strides = [1, 1]} : vector<40x32xf32> to vector<32x32xf32>
    %1033 = vector.extract_strided_slice %1028 {offsets = [8, 0], sizes = [32, 32], strides = [1, 1]} : vector<40x32xf32> to vector<32x32xf32>
    %1034 = tpu.concatenate %1029, %1030, %1031, %1032, %1033 in 1 : vector<32x32xf32>, vector<32x32xf32>, vector<32x32xf32>, vector<32x32xf32>, vector<32x32xf32> -> vector<32x160xf32>
    %1035 = arith.truncf %1034 : vector<32x160xf32> to vector<32x160xbf16>
    %cst_157 = arith.constant dense<0.000000e+00> : vector<32x32xf32>
    %1036 = tpu.matmul %1035, %1019, %cst_157 {dimension_numbers = #tpu.dot_dimension_numbers<[1], [0], [0], [1], [0, 0, 1, 1], [], []>} : vector<32x160xbf16>, vector<160x32xbf16>, vector<32x32xf32> -> vector<32x32xf32>
    %1037 = vector.broadcast %1020 : vector<1x32xf32> to vector<32x32xf32>
    %1038 = arith.addf %1036, %1037 : vector<32x32xf32>
    %cst_158 = arith.constant 0.000000e+00 : f32
    %1039 = vector.broadcast %cst_158 : f32 to vector<32x32xf32>
    %1040 = arith.maximumf %1038, %1039 : vector<32x32xf32>
    %1041 = arith.truncf %1040 : vector<32x32xf32> to vector<32x32xbf16>
    %cst_159 = arith.constant dense<0.000000e+00> : vector<32x96xf32>
    %1042 = tpu.matmul %1041, %1021, %cst_159 {dimension_numbers = #tpu.dot_dimension_numbers<[1], [0], [0], [1], [0, 0, 1, 1], [], []>} : vector<32x32xbf16>, vector<32x96xbf16>, vector<32x96xf32> -> vector<32x96xf32>
    %1043 = vector.broadcast %1022 : vector<1x96xf32> to vector<32x96xf32>
    %1044 = arith.addf %1042, %1043 : vector<32x96xf32>
    %1045 = vector.extract_strided_slice %1044 {offsets = [0, 0], sizes = [2, 96], strides = [1, 1]} : vector<32x96xf32> to vector<2x96xf32>
    %1046 = vector.extract_strided_slice %1044 {offsets = [30, 0], sizes = [2, 96], strides = [1, 1]} : vector<32x96xf32> to vector<2x96xf32>
    %1047 = arith.truncf %9 : vector<2x32xf32> to vector<2x32xbf16>
    %cst_160 = arith.constant dense<0.000000e+00> : vector<2x96xf32>
    %1048 = tpu.matmul %1047, %1023, %cst_160 {dimension_numbers = #tpu.dot_dimension_numbers<[1], [0], [0], [1], [0, 0, 1, 1], [], []>} : vector<2x32xbf16>, vector<32x96xbf16>, vector<2x96xf32> -> vector<2x96xf32>
    %1049 = vector.broadcast %1024 : vector<1x96xf32> to vector<2x96xf32>
    %1050 = arith.addf %1048, %1049 : vector<2x96xf32>
    %1051 = vector.extract_strided_slice %9 {offsets = [0, 0], sizes = [2, 16], strides = [1, 1]} : vector<2x32xf32> to vector<2x16xf32>
    %1052 = vector.extract_strided_slice %9 {offsets = [0, 16], sizes = [2, 16], strides = [1, 1]} : vector<2x32xf32> to vector<2x16xf32>
    %1053 = vector.extract_strided_slice %1045 {offsets = [0, 0], sizes = [2, 16], strides = [1, 1]} : vector<2x96xf32> to vector<2x16xf32>
    %1054 = vector.extract_strided_slice %1050 {offsets = [0, 0], sizes = [2, 16], strides = [1, 1]} : vector<2x96xf32> to vector<2x16xf32>
    %1055 = arith.addf %1053, %1054 : vector<2x16xf32>
    %1056 = arith.negf %1055 : vector<2x16xf32>
    %1057 = math.exp %1056 : vector<2x16xf32>
    %cst_161 = arith.constant 1.000000e+00 : f32
    %1058 = vector.broadcast %cst_161 : f32 to vector<2x16xf32>
    %1059 = arith.addf %1058, %1057 : vector<2x16xf32>
    %1060 = arith.divf %1058, %1059 : vector<2x16xf32>
    %1061 = vector.extract_strided_slice %1045 {offsets = [0, 16], sizes = [2, 16], strides = [1, 1]} : vector<2x96xf32> to vector<2x16xf32>
    %1062 = vector.extract_strided_slice %1050 {offsets = [0, 16], sizes = [2, 16], strides = [1, 1]} : vector<2x96xf32> to vector<2x16xf32>
    %1063 = arith.addf %1061, %1062 : vector<2x16xf32>
    %1064 = arith.negf %1063 : vector<2x16xf32>
    %1065 = math.exp %1064 : vector<2x16xf32>
    %cst_162 = arith.constant 1.000000e+00 : f32
    %1066 = vector.broadcast %cst_162 : f32 to vector<2x16xf32>
    %1067 = arith.addf %1066, %1065 : vector<2x16xf32>
    %1068 = arith.divf %1066, %1067 : vector<2x16xf32>
    %1069 = vector.extract_strided_slice %1045 {offsets = [0, 32], sizes = [2, 16], strides = [1, 1]} : vector<2x96xf32> to vector<2x16xf32>
    %1070 = vector.extract_strided_slice %1050 {offsets = [0, 32], sizes = [2, 16], strides = [1, 1]} : vector<2x96xf32> to vector<2x16xf32>
    %1071 = arith.mulf %1060, %1070 : vector<2x16xf32>
    %1072 = arith.addf %1069, %1071 : vector<2x16xf32>
    %1073 = math.tanh %1072 : vector<2x16xf32>
    %cst_163 = arith.constant 1.000000e+00 : f32
    %1074 = vector.broadcast %cst_163 : f32 to vector<2x16xf32>
    %1075 = arith.subf %1074, %1068 : vector<2x16xf32>
    %1076 = arith.mulf %1075, %1073 : vector<2x16xf32>
    %1077 = arith.mulf %1068, %1051 : vector<2x16xf32>
    %1078 = arith.addf %1076, %1077 : vector<2x16xf32>
    %1079 = vector.extract_strided_slice %1046 {offsets = [0, 48], sizes = [2, 16], strides = [1, 1]} : vector<2x96xf32> to vector<2x16xf32>
    %1080 = vector.extract_strided_slice %1050 {offsets = [0, 48], sizes = [2, 16], strides = [1, 1]} : vector<2x96xf32> to vector<2x16xf32>
    %1081 = arith.addf %1079, %1080 : vector<2x16xf32>
    %1082 = arith.negf %1081 : vector<2x16xf32>
    %1083 = math.exp %1082 : vector<2x16xf32>
    %cst_164 = arith.constant 1.000000e+00 : f32
    %1084 = vector.broadcast %cst_164 : f32 to vector<2x16xf32>
    %1085 = arith.addf %1084, %1083 : vector<2x16xf32>
    %1086 = arith.divf %1084, %1085 : vector<2x16xf32>
    %1087 = vector.extract_strided_slice %1046 {offsets = [0, 64], sizes = [2, 16], strides = [1, 1]} : vector<2x96xf32> to vector<2x16xf32>
    %1088 = vector.extract_strided_slice %1050 {offsets = [0, 64], sizes = [2, 16], strides = [1, 1]} : vector<2x96xf32> to vector<2x16xf32>
    %1089 = arith.addf %1087, %1088 : vector<2x16xf32>
    %1090 = arith.negf %1089 : vector<2x16xf32>
    %1091 = math.exp %1090 : vector<2x16xf32>
    %cst_165 = arith.constant 1.000000e+00 : f32
    %1092 = vector.broadcast %cst_165 : f32 to vector<2x16xf32>
    %1093 = arith.addf %1092, %1091 : vector<2x16xf32>
    %1094 = arith.divf %1092, %1093 : vector<2x16xf32>
    %1095 = vector.extract_strided_slice %1046 {offsets = [0, 80], sizes = [2, 16], strides = [1, 1]} : vector<2x96xf32> to vector<2x16xf32>
    %1096 = vector.extract_strided_slice %1050 {offsets = [0, 80], sizes = [2, 16], strides = [1, 1]} : vector<2x96xf32> to vector<2x16xf32>
    %1097 = arith.mulf %1086, %1096 : vector<2x16xf32>
    %1098 = arith.addf %1095, %1097 : vector<2x16xf32>
    %1099 = math.tanh %1098 : vector<2x16xf32>
    %cst_166 = arith.constant 1.000000e+00 : f32
    %1100 = vector.broadcast %cst_166 : f32 to vector<2x16xf32>
    %1101 = arith.subf %1100, %1094 : vector<2x16xf32>
    %1102 = arith.mulf %1101, %1099 : vector<2x16xf32>
    %1103 = arith.mulf %1094, %1052 : vector<2x16xf32>
    %1104 = arith.addf %1102, %1103 : vector<2x16xf32>
    %1105 = tpu.concatenate %1078, %1104 in 1 : vector<2x16xf32>, vector<2x16xf32> -> vector<2x32xf32>
    %1106 = vector.extract_strided_slice %1044 {offsets = [2, 0], sizes = [2, 96], strides = [1, 1]} : vector<32x96xf32> to vector<2x96xf32>
    %1107 = vector.extract_strided_slice %1044 {offsets = [28, 0], sizes = [2, 96], strides = [1, 1]} : vector<32x96xf32> to vector<2x96xf32>
    %1108 = arith.truncf %1105 : vector<2x32xf32> to vector<2x32xbf16>
    %cst_167 = arith.constant dense<0.000000e+00> : vector<2x96xf32>
    %1109 = tpu.matmul %1108, %1023, %cst_167 {dimension_numbers = #tpu.dot_dimension_numbers<[1], [0], [0], [1], [0, 0, 1, 1], [], []>} : vector<2x32xbf16>, vector<32x96xbf16>, vector<2x96xf32> -> vector<2x96xf32>
    %1110 = vector.broadcast %1024 : vector<1x96xf32> to vector<2x96xf32>
    %1111 = arith.addf %1109, %1110 : vector<2x96xf32>
    %1112 = vector.extract_strided_slice %1105 {offsets = [0, 0], sizes = [2, 16], strides = [1, 1]} : vector<2x32xf32> to vector<2x16xf32>
    %1113 = vector.extract_strided_slice %1105 {offsets = [0, 16], sizes = [2, 16], strides = [1, 1]} : vector<2x32xf32> to vector<2x16xf32>
    %1114 = vector.extract_strided_slice %1106 {offsets = [0, 0], sizes = [2, 16], strides = [1, 1]} : vector<2x96xf32> to vector<2x16xf32>
    %1115 = vector.extract_strided_slice %1111 {offsets = [0, 0], sizes = [2, 16], strides = [1, 1]} : vector<2x96xf32> to vector<2x16xf32>
    %1116 = arith.addf %1114, %1115 : vector<2x16xf32>
    %1117 = arith.negf %1116 : vector<2x16xf32>
    %1118 = math.exp %1117 : vector<2x16xf32>
    %cst_168 = arith.constant 1.000000e+00 : f32
    %1119 = vector.broadcast %cst_168 : f32 to vector<2x16xf32>
    %1120 = arith.addf %1119, %1118 : vector<2x16xf32>
    %1121 = arith.divf %1119, %1120 : vector<2x16xf32>
    %1122 = vector.extract_strided_slice %1106 {offsets = [0, 16], sizes = [2, 16], strides = [1, 1]} : vector<2x96xf32> to vector<2x16xf32>
    %1123 = vector.extract_strided_slice %1111 {offsets = [0, 16], sizes = [2, 16], strides = [1, 1]} : vector<2x96xf32> to vector<2x16xf32>
    %1124 = arith.addf %1122, %1123 : vector<2x16xf32>
    %1125 = arith.negf %1124 : vector<2x16xf32>
    %1126 = math.exp %1125 : vector<2x16xf32>
    %cst_169 = arith.constant 1.000000e+00 : f32
    %1127 = vector.broadcast %cst_169 : f32 to vector<2x16xf32>
    %1128 = arith.addf %1127, %1126 : vector<2x16xf32>
    %1129 = arith.divf %1127, %1128 : vector<2x16xf32>
    %1130 = vector.extract_strided_slice %1106 {offsets = [0, 32], sizes = [2, 16], strides = [1, 1]} : vector<2x96xf32> to vector<2x16xf32>
    %1131 = vector.extract_strided_slice %1111 {offsets = [0, 32], sizes = [2, 16], strides = [1, 1]} : vector<2x96xf32> to vector<2x16xf32>
    %1132 = arith.mulf %1121, %1131 : vector<2x16xf32>
    %1133 = arith.addf %1130, %1132 : vector<2x16xf32>
    %1134 = math.tanh %1133 : vector<2x16xf32>
    %cst_170 = arith.constant 1.000000e+00 : f32
    %1135 = vector.broadcast %cst_170 : f32 to vector<2x16xf32>
    %1136 = arith.subf %1135, %1129 : vector<2x16xf32>
    %1137 = arith.mulf %1136, %1134 : vector<2x16xf32>
    %1138 = arith.mulf %1129, %1112 : vector<2x16xf32>
    %1139 = arith.addf %1137, %1138 : vector<2x16xf32>
    %1140 = vector.extract_strided_slice %1107 {offsets = [0, 48], sizes = [2, 16], strides = [1, 1]} : vector<2x96xf32> to vector<2x16xf32>
    %1141 = vector.extract_strided_slice %1111 {offsets = [0, 48], sizes = [2, 16], strides = [1, 1]} : vector<2x96xf32> to vector<2x16xf32>
    %1142 = arith.addf %1140, %1141 : vector<2x16xf32>
    %1143 = arith.negf %1142 : vector<2x16xf32>
    %1144 = math.exp %1143 : vector<2x16xf32>
    %cst_171 = arith.constant 1.000000e+00 : f32
    %1145 = vector.broadcast %cst_171 : f32 to vector<2x16xf32>
    %1146 = arith.addf %1145, %1144 : vector<2x16xf32>
    %1147 = arith.divf %1145, %1146 : vector<2x16xf32>
    %1148 = vector.extract_strided_slice %1107 {offsets = [0, 64], sizes = [2, 16], strides = [1, 1]} : vector<2x96xf32> to vector<2x16xf32>
    %1149 = vector.extract_strided_slice %1111 {offsets = [0, 64], sizes = [2, 16], strides = [1, 1]} : vector<2x96xf32> to vector<2x16xf32>
    %1150 = arith.addf %1148, %1149 : vector<2x16xf32>
    %1151 = arith.negf %1150 : vector<2x16xf32>
    %1152 = math.exp %1151 : vector<2x16xf32>
    %cst_172 = arith.constant 1.000000e+00 : f32
    %1153 = vector.broadcast %cst_172 : f32 to vector<2x16xf32>
    %1154 = arith.addf %1153, %1152 : vector<2x16xf32>
    %1155 = arith.divf %1153, %1154 : vector<2x16xf32>
    %1156 = vector.extract_strided_slice %1107 {offsets = [0, 80], sizes = [2, 16], strides = [1, 1]} : vector<2x96xf32> to vector<2x16xf32>
    %1157 = vector.extract_strided_slice %1111 {offsets = [0, 80], sizes = [2, 16], strides = [1, 1]} : vector<2x96xf32> to vector<2x16xf32>
    %1158 = arith.mulf %1147, %1157 : vector<2x16xf32>
    %1159 = arith.addf %1156, %1158 : vector<2x16xf32>
    %1160 = math.tanh %1159 : vector<2x16xf32>
    %cst_173 = arith.constant 1.000000e+00 : f32
    %1161 = vector.broadcast %cst_173 : f32 to vector<2x16xf32>
    %1162 = arith.subf %1161, %1155 : vector<2x16xf32>
    %1163 = arith.mulf %1162, %1160 : vector<2x16xf32>
    %1164 = arith.mulf %1155, %1113 : vector<2x16xf32>
    %1165 = arith.addf %1163, %1164 : vector<2x16xf32>
    %1166 = tpu.concatenate %1139, %1165 in 1 : vector<2x16xf32>, vector<2x16xf32> -> vector<2x32xf32>
    %1167 = vector.extract_strided_slice %1044 {offsets = [4, 0], sizes = [2, 96], strides = [1, 1]} : vector<32x96xf32> to vector<2x96xf32>
    %1168 = vector.extract_strided_slice %1044 {offsets = [26, 0], sizes = [2, 96], strides = [1, 1]} : vector<32x96xf32> to vector<2x96xf32>
    %1169 = arith.truncf %1166 : vector<2x32xf32> to vector<2x32xbf16>
    %cst_174 = arith.constant dense<0.000000e+00> : vector<2x96xf32>
    %1170 = tpu.matmul %1169, %1023, %cst_174 {dimension_numbers = #tpu.dot_dimension_numbers<[1], [0], [0], [1], [0, 0, 1, 1], [], []>} : vector<2x32xbf16>, vector<32x96xbf16>, vector<2x96xf32> -> vector<2x96xf32>
    %1171 = vector.broadcast %1024 : vector<1x96xf32> to vector<2x96xf32>
    %1172 = arith.addf %1170, %1171 : vector<2x96xf32>
    %1173 = vector.extract_strided_slice %1166 {offsets = [0, 0], sizes = [2, 16], strides = [1, 1]} : vector<2x32xf32> to vector<2x16xf32>
    %1174 = vector.extract_strided_slice %1166 {offsets = [0, 16], sizes = [2, 16], strides = [1, 1]} : vector<2x32xf32> to vector<2x16xf32>
    %1175 = vector.extract_strided_slice %1167 {offsets = [0, 0], sizes = [2, 16], strides = [1, 1]} : vector<2x96xf32> to vector<2x16xf32>
    %1176 = vector.extract_strided_slice %1172 {offsets = [0, 0], sizes = [2, 16], strides = [1, 1]} : vector<2x96xf32> to vector<2x16xf32>
    %1177 = arith.addf %1175, %1176 : vector<2x16xf32>
    %1178 = arith.negf %1177 : vector<2x16xf32>
    %1179 = math.exp %1178 : vector<2x16xf32>
    %cst_175 = arith.constant 1.000000e+00 : f32
    %1180 = vector.broadcast %cst_175 : f32 to vector<2x16xf32>
    %1181 = arith.addf %1180, %1179 : vector<2x16xf32>
    %1182 = arith.divf %1180, %1181 : vector<2x16xf32>
    %1183 = vector.extract_strided_slice %1167 {offsets = [0, 16], sizes = [2, 16], strides = [1, 1]} : vector<2x96xf32> to vector<2x16xf32>
    %1184 = vector.extract_strided_slice %1172 {offsets = [0, 16], sizes = [2, 16], strides = [1, 1]} : vector<2x96xf32> to vector<2x16xf32>
    %1185 = arith.addf %1183, %1184 : vector<2x16xf32>
    %1186 = arith.negf %1185 : vector<2x16xf32>
    %1187 = math.exp %1186 : vector<2x16xf32>
    %cst_176 = arith.constant 1.000000e+00 : f32
    %1188 = vector.broadcast %cst_176 : f32 to vector<2x16xf32>
    %1189 = arith.addf %1188, %1187 : vector<2x16xf32>
    %1190 = arith.divf %1188, %1189 : vector<2x16xf32>
    %1191 = vector.extract_strided_slice %1167 {offsets = [0, 32], sizes = [2, 16], strides = [1, 1]} : vector<2x96xf32> to vector<2x16xf32>
    %1192 = vector.extract_strided_slice %1172 {offsets = [0, 32], sizes = [2, 16], strides = [1, 1]} : vector<2x96xf32> to vector<2x16xf32>
    %1193 = arith.mulf %1182, %1192 : vector<2x16xf32>
    %1194 = arith.addf %1191, %1193 : vector<2x16xf32>
    %1195 = math.tanh %1194 : vector<2x16xf32>
    %cst_177 = arith.constant 1.000000e+00 : f32
    %1196 = vector.broadcast %cst_177 : f32 to vector<2x16xf32>
    %1197 = arith.subf %1196, %1190 : vector<2x16xf32>
    %1198 = arith.mulf %1197, %1195 : vector<2x16xf32>
    %1199 = arith.mulf %1190, %1173 : vector<2x16xf32>
    %1200 = arith.addf %1198, %1199 : vector<2x16xf32>
    %1201 = vector.extract_strided_slice %1168 {offsets = [0, 48], sizes = [2, 16], strides = [1, 1]} : vector<2x96xf32> to vector<2x16xf32>
    %1202 = vector.extract_strided_slice %1172 {offsets = [0, 48], sizes = [2, 16], strides = [1, 1]} : vector<2x96xf32> to vector<2x16xf32>
    %1203 = arith.addf %1201, %1202 : vector<2x16xf32>
    %1204 = arith.negf %1203 : vector<2x16xf32>
    %1205 = math.exp %1204 : vector<2x16xf32>
    %cst_178 = arith.constant 1.000000e+00 : f32
    %1206 = vector.broadcast %cst_178 : f32 to vector<2x16xf32>
    %1207 = arith.addf %1206, %1205 : vector<2x16xf32>
    %1208 = arith.divf %1206, %1207 : vector<2x16xf32>
    %1209 = vector.extract_strided_slice %1168 {offsets = [0, 64], sizes = [2, 16], strides = [1, 1]} : vector<2x96xf32> to vector<2x16xf32>
    %1210 = vector.extract_strided_slice %1172 {offsets = [0, 64], sizes = [2, 16], strides = [1, 1]} : vector<2x96xf32> to vector<2x16xf32>
    %1211 = arith.addf %1209, %1210 : vector<2x16xf32>
    %1212 = arith.negf %1211 : vector<2x16xf32>
    %1213 = math.exp %1212 : vector<2x16xf32>
    %cst_179 = arith.constant 1.000000e+00 : f32
    %1214 = vector.broadcast %cst_179 : f32 to vector<2x16xf32>
    %1215 = arith.addf %1214, %1213 : vector<2x16xf32>
    %1216 = arith.divf %1214, %1215 : vector<2x16xf32>
    %1217 = vector.extract_strided_slice %1168 {offsets = [0, 80], sizes = [2, 16], strides = [1, 1]} : vector<2x96xf32> to vector<2x16xf32>
    %1218 = vector.extract_strided_slice %1172 {offsets = [0, 80], sizes = [2, 16], strides = [1, 1]} : vector<2x96xf32> to vector<2x16xf32>
    %1219 = arith.mulf %1208, %1218 : vector<2x16xf32>
    %1220 = arith.addf %1217, %1219 : vector<2x16xf32>
    %1221 = math.tanh %1220 : vector<2x16xf32>
    %cst_180 = arith.constant 1.000000e+00 : f32
    %1222 = vector.broadcast %cst_180 : f32 to vector<2x16xf32>
    %1223 = arith.subf %1222, %1216 : vector<2x16xf32>
    %1224 = arith.mulf %1223, %1221 : vector<2x16xf32>
    %1225 = arith.mulf %1216, %1174 : vector<2x16xf32>
    %1226 = arith.addf %1224, %1225 : vector<2x16xf32>
    %1227 = tpu.concatenate %1200, %1226 in 1 : vector<2x16xf32>, vector<2x16xf32> -> vector<2x32xf32>
    %1228 = vector.extract_strided_slice %1044 {offsets = [6, 0], sizes = [2, 96], strides = [1, 1]} : vector<32x96xf32> to vector<2x96xf32>
    %1229 = vector.extract_strided_slice %1044 {offsets = [24, 0], sizes = [2, 96], strides = [1, 1]} : vector<32x96xf32> to vector<2x96xf32>
    %1230 = arith.truncf %1227 : vector<2x32xf32> to vector<2x32xbf16>
    %cst_181 = arith.constant dense<0.000000e+00> : vector<2x96xf32>
    %1231 = tpu.matmul %1230, %1023, %cst_181 {dimension_numbers = #tpu.dot_dimension_numbers<[1], [0], [0], [1], [0, 0, 1, 1], [], []>} : vector<2x32xbf16>, vector<32x96xbf16>, vector<2x96xf32> -> vector<2x96xf32>
    %1232 = vector.broadcast %1024 : vector<1x96xf32> to vector<2x96xf32>
    %1233 = arith.addf %1231, %1232 : vector<2x96xf32>
    %1234 = vector.extract_strided_slice %1227 {offsets = [0, 0], sizes = [2, 16], strides = [1, 1]} : vector<2x32xf32> to vector<2x16xf32>
    %1235 = vector.extract_strided_slice %1227 {offsets = [0, 16], sizes = [2, 16], strides = [1, 1]} : vector<2x32xf32> to vector<2x16xf32>
    %1236 = vector.extract_strided_slice %1228 {offsets = [0, 0], sizes = [2, 16], strides = [1, 1]} : vector<2x96xf32> to vector<2x16xf32>
    %1237 = vector.extract_strided_slice %1233 {offsets = [0, 0], sizes = [2, 16], strides = [1, 1]} : vector<2x96xf32> to vector<2x16xf32>
    %1238 = arith.addf %1236, %1237 : vector<2x16xf32>
    %1239 = arith.negf %1238 : vector<2x16xf32>
    %1240 = math.exp %1239 : vector<2x16xf32>
    %cst_182 = arith.constant 1.000000e+00 : f32
    %1241 = vector.broadcast %cst_182 : f32 to vector<2x16xf32>
    %1242 = arith.addf %1241, %1240 : vector<2x16xf32>
    %1243 = arith.divf %1241, %1242 : vector<2x16xf32>
    %1244 = vector.extract_strided_slice %1228 {offsets = [0, 16], sizes = [2, 16], strides = [1, 1]} : vector<2x96xf32> to vector<2x16xf32>
    %1245 = vector.extract_strided_slice %1233 {offsets = [0, 16], sizes = [2, 16], strides = [1, 1]} : vector<2x96xf32> to vector<2x16xf32>
    %1246 = arith.addf %1244, %1245 : vector<2x16xf32>
    %1247 = arith.negf %1246 : vector<2x16xf32>
    %1248 = math.exp %1247 : vector<2x16xf32>
    %cst_183 = arith.constant 1.000000e+00 : f32
    %1249 = vector.broadcast %cst_183 : f32 to vector<2x16xf32>
    %1250 = arith.addf %1249, %1248 : vector<2x16xf32>
    %1251 = arith.divf %1249, %1250 : vector<2x16xf32>
    %1252 = vector.extract_strided_slice %1228 {offsets = [0, 32], sizes = [2, 16], strides = [1, 1]} : vector<2x96xf32> to vector<2x16xf32>
    %1253 = vector.extract_strided_slice %1233 {offsets = [0, 32], sizes = [2, 16], strides = [1, 1]} : vector<2x96xf32> to vector<2x16xf32>
    %1254 = arith.mulf %1243, %1253 : vector<2x16xf32>
    %1255 = arith.addf %1252, %1254 : vector<2x16xf32>
    %1256 = math.tanh %1255 : vector<2x16xf32>
    %cst_184 = arith.constant 1.000000e+00 : f32
    %1257 = vector.broadcast %cst_184 : f32 to vector<2x16xf32>
    %1258 = arith.subf %1257, %1251 : vector<2x16xf32>
    %1259 = arith.mulf %1258, %1256 : vector<2x16xf32>
    %1260 = arith.mulf %1251, %1234 : vector<2x16xf32>
    %1261 = arith.addf %1259, %1260 : vector<2x16xf32>
    %1262 = vector.extract_strided_slice %1229 {offsets = [0, 48], sizes = [2, 16], strides = [1, 1]} : vector<2x96xf32> to vector<2x16xf32>
    %1263 = vector.extract_strided_slice %1233 {offsets = [0, 48], sizes = [2, 16], strides = [1, 1]} : vector<2x96xf32> to vector<2x16xf32>
    %1264 = arith.addf %1262, %1263 : vector<2x16xf32>
    %1265 = arith.negf %1264 : vector<2x16xf32>
    %1266 = math.exp %1265 : vector<2x16xf32>
    %cst_185 = arith.constant 1.000000e+00 : f32
    %1267 = vector.broadcast %cst_185 : f32 to vector<2x16xf32>
    %1268 = arith.addf %1267, %1266 : vector<2x16xf32>
    %1269 = arith.divf %1267, %1268 : vector<2x16xf32>
    %1270 = vector.extract_strided_slice %1229 {offsets = [0, 64], sizes = [2, 16], strides = [1, 1]} : vector<2x96xf32> to vector<2x16xf32>
    %1271 = vector.extract_strided_slice %1233 {offsets = [0, 64], sizes = [2, 16], strides = [1, 1]} : vector<2x96xf32> to vector<2x16xf32>
    %1272 = arith.addf %1270, %1271 : vector<2x16xf32>
    %1273 = arith.negf %1272 : vector<2x16xf32>
    %1274 = math.exp %1273 : vector<2x16xf32>
    %cst_186 = arith.constant 1.000000e+00 : f32
    %1275 = vector.broadcast %cst_186 : f32 to vector<2x16xf32>
    %1276 = arith.addf %1275, %1274 : vector<2x16xf32>
    %1277 = arith.divf %1275, %1276 : vector<2x16xf32>
    %1278 = vector.extract_strided_slice %1229 {offsets = [0, 80], sizes = [2, 16], strides = [1, 1]} : vector<2x96xf32> to vector<2x16xf32>
    %1279 = vector.extract_strided_slice %1233 {offsets = [0, 80], sizes = [2, 16], strides = [1, 1]} : vector<2x96xf32> to vector<2x16xf32>
    %1280 = arith.mulf %1269, %1279 : vector<2x16xf32>
    %1281 = arith.addf %1278, %1280 : vector<2x16xf32>
    %1282 = math.tanh %1281 : vector<2x16xf32>
    %cst_187 = arith.constant 1.000000e+00 : f32
    %1283 = vector.broadcast %cst_187 : f32 to vector<2x16xf32>
    %1284 = arith.subf %1283, %1277 : vector<2x16xf32>
    %1285 = arith.mulf %1284, %1282 : vector<2x16xf32>
    %1286 = arith.mulf %1277, %1235 : vector<2x16xf32>
    %1287 = arith.addf %1285, %1286 : vector<2x16xf32>
    %1288 = tpu.concatenate %1261, %1287 in 1 : vector<2x16xf32>, vector<2x16xf32> -> vector<2x32xf32>
    %1289 = vector.extract_strided_slice %1044 {offsets = [8, 0], sizes = [2, 96], strides = [1, 1]} : vector<32x96xf32> to vector<2x96xf32>
    %1290 = vector.extract_strided_slice %1044 {offsets = [22, 0], sizes = [2, 96], strides = [1, 1]} : vector<32x96xf32> to vector<2x96xf32>
    %1291 = arith.truncf %1288 : vector<2x32xf32> to vector<2x32xbf16>
    %cst_188 = arith.constant dense<0.000000e+00> : vector<2x96xf32>
    %1292 = tpu.matmul %1291, %1023, %cst_188 {dimension_numbers = #tpu.dot_dimension_numbers<[1], [0], [0], [1], [0, 0, 1, 1], [], []>} : vector<2x32xbf16>, vector<32x96xbf16>, vector<2x96xf32> -> vector<2x96xf32>
    %1293 = vector.broadcast %1024 : vector<1x96xf32> to vector<2x96xf32>
    %1294 = arith.addf %1292, %1293 : vector<2x96xf32>
    %1295 = vector.extract_strided_slice %1288 {offsets = [0, 0], sizes = [2, 16], strides = [1, 1]} : vector<2x32xf32> to vector<2x16xf32>
    %1296 = vector.extract_strided_slice %1288 {offsets = [0, 16], sizes = [2, 16], strides = [1, 1]} : vector<2x32xf32> to vector<2x16xf32>
    %1297 = vector.extract_strided_slice %1289 {offsets = [0, 0], sizes = [2, 16], strides = [1, 1]} : vector<2x96xf32> to vector<2x16xf32>
    %1298 = vector.extract_strided_slice %1294 {offsets = [0, 0], sizes = [2, 16], strides = [1, 1]} : vector<2x96xf32> to vector<2x16xf32>
    %1299 = arith.addf %1297, %1298 : vector<2x16xf32>
    %1300 = arith.negf %1299 : vector<2x16xf32>
    %1301 = math.exp %1300 : vector<2x16xf32>
    %cst_189 = arith.constant 1.000000e+00 : f32
    %1302 = vector.broadcast %cst_189 : f32 to vector<2x16xf32>
    %1303 = arith.addf %1302, %1301 : vector<2x16xf32>
    %1304 = arith.divf %1302, %1303 : vector<2x16xf32>
    %1305 = vector.extract_strided_slice %1289 {offsets = [0, 16], sizes = [2, 16], strides = [1, 1]} : vector<2x96xf32> to vector<2x16xf32>
    %1306 = vector.extract_strided_slice %1294 {offsets = [0, 16], sizes = [2, 16], strides = [1, 1]} : vector<2x96xf32> to vector<2x16xf32>
    %1307 = arith.addf %1305, %1306 : vector<2x16xf32>
    %1308 = arith.negf %1307 : vector<2x16xf32>
    %1309 = math.exp %1308 : vector<2x16xf32>
    %cst_190 = arith.constant 1.000000e+00 : f32
    %1310 = vector.broadcast %cst_190 : f32 to vector<2x16xf32>
    %1311 = arith.addf %1310, %1309 : vector<2x16xf32>
    %1312 = arith.divf %1310, %1311 : vector<2x16xf32>
    %1313 = vector.extract_strided_slice %1289 {offsets = [0, 32], sizes = [2, 16], strides = [1, 1]} : vector<2x96xf32> to vector<2x16xf32>
    %1314 = vector.extract_strided_slice %1294 {offsets = [0, 32], sizes = [2, 16], strides = [1, 1]} : vector<2x96xf32> to vector<2x16xf32>
    %1315 = arith.mulf %1304, %1314 : vector<2x16xf32>
    %1316 = arith.addf %1313, %1315 : vector<2x16xf32>
    %1317 = math.tanh %1316 : vector<2x16xf32>
    %cst_191 = arith.constant 1.000000e+00 : f32
    %1318 = vector.broadcast %cst_191 : f32 to vector<2x16xf32>
    %1319 = arith.subf %1318, %1312 : vector<2x16xf32>
    %1320 = arith.mulf %1319, %1317 : vector<2x16xf32>
    %1321 = arith.mulf %1312, %1295 : vector<2x16xf32>
    %1322 = arith.addf %1320, %1321 : vector<2x16xf32>
    %1323 = vector.extract_strided_slice %1290 {offsets = [0, 48], sizes = [2, 16], strides = [1, 1]} : vector<2x96xf32> to vector<2x16xf32>
    %1324 = vector.extract_strided_slice %1294 {offsets = [0, 48], sizes = [2, 16], strides = [1, 1]} : vector<2x96xf32> to vector<2x16xf32>
    %1325 = arith.addf %1323, %1324 : vector<2x16xf32>
    %1326 = arith.negf %1325 : vector<2x16xf32>
    %1327 = math.exp %1326 : vector<2x16xf32>
    %cst_192 = arith.constant 1.000000e+00 : f32
    %1328 = vector.broadcast %cst_192 : f32 to vector<2x16xf32>
    %1329 = arith.addf %1328, %1327 : vector<2x16xf32>
    %1330 = arith.divf %1328, %1329 : vector<2x16xf32>
    %1331 = vector.extract_strided_slice %1290 {offsets = [0, 64], sizes = [2, 16], strides = [1, 1]} : vector<2x96xf32> to vector<2x16xf32>
    %1332 = vector.extract_strided_slice %1294 {offsets = [0, 64], sizes = [2, 16], strides = [1, 1]} : vector<2x96xf32> to vector<2x16xf32>
    %1333 = arith.addf %1331, %1332 : vector<2x16xf32>
    %1334 = arith.negf %1333 : vector<2x16xf32>
    %1335 = math.exp %1334 : vector<2x16xf32>
    %cst_193 = arith.constant 1.000000e+00 : f32
    %1336 = vector.broadcast %cst_193 : f32 to vector<2x16xf32>
    %1337 = arith.addf %1336, %1335 : vector<2x16xf32>
    %1338 = arith.divf %1336, %1337 : vector<2x16xf32>
    %1339 = vector.extract_strided_slice %1290 {offsets = [0, 80], sizes = [2, 16], strides = [1, 1]} : vector<2x96xf32> to vector<2x16xf32>
    %1340 = vector.extract_strided_slice %1294 {offsets = [0, 80], sizes = [2, 16], strides = [1, 1]} : vector<2x96xf32> to vector<2x16xf32>
    %1341 = arith.mulf %1330, %1340 : vector<2x16xf32>
    %1342 = arith.addf %1339, %1341 : vector<2x16xf32>
    %1343 = math.tanh %1342 : vector<2x16xf32>
    %cst_194 = arith.constant 1.000000e+00 : f32
    %1344 = vector.broadcast %cst_194 : f32 to vector<2x16xf32>
    %1345 = arith.subf %1344, %1338 : vector<2x16xf32>
    %1346 = arith.mulf %1345, %1343 : vector<2x16xf32>
    %1347 = arith.mulf %1338, %1296 : vector<2x16xf32>
    %1348 = arith.addf %1346, %1347 : vector<2x16xf32>
    %1349 = tpu.concatenate %1322, %1348 in 1 : vector<2x16xf32>, vector<2x16xf32> -> vector<2x32xf32>
    %1350 = vector.extract_strided_slice %1044 {offsets = [10, 0], sizes = [2, 96], strides = [1, 1]} : vector<32x96xf32> to vector<2x96xf32>
    %1351 = vector.extract_strided_slice %1044 {offsets = [20, 0], sizes = [2, 96], strides = [1, 1]} : vector<32x96xf32> to vector<2x96xf32>
    %1352 = arith.truncf %1349 : vector<2x32xf32> to vector<2x32xbf16>
    %cst_195 = arith.constant dense<0.000000e+00> : vector<2x96xf32>
    %1353 = tpu.matmul %1352, %1023, %cst_195 {dimension_numbers = #tpu.dot_dimension_numbers<[1], [0], [0], [1], [0, 0, 1, 1], [], []>} : vector<2x32xbf16>, vector<32x96xbf16>, vector<2x96xf32> -> vector<2x96xf32>
    %1354 = vector.broadcast %1024 : vector<1x96xf32> to vector<2x96xf32>
    %1355 = arith.addf %1353, %1354 : vector<2x96xf32>
    %1356 = vector.extract_strided_slice %1349 {offsets = [0, 0], sizes = [2, 16], strides = [1, 1]} : vector<2x32xf32> to vector<2x16xf32>
    %1357 = vector.extract_strided_slice %1349 {offsets = [0, 16], sizes = [2, 16], strides = [1, 1]} : vector<2x32xf32> to vector<2x16xf32>
    %1358 = vector.extract_strided_slice %1350 {offsets = [0, 0], sizes = [2, 16], strides = [1, 1]} : vector<2x96xf32> to vector<2x16xf32>
    %1359 = vector.extract_strided_slice %1355 {offsets = [0, 0], sizes = [2, 16], strides = [1, 1]} : vector<2x96xf32> to vector<2x16xf32>
    %1360 = arith.addf %1358, %1359 : vector<2x16xf32>
    %1361 = arith.negf %1360 : vector<2x16xf32>
    %1362 = math.exp %1361 : vector<2x16xf32>
    %cst_196 = arith.constant 1.000000e+00 : f32
    %1363 = vector.broadcast %cst_196 : f32 to vector<2x16xf32>
    %1364 = arith.addf %1363, %1362 : vector<2x16xf32>
    %1365 = arith.divf %1363, %1364 : vector<2x16xf32>
    %1366 = vector.extract_strided_slice %1350 {offsets = [0, 16], sizes = [2, 16], strides = [1, 1]} : vector<2x96xf32> to vector<2x16xf32>
    %1367 = vector.extract_strided_slice %1355 {offsets = [0, 16], sizes = [2, 16], strides = [1, 1]} : vector<2x96xf32> to vector<2x16xf32>
    %1368 = arith.addf %1366, %1367 : vector<2x16xf32>
    %1369 = arith.negf %1368 : vector<2x16xf32>
    %1370 = math.exp %1369 : vector<2x16xf32>
    %cst_197 = arith.constant 1.000000e+00 : f32
    %1371 = vector.broadcast %cst_197 : f32 to vector<2x16xf32>
    %1372 = arith.addf %1371, %1370 : vector<2x16xf32>
    %1373 = arith.divf %1371, %1372 : vector<2x16xf32>
    %1374 = vector.extract_strided_slice %1350 {offsets = [0, 32], sizes = [2, 16], strides = [1, 1]} : vector<2x96xf32> to vector<2x16xf32>
    %1375 = vector.extract_strided_slice %1355 {offsets = [0, 32], sizes = [2, 16], strides = [1, 1]} : vector<2x96xf32> to vector<2x16xf32>
    %1376 = arith.mulf %1365, %1375 : vector<2x16xf32>
    %1377 = arith.addf %1374, %1376 : vector<2x16xf32>
    %1378 = math.tanh %1377 : vector<2x16xf32>
    %cst_198 = arith.constant 1.000000e+00 : f32
    %1379 = vector.broadcast %cst_198 : f32 to vector<2x16xf32>
    %1380 = arith.subf %1379, %1373 : vector<2x16xf32>
    %1381 = arith.mulf %1380, %1378 : vector<2x16xf32>
    %1382 = arith.mulf %1373, %1356 : vector<2x16xf32>
    %1383 = arith.addf %1381, %1382 : vector<2x16xf32>
    %1384 = vector.extract_strided_slice %1351 {offsets = [0, 48], sizes = [2, 16], strides = [1, 1]} : vector<2x96xf32> to vector<2x16xf32>
    %1385 = vector.extract_strided_slice %1355 {offsets = [0, 48], sizes = [2, 16], strides = [1, 1]} : vector<2x96xf32> to vector<2x16xf32>
    %1386 = arith.addf %1384, %1385 : vector<2x16xf32>
    %1387 = arith.negf %1386 : vector<2x16xf32>
    %1388 = math.exp %1387 : vector<2x16xf32>
    %cst_199 = arith.constant 1.000000e+00 : f32
    %1389 = vector.broadcast %cst_199 : f32 to vector<2x16xf32>
    %1390 = arith.addf %1389, %1388 : vector<2x16xf32>
    %1391 = arith.divf %1389, %1390 : vector<2x16xf32>
    %1392 = vector.extract_strided_slice %1351 {offsets = [0, 64], sizes = [2, 16], strides = [1, 1]} : vector<2x96xf32> to vector<2x16xf32>
    %1393 = vector.extract_strided_slice %1355 {offsets = [0, 64], sizes = [2, 16], strides = [1, 1]} : vector<2x96xf32> to vector<2x16xf32>
    %1394 = arith.addf %1392, %1393 : vector<2x16xf32>
    %1395 = arith.negf %1394 : vector<2x16xf32>
    %1396 = math.exp %1395 : vector<2x16xf32>
    %cst_200 = arith.constant 1.000000e+00 : f32
    %1397 = vector.broadcast %cst_200 : f32 to vector<2x16xf32>
    %1398 = arith.addf %1397, %1396 : vector<2x16xf32>
    %1399 = arith.divf %1397, %1398 : vector<2x16xf32>
    %1400 = vector.extract_strided_slice %1351 {offsets = [0, 80], sizes = [2, 16], strides = [1, 1]} : vector<2x96xf32> to vector<2x16xf32>
    %1401 = vector.extract_strided_slice %1355 {offsets = [0, 80], sizes = [2, 16], strides = [1, 1]} : vector<2x96xf32> to vector<2x16xf32>
    %1402 = arith.mulf %1391, %1401 : vector<2x16xf32>
    %1403 = arith.addf %1400, %1402 : vector<2x16xf32>
    %1404 = math.tanh %1403 : vector<2x16xf32>
    %cst_201 = arith.constant 1.000000e+00 : f32
    %1405 = vector.broadcast %cst_201 : f32 to vector<2x16xf32>
    %1406 = arith.subf %1405, %1399 : vector<2x16xf32>
    %1407 = arith.mulf %1406, %1404 : vector<2x16xf32>
    %1408 = arith.mulf %1399, %1357 : vector<2x16xf32>
    %1409 = arith.addf %1407, %1408 : vector<2x16xf32>
    %1410 = tpu.concatenate %1383, %1409 in 1 : vector<2x16xf32>, vector<2x16xf32> -> vector<2x32xf32>
    %1411 = vector.extract_strided_slice %1044 {offsets = [12, 0], sizes = [2, 96], strides = [1, 1]} : vector<32x96xf32> to vector<2x96xf32>
    %1412 = vector.extract_strided_slice %1044 {offsets = [18, 0], sizes = [2, 96], strides = [1, 1]} : vector<32x96xf32> to vector<2x96xf32>
    %1413 = arith.truncf %1410 : vector<2x32xf32> to vector<2x32xbf16>
    %cst_202 = arith.constant dense<0.000000e+00> : vector<2x96xf32>
    %1414 = tpu.matmul %1413, %1023, %cst_202 {dimension_numbers = #tpu.dot_dimension_numbers<[1], [0], [0], [1], [0, 0, 1, 1], [], []>} : vector<2x32xbf16>, vector<32x96xbf16>, vector<2x96xf32> -> vector<2x96xf32>
    %1415 = vector.broadcast %1024 : vector<1x96xf32> to vector<2x96xf32>
    %1416 = arith.addf %1414, %1415 : vector<2x96xf32>
    %1417 = vector.extract_strided_slice %1410 {offsets = [0, 0], sizes = [2, 16], strides = [1, 1]} : vector<2x32xf32> to vector<2x16xf32>
    %1418 = vector.extract_strided_slice %1410 {offsets = [0, 16], sizes = [2, 16], strides = [1, 1]} : vector<2x32xf32> to vector<2x16xf32>
    %1419 = vector.extract_strided_slice %1411 {offsets = [0, 0], sizes = [2, 16], strides = [1, 1]} : vector<2x96xf32> to vector<2x16xf32>
    %1420 = vector.extract_strided_slice %1416 {offsets = [0, 0], sizes = [2, 16], strides = [1, 1]} : vector<2x96xf32> to vector<2x16xf32>
    %1421 = arith.addf %1419, %1420 : vector<2x16xf32>
    %1422 = arith.negf %1421 : vector<2x16xf32>
    %1423 = math.exp %1422 : vector<2x16xf32>
    %cst_203 = arith.constant 1.000000e+00 : f32
    %1424 = vector.broadcast %cst_203 : f32 to vector<2x16xf32>
    %1425 = arith.addf %1424, %1423 : vector<2x16xf32>
    %1426 = arith.divf %1424, %1425 : vector<2x16xf32>
    %1427 = vector.extract_strided_slice %1411 {offsets = [0, 16], sizes = [2, 16], strides = [1, 1]} : vector<2x96xf32> to vector<2x16xf32>
    %1428 = vector.extract_strided_slice %1416 {offsets = [0, 16], sizes = [2, 16], strides = [1, 1]} : vector<2x96xf32> to vector<2x16xf32>
    %1429 = arith.addf %1427, %1428 : vector<2x16xf32>
    %1430 = arith.negf %1429 : vector<2x16xf32>
    %1431 = math.exp %1430 : vector<2x16xf32>
    %cst_204 = arith.constant 1.000000e+00 : f32
    %1432 = vector.broadcast %cst_204 : f32 to vector<2x16xf32>
    %1433 = arith.addf %1432, %1431 : vector<2x16xf32>
    %1434 = arith.divf %1432, %1433 : vector<2x16xf32>
    %1435 = vector.extract_strided_slice %1411 {offsets = [0, 32], sizes = [2, 16], strides = [1, 1]} : vector<2x96xf32> to vector<2x16xf32>
    %1436 = vector.extract_strided_slice %1416 {offsets = [0, 32], sizes = [2, 16], strides = [1, 1]} : vector<2x96xf32> to vector<2x16xf32>
    %1437 = arith.mulf %1426, %1436 : vector<2x16xf32>
    %1438 = arith.addf %1435, %1437 : vector<2x16xf32>
    %1439 = math.tanh %1438 : vector<2x16xf32>
    %cst_205 = arith.constant 1.000000e+00 : f32
    %1440 = vector.broadcast %cst_205 : f32 to vector<2x16xf32>
    %1441 = arith.subf %1440, %1434 : vector<2x16xf32>
    %1442 = arith.mulf %1441, %1439 : vector<2x16xf32>
    %1443 = arith.mulf %1434, %1417 : vector<2x16xf32>
    %1444 = arith.addf %1442, %1443 : vector<2x16xf32>
    %1445 = vector.extract_strided_slice %1412 {offsets = [0, 48], sizes = [2, 16], strides = [1, 1]} : vector<2x96xf32> to vector<2x16xf32>
    %1446 = vector.extract_strided_slice %1416 {offsets = [0, 48], sizes = [2, 16], strides = [1, 1]} : vector<2x96xf32> to vector<2x16xf32>
    %1447 = arith.addf %1445, %1446 : vector<2x16xf32>
    %1448 = arith.negf %1447 : vector<2x16xf32>
    %1449 = math.exp %1448 : vector<2x16xf32>
    %cst_206 = arith.constant 1.000000e+00 : f32
    %1450 = vector.broadcast %cst_206 : f32 to vector<2x16xf32>
    %1451 = arith.addf %1450, %1449 : vector<2x16xf32>
    %1452 = arith.divf %1450, %1451 : vector<2x16xf32>
    %1453 = vector.extract_strided_slice %1412 {offsets = [0, 64], sizes = [2, 16], strides = [1, 1]} : vector<2x96xf32> to vector<2x16xf32>
    %1454 = vector.extract_strided_slice %1416 {offsets = [0, 64], sizes = [2, 16], strides = [1, 1]} : vector<2x96xf32> to vector<2x16xf32>
    %1455 = arith.addf %1453, %1454 : vector<2x16xf32>
    %1456 = arith.negf %1455 : vector<2x16xf32>
    %1457 = math.exp %1456 : vector<2x16xf32>
    %cst_207 = arith.constant 1.000000e+00 : f32
    %1458 = vector.broadcast %cst_207 : f32 to vector<2x16xf32>
    %1459 = arith.addf %1458, %1457 : vector<2x16xf32>
    %1460 = arith.divf %1458, %1459 : vector<2x16xf32>
    %1461 = vector.extract_strided_slice %1412 {offsets = [0, 80], sizes = [2, 16], strides = [1, 1]} : vector<2x96xf32> to vector<2x16xf32>
    %1462 = vector.extract_strided_slice %1416 {offsets = [0, 80], sizes = [2, 16], strides = [1, 1]} : vector<2x96xf32> to vector<2x16xf32>
    %1463 = arith.mulf %1452, %1462 : vector<2x16xf32>
    %1464 = arith.addf %1461, %1463 : vector<2x16xf32>
    %1465 = math.tanh %1464 : vector<2x16xf32>
    %cst_208 = arith.constant 1.000000e+00 : f32
    %1466 = vector.broadcast %cst_208 : f32 to vector<2x16xf32>
    %1467 = arith.subf %1466, %1460 : vector<2x16xf32>
    %1468 = arith.mulf %1467, %1465 : vector<2x16xf32>
    %1469 = arith.mulf %1460, %1418 : vector<2x16xf32>
    %1470 = arith.addf %1468, %1469 : vector<2x16xf32>
    %1471 = tpu.concatenate %1444, %1470 in 1 : vector<2x16xf32>, vector<2x16xf32> -> vector<2x32xf32>
    %1472 = vector.extract_strided_slice %1044 {offsets = [14, 0], sizes = [2, 96], strides = [1, 1]} : vector<32x96xf32> to vector<2x96xf32>
    %1473 = vector.extract_strided_slice %1044 {offsets = [16, 0], sizes = [2, 96], strides = [1, 1]} : vector<32x96xf32> to vector<2x96xf32>
    %1474 = arith.truncf %1471 : vector<2x32xf32> to vector<2x32xbf16>
    %cst_209 = arith.constant dense<0.000000e+00> : vector<2x96xf32>
    %1475 = tpu.matmul %1474, %1023, %cst_209 {dimension_numbers = #tpu.dot_dimension_numbers<[1], [0], [0], [1], [0, 0, 1, 1], [], []>} : vector<2x32xbf16>, vector<32x96xbf16>, vector<2x96xf32> -> vector<2x96xf32>
    %1476 = vector.broadcast %1024 : vector<1x96xf32> to vector<2x96xf32>
    %1477 = arith.addf %1475, %1476 : vector<2x96xf32>
    %1478 = vector.extract_strided_slice %1471 {offsets = [0, 0], sizes = [2, 16], strides = [1, 1]} : vector<2x32xf32> to vector<2x16xf32>
    %1479 = vector.extract_strided_slice %1471 {offsets = [0, 16], sizes = [2, 16], strides = [1, 1]} : vector<2x32xf32> to vector<2x16xf32>
    %1480 = vector.extract_strided_slice %1472 {offsets = [0, 0], sizes = [2, 16], strides = [1, 1]} : vector<2x96xf32> to vector<2x16xf32>
    %1481 = vector.extract_strided_slice %1477 {offsets = [0, 0], sizes = [2, 16], strides = [1, 1]} : vector<2x96xf32> to vector<2x16xf32>
    %1482 = arith.addf %1480, %1481 : vector<2x16xf32>
    %1483 = arith.negf %1482 : vector<2x16xf32>
    %1484 = math.exp %1483 : vector<2x16xf32>
    %cst_210 = arith.constant 1.000000e+00 : f32
    %1485 = vector.broadcast %cst_210 : f32 to vector<2x16xf32>
    %1486 = arith.addf %1485, %1484 : vector<2x16xf32>
    %1487 = arith.divf %1485, %1486 : vector<2x16xf32>
    %1488 = vector.extract_strided_slice %1472 {offsets = [0, 16], sizes = [2, 16], strides = [1, 1]} : vector<2x96xf32> to vector<2x16xf32>
    %1489 = vector.extract_strided_slice %1477 {offsets = [0, 16], sizes = [2, 16], strides = [1, 1]} : vector<2x96xf32> to vector<2x16xf32>
    %1490 = arith.addf %1488, %1489 : vector<2x16xf32>
    %1491 = arith.negf %1490 : vector<2x16xf32>
    %1492 = math.exp %1491 : vector<2x16xf32>
    %cst_211 = arith.constant 1.000000e+00 : f32
    %1493 = vector.broadcast %cst_211 : f32 to vector<2x16xf32>
    %1494 = arith.addf %1493, %1492 : vector<2x16xf32>
    %1495 = arith.divf %1493, %1494 : vector<2x16xf32>
    %1496 = vector.extract_strided_slice %1472 {offsets = [0, 32], sizes = [2, 16], strides = [1, 1]} : vector<2x96xf32> to vector<2x16xf32>
    %1497 = vector.extract_strided_slice %1477 {offsets = [0, 32], sizes = [2, 16], strides = [1, 1]} : vector<2x96xf32> to vector<2x16xf32>
    %1498 = arith.mulf %1487, %1497 : vector<2x16xf32>
    %1499 = arith.addf %1496, %1498 : vector<2x16xf32>
    %1500 = math.tanh %1499 : vector<2x16xf32>
    %cst_212 = arith.constant 1.000000e+00 : f32
    %1501 = vector.broadcast %cst_212 : f32 to vector<2x16xf32>
    %1502 = arith.subf %1501, %1495 : vector<2x16xf32>
    %1503 = arith.mulf %1502, %1500 : vector<2x16xf32>
    %1504 = arith.mulf %1495, %1478 : vector<2x16xf32>
    %1505 = arith.addf %1503, %1504 : vector<2x16xf32>
    %1506 = vector.extract_strided_slice %1473 {offsets = [0, 48], sizes = [2, 16], strides = [1, 1]} : vector<2x96xf32> to vector<2x16xf32>
    %1507 = vector.extract_strided_slice %1477 {offsets = [0, 48], sizes = [2, 16], strides = [1, 1]} : vector<2x96xf32> to vector<2x16xf32>
    %1508 = arith.addf %1506, %1507 : vector<2x16xf32>
    %1509 = arith.negf %1508 : vector<2x16xf32>
    %1510 = math.exp %1509 : vector<2x16xf32>
    %cst_213 = arith.constant 1.000000e+00 : f32
    %1511 = vector.broadcast %cst_213 : f32 to vector<2x16xf32>
    %1512 = arith.addf %1511, %1510 : vector<2x16xf32>
    %1513 = arith.divf %1511, %1512 : vector<2x16xf32>
    %1514 = vector.extract_strided_slice %1473 {offsets = [0, 64], sizes = [2, 16], strides = [1, 1]} : vector<2x96xf32> to vector<2x16xf32>
    %1515 = vector.extract_strided_slice %1477 {offsets = [0, 64], sizes = [2, 16], strides = [1, 1]} : vector<2x96xf32> to vector<2x16xf32>
    %1516 = arith.addf %1514, %1515 : vector<2x16xf32>
    %1517 = arith.negf %1516 : vector<2x16xf32>
    %1518 = math.exp %1517 : vector<2x16xf32>
    %cst_214 = arith.constant 1.000000e+00 : f32
    %1519 = vector.broadcast %cst_214 : f32 to vector<2x16xf32>
    %1520 = arith.addf %1519, %1518 : vector<2x16xf32>
    %1521 = arith.divf %1519, %1520 : vector<2x16xf32>
    %1522 = vector.extract_strided_slice %1473 {offsets = [0, 80], sizes = [2, 16], strides = [1, 1]} : vector<2x96xf32> to vector<2x16xf32>
    %1523 = vector.extract_strided_slice %1477 {offsets = [0, 80], sizes = [2, 16], strides = [1, 1]} : vector<2x96xf32> to vector<2x16xf32>
    %1524 = arith.mulf %1513, %1523 : vector<2x16xf32>
    %1525 = arith.addf %1522, %1524 : vector<2x16xf32>
    %1526 = math.tanh %1525 : vector<2x16xf32>
    %cst_215 = arith.constant 1.000000e+00 : f32
    %1527 = vector.broadcast %cst_215 : f32 to vector<2x16xf32>
    %1528 = arith.subf %1527, %1521 : vector<2x16xf32>
    %1529 = arith.mulf %1528, %1526 : vector<2x16xf32>
    %1530 = arith.mulf %1521, %1479 : vector<2x16xf32>
    %1531 = arith.addf %1529, %1530 : vector<2x16xf32>
    %1532 = tpu.concatenate %1505, %1531 in 1 : vector<2x16xf32>, vector<2x16xf32> -> vector<2x32xf32>
    %1533 = vector.extract_strided_slice %1044 {offsets = [16, 0], sizes = [2, 96], strides = [1, 1]} : vector<32x96xf32> to vector<2x96xf32>
    %1534 = vector.extract_strided_slice %1044 {offsets = [14, 0], sizes = [2, 96], strides = [1, 1]} : vector<32x96xf32> to vector<2x96xf32>
    %1535 = arith.truncf %1532 : vector<2x32xf32> to vector<2x32xbf16>
    %cst_216 = arith.constant dense<0.000000e+00> : vector<2x96xf32>
    %1536 = tpu.matmul %1535, %1023, %cst_216 {dimension_numbers = #tpu.dot_dimension_numbers<[1], [0], [0], [1], [0, 0, 1, 1], [], []>} : vector<2x32xbf16>, vector<32x96xbf16>, vector<2x96xf32> -> vector<2x96xf32>
    %1537 = vector.broadcast %1024 : vector<1x96xf32> to vector<2x96xf32>
    %1538 = arith.addf %1536, %1537 : vector<2x96xf32>
    %1539 = vector.extract_strided_slice %1532 {offsets = [0, 0], sizes = [2, 16], strides = [1, 1]} : vector<2x32xf32> to vector<2x16xf32>
    %1540 = vector.extract_strided_slice %1532 {offsets = [0, 16], sizes = [2, 16], strides = [1, 1]} : vector<2x32xf32> to vector<2x16xf32>
    %1541 = vector.extract_strided_slice %1533 {offsets = [0, 0], sizes = [2, 16], strides = [1, 1]} : vector<2x96xf32> to vector<2x16xf32>
    %1542 = vector.extract_strided_slice %1538 {offsets = [0, 0], sizes = [2, 16], strides = [1, 1]} : vector<2x96xf32> to vector<2x16xf32>
    %1543 = arith.addf %1541, %1542 : vector<2x16xf32>
    %1544 = arith.negf %1543 : vector<2x16xf32>
    %1545 = math.exp %1544 : vector<2x16xf32>
    %cst_217 = arith.constant 1.000000e+00 : f32
    %1546 = vector.broadcast %cst_217 : f32 to vector<2x16xf32>
    %1547 = arith.addf %1546, %1545 : vector<2x16xf32>
    %1548 = arith.divf %1546, %1547 : vector<2x16xf32>
    %1549 = vector.extract_strided_slice %1533 {offsets = [0, 16], sizes = [2, 16], strides = [1, 1]} : vector<2x96xf32> to vector<2x16xf32>
    %1550 = vector.extract_strided_slice %1538 {offsets = [0, 16], sizes = [2, 16], strides = [1, 1]} : vector<2x96xf32> to vector<2x16xf32>
    %1551 = arith.addf %1549, %1550 : vector<2x16xf32>
    %1552 = arith.negf %1551 : vector<2x16xf32>
    %1553 = math.exp %1552 : vector<2x16xf32>
    %cst_218 = arith.constant 1.000000e+00 : f32
    %1554 = vector.broadcast %cst_218 : f32 to vector<2x16xf32>
    %1555 = arith.addf %1554, %1553 : vector<2x16xf32>
    %1556 = arith.divf %1554, %1555 : vector<2x16xf32>
    %1557 = vector.extract_strided_slice %1533 {offsets = [0, 32], sizes = [2, 16], strides = [1, 1]} : vector<2x96xf32> to vector<2x16xf32>
    %1558 = vector.extract_strided_slice %1538 {offsets = [0, 32], sizes = [2, 16], strides = [1, 1]} : vector<2x96xf32> to vector<2x16xf32>
    %1559 = arith.mulf %1548, %1558 : vector<2x16xf32>
    %1560 = arith.addf %1557, %1559 : vector<2x16xf32>
    %1561 = math.tanh %1560 : vector<2x16xf32>
    %cst_219 = arith.constant 1.000000e+00 : f32
    %1562 = vector.broadcast %cst_219 : f32 to vector<2x16xf32>
    %1563 = arith.subf %1562, %1556 : vector<2x16xf32>
    %1564 = arith.mulf %1563, %1561 : vector<2x16xf32>
    %1565 = arith.mulf %1556, %1539 : vector<2x16xf32>
    %1566 = arith.addf %1564, %1565 : vector<2x16xf32>
    %1567 = vector.extract_strided_slice %1534 {offsets = [0, 48], sizes = [2, 16], strides = [1, 1]} : vector<2x96xf32> to vector<2x16xf32>
    %1568 = vector.extract_strided_slice %1538 {offsets = [0, 48], sizes = [2, 16], strides = [1, 1]} : vector<2x96xf32> to vector<2x16xf32>
    %1569 = arith.addf %1567, %1568 : vector<2x16xf32>
    %1570 = arith.negf %1569 : vector<2x16xf32>
    %1571 = math.exp %1570 : vector<2x16xf32>
    %cst_220 = arith.constant 1.000000e+00 : f32
    %1572 = vector.broadcast %cst_220 : f32 to vector<2x16xf32>
    %1573 = arith.addf %1572, %1571 : vector<2x16xf32>
    %1574 = arith.divf %1572, %1573 : vector<2x16xf32>
    %1575 = vector.extract_strided_slice %1534 {offsets = [0, 64], sizes = [2, 16], strides = [1, 1]} : vector<2x96xf32> to vector<2x16xf32>
    %1576 = vector.extract_strided_slice %1538 {offsets = [0, 64], sizes = [2, 16], strides = [1, 1]} : vector<2x96xf32> to vector<2x16xf32>
    %1577 = arith.addf %1575, %1576 : vector<2x16xf32>
    %1578 = arith.negf %1577 : vector<2x16xf32>
    %1579 = math.exp %1578 : vector<2x16xf32>
    %cst_221 = arith.constant 1.000000e+00 : f32
    %1580 = vector.broadcast %cst_221 : f32 to vector<2x16xf32>
    %1581 = arith.addf %1580, %1579 : vector<2x16xf32>
    %1582 = arith.divf %1580, %1581 : vector<2x16xf32>
    %1583 = vector.extract_strided_slice %1534 {offsets = [0, 80], sizes = [2, 16], strides = [1, 1]} : vector<2x96xf32> to vector<2x16xf32>
    %1584 = vector.extract_strided_slice %1538 {offsets = [0, 80], sizes = [2, 16], strides = [1, 1]} : vector<2x96xf32> to vector<2x16xf32>
    %1585 = arith.mulf %1574, %1584 : vector<2x16xf32>
    %1586 = arith.addf %1583, %1585 : vector<2x16xf32>
    %1587 = math.tanh %1586 : vector<2x16xf32>
    %cst_222 = arith.constant 1.000000e+00 : f32
    %1588 = vector.broadcast %cst_222 : f32 to vector<2x16xf32>
    %1589 = arith.subf %1588, %1582 : vector<2x16xf32>
    %1590 = arith.mulf %1589, %1587 : vector<2x16xf32>
    %1591 = arith.mulf %1582, %1540 : vector<2x16xf32>
    %1592 = arith.addf %1590, %1591 : vector<2x16xf32>
    %1593 = tpu.concatenate %1566, %1592 in 1 : vector<2x16xf32>, vector<2x16xf32> -> vector<2x32xf32>
    %1594 = vector.extract_strided_slice %1044 {offsets = [18, 0], sizes = [2, 96], strides = [1, 1]} : vector<32x96xf32> to vector<2x96xf32>
    %1595 = vector.extract_strided_slice %1044 {offsets = [12, 0], sizes = [2, 96], strides = [1, 1]} : vector<32x96xf32> to vector<2x96xf32>
    %1596 = arith.truncf %1593 : vector<2x32xf32> to vector<2x32xbf16>
    %cst_223 = arith.constant dense<0.000000e+00> : vector<2x96xf32>
    %1597 = tpu.matmul %1596, %1023, %cst_223 {dimension_numbers = #tpu.dot_dimension_numbers<[1], [0], [0], [1], [0, 0, 1, 1], [], []>} : vector<2x32xbf16>, vector<32x96xbf16>, vector<2x96xf32> -> vector<2x96xf32>
    %1598 = vector.broadcast %1024 : vector<1x96xf32> to vector<2x96xf32>
    %1599 = arith.addf %1597, %1598 : vector<2x96xf32>
    %1600 = vector.extract_strided_slice %1593 {offsets = [0, 0], sizes = [2, 16], strides = [1, 1]} : vector<2x32xf32> to vector<2x16xf32>
    %1601 = vector.extract_strided_slice %1593 {offsets = [0, 16], sizes = [2, 16], strides = [1, 1]} : vector<2x32xf32> to vector<2x16xf32>
    %1602 = vector.extract_strided_slice %1594 {offsets = [0, 0], sizes = [2, 16], strides = [1, 1]} : vector<2x96xf32> to vector<2x16xf32>
    %1603 = vector.extract_strided_slice %1599 {offsets = [0, 0], sizes = [2, 16], strides = [1, 1]} : vector<2x96xf32> to vector<2x16xf32>
    %1604 = arith.addf %1602, %1603 : vector<2x16xf32>
    %1605 = arith.negf %1604 : vector<2x16xf32>
    %1606 = math.exp %1605 : vector<2x16xf32>
    %cst_224 = arith.constant 1.000000e+00 : f32
    %1607 = vector.broadcast %cst_224 : f32 to vector<2x16xf32>
    %1608 = arith.addf %1607, %1606 : vector<2x16xf32>
    %1609 = arith.divf %1607, %1608 : vector<2x16xf32>
    %1610 = vector.extract_strided_slice %1594 {offsets = [0, 16], sizes = [2, 16], strides = [1, 1]} : vector<2x96xf32> to vector<2x16xf32>
    %1611 = vector.extract_strided_slice %1599 {offsets = [0, 16], sizes = [2, 16], strides = [1, 1]} : vector<2x96xf32> to vector<2x16xf32>
    %1612 = arith.addf %1610, %1611 : vector<2x16xf32>
    %1613 = arith.negf %1612 : vector<2x16xf32>
    %1614 = math.exp %1613 : vector<2x16xf32>
    %cst_225 = arith.constant 1.000000e+00 : f32
    %1615 = vector.broadcast %cst_225 : f32 to vector<2x16xf32>
    %1616 = arith.addf %1615, %1614 : vector<2x16xf32>
    %1617 = arith.divf %1615, %1616 : vector<2x16xf32>
    %1618 = vector.extract_strided_slice %1594 {offsets = [0, 32], sizes = [2, 16], strides = [1, 1]} : vector<2x96xf32> to vector<2x16xf32>
    %1619 = vector.extract_strided_slice %1599 {offsets = [0, 32], sizes = [2, 16], strides = [1, 1]} : vector<2x96xf32> to vector<2x16xf32>
    %1620 = arith.mulf %1609, %1619 : vector<2x16xf32>
    %1621 = arith.addf %1618, %1620 : vector<2x16xf32>
    %1622 = math.tanh %1621 : vector<2x16xf32>
    %cst_226 = arith.constant 1.000000e+00 : f32
    %1623 = vector.broadcast %cst_226 : f32 to vector<2x16xf32>
    %1624 = arith.subf %1623, %1617 : vector<2x16xf32>
    %1625 = arith.mulf %1624, %1622 : vector<2x16xf32>
    %1626 = arith.mulf %1617, %1600 : vector<2x16xf32>
    %1627 = arith.addf %1625, %1626 : vector<2x16xf32>
    %1628 = vector.extract_strided_slice %1595 {offsets = [0, 48], sizes = [2, 16], strides = [1, 1]} : vector<2x96xf32> to vector<2x16xf32>
    %1629 = vector.extract_strided_slice %1599 {offsets = [0, 48], sizes = [2, 16], strides = [1, 1]} : vector<2x96xf32> to vector<2x16xf32>
    %1630 = arith.addf %1628, %1629 : vector<2x16xf32>
    %1631 = arith.negf %1630 : vector<2x16xf32>
    %1632 = math.exp %1631 : vector<2x16xf32>
    %cst_227 = arith.constant 1.000000e+00 : f32
    %1633 = vector.broadcast %cst_227 : f32 to vector<2x16xf32>
    %1634 = arith.addf %1633, %1632 : vector<2x16xf32>
    %1635 = arith.divf %1633, %1634 : vector<2x16xf32>
    %1636 = vector.extract_strided_slice %1595 {offsets = [0, 64], sizes = [2, 16], strides = [1, 1]} : vector<2x96xf32> to vector<2x16xf32>
    %1637 = vector.extract_strided_slice %1599 {offsets = [0, 64], sizes = [2, 16], strides = [1, 1]} : vector<2x96xf32> to vector<2x16xf32>
    %1638 = arith.addf %1636, %1637 : vector<2x16xf32>
    %1639 = arith.negf %1638 : vector<2x16xf32>
    %1640 = math.exp %1639 : vector<2x16xf32>
    %cst_228 = arith.constant 1.000000e+00 : f32
    %1641 = vector.broadcast %cst_228 : f32 to vector<2x16xf32>
    %1642 = arith.addf %1641, %1640 : vector<2x16xf32>
    %1643 = arith.divf %1641, %1642 : vector<2x16xf32>
    %1644 = vector.extract_strided_slice %1595 {offsets = [0, 80], sizes = [2, 16], strides = [1, 1]} : vector<2x96xf32> to vector<2x16xf32>
    %1645 = vector.extract_strided_slice %1599 {offsets = [0, 80], sizes = [2, 16], strides = [1, 1]} : vector<2x96xf32> to vector<2x16xf32>
    %1646 = arith.mulf %1635, %1645 : vector<2x16xf32>
    %1647 = arith.addf %1644, %1646 : vector<2x16xf32>
    %1648 = math.tanh %1647 : vector<2x16xf32>
    %cst_229 = arith.constant 1.000000e+00 : f32
    %1649 = vector.broadcast %cst_229 : f32 to vector<2x16xf32>
    %1650 = arith.subf %1649, %1643 : vector<2x16xf32>
    %1651 = arith.mulf %1650, %1648 : vector<2x16xf32>
    %1652 = arith.mulf %1643, %1601 : vector<2x16xf32>
    %1653 = arith.addf %1651, %1652 : vector<2x16xf32>
    %1654 = tpu.concatenate %1627, %1653 in 1 : vector<2x16xf32>, vector<2x16xf32> -> vector<2x32xf32>
    %1655 = vector.extract_strided_slice %1044 {offsets = [20, 0], sizes = [2, 96], strides = [1, 1]} : vector<32x96xf32> to vector<2x96xf32>
    %1656 = vector.extract_strided_slice %1044 {offsets = [10, 0], sizes = [2, 96], strides = [1, 1]} : vector<32x96xf32> to vector<2x96xf32>
    %1657 = arith.truncf %1654 : vector<2x32xf32> to vector<2x32xbf16>
    %cst_230 = arith.constant dense<0.000000e+00> : vector<2x96xf32>
    %1658 = tpu.matmul %1657, %1023, %cst_230 {dimension_numbers = #tpu.dot_dimension_numbers<[1], [0], [0], [1], [0, 0, 1, 1], [], []>} : vector<2x32xbf16>, vector<32x96xbf16>, vector<2x96xf32> -> vector<2x96xf32>
    %1659 = vector.broadcast %1024 : vector<1x96xf32> to vector<2x96xf32>
    %1660 = arith.addf %1658, %1659 : vector<2x96xf32>
    %1661 = vector.extract_strided_slice %1654 {offsets = [0, 0], sizes = [2, 16], strides = [1, 1]} : vector<2x32xf32> to vector<2x16xf32>
    %1662 = vector.extract_strided_slice %1654 {offsets = [0, 16], sizes = [2, 16], strides = [1, 1]} : vector<2x32xf32> to vector<2x16xf32>
    %1663 = vector.extract_strided_slice %1655 {offsets = [0, 0], sizes = [2, 16], strides = [1, 1]} : vector<2x96xf32> to vector<2x16xf32>
    %1664 = vector.extract_strided_slice %1660 {offsets = [0, 0], sizes = [2, 16], strides = [1, 1]} : vector<2x96xf32> to vector<2x16xf32>
    %1665 = arith.addf %1663, %1664 : vector<2x16xf32>
    %1666 = arith.negf %1665 : vector<2x16xf32>
    %1667 = math.exp %1666 : vector<2x16xf32>
    %cst_231 = arith.constant 1.000000e+00 : f32
    %1668 = vector.broadcast %cst_231 : f32 to vector<2x16xf32>
    %1669 = arith.addf %1668, %1667 : vector<2x16xf32>
    %1670 = arith.divf %1668, %1669 : vector<2x16xf32>
    %1671 = vector.extract_strided_slice %1655 {offsets = [0, 16], sizes = [2, 16], strides = [1, 1]} : vector<2x96xf32> to vector<2x16xf32>
    %1672 = vector.extract_strided_slice %1660 {offsets = [0, 16], sizes = [2, 16], strides = [1, 1]} : vector<2x96xf32> to vector<2x16xf32>
    %1673 = arith.addf %1671, %1672 : vector<2x16xf32>
    %1674 = arith.negf %1673 : vector<2x16xf32>
    %1675 = math.exp %1674 : vector<2x16xf32>
    %cst_232 = arith.constant 1.000000e+00 : f32
    %1676 = vector.broadcast %cst_232 : f32 to vector<2x16xf32>
    %1677 = arith.addf %1676, %1675 : vector<2x16xf32>
    %1678 = arith.divf %1676, %1677 : vector<2x16xf32>
    %1679 = vector.extract_strided_slice %1655 {offsets = [0, 32], sizes = [2, 16], strides = [1, 1]} : vector<2x96xf32> to vector<2x16xf32>
    %1680 = vector.extract_strided_slice %1660 {offsets = [0, 32], sizes = [2, 16], strides = [1, 1]} : vector<2x96xf32> to vector<2x16xf32>
    %1681 = arith.mulf %1670, %1680 : vector<2x16xf32>
    %1682 = arith.addf %1679, %1681 : vector<2x16xf32>
    %1683 = math.tanh %1682 : vector<2x16xf32>
    %cst_233 = arith.constant 1.000000e+00 : f32
    %1684 = vector.broadcast %cst_233 : f32 to vector<2x16xf32>
    %1685 = arith.subf %1684, %1678 : vector<2x16xf32>
    %1686 = arith.mulf %1685, %1683 : vector<2x16xf32>
    %1687 = arith.mulf %1678, %1661 : vector<2x16xf32>
    %1688 = arith.addf %1686, %1687 : vector<2x16xf32>
    %1689 = vector.extract_strided_slice %1656 {offsets = [0, 48], sizes = [2, 16], strides = [1, 1]} : vector<2x96xf32> to vector<2x16xf32>
    %1690 = vector.extract_strided_slice %1660 {offsets = [0, 48], sizes = [2, 16], strides = [1, 1]} : vector<2x96xf32> to vector<2x16xf32>
    %1691 = arith.addf %1689, %1690 : vector<2x16xf32>
    %1692 = arith.negf %1691 : vector<2x16xf32>
    %1693 = math.exp %1692 : vector<2x16xf32>
    %cst_234 = arith.constant 1.000000e+00 : f32
    %1694 = vector.broadcast %cst_234 : f32 to vector<2x16xf32>
    %1695 = arith.addf %1694, %1693 : vector<2x16xf32>
    %1696 = arith.divf %1694, %1695 : vector<2x16xf32>
    %1697 = vector.extract_strided_slice %1656 {offsets = [0, 64], sizes = [2, 16], strides = [1, 1]} : vector<2x96xf32> to vector<2x16xf32>
    %1698 = vector.extract_strided_slice %1660 {offsets = [0, 64], sizes = [2, 16], strides = [1, 1]} : vector<2x96xf32> to vector<2x16xf32>
    %1699 = arith.addf %1697, %1698 : vector<2x16xf32>
    %1700 = arith.negf %1699 : vector<2x16xf32>
    %1701 = math.exp %1700 : vector<2x16xf32>
    %cst_235 = arith.constant 1.000000e+00 : f32
    %1702 = vector.broadcast %cst_235 : f32 to vector<2x16xf32>
    %1703 = arith.addf %1702, %1701 : vector<2x16xf32>
    %1704 = arith.divf %1702, %1703 : vector<2x16xf32>
    %1705 = vector.extract_strided_slice %1656 {offsets = [0, 80], sizes = [2, 16], strides = [1, 1]} : vector<2x96xf32> to vector<2x16xf32>
    %1706 = vector.extract_strided_slice %1660 {offsets = [0, 80], sizes = [2, 16], strides = [1, 1]} : vector<2x96xf32> to vector<2x16xf32>
    %1707 = arith.mulf %1696, %1706 : vector<2x16xf32>
    %1708 = arith.addf %1705, %1707 : vector<2x16xf32>
    %1709 = math.tanh %1708 : vector<2x16xf32>
    %cst_236 = arith.constant 1.000000e+00 : f32
    %1710 = vector.broadcast %cst_236 : f32 to vector<2x16xf32>
    %1711 = arith.subf %1710, %1704 : vector<2x16xf32>
    %1712 = arith.mulf %1711, %1709 : vector<2x16xf32>
    %1713 = arith.mulf %1704, %1662 : vector<2x16xf32>
    %1714 = arith.addf %1712, %1713 : vector<2x16xf32>
    %1715 = tpu.concatenate %1688, %1714 in 1 : vector<2x16xf32>, vector<2x16xf32> -> vector<2x32xf32>
    %1716 = vector.extract_strided_slice %1044 {offsets = [22, 0], sizes = [2, 96], strides = [1, 1]} : vector<32x96xf32> to vector<2x96xf32>
    %1717 = vector.extract_strided_slice %1044 {offsets = [8, 0], sizes = [2, 96], strides = [1, 1]} : vector<32x96xf32> to vector<2x96xf32>
    %1718 = arith.truncf %1715 : vector<2x32xf32> to vector<2x32xbf16>
    %cst_237 = arith.constant dense<0.000000e+00> : vector<2x96xf32>
    %1719 = tpu.matmul %1718, %1023, %cst_237 {dimension_numbers = #tpu.dot_dimension_numbers<[1], [0], [0], [1], [0, 0, 1, 1], [], []>} : vector<2x32xbf16>, vector<32x96xbf16>, vector<2x96xf32> -> vector<2x96xf32>
    %1720 = vector.broadcast %1024 : vector<1x96xf32> to vector<2x96xf32>
    %1721 = arith.addf %1719, %1720 : vector<2x96xf32>
    %1722 = vector.extract_strided_slice %1715 {offsets = [0, 0], sizes = [2, 16], strides = [1, 1]} : vector<2x32xf32> to vector<2x16xf32>
    %1723 = vector.extract_strided_slice %1715 {offsets = [0, 16], sizes = [2, 16], strides = [1, 1]} : vector<2x32xf32> to vector<2x16xf32>
    %1724 = vector.extract_strided_slice %1716 {offsets = [0, 0], sizes = [2, 16], strides = [1, 1]} : vector<2x96xf32> to vector<2x16xf32>
    %1725 = vector.extract_strided_slice %1721 {offsets = [0, 0], sizes = [2, 16], strides = [1, 1]} : vector<2x96xf32> to vector<2x16xf32>
    %1726 = arith.addf %1724, %1725 : vector<2x16xf32>
    %1727 = arith.negf %1726 : vector<2x16xf32>
    %1728 = math.exp %1727 : vector<2x16xf32>
    %cst_238 = arith.constant 1.000000e+00 : f32
    %1729 = vector.broadcast %cst_238 : f32 to vector<2x16xf32>
    %1730 = arith.addf %1729, %1728 : vector<2x16xf32>
    %1731 = arith.divf %1729, %1730 : vector<2x16xf32>
    %1732 = vector.extract_strided_slice %1716 {offsets = [0, 16], sizes = [2, 16], strides = [1, 1]} : vector<2x96xf32> to vector<2x16xf32>
    %1733 = vector.extract_strided_slice %1721 {offsets = [0, 16], sizes = [2, 16], strides = [1, 1]} : vector<2x96xf32> to vector<2x16xf32>
    %1734 = arith.addf %1732, %1733 : vector<2x16xf32>
    %1735 = arith.negf %1734 : vector<2x16xf32>
    %1736 = math.exp %1735 : vector<2x16xf32>
    %cst_239 = arith.constant 1.000000e+00 : f32
    %1737 = vector.broadcast %cst_239 : f32 to vector<2x16xf32>
    %1738 = arith.addf %1737, %1736 : vector<2x16xf32>
    %1739 = arith.divf %1737, %1738 : vector<2x16xf32>
    %1740 = vector.extract_strided_slice %1716 {offsets = [0, 32], sizes = [2, 16], strides = [1, 1]} : vector<2x96xf32> to vector<2x16xf32>
    %1741 = vector.extract_strided_slice %1721 {offsets = [0, 32], sizes = [2, 16], strides = [1, 1]} : vector<2x96xf32> to vector<2x16xf32>
    %1742 = arith.mulf %1731, %1741 : vector<2x16xf32>
    %1743 = arith.addf %1740, %1742 : vector<2x16xf32>
    %1744 = math.tanh %1743 : vector<2x16xf32>
    %cst_240 = arith.constant 1.000000e+00 : f32
    %1745 = vector.broadcast %cst_240 : f32 to vector<2x16xf32>
    %1746 = arith.subf %1745, %1739 : vector<2x16xf32>
    %1747 = arith.mulf %1746, %1744 : vector<2x16xf32>
    %1748 = arith.mulf %1739, %1722 : vector<2x16xf32>
    %1749 = arith.addf %1747, %1748 : vector<2x16xf32>
    %1750 = vector.extract_strided_slice %1717 {offsets = [0, 48], sizes = [2, 16], strides = [1, 1]} : vector<2x96xf32> to vector<2x16xf32>
    %1751 = vector.extract_strided_slice %1721 {offsets = [0, 48], sizes = [2, 16], strides = [1, 1]} : vector<2x96xf32> to vector<2x16xf32>
    %1752 = arith.addf %1750, %1751 : vector<2x16xf32>
    %1753 = arith.negf %1752 : vector<2x16xf32>
    %1754 = math.exp %1753 : vector<2x16xf32>
    %cst_241 = arith.constant 1.000000e+00 : f32
    %1755 = vector.broadcast %cst_241 : f32 to vector<2x16xf32>
    %1756 = arith.addf %1755, %1754 : vector<2x16xf32>
    %1757 = arith.divf %1755, %1756 : vector<2x16xf32>
    %1758 = vector.extract_strided_slice %1717 {offsets = [0, 64], sizes = [2, 16], strides = [1, 1]} : vector<2x96xf32> to vector<2x16xf32>
    %1759 = vector.extract_strided_slice %1721 {offsets = [0, 64], sizes = [2, 16], strides = [1, 1]} : vector<2x96xf32> to vector<2x16xf32>
    %1760 = arith.addf %1758, %1759 : vector<2x16xf32>
    %1761 = arith.negf %1760 : vector<2x16xf32>
    %1762 = math.exp %1761 : vector<2x16xf32>
    %cst_242 = arith.constant 1.000000e+00 : f32
    %1763 = vector.broadcast %cst_242 : f32 to vector<2x16xf32>
    %1764 = arith.addf %1763, %1762 : vector<2x16xf32>
    %1765 = arith.divf %1763, %1764 : vector<2x16xf32>
    %1766 = vector.extract_strided_slice %1717 {offsets = [0, 80], sizes = [2, 16], strides = [1, 1]} : vector<2x96xf32> to vector<2x16xf32>
    %1767 = vector.extract_strided_slice %1721 {offsets = [0, 80], sizes = [2, 16], strides = [1, 1]} : vector<2x96xf32> to vector<2x16xf32>
    %1768 = arith.mulf %1757, %1767 : vector<2x16xf32>
    %1769 = arith.addf %1766, %1768 : vector<2x16xf32>
    %1770 = math.tanh %1769 : vector<2x16xf32>
    %cst_243 = arith.constant 1.000000e+00 : f32
    %1771 = vector.broadcast %cst_243 : f32 to vector<2x16xf32>
    %1772 = arith.subf %1771, %1765 : vector<2x16xf32>
    %1773 = arith.mulf %1772, %1770 : vector<2x16xf32>
    %1774 = arith.mulf %1765, %1723 : vector<2x16xf32>
    %1775 = arith.addf %1773, %1774 : vector<2x16xf32>
    %1776 = tpu.concatenate %1749, %1775 in 1 : vector<2x16xf32>, vector<2x16xf32> -> vector<2x32xf32>
    %1777 = vector.extract_strided_slice %1044 {offsets = [24, 0], sizes = [2, 96], strides = [1, 1]} : vector<32x96xf32> to vector<2x96xf32>
    %1778 = vector.extract_strided_slice %1044 {offsets = [6, 0], sizes = [2, 96], strides = [1, 1]} : vector<32x96xf32> to vector<2x96xf32>
    %1779 = arith.truncf %1776 : vector<2x32xf32> to vector<2x32xbf16>
    %cst_244 = arith.constant dense<0.000000e+00> : vector<2x96xf32>
    %1780 = tpu.matmul %1779, %1023, %cst_244 {dimension_numbers = #tpu.dot_dimension_numbers<[1], [0], [0], [1], [0, 0, 1, 1], [], []>} : vector<2x32xbf16>, vector<32x96xbf16>, vector<2x96xf32> -> vector<2x96xf32>
    %1781 = vector.broadcast %1024 : vector<1x96xf32> to vector<2x96xf32>
    %1782 = arith.addf %1780, %1781 : vector<2x96xf32>
    %1783 = vector.extract_strided_slice %1776 {offsets = [0, 0], sizes = [2, 16], strides = [1, 1]} : vector<2x32xf32> to vector<2x16xf32>
    %1784 = vector.extract_strided_slice %1776 {offsets = [0, 16], sizes = [2, 16], strides = [1, 1]} : vector<2x32xf32> to vector<2x16xf32>
    %1785 = vector.extract_strided_slice %1777 {offsets = [0, 0], sizes = [2, 16], strides = [1, 1]} : vector<2x96xf32> to vector<2x16xf32>
    %1786 = vector.extract_strided_slice %1782 {offsets = [0, 0], sizes = [2, 16], strides = [1, 1]} : vector<2x96xf32> to vector<2x16xf32>
    %1787 = arith.addf %1785, %1786 : vector<2x16xf32>
    %1788 = arith.negf %1787 : vector<2x16xf32>
    %1789 = math.exp %1788 : vector<2x16xf32>
    %cst_245 = arith.constant 1.000000e+00 : f32
    %1790 = vector.broadcast %cst_245 : f32 to vector<2x16xf32>
    %1791 = arith.addf %1790, %1789 : vector<2x16xf32>
    %1792 = arith.divf %1790, %1791 : vector<2x16xf32>
    %1793 = vector.extract_strided_slice %1777 {offsets = [0, 16], sizes = [2, 16], strides = [1, 1]} : vector<2x96xf32> to vector<2x16xf32>
    %1794 = vector.extract_strided_slice %1782 {offsets = [0, 16], sizes = [2, 16], strides = [1, 1]} : vector<2x96xf32> to vector<2x16xf32>
    %1795 = arith.addf %1793, %1794 : vector<2x16xf32>
    %1796 = arith.negf %1795 : vector<2x16xf32>
    %1797 = math.exp %1796 : vector<2x16xf32>
    %cst_246 = arith.constant 1.000000e+00 : f32
    %1798 = vector.broadcast %cst_246 : f32 to vector<2x16xf32>
    %1799 = arith.addf %1798, %1797 : vector<2x16xf32>
    %1800 = arith.divf %1798, %1799 : vector<2x16xf32>
    %1801 = vector.extract_strided_slice %1777 {offsets = [0, 32], sizes = [2, 16], strides = [1, 1]} : vector<2x96xf32> to vector<2x16xf32>
    %1802 = vector.extract_strided_slice %1782 {offsets = [0, 32], sizes = [2, 16], strides = [1, 1]} : vector<2x96xf32> to vector<2x16xf32>
    %1803 = arith.mulf %1792, %1802 : vector<2x16xf32>
    %1804 = arith.addf %1801, %1803 : vector<2x16xf32>
    %1805 = math.tanh %1804 : vector<2x16xf32>
    %cst_247 = arith.constant 1.000000e+00 : f32
    %1806 = vector.broadcast %cst_247 : f32 to vector<2x16xf32>
    %1807 = arith.subf %1806, %1800 : vector<2x16xf32>
    %1808 = arith.mulf %1807, %1805 : vector<2x16xf32>
    %1809 = arith.mulf %1800, %1783 : vector<2x16xf32>
    %1810 = arith.addf %1808, %1809 : vector<2x16xf32>
    %1811 = vector.extract_strided_slice %1778 {offsets = [0, 48], sizes = [2, 16], strides = [1, 1]} : vector<2x96xf32> to vector<2x16xf32>
    %1812 = vector.extract_strided_slice %1782 {offsets = [0, 48], sizes = [2, 16], strides = [1, 1]} : vector<2x96xf32> to vector<2x16xf32>
    %1813 = arith.addf %1811, %1812 : vector<2x16xf32>
    %1814 = arith.negf %1813 : vector<2x16xf32>
    %1815 = math.exp %1814 : vector<2x16xf32>
    %cst_248 = arith.constant 1.000000e+00 : f32
    %1816 = vector.broadcast %cst_248 : f32 to vector<2x16xf32>
    %1817 = arith.addf %1816, %1815 : vector<2x16xf32>
    %1818 = arith.divf %1816, %1817 : vector<2x16xf32>
    %1819 = vector.extract_strided_slice %1778 {offsets = [0, 64], sizes = [2, 16], strides = [1, 1]} : vector<2x96xf32> to vector<2x16xf32>
    %1820 = vector.extract_strided_slice %1782 {offsets = [0, 64], sizes = [2, 16], strides = [1, 1]} : vector<2x96xf32> to vector<2x16xf32>
    %1821 = arith.addf %1819, %1820 : vector<2x16xf32>
    %1822 = arith.negf %1821 : vector<2x16xf32>
    %1823 = math.exp %1822 : vector<2x16xf32>
    %cst_249 = arith.constant 1.000000e+00 : f32
    %1824 = vector.broadcast %cst_249 : f32 to vector<2x16xf32>
    %1825 = arith.addf %1824, %1823 : vector<2x16xf32>
    %1826 = arith.divf %1824, %1825 : vector<2x16xf32>
    %1827 = vector.extract_strided_slice %1778 {offsets = [0, 80], sizes = [2, 16], strides = [1, 1]} : vector<2x96xf32> to vector<2x16xf32>
    %1828 = vector.extract_strided_slice %1782 {offsets = [0, 80], sizes = [2, 16], strides = [1, 1]} : vector<2x96xf32> to vector<2x16xf32>
    %1829 = arith.mulf %1818, %1828 : vector<2x16xf32>
    %1830 = arith.addf %1827, %1829 : vector<2x16xf32>
    %1831 = math.tanh %1830 : vector<2x16xf32>
    %cst_250 = arith.constant 1.000000e+00 : f32
    %1832 = vector.broadcast %cst_250 : f32 to vector<2x16xf32>
    %1833 = arith.subf %1832, %1826 : vector<2x16xf32>
    %1834 = arith.mulf %1833, %1831 : vector<2x16xf32>
    %1835 = arith.mulf %1826, %1784 : vector<2x16xf32>
    %1836 = arith.addf %1834, %1835 : vector<2x16xf32>
    %1837 = tpu.concatenate %1810, %1836 in 1 : vector<2x16xf32>, vector<2x16xf32> -> vector<2x32xf32>
    %1838 = vector.extract_strided_slice %1044 {offsets = [26, 0], sizes = [2, 96], strides = [1, 1]} : vector<32x96xf32> to vector<2x96xf32>
    %1839 = vector.extract_strided_slice %1044 {offsets = [4, 0], sizes = [2, 96], strides = [1, 1]} : vector<32x96xf32> to vector<2x96xf32>
    %1840 = arith.truncf %1837 : vector<2x32xf32> to vector<2x32xbf16>
    %cst_251 = arith.constant dense<0.000000e+00> : vector<2x96xf32>
    %1841 = tpu.matmul %1840, %1023, %cst_251 {dimension_numbers = #tpu.dot_dimension_numbers<[1], [0], [0], [1], [0, 0, 1, 1], [], []>} : vector<2x32xbf16>, vector<32x96xbf16>, vector<2x96xf32> -> vector<2x96xf32>
    %1842 = vector.broadcast %1024 : vector<1x96xf32> to vector<2x96xf32>
    %1843 = arith.addf %1841, %1842 : vector<2x96xf32>
    %1844 = vector.extract_strided_slice %1837 {offsets = [0, 0], sizes = [2, 16], strides = [1, 1]} : vector<2x32xf32> to vector<2x16xf32>
    %1845 = vector.extract_strided_slice %1837 {offsets = [0, 16], sizes = [2, 16], strides = [1, 1]} : vector<2x32xf32> to vector<2x16xf32>
    %1846 = vector.extract_strided_slice %1838 {offsets = [0, 0], sizes = [2, 16], strides = [1, 1]} : vector<2x96xf32> to vector<2x16xf32>
    %1847 = vector.extract_strided_slice %1843 {offsets = [0, 0], sizes = [2, 16], strides = [1, 1]} : vector<2x96xf32> to vector<2x16xf32>
    %1848 = arith.addf %1846, %1847 : vector<2x16xf32>
    %1849 = arith.negf %1848 : vector<2x16xf32>
    %1850 = math.exp %1849 : vector<2x16xf32>
    %cst_252 = arith.constant 1.000000e+00 : f32
    %1851 = vector.broadcast %cst_252 : f32 to vector<2x16xf32>
    %1852 = arith.addf %1851, %1850 : vector<2x16xf32>
    %1853 = arith.divf %1851, %1852 : vector<2x16xf32>
    %1854 = vector.extract_strided_slice %1838 {offsets = [0, 16], sizes = [2, 16], strides = [1, 1]} : vector<2x96xf32> to vector<2x16xf32>
    %1855 = vector.extract_strided_slice %1843 {offsets = [0, 16], sizes = [2, 16], strides = [1, 1]} : vector<2x96xf32> to vector<2x16xf32>
    %1856 = arith.addf %1854, %1855 : vector<2x16xf32>
    %1857 = arith.negf %1856 : vector<2x16xf32>
    %1858 = math.exp %1857 : vector<2x16xf32>
    %cst_253 = arith.constant 1.000000e+00 : f32
    %1859 = vector.broadcast %cst_253 : f32 to vector<2x16xf32>
    %1860 = arith.addf %1859, %1858 : vector<2x16xf32>
    %1861 = arith.divf %1859, %1860 : vector<2x16xf32>
    %1862 = vector.extract_strided_slice %1838 {offsets = [0, 32], sizes = [2, 16], strides = [1, 1]} : vector<2x96xf32> to vector<2x16xf32>
    %1863 = vector.extract_strided_slice %1843 {offsets = [0, 32], sizes = [2, 16], strides = [1, 1]} : vector<2x96xf32> to vector<2x16xf32>
    %1864 = arith.mulf %1853, %1863 : vector<2x16xf32>
    %1865 = arith.addf %1862, %1864 : vector<2x16xf32>
    %1866 = math.tanh %1865 : vector<2x16xf32>
    %cst_254 = arith.constant 1.000000e+00 : f32
    %1867 = vector.broadcast %cst_254 : f32 to vector<2x16xf32>
    %1868 = arith.subf %1867, %1861 : vector<2x16xf32>
    %1869 = arith.mulf %1868, %1866 : vector<2x16xf32>
    %1870 = arith.mulf %1861, %1844 : vector<2x16xf32>
    %1871 = arith.addf %1869, %1870 : vector<2x16xf32>
    %1872 = vector.extract_strided_slice %1839 {offsets = [0, 48], sizes = [2, 16], strides = [1, 1]} : vector<2x96xf32> to vector<2x16xf32>
    %1873 = vector.extract_strided_slice %1843 {offsets = [0, 48], sizes = [2, 16], strides = [1, 1]} : vector<2x96xf32> to vector<2x16xf32>
    %1874 = arith.addf %1872, %1873 : vector<2x16xf32>
    %1875 = arith.negf %1874 : vector<2x16xf32>
    %1876 = math.exp %1875 : vector<2x16xf32>
    %cst_255 = arith.constant 1.000000e+00 : f32
    %1877 = vector.broadcast %cst_255 : f32 to vector<2x16xf32>
    %1878 = arith.addf %1877, %1876 : vector<2x16xf32>
    %1879 = arith.divf %1877, %1878 : vector<2x16xf32>
    %1880 = vector.extract_strided_slice %1839 {offsets = [0, 64], sizes = [2, 16], strides = [1, 1]} : vector<2x96xf32> to vector<2x16xf32>
    %1881 = vector.extract_strided_slice %1843 {offsets = [0, 64], sizes = [2, 16], strides = [1, 1]} : vector<2x96xf32> to vector<2x16xf32>
    %1882 = arith.addf %1880, %1881 : vector<2x16xf32>
    %1883 = arith.negf %1882 : vector<2x16xf32>
    %1884 = math.exp %1883 : vector<2x16xf32>
    %cst_256 = arith.constant 1.000000e+00 : f32
    %1885 = vector.broadcast %cst_256 : f32 to vector<2x16xf32>
    %1886 = arith.addf %1885, %1884 : vector<2x16xf32>
    %1887 = arith.divf %1885, %1886 : vector<2x16xf32>
    %1888 = vector.extract_strided_slice %1839 {offsets = [0, 80], sizes = [2, 16], strides = [1, 1]} : vector<2x96xf32> to vector<2x16xf32>
    %1889 = vector.extract_strided_slice %1843 {offsets = [0, 80], sizes = [2, 16], strides = [1, 1]} : vector<2x96xf32> to vector<2x16xf32>
    %1890 = arith.mulf %1879, %1889 : vector<2x16xf32>
    %1891 = arith.addf %1888, %1890 : vector<2x16xf32>
    %1892 = math.tanh %1891 : vector<2x16xf32>
    %cst_257 = arith.constant 1.000000e+00 : f32
    %1893 = vector.broadcast %cst_257 : f32 to vector<2x16xf32>
    %1894 = arith.subf %1893, %1887 : vector<2x16xf32>
    %1895 = arith.mulf %1894, %1892 : vector<2x16xf32>
    %1896 = arith.mulf %1887, %1845 : vector<2x16xf32>
    %1897 = arith.addf %1895, %1896 : vector<2x16xf32>
    %1898 = tpu.concatenate %1871, %1897 in 1 : vector<2x16xf32>, vector<2x16xf32> -> vector<2x32xf32>
    %1899 = vector.extract_strided_slice %1044 {offsets = [28, 0], sizes = [2, 96], strides = [1, 1]} : vector<32x96xf32> to vector<2x96xf32>
    %1900 = vector.extract_strided_slice %1044 {offsets = [2, 0], sizes = [2, 96], strides = [1, 1]} : vector<32x96xf32> to vector<2x96xf32>
    %1901 = arith.truncf %1898 : vector<2x32xf32> to vector<2x32xbf16>
    %cst_258 = arith.constant dense<0.000000e+00> : vector<2x96xf32>
    %1902 = tpu.matmul %1901, %1023, %cst_258 {dimension_numbers = #tpu.dot_dimension_numbers<[1], [0], [0], [1], [0, 0, 1, 1], [], []>} : vector<2x32xbf16>, vector<32x96xbf16>, vector<2x96xf32> -> vector<2x96xf32>
    %1903 = vector.broadcast %1024 : vector<1x96xf32> to vector<2x96xf32>
    %1904 = arith.addf %1902, %1903 : vector<2x96xf32>
    %1905 = vector.extract_strided_slice %1898 {offsets = [0, 0], sizes = [2, 16], strides = [1, 1]} : vector<2x32xf32> to vector<2x16xf32>
    %1906 = vector.extract_strided_slice %1898 {offsets = [0, 16], sizes = [2, 16], strides = [1, 1]} : vector<2x32xf32> to vector<2x16xf32>
    %1907 = vector.extract_strided_slice %1899 {offsets = [0, 0], sizes = [2, 16], strides = [1, 1]} : vector<2x96xf32> to vector<2x16xf32>
    %1908 = vector.extract_strided_slice %1904 {offsets = [0, 0], sizes = [2, 16], strides = [1, 1]} : vector<2x96xf32> to vector<2x16xf32>
    %1909 = arith.addf %1907, %1908 : vector<2x16xf32>
    %1910 = arith.negf %1909 : vector<2x16xf32>
    %1911 = math.exp %1910 : vector<2x16xf32>
    %cst_259 = arith.constant 1.000000e+00 : f32
    %1912 = vector.broadcast %cst_259 : f32 to vector<2x16xf32>
    %1913 = arith.addf %1912, %1911 : vector<2x16xf32>
    %1914 = arith.divf %1912, %1913 : vector<2x16xf32>
    %1915 = vector.extract_strided_slice %1899 {offsets = [0, 16], sizes = [2, 16], strides = [1, 1]} : vector<2x96xf32> to vector<2x16xf32>
    %1916 = vector.extract_strided_slice %1904 {offsets = [0, 16], sizes = [2, 16], strides = [1, 1]} : vector<2x96xf32> to vector<2x16xf32>
    %1917 = arith.addf %1915, %1916 : vector<2x16xf32>
    %1918 = arith.negf %1917 : vector<2x16xf32>
    %1919 = math.exp %1918 : vector<2x16xf32>
    %cst_260 = arith.constant 1.000000e+00 : f32
    %1920 = vector.broadcast %cst_260 : f32 to vector<2x16xf32>
    %1921 = arith.addf %1920, %1919 : vector<2x16xf32>
    %1922 = arith.divf %1920, %1921 : vector<2x16xf32>
    %1923 = vector.extract_strided_slice %1899 {offsets = [0, 32], sizes = [2, 16], strides = [1, 1]} : vector<2x96xf32> to vector<2x16xf32>
    %1924 = vector.extract_strided_slice %1904 {offsets = [0, 32], sizes = [2, 16], strides = [1, 1]} : vector<2x96xf32> to vector<2x16xf32>
    %1925 = arith.mulf %1914, %1924 : vector<2x16xf32>
    %1926 = arith.addf %1923, %1925 : vector<2x16xf32>
    %1927 = math.tanh %1926 : vector<2x16xf32>
    %cst_261 = arith.constant 1.000000e+00 : f32
    %1928 = vector.broadcast %cst_261 : f32 to vector<2x16xf32>
    %1929 = arith.subf %1928, %1922 : vector<2x16xf32>
    %1930 = arith.mulf %1929, %1927 : vector<2x16xf32>
    %1931 = arith.mulf %1922, %1905 : vector<2x16xf32>
    %1932 = arith.addf %1930, %1931 : vector<2x16xf32>
    %1933 = vector.extract_strided_slice %1900 {offsets = [0, 48], sizes = [2, 16], strides = [1, 1]} : vector<2x96xf32> to vector<2x16xf32>
    %1934 = vector.extract_strided_slice %1904 {offsets = [0, 48], sizes = [2, 16], strides = [1, 1]} : vector<2x96xf32> to vector<2x16xf32>
    %1935 = arith.addf %1933, %1934 : vector<2x16xf32>
    %1936 = arith.negf %1935 : vector<2x16xf32>
    %1937 = math.exp %1936 : vector<2x16xf32>
    %cst_262 = arith.constant 1.000000e+00 : f32
    %1938 = vector.broadcast %cst_262 : f32 to vector<2x16xf32>
    %1939 = arith.addf %1938, %1937 : vector<2x16xf32>
    %1940 = arith.divf %1938, %1939 : vector<2x16xf32>
    %1941 = vector.extract_strided_slice %1900 {offsets = [0, 64], sizes = [2, 16], strides = [1, 1]} : vector<2x96xf32> to vector<2x16xf32>
    %1942 = vector.extract_strided_slice %1904 {offsets = [0, 64], sizes = [2, 16], strides = [1, 1]} : vector<2x96xf32> to vector<2x16xf32>
    %1943 = arith.addf %1941, %1942 : vector<2x16xf32>
    %1944 = arith.negf %1943 : vector<2x16xf32>
    %1945 = math.exp %1944 : vector<2x16xf32>
    %cst_263 = arith.constant 1.000000e+00 : f32
    %1946 = vector.broadcast %cst_263 : f32 to vector<2x16xf32>
    %1947 = arith.addf %1946, %1945 : vector<2x16xf32>
    %1948 = arith.divf %1946, %1947 : vector<2x16xf32>
    %1949 = vector.extract_strided_slice %1900 {offsets = [0, 80], sizes = [2, 16], strides = [1, 1]} : vector<2x96xf32> to vector<2x16xf32>
    %1950 = vector.extract_strided_slice %1904 {offsets = [0, 80], sizes = [2, 16], strides = [1, 1]} : vector<2x96xf32> to vector<2x16xf32>
    %1951 = arith.mulf %1940, %1950 : vector<2x16xf32>
    %1952 = arith.addf %1949, %1951 : vector<2x16xf32>
    %1953 = math.tanh %1952 : vector<2x16xf32>
    %cst_264 = arith.constant 1.000000e+00 : f32
    %1954 = vector.broadcast %cst_264 : f32 to vector<2x16xf32>
    %1955 = arith.subf %1954, %1948 : vector<2x16xf32>
    %1956 = arith.mulf %1955, %1953 : vector<2x16xf32>
    %1957 = arith.mulf %1948, %1906 : vector<2x16xf32>
    %1958 = arith.addf %1956, %1957 : vector<2x16xf32>
    %1959 = tpu.concatenate %1932, %1958 in 1 : vector<2x16xf32>, vector<2x16xf32> -> vector<2x32xf32>
    %1960 = vector.extract_strided_slice %1044 {offsets = [30, 0], sizes = [2, 96], strides = [1, 1]} : vector<32x96xf32> to vector<2x96xf32>
    %1961 = vector.extract_strided_slice %1044 {offsets = [0, 0], sizes = [2, 96], strides = [1, 1]} : vector<32x96xf32> to vector<2x96xf32>
    %1962 = arith.truncf %1959 : vector<2x32xf32> to vector<2x32xbf16>
    %cst_265 = arith.constant dense<0.000000e+00> : vector<2x96xf32>
    %1963 = tpu.matmul %1962, %1023, %cst_265 {dimension_numbers = #tpu.dot_dimension_numbers<[1], [0], [0], [1], [0, 0, 1, 1], [], []>} : vector<2x32xbf16>, vector<32x96xbf16>, vector<2x96xf32> -> vector<2x96xf32>
    %1964 = vector.broadcast %1024 : vector<1x96xf32> to vector<2x96xf32>
    %1965 = arith.addf %1963, %1964 : vector<2x96xf32>
    %1966 = vector.extract_strided_slice %1959 {offsets = [0, 0], sizes = [2, 16], strides = [1, 1]} : vector<2x32xf32> to vector<2x16xf32>
    %1967 = vector.extract_strided_slice %1959 {offsets = [0, 16], sizes = [2, 16], strides = [1, 1]} : vector<2x32xf32> to vector<2x16xf32>
    %1968 = vector.extract_strided_slice %1960 {offsets = [0, 0], sizes = [2, 16], strides = [1, 1]} : vector<2x96xf32> to vector<2x16xf32>
    %1969 = vector.extract_strided_slice %1965 {offsets = [0, 0], sizes = [2, 16], strides = [1, 1]} : vector<2x96xf32> to vector<2x16xf32>
    %1970 = arith.addf %1968, %1969 : vector<2x16xf32>
    %1971 = arith.negf %1970 : vector<2x16xf32>
    %1972 = math.exp %1971 : vector<2x16xf32>
    %cst_266 = arith.constant 1.000000e+00 : f32
    %1973 = vector.broadcast %cst_266 : f32 to vector<2x16xf32>
    %1974 = arith.addf %1973, %1972 : vector<2x16xf32>
    %1975 = arith.divf %1973, %1974 : vector<2x16xf32>
    %1976 = vector.extract_strided_slice %1960 {offsets = [0, 16], sizes = [2, 16], strides = [1, 1]} : vector<2x96xf32> to vector<2x16xf32>
    %1977 = vector.extract_strided_slice %1965 {offsets = [0, 16], sizes = [2, 16], strides = [1, 1]} : vector<2x96xf32> to vector<2x16xf32>
    %1978 = arith.addf %1976, %1977 : vector<2x16xf32>
    %1979 = arith.negf %1978 : vector<2x16xf32>
    %1980 = math.exp %1979 : vector<2x16xf32>
    %cst_267 = arith.constant 1.000000e+00 : f32
    %1981 = vector.broadcast %cst_267 : f32 to vector<2x16xf32>
    %1982 = arith.addf %1981, %1980 : vector<2x16xf32>
    %1983 = arith.divf %1981, %1982 : vector<2x16xf32>
    %1984 = vector.extract_strided_slice %1960 {offsets = [0, 32], sizes = [2, 16], strides = [1, 1]} : vector<2x96xf32> to vector<2x16xf32>
    %1985 = vector.extract_strided_slice %1965 {offsets = [0, 32], sizes = [2, 16], strides = [1, 1]} : vector<2x96xf32> to vector<2x16xf32>
    %1986 = arith.mulf %1975, %1985 : vector<2x16xf32>
    %1987 = arith.addf %1984, %1986 : vector<2x16xf32>
    %1988 = math.tanh %1987 : vector<2x16xf32>
    %cst_268 = arith.constant 1.000000e+00 : f32
    %1989 = vector.broadcast %cst_268 : f32 to vector<2x16xf32>
    %1990 = arith.subf %1989, %1983 : vector<2x16xf32>
    %1991 = arith.mulf %1990, %1988 : vector<2x16xf32>
    %1992 = arith.mulf %1983, %1966 : vector<2x16xf32>
    %1993 = arith.addf %1991, %1992 : vector<2x16xf32>
    %1994 = vector.extract_strided_slice %1961 {offsets = [0, 48], sizes = [2, 16], strides = [1, 1]} : vector<2x96xf32> to vector<2x16xf32>
    %1995 = vector.extract_strided_slice %1965 {offsets = [0, 48], sizes = [2, 16], strides = [1, 1]} : vector<2x96xf32> to vector<2x16xf32>
    %1996 = arith.addf %1994, %1995 : vector<2x16xf32>
    %1997 = arith.negf %1996 : vector<2x16xf32>
    %1998 = math.exp %1997 : vector<2x16xf32>
    %cst_269 = arith.constant 1.000000e+00 : f32
    %1999 = vector.broadcast %cst_269 : f32 to vector<2x16xf32>
    %2000 = arith.addf %1999, %1998 : vector<2x16xf32>
    %2001 = arith.divf %1999, %2000 : vector<2x16xf32>
    %2002 = vector.extract_strided_slice %1961 {offsets = [0, 64], sizes = [2, 16], strides = [1, 1]} : vector<2x96xf32> to vector<2x16xf32>
    %2003 = vector.extract_strided_slice %1965 {offsets = [0, 64], sizes = [2, 16], strides = [1, 1]} : vector<2x96xf32> to vector<2x16xf32>
    %2004 = arith.addf %2002, %2003 : vector<2x16xf32>
    %2005 = arith.negf %2004 : vector<2x16xf32>
    %2006 = math.exp %2005 : vector<2x16xf32>
    %cst_270 = arith.constant 1.000000e+00 : f32
    %2007 = vector.broadcast %cst_270 : f32 to vector<2x16xf32>
    %2008 = arith.addf %2007, %2006 : vector<2x16xf32>
    %2009 = arith.divf %2007, %2008 : vector<2x16xf32>
    %2010 = vector.extract_strided_slice %1961 {offsets = [0, 80], sizes = [2, 16], strides = [1, 1]} : vector<2x96xf32> to vector<2x16xf32>
    %2011 = vector.extract_strided_slice %1965 {offsets = [0, 80], sizes = [2, 16], strides = [1, 1]} : vector<2x96xf32> to vector<2x16xf32>
    %2012 = arith.mulf %2001, %2011 : vector<2x16xf32>
    %2013 = arith.addf %2010, %2012 : vector<2x16xf32>
    %2014 = math.tanh %2013 : vector<2x16xf32>
    %cst_271 = arith.constant 1.000000e+00 : f32
    %2015 = vector.broadcast %cst_271 : f32 to vector<2x16xf32>
    %2016 = arith.subf %2015, %2009 : vector<2x16xf32>
    %2017 = arith.mulf %2016, %2014 : vector<2x16xf32>
    %2018 = arith.mulf %2009, %1967 : vector<2x16xf32>
    %2019 = arith.addf %2017, %2018 : vector<2x16xf32>
    %2020 = tpu.concatenate %1078, %1139, %1200, %1261, %1322, %1383, %1444, %1505, %1566, %1627, %1688, %1749, %1810, %1871, %1932, %1993 in 0 : vector<2x16xf32>, vector<2x16xf32>, vector<2x16xf32>, vector<2x16xf32>, vector<2x16xf32>, vector<2x16xf32>, vector<2x16xf32>, vector<2x16xf32>, vector<2x16xf32>, vector<2x16xf32>, vector<2x16xf32>, vector<2x16xf32>, vector<2x16xf32>, vector<2x16xf32>, vector<2x16xf32>, vector<2x16xf32> -> vector<32x16xf32>
    %2021 = tpu.concatenate %2019, %1958, %1897, %1836, %1775, %1714, %1653, %1592, %1531, %1470, %1409, %1348, %1287, %1226, %1165, %1104 in 0 : vector<2x16xf32>, vector<2x16xf32>, vector<2x16xf32>, vector<2x16xf32>, vector<2x16xf32>, vector<2x16xf32>, vector<2x16xf32>, vector<2x16xf32>, vector<2x16xf32>, vector<2x16xf32>, vector<2x16xf32>, vector<2x16xf32>, vector<2x16xf32>, vector<2x16xf32>, vector<2x16xf32>, vector<2x16xf32> -> vector<32x16xf32>
    %2022 = tpu.concatenate %2020, %2021 in 1 : vector<32x16xf32>, vector<32x16xf32> -> vector<32x32xf32>
    %2023 = vector.broadcast %1025 : vector<1x32xf32> to vector<32x32xf32>
    %2024 = arith.mulf %2022, %2023 : vector<32x32xf32>
    %2025 = vector.broadcast %1026 : vector<1x32xf32> to vector<32x32xf32>
    %2026 = arith.addf %2024, %2025 : vector<32x32xf32>
    %2027 = math.tanh %2026 : vector<32x32xf32>
    %c0_272 = arith.constant 0 : index
    %c0_273 = arith.constant 0 : index
    %2028 = vector.load %arg20[%c0_272, %c0_273] : memref<32x32xf32, #tpu.memory_space<vmem>>, vector<32x32xf32>
    tpu.vector_store %arg20[%c0_272, %c0_273], %2027 {strides = array<i32>} : memref<32x32xf32, #tpu.memory_space<vmem>>, vector<32x32xf32>,
    return
  }
}

</mosaic_0001>

<bundles_post_ra>
// kernel: encoder_forward.1
= control target key start
LH: loop header
LB: loop body
LE: loop exit
PB: predicated region body
PF: predicated region fallthrough
CT: control target
= control target key end

     0   :  { %vm93_vm0 = vcmask 1044480   ;;  %vm86_vm1 = vcmask 80896   ;;  %v5811_v8 = vmov 0   ;;  %vm188_vm2 = vcmask 1043456   ;;  %s5813_s26 = smov 32   ;;  %s5814_s27 = smov 64   ;;  %s7317_s2 = inlined_call_operand.vmem [shape: bf16[10,32], index: 2, kind: input, shape index: {}]   ;;  %s7318_s0 = inlined_call_operand.vmem [shape: f32[32,10], index: 0, kind: input, shape index: {}]   ;;  %s7319_s4 = inlined_call_operand.vmem [shape: bf16[160,32], index: 4, kind: input, shape index: {}]   ;;  %s7320_s3 = inlined_call_operand.vmem [shape: f32[1,32], index: 3, kind: input, shape index: {}]   ;;  %s7321_s6 = inlined_call_operand.vmem [shape: bf16[32,96], index: 6, kind: input, shape index: {}]   ;;  %s7322_s8 = inlined_call_operand.vmem [shape: bf16[32,96], index: 8, kind: input, shape index: {}]   ;;  %s7323_s5 = inlined_call_operand.vmem [shape: f32[1,32], index: 5, kind: input, shape index: {}]   ;;  %s7324_s1 = inlined_call_operand.vmem [shape: f32[2,32], index: 1, kind: input, shape index: {}]   ;;  %s7325_s7 = inlined_call_operand.vmem [shape: f32[1,96], index: 7, kind: input, shape index: {}]   ;;  %s7326_s9 = inlined_call_operand.vmem [shape: f32[1,96], index: 9, kind: input, shape index: {}]   ;;  %s7327_s12 = inlined_call_operand.vmem [shape: bf16[160,32], index: 12, kind: input, shape index: {}]   ;;  %s7328_s10 = inlined_call_operand.vmem [shape: f32[1,32], index: 10, kind: input, shape index: {}]   ;;  %s7329_s11 = inlined_call_operand.vmem [shape: f32[1,32], index: 11, kind: input, shape index: {}]   ;;  %s7330_s14 = inlined_call_operand.vmem [shape: bf16[32,96], index: 14, kind: input, shape index: {}]   ;;  %s7331_s16 = inlined_call_operand.vmem [shape: bf16[32,96], index: 16, kind: input, shape index: {}]   ;;  %s7332_s13 = inlined_call_operand.vmem [shape: f32[1,32], index: 13, kind: input, shape index: {}]   ;;  %s7333_s15 = inlined_call_operand.vmem [shape: f32[1,96], index: 15, kind: input, shape index: {}]   ;;  %s7334_s17 = inlined_call_operand.vmem [shape: f32[1,96], index: 17, kind: input, shape index: {}]   ;;  %s7335_s18 = inlined_call_operand.vmem [shape: f32[1,32], index: 18, kind: input, shape index: {}]   ;;  %s7336_s19 = inlined_call_operand.vmem [shape: f32[1,32], index: 19, kind: input, shape index: {}]   ;;  %s7337_s20 = inlined_call_operand.vmem [shape: f32[32,32], index: 20, kind: output, shape index: {}]  }
   0x1   :  { %7341 = sst [smem:[#allocation2_spill]] %s7317_s2  ;;  %361 = vmatprep.subr.bf16.mxu1 %v5811_v8  ;;  %vm270_vm3 = vcmask 261120   ;;  %vm248_vm4 = vcmask 1041408   ;;  %vm205_vm5 = vcmask 1045504   ;;  %vm275_vm6 = vcmask 523264   ;;  %s5818_s30 = smov 16  }
   0x2   :  { %7342 = sst [smem:[#allocation3_spill]] %s7318_s0  ;;  %s7346_s23 = sld [smem:[#allocation2_spill]]  ;;  %vm280_vm7 = vcmask 785408   ;;  %vm5816_vm8 = vmmov 0   ;;  %vm621_vm9 = vcmask 130048  }
   0x3   :  { %7343 = sst [smem:[#allocation4_spill]] %s7319_s4  ;;  %s7347_s25 = sld [smem:[#allocation3_spill]] }
   0x4   :  { %7344 = sst [smem:[#allocation5_spill]] %s7320_s3  ;;  %s7348_s21 = sld [smem:[#allocation4_spill]] }
   0x5   :  { %7345 = sst [smem:[#allocation6_spill]] %s7321_s6  ;;  %s5819_s2 = smov 112  }
   0x6   :  { %s7350_s29 = sld [smem:[#allocation6_spill]]  ;;  %s5820_s0 = smov 80  }
   0x8   :  { %v5376_v0 = vld [vmem:[%s7346_s23] sm:$0x1f]   ;;  %s7349_s23 = sld [smem:[#allocation5_spill]] }
   0x9   :  { %v66_v1 = vld [vmem:[%s7347_s25] sm:$0xff]  ;;  %v67_v2 = vld [vmem:[%s7347_s25 + $0x8] sm:$0xff]  ;;  %v68_v3 = vld [vmem:[%s7347_s25 + $0x10] sm:$0xff]  ;;  %5305 = vmatprep.subr.msk.bf16.mxu0 %vm93_vm0, %v5376_v0  ;;  %v95_v4 = vsel %vm93_vm0, %v5376_v0, 0 }
   0xa   :  { %v70_v5 = vpack.c.bf16 %v67_v2, %v66_v1  ;;  %v69_v6 = vld [vmem:[%s7347_s25 + $0x18] sm:$0xff]  ;;  %5028 = vmatpush3.bf16.msra.mxu0 %v95_v4  ;;  %v5377_v9 = vld [vmem:[%s7348_s21] sm:$0xff]   ;;  %v5378_v10 = vld [vmem:[%s7348_s21 + $0x8] sm:$0xff]  }
   0xb   :  { %v71_v7 = vpack.c.bf16 %v69_v6, %v68_v3  ;;  %362 = vmatpush1.bf16.msra.mxu1 %v5377_v9  ;;  %v5379_v11 = vld [vmem:[%s7348_s21 + $0x10] sm:$0xff]   ;;  %v5380_v12 = vld [vmem:[%s7348_s21 + $0x18] sm:$0xff]   ;;  %v5381_v13 = vld [vmem:[%s7348_s21 + $0x20] sm:$0xff]  }
   0xc   :  { %5029 = vmatprep.mubr.msk.bf16.mxu0 %vm86_vm1, %v70_v5  ;;  %363 = vmatprep.subr.bf16.mxu1 %v5811_v8  ;;  %v5382_v14 = vld [vmem:[%s7348_s21 + $0x28] sm:$0xff]   ;;  %v5383_v15 = vld [vmem:[%s7348_s21 + $0x30] sm:$0xff]   ;;  %v5384_v16 = vld [vmem:[%s7348_s21 + $0x38] sm:$0xff]  }
   0xd   :  { %5030 = vmatmul.mubr.msk.bf16.vlgmr.msra.gmra.mrb[0].mxu0 %vm86_vm1, %v71_v7  ;;  %v5385_v31 = vld [vmem:[%s7348_s21 + $0x40] sm:$0xff]   ;;  %v5386_v42 = vld [vmem:[%s7348_s21 + $0x48] sm:$0xff]   ;;  %s5812_s21 = smov 96  }
   0xe   :  { %v4774_v17 = vld [vmem:[%s7349_s23] ss:$0 sm:$0xff] }
   0xf   :  { %364 = vmatpush1.bf16.msra.mxu1 %v5378_v10 }
  0x10   :  { %365 = vmatprep.subr.bf16.mxu1 %v5811_v8 }
  0x13   :  { %366 = vmatpush1.bf16.msra.mxu1 %v5379_v11 }
  0x14   :  { %367 = vmatprep.subr.bf16.mxu1 %v5811_v8 }
  0x17   :  { %368 = vmatpush1.bf16.msra.mxu1 %v5380_v12 }
  0x18   :  { %369 = vmatprep.subr.bf16.mxu1 %v5811_v8 }
  0x1b   :  { %370 = vmatpush1.bf16.msra.mxu1 %v5381_v13 }
  0x1c   :  { %371 = vmatprep.subr.bf16.mxu1 %v5811_v8 }
  0x1f   :  { %372 = vmatpush1.bf16.msra.mxu1 %v5382_v14 }
  0x20   :  { %373 = vmatprep.subr.bf16.mxu1 %v5811_v8 }
  0x23   :  { %374 = vmatpush1.bf16.msra.mxu1 %v5383_v15 }
  0x24   :  { %375 = vmatprep.subr.bf16.mxu1 %v5811_v8 }
  0x27   :  { %376 = vmatpush1.bf16.msra.mxu1 %v5384_v16 }
  0x28   :  { %377 = vmatprep.subr.bf16.mxu1 %v5811_v8 }
  0x2b   :  { %378 = vmatpush1.bf16.msra.mxu1 %v5385_v31 }
  0x2c   :  { %379 = vmatprep.subr.bf16.mxu1 %v5811_v8 }
  0x2f   :  { %380 = vmatpush1.bf16.msra.mxu1 %v5386_v42 }
  0xe0   :  { %v5031_v18 = vpop.f32.mrb[0].mxu0 }
  0xe1   :  { %v140_v19 = vadd.f32 %v5031_v18, %v4774_v17  ;;  %v131_v20 = vpop.f32.mrb[1].mxu0 }
  0xe2   :  { %v132_v21 = vadd.f32 %v4774_v17, %v131_v20  ;;  %v5032_v22 = vpop.f32.mrb[2].mxu0 }
  0xe3   :  { %v148_v23 = vmax.f32 %v140_v19, 0.0  ;;  %v143_v24 = vadd.f32 %v5032_v22, %v4774_v17  ;;  %v134_v25 = vpop.f32.mrb[3].mxu0 }
  0xe4   :  { %v146_v26 = vmax.f32 %v132_v21, 0.0  ;;  %v135_v27 = vadd.f32 %v4774_v17, %v134_v25 }
  0xe5   :  { %v149_v28 = vmax.f32 %v143_v24, 0.0  ;;  %v192_v32 = vrot.slane %v148_v23, 4 }
  0xe6   :  { %v189_v29 = vrot.slane %v146_v26, 4  ;;  %v147_v30 = vmax.f32 %v135_v27, 0.0 }
  0xe7   :  { %v194_v33 = vrot.slane %v149_v28, 4 }
  0xe8   :  { %v5981_v34 = vsel %vm188_vm2, 0.0, %v189_v29  ;;  %v190_v35 = vrot.slane %v147_v30, 4 }
  0xe9   :  { %v5984_v36 = vsel %vm188_vm2, %v192_v32, %v194_v33  ;;  %v5987_v37 = vsel %vm188_vm2, %v194_v33, 0.0  ;;  %v227_v38 = vrot.slane %v5981_v34, 4  ;;  %v249_v41 = vrot.slane %v5981_v34, 6 }
  0xea   :  { %v213_v39 = vrot.slane %v5987_v37, 2  ;;  %v191_v40 = vsel %vm188_vm2, %v189_v29, %v190_v35  ;;  %v5998_v43 = vsel %vm188_vm2, %v190_v35, %v192_v32  ;;  %v206_v45 = vrot.slane %v5981_v34, 2 }
  0xeb   :  { %v250_v44 = vrot.slane %v191_v40, 6  ;;  %v207_v46 = vrot.slane %v191_v40, 2  ;;  %v286_v47 = vpack.c.bf16 %v5998_v43, %v191_v40  ;;  %v252_v48 = vrot.slane %v5998_v43, 6 }
  0xec   :  { %v209_v49 = vrot.slane %v5998_v43, 2  ;;  %v211_v50 = vrot.slane %v5984_v36, 2  ;;  %v228_v53 = vrot.slane %v191_v40, 4  ;;  %v230_v54 = vrot.slane %v5998_v43, 4 }
  0xed   :  { %v251_v51 = vsel %vm248_vm4, %v249_v41, %v250_v44  ;;  %v208_v52 = vsel %vm205_vm5, %v206_v45, %v207_v46  ;;  %v234_v55 = vrot.slane %v5987_v37, 4  ;;  %v256_v56 = vrot.slane %v5987_v37, 6  ;;  %4789 = vmatprep.mubr.msk.bf16.mxu1 %vm270_vm3, %v286_v47 }
  0xee   :  { %v253_v57 = vsel %vm248_vm4, %v250_v44, %v252_v48  ;;  %v210_v58 = vsel %vm205_vm5, %v207_v46, %v209_v49  ;;  %v212_v61 = vsel %vm205_vm5, %v209_v49, %v211_v50  ;;  %v214_v62 = vsel %vm205_vm5, %v211_v50, %v213_v39  ;;  %v6065_v49 = vld [vmem:[%s7322_s8 + $0x8] sm:$0xff]   ;;  %v4778_v50 = vld [vmem:[%s7323_s5] ss:$0 sm:$0xff] }
  0xef   :  { %v5326_v59 = vpack.i.bf16 %v253_v57, %v251_v51  ;;  %v5316_v60 = vpack.i.bf16 %v210_v58, %v208_v52  ;;  %v229_v63 = vsel %vm188_vm2, %v227_v38, %v228_v53  ;;  %v231_v0 = vsel %vm188_vm2, %v228_v53, %v230_v54 }
  0xf0   :  { %v254_v1 = vrot.slane %v5984_v36, 6  ;;  %v232_v2 = vrot.slane %v5984_v36, 4  ;;  %v5331_v3 = vpack.i.bf16 %v214_v62, %v212_v61  ;;  %v5321_v4 = vpack.i.bf16 %v231_v0, %v229_v63 }
  0xf1   :  { %5327 = vrot.lane.b32.xlu1 %v5326_v59, %s5812_s21  ;;  %5317 = vrot.lane.b32.xlu0 %v5316_v60, %s5813_s26  ;;  %v288_v38 = vpack.c.bf16 %v5987_v37, %v5984_v36  ;;  %v5815_v47 = vmov 0.0  }
  0xf2   :  { %v255_v5 = vsel %vm248_vm4, %v252_v48, %v254_v1  ;;  %v257_v6 = vsel %vm248_vm4, %v254_v1, %v256_v56  ;;  %v233_v7 = vsel %vm188_vm2, %v230_v54, %v232_v2  ;;  %v235_v9 = vsel %vm188_vm2, %v232_v2, %v234_v55  ;;  %5081 = vmatprep.subr.bf16.mxu1 %v5815_v47  ;;  %v6057_v48 = vld [vmem:[%s7322_s8] sm:$0xff]  }
  0xf3   :  { %v5341_v10 = vpack.i.bf16 %v257_v6, %v255_v5  ;;  %v5336_v11 = vpack.i.bf16 %v235_v9, %v233_v7  ;;  %v150_v5 = vld [vmem:[%s7324_s1] sm:$0x3] }
  0xf4   :  { %v6083_v6 = vpack.c.bf16 %v150_v5, %v150_v5  ;;  %v4791_v7 = vld [vmem:[%s7325_s7] ss:$0 sm:$0xff]  ;;  %s5817_s7 = smov 48  }
  0xf5   :  { %5332 = vrot.lane.b32.xlu1 %v5331_v3, %s5813_s26  ;;  %5322 = vrot.lane.b32.xlu0 %v5321_v4, %s5814_s27 }
  0xf9   :  { %5342 = vrot.lane.b32.xlu1 %v5341_v10, %s5812_s21  ;;  %5337 = vrot.lane.b32.xlu0 %v5336_v11, %s5814_s27 }
 0x163   :  { %v5328_v12 = vpop.permute.xlu1 %5327  ;;  %v5318_v13 = vpop.permute.xlu0 %5317 }
 0x164   :  { %v5320_v14 = vunpack.i.h.bf16 %v5318_v13  ;;  %v5319_v15 = vunpack.i.l.bf16 %v5318_v13  ;;  %v5330_v20 = vunpack.i.h.bf16 %v5328_v12  ;;  %v5329_v21 = vunpack.i.l.bf16 %v5328_v12 }
 0x166   :  { %v272_v22 = vsel %vm270_vm3, %v191_v40, %v5320_v14  ;;  %v271_v23 = vsel %vm270_vm3, %v5981_v34, %v5319_v15  ;;  %v6105_v15 = vld [vmem:[%s7326_s9] ss:$0 sm:$0xff] }
 0x167   :  { %v5333_v16 = vpop.permute.xlu1 %5332  ;;  %v5323_v17 = vpop.permute.xlu0 %5322 }
 0x168   :  { %v5325_v18 = vunpack.i.h.bf16 %v5323_v17  ;;  %v5324_v19 = vunpack.i.l.bf16 %v5323_v17  ;;  %v5335_v24 = vunpack.i.h.bf16 %v5333_v16  ;;  %v5334_v25 = vunpack.i.l.bf16 %v5333_v16 }
 0x16a   :  { %v276_v26 = vsel %vm275_vm6, %v271_v23, %v5324_v19  ;;  %v277_v27 = vsel %vm275_vm6, %v272_v22, %v5325_v18  ;;  %v274_v34 = vsel %vm270_vm3, %v5984_v36, %v5335_v24  ;;  %v273_v39 = vsel %vm270_vm3, %v5998_v43, %v5334_v25  ;;  %v5387_v36 = vld [vmem:[%s7350_s29] sm:$0xff]   ;;  %v5388_v43 = vld [vmem:[%s7350_s29 + $0x8] sm:$0xff]  }
 0x16b   :  { %v5343_v28 = vpop.permute.xlu1 %5342  ;;  %v5338_v29 = vpop.permute.xlu0 %5337  ;;  %v281_v30 = vsel %vm280_vm7, %v276_v26, %v5329_v21  ;;  %v282_v31 = vsel %vm280_vm7, %v277_v27, %v5330_v20  ;;  %5033 = vmatprep.subr.bf16.mxu0 %v5387_v36 }
 0x16c   :  { %v5340_v32 = vunpack.i.h.bf16 %v5338_v29  ;;  %v5339_v33 = vunpack.i.l.bf16 %v5338_v29  ;;  %v285_v35 = vpack.c.bf16 %v282_v31, %v281_v30  ;;  %v5345_v40 = vunpack.i.h.bf16 %v5343_v28  ;;  %5034 = vmatpush3.bf16.msra.mxu0 %v5387_v36 }
 0x16d   :  { %v5344_v41 = vunpack.i.l.bf16 %v5343_v28  ;;  %5035 = vmatprep.subr.bf16.mxu0 %v5388_v43 }
 0x16e   :  { %394 = vmatmul.mubr.bf16.vlgmr.msra.gmra.mrb[0].mxu1 %v285_v35  ;;  %v278_v42 = vsel %vm275_vm6, %v273_v39, %v5339_v33  ;;  %v279_v44 = vsel %vm275_vm6, %v274_v34, %v5340_v32 }
 0x16f   :  { %4790 = vmatprep.mubr.msk.bf16.mxu1 %vm270_vm3, %v288_v38  ;;  %v283_v45 = vsel %vm280_vm7, %v278_v42, %v5344_v41  ;;  %v284_v46 = vsel %vm280_vm7, %v279_v44, %v5345_v40  ;;  %5082 = vmatpush3.bf16.msra.mxu1 %v6057_v48  ;;  %v606_v40 = vrot.slane %v150_v5, 2 }
 0x170   :  { %v287_v37 = vpack.c.bf16 %v284_v46, %v283_v45  ;;  %5036 = vmatpush3.bf16.msra.mxu0 %v5388_v43  ;;  %5083 = vmatprep.subr.bf16.mxu1 %v5815_v47 }
 0x171   :  { %5041 = vmatprep.subr.bf16.mxu0 %v5815_v47 }
 0x173   :  { %5084 = vmatpush3.bf16.msra.mxu1 %v6065_v49 }
 0x174   :  { %5097 = vmatprep.subr.bf16.mxu1 %v5815_v47 }
 0x176   :  { %402 = vmatmul.mubr.bf16.gmra.mrb[4].mxu1 %v287_v37 }
 0x177   :  { %5085 = vmatprep.mubr.msk.bf16.mxu1 %vm5816_vm8, %v5815_v47 }
 0x241   :  { %v395_v51 = vpop.f32.mrb[0].mxu1 }
 0x242   :  { %v396_v52 = vadd.f32 %v4778_v50, %v395_v51  ;;  %v397_v53 = vpop.f32.mrb[1].mxu1 }
 0x243   :  { %v398_v54 = vpop.f32.mrb[2].mxu1 }
 0x244   :  { %v399_v55 = vadd.f32 %v4778_v50, %v398_v54  ;;  %v400_v56 = vpop.f32.mrb[3].mxu1  ;;  %v410_v57 = vmax.f32 %v396_v52, 0.0 }
 0x246   :  { %v411_v58 = vmax.f32 %v399_v55, 0.0 }
 0x248   :  { %v414_v59 = vpack.c.bf16 %v411_v58, %v410_v57 }
 0x249   :  { %v403_v60 = vpop.f32.mrb[4].mxu1 }
 0x24a   :  { %v404_v61 = vadd.f32 %v4778_v50, %v403_v60  ;;  %v405_v62 = vpop.f32.mrb[5].mxu1  ;;  %5037 = vmatprep.mubr.msk.bf16.mxu0 %vm270_vm3, %v414_v59 }
 0x24b   :  { %v406_v63 = vpop.f32.mrb[6].mxu1 }
 0x24c   :  { %v407_v0 = vadd.f32 %v4778_v50, %v406_v63  ;;  %v408_v1 = vpop.f32.mrb[7].mxu1  ;;  %v412_v2 = vmax.f32 %v404_v61, 0.0 }
 0x24e   :  { %v413_v3 = vmax.f32 %v407_v0, 0.0 }
 0x250   :  { %v415_v4 = vpack.c.bf16 %v413_v3, %v412_v2 }
 0x252   :  { %5038 = vmatmul.mubr.msk.bf16.vlgmr.msra.gmra.mrb[4].mxu0 %vm270_vm3, %v415_v4 }
 0x253   :  { %5042 = vmatpush3.bf16.msra.mxu0 %v6057_v48  ;;  %5045 = vmatprep.mubr.msk.bf16.mxu0 %vm5816_vm8, %v5815_v47 }
 0x254   :  { %5043 = vmatprep.subr.bf16.mxu0 %v5815_v47 }
 0x257   :  { %5044 = vmatpush3.bf16.msra.mxu0 %v6065_v49 }
 0x258   :  { %5049 = vmatprep.subr.bf16.mxu0 %v5815_v47 }
 0x25a   :  { %5046 = vmatmul.mubr.msk.bf16.vlgmr.msra.gmra.mrb[8].mxu0 %vm270_vm3, %v6083_v6 }
 0x25b   :  { %5050 = vmatpush3.bf16.msra.mxu0 %v6057_v48  ;;  %5053 = vmatprep.mubr.msk.bf16.mxu0 %vm5816_vm8, %v5815_v47 }
 0x25c   :  { %5051 = vmatprep.subr.bf16.mxu0 %v5815_v47 }
 0x25f   :  { %5052 = vmatpush3.bf16.msra.mxu0 %v6065_v49 }
 0x260   :  { %5057 = vmatprep.subr.bf16.mxu0 %v5815_v47 }
 0x325   :  { %v5039_v9 = vpop.f32.mrb[4].mxu0 }
 0x326   :  { %v6098_v10 = vadd.f32 %v5039_v9, %v4791_v7  ;;  %v474_v11 = vpop.f32.mrb[5].mxu0 }
 0x327   :  { %v5040_v12 = vpop.f32.mrb[6].mxu0  ;;  %v6110_v22 = vadd.f32 %v4791_v7, %v474_v11 }
 0x328   :  { %v477_v13 = vpop.f32.mrb[7].mxu0  ;;  %v6112_v23 = vadd.f32 %v5040_v12, %v4791_v7 }
 0x329   :  { %v6100_v14 = vadd.f32 %v4791_v7, %v477_v13 }
 0x32d   :  { %v545_v16 = vpop.f32.mrb[8].mxu0 }
 0x32e   :  { %v546_v17 = vadd.f32 %v6105_v15, %v545_v16  ;;  %v5047_v18 = vpop.f32.mrb[9].mxu0 }
 0x32f   :  { %v548_v19 = vpop.f32.mrb[10].mxu0 }
 0x330   :  { %559 = vrot.lane.b32.xlu1 %v546_v17, %s5812_s21  ;;  %v5048_v20 = vpop.f32.mrb[11].mxu0  ;;  %v581_v21 = vrot.slane %v546_v17, 2  ;;  %v551_v24 = vadd.f32 %v546_v17, %v6110_v22 }
 0x332   :  { %590 = vrot.lane.b32.xlu0 %v581_v21, %s5812_s21  ;;  %v583_v25 = vadd.f32 %v581_v21, %v6112_v23  ;;  %v4800_v26 = vmul.f32 -1.442695, %v551_v24 }
 0x334   :  { %v4801_v27 = vmul.f32 -1.442695, %v583_v25  ;;  %5405 = vpow2.f32 %v4800_v26 }
 0x336   :  { %5407 = vpow2.f32 %v4801_v27 }
 0x33e   :  { %v5406_v28 = vpop.eup %5405 }
 0x33f   :  { %v555_v30 = vadd.f32 1.0, %v5406_v28 }
 0x340   :  { %v5408_v29 = vpop.eup %5407 }
 0x341   :  { %v587_v31 = vadd.f32 1.0, %v5408_v29  ;;  %5409 = vrcp.f32 %v555_v30 }
 0x343   :  { %5411 = vrcp.f32 %v587_v31 }
 0x34b   :  { %v5410_v32 = vpop.eup %5409 }
 0x34c   :  { %v569_v55 = vsub.f32 1.0, %v5410_v32 }
 0x34d   :  { %v5412_v38 = vpop.eup %5411 }
 0x34e   :  { %v600_v43 = vsub.f32 1.0, %v5412_v38 }
 0x3a2   :  { %v560_v33 = vpop.permute.xlu1 %559 }
 0x3a3   :  { %v562_v35 = vmul.f32 %v5410_v32, %v560_v33 }
 0x3a4   :  { %v591_v34 = vpop.permute.xlu0 %590 }
 0x3a5   :  { %v593_v39 = vmul.f32 %v5412_v38, %v591_v34  ;;  %564 = vrot.lane.b32.xlu1 %v562_v35, %s5813_s26 }
 0x3a7   :  { %595 = vrot.lane.b32.xlu0 %v593_v39, %s5813_s26 }
 0x3a9   :  { %607 = vrot.lane.b32.xlu1 %v606_v40, %s5817_s7 }
 0x3ad   :  { %576 = vrot.lane.b32.xlu1 %v150_v5, %s5818_s30 }
 0x417   :  { %v565_v41 = vpop.permute.xlu1 %564 }
 0x418   :  { %v567_v45 = vadd.f32 %v565_v41, %v6110_v22 }
 0x419   :  { %v596_v42 = vpop.permute.xlu0 %595 }
 0x41a   :  { %v598_v44 = vadd.f32 %v596_v42, %v6112_v23 }
 0x41b   :  { %v6124_v36 = vpop.permute.xlu1 %607 }
 0x41c   :  { %5413 = vtanh.f32 %v598_v44  ;;  %v610_v51 = vmul.f32 %v5412_v38, %v6124_v36 }
 0x41d   :  { %5415 = vtanh.f32 %v567_v45 }
 0x41f   :  { %v6127_v53 = vpop.permute.xlu1 %576 }
 0x420   :  { %v579_v57 = vmul.f32 %v5410_v32, %v6127_v53 }
 0x426   :  { %v5414_v46 = vpop.eup %5413 }
 0x427   :  { %602 = vrot.lane.b32.xlu0 %v5414_v46, %s5819_s2  ;;  %v5416_v37 = vpop.eup %5415 }
 0x42b   :  { %571 = vrot.lane.b32.xlu0 %v5416_v37, %s5819_s2 }
 0x499   :  { %v603_v50 = vpop.permute.xlu0 %602 }
 0x49a   :  { %v605_v52 = vmul.f32 %v603_v50, %v600_v43 }
 0x49c   :  { %v6129_v54 = vadd.f32 %v610_v51, %v605_v52 }
 0x49d   :  { %v572_v56 = vpop.permute.xlu0 %571 }
 0x49e   :  { %v574_v58 = vmul.f32 %v572_v56, %v569_v55  ;;  %v617_v59 = vrot.slane %v6129_v54, 6 }
 0x4a0   :  { %v6133_v60 = vadd.f32 %v579_v57, %v574_v58  ;;  %618 = vrot.lane.b32.xlu1 %v617_v59, %s5820_s0 }
 0x4a2   :  { %613 = vrot.lane.b32.xlu0 %v6133_v60, %s5819_s2 }
 0x512   :  { %v619_v61 = vpop.permute.xlu1 %618 }
 0x514   :  { %v614_v62 = vpop.permute.xlu0 %613 }
 0x515   :  { %v622_v63 = vsel %vm621_vm9, %v614_v62, %v619_v61 }
 0x516   :  { %v623_v0 = vpack.c.bf16 %v622_v63, %v622_v63  ;;  %v725_v29 = vrot.slane %v622_v63, 4  ;;  %v694_v30 = vrot.slane %v622_v63, 6 }
 0x518   :  { %5054 = vmatmul.mubr.msk.bf16.vlgmr.msra.gmra.mrb[12].mxu0 %vm270_vm3, %v623_v0 }
 0x519   :  { %5058 = vmatpush3.bf16.msra.mxu0 %v6057_v48  ;;  %5061 = vmatprep.mubr.msk.bf16.mxu0 %vm5816_vm8, %v5815_v47 }
 0x51a   :  { %5059 = vmatprep.subr.bf16.mxu0 %v5815_v47 }
 0x51d   :  { %5060 = vmatpush3.bf16.msra.mxu0 %v6065_v49 }
 0x51e   :  { %5065 = vmatprep.subr.bf16.mxu0 %v5815_v47 }
 0x5eb   :  { %v661_v1 = vpop.f32.mrb[12].mxu0 }
 0x5ec   :  { %v662_v2 = vadd.f32 %v6105_v15, %v661_v1  ;;  %v5055_v3 = vpop.f32.mrb[13].mxu0 }
 0x5ed   :  { %v664_v4 = vpop.f32.mrb[14].mxu0 }
 0x5ee   :  { %v668_v5 = vrot.slane %v662_v2, 6  ;;  %v700_v7 = vrot.slane %v662_v2, 4  ;;  %v5056_v9 = vpop.f32.mrb[15].mxu0 }
 0x5f0   :  { %709 = vrot.lane.b32.xlu0 %v700_v7, %s5812_s21  ;;  %677 = vrot.lane.b32.xlu1 %v668_v5, %s5812_s21  ;;  %v670_v11 = vadd.f32 %v668_v5, %v6110_v22  ;;  %v702_v12 = vadd.f32 %v700_v7, %v6112_v23 }
 0x5f2   :  { %v4803_v13 = vmul.f32 -1.442695, %v670_v11  ;;  %v4804_v16 = vmul.f32 -1.442695, %v702_v12 }
 0x5f4   :  { %5417 = vpow2.f32 %v4803_v13 }
 0x5f5   :  { %5419 = vpow2.f32 %v4804_v16 }
 0x5fe   :  { %v5418_v17 = vpop.eup %5417 }
 0x5ff   :  { %v5420_v18 = vpop.eup %5419  ;;  %v674_v19 = vadd.f32 1.0, %v5418_v17 }
 0x600   :  { %v706_v20 = vadd.f32 1.0, %v5420_v18 }
 0x601   :  { %5421 = vrcp.f32 %v674_v19 }
 0x602   :  { %5423 = vrcp.f32 %v706_v20 }
 0x60b   :  { %v5422_v21 = vpop.eup %5421 }
 0x60c   :  { %v5424_v24 = vpop.eup %5423  ;;  %v687_v37 = vsub.f32 1.0, %v5422_v21 }
 0x60d   :  { %v719_v40 = vsub.f32 1.0, %v5424_v24 }
 0x662   :  { %v710_v25 = vpop.permute.xlu0 %709  ;;  %v678_v26 = vpop.permute.xlu1 %677 }
 0x663   :  { %v712_v27 = vmul.f32 %v5424_v24, %v710_v25  ;;  %v680_v28 = vmul.f32 %v5422_v21, %v678_v26 }
 0x665   :  { %714 = vrot.lane.b32.xlu0 %v712_v27, %s5813_s26  ;;  %682 = vrot.lane.b32.xlu1 %v680_v28, %s5813_s26 }
 0x669   :  { %726 = vrot.lane.b32.xlu1 %v725_v29, %s5817_s7 }
 0x66d   :  { %695 = vrot.lane.b32.xlu1 %v694_v30, %s5818_s30 }
 0x6d7   :  { %v715_v31 = vpop.permute.xlu0 %714  ;;  %v683_v32 = vpop.permute.xlu1 %682 }
 0x6d8   :  { %v717_v33 = vadd.f32 %v715_v31, %v6112_v23  ;;  %v685_v35 = vadd.f32 %v683_v32, %v6110_v22 }
 0x6da   :  { %5425 = vtanh.f32 %v717_v33 }
 0x6db   :  { %5427 = vtanh.f32 %v685_v35  ;;  %v727_v39 = vpop.permute.xlu1 %726 }
 0x6dc   :  { %v729_v42 = vmul.f32 %v5424_v24, %v727_v39 }
 0x6df   :  { %v696_v45 = vpop.permute.xlu1 %695 }
 0x6e0   :  { %v698_v50 = vmul.f32 %v5422_v21, %v696_v45 }
 0x6e4   :  { %v5426_v38 = vpop.eup %5425 }
 0x6e5   :  { %721 = vrot.lane.b32.xlu0 %v5426_v38, %s5819_s2  ;;  %v5428_v34 = vpop.eup %5427 }
 0x6e9   :  { %689 = vrot.lane.b32.xlu0 %v5428_v34, %s5819_s2 }
 0x757   :  { %v722_v41 = vpop.permute.xlu0 %721 }
 0x758   :  { %v724_v44 = vmul.f32 %v722_v41, %v719_v40 }
 0x75a   :  { %v6159_v46 = vadd.f32 %v729_v42, %v724_v44 }
 0x75b   :  { %v690_v43 = vpop.permute.xlu0 %689 }
 0x75c   :  { %v692_v51 = vmul.f32 %v690_v43, %v687_v37  ;;  %v736_v52 = vrot.slane %v6159_v46, 2 }
 0x75e   :  { %v6162_v55 = vadd.f32 %v698_v50, %v692_v51  ;;  %737 = vrot.lane.b32.xlu1 %v736_v52, %s5820_s0 }
 0x760   :  { %732 = vrot.lane.b32.xlu0 %v6162_v55, %s5819_s2  ;;  %v2384_v51 = vsel %vm248_vm4, %v6133_v60, %v6162_v55 }
 0x7d0   :  { %v738_v56 = vpop.permute.xlu1 %737 }
 0x7d2   :  { %v733_v57 = vpop.permute.xlu0 %732 }
 0x7d3   :  { %v740_v58 = vsel %vm621_vm9, %v733_v57, %v738_v56 }
 0x7d4   :  { %v741_v59 = vpack.c.bf16 %v740_v58, %v740_v58  ;;  %v814_v26 = vrot.slane %v740_v58, 6 }
 0x7d6   :  { %v743_v61 = vrot.slane %v741_v59, 1 }
 0x7d8   :  { %5062 = vmatmul.mubr.msk.bf16.vlgmr.msra.gmra.mrb[16].mxu0 %vm270_vm3, %v743_v61 }
 0x7d9   :  { %5066 = vmatpush3.bf16.msra.mxu0 %v6057_v48  ;;  %5069 = vmatprep.mubr.msk.bf16.mxu0 %vm5816_vm8, %v5815_v47 }
 0x7da   :  { %5067 = vmatprep.subr.bf16.mxu0 %v5815_v47 }
 0x7dd   :  { %5068 = vmatpush3.bf16.msra.mxu0 %v6065_v49 }
 0x7de   :  { %5073 = vmatprep.subr.bf16.mxu0 %v5815_v47 }
 0x8ab   :  { %v781_v62 = vpop.f32.mrb[16].mxu0 }
 0x8ac   :  { %v782_v63 = vadd.f32 %v6105_v15, %v781_v62  ;;  %v5063_v0 = vpop.f32.mrb[17].mxu0 }
 0x8ad   :  { %v784_v1 = vpop.f32.mrb[18].mxu0 }
 0x8ae   :  { %v788_v2 = vrot.slane %v782_v63, 4  ;;  %v820_v3 = vrot.slane %v782_v63, 6  ;;  %v5064_v4 = vpop.f32.mrb[19].mxu0 }
 0x8b0   :  { %829 = vrot.lane.b32.xlu0 %v820_v3, %s5812_s21  ;;  %797 = vrot.lane.b32.xlu1 %v788_v2, %s5812_s21  ;;  %v790_v5 = vadd.f32 %v788_v2, %v6110_v22  ;;  %v822_v7 = vadd.f32 %v820_v3, %v6112_v23 }
 0x8b2   :  { %v4806_v9 = vmul.f32 -1.442695, %v790_v5  ;;  %v4807_v11 = vmul.f32 -1.442695, %v822_v7 }
 0x8b4   :  { %5429 = vpow2.f32 %v4806_v9 }
 0x8b5   :  { %5431 = vpow2.f32 %v4807_v11 }
 0x8be   :  { %v5430_v12 = vpop.eup %5429 }
 0x8bf   :  { %v5432_v13 = vpop.eup %5431  ;;  %v794_v16 = vadd.f32 1.0, %v5430_v12 }
 0x8c0   :  { %v826_v17 = vadd.f32 1.0, %v5432_v13 }
 0x8c1   :  { %5433 = vrcp.f32 %v794_v16 }
 0x8c2   :  { %5435 = vrcp.f32 %v826_v17 }
 0x8cb   :  { %v5434_v18 = vpop.eup %5433 }
 0x8cc   :  { %v5436_v19 = vpop.eup %5435  ;;  %v807_v42 = vsub.f32 1.0, %v5434_v18 }
 0x8cd   :  { %v839_v35 = vsub.f32 1.0, %v5436_v19 }
 0x922   :  { %v830_v20 = vpop.permute.xlu0 %829  ;;  %v798_v21 = vpop.permute.xlu1 %797 }
 0x923   :  { %v832_v24 = vmul.f32 %v5436_v19, %v830_v20  ;;  %v800_v25 = vmul.f32 %v5434_v18, %v798_v21 }
 0x925   :  { %834 = vrot.lane.b32.xlu0 %v832_v24, %s5813_s26  ;;  %802 = vrot.lane.b32.xlu1 %v800_v25, %s5813_s26 }
 0x929   :  { %845 = vrot.lane.b32.xlu1 %v740_v58, %s5817_s7 }
 0x92d   :  { %815 = vrot.lane.b32.xlu1 %v814_v26, %s5818_s30 }
 0x997   :  { %v835_v27 = vpop.permute.xlu0 %834  ;;  %v803_v28 = vpop.permute.xlu1 %802 }
 0x998   :  { %v837_v29 = vadd.f32 %v835_v27, %v6112_v23  ;;  %v805_v30 = vadd.f32 %v803_v28, %v6110_v22 }
 0x99a   :  { %5437 = vtanh.f32 %v837_v29 }
 0x99b   :  { %5439 = vtanh.f32 %v805_v30  ;;  %v846_v33 = vpop.permute.xlu1 %845 }
 0x99c   :  { %v848_v34 = vmul.f32 %v5436_v19, %v846_v33 }
 0x99f   :  { %v816_v40 = vpop.permute.xlu1 %815 }
 0x9a0   :  { %v818_v45 = vmul.f32 %v5434_v18, %v816_v40 }
 0x9a4   :  { %v5438_v31 = vpop.eup %5437 }
 0x9a5   :  { %841 = vrot.lane.b32.xlu0 %v5438_v31, %s5819_s2  ;;  %v5440_v32 = vpop.eup %5439 }
 0x9a9   :  { %809 = vrot.lane.b32.xlu0 %v5440_v32, %s5819_s2 }
 0xa17   :  { %v842_v38 = vpop.permute.xlu0 %841 }
 0xa18   :  { %v844_v39 = vmul.f32 %v842_v38, %v839_v35 }
 0xa1a   :  { %v6188_v41 = vadd.f32 %v848_v34, %v844_v39 }
 0xa1b   :  { %v810_v44 = vpop.permute.xlu0 %809 }
 0xa1c   :  { %v812_v37 = vmul.f32 %v810_v44, %v807_v42  ;;  %v855_v43 = vrot.slane %v6188_v41, 6 }
 0xa1e   :  { %v819_v50 = vadd.f32 %v818_v45, %v812_v37  ;;  %856 = vrot.lane.b32.xlu1 %v855_v43, %s5820_s0 }
 0xa20   :  { %851 = vrot.lane.b32.xlu0 %v819_v50, %s5819_s2  ;;  %v6197_v52 = vsel %vm188_vm2, %v2384_v51, %v819_v50 }
 0xa90   :  { %v857_v56 = vpop.permute.xlu1 %856 }
 0xa92   :  { %v852_v57 = vpop.permute.xlu0 %851 }
 0xa93   :  { %v859_v58 = vsel %vm621_vm9, %v852_v57, %v857_v56 }
 0xa94   :  { %v860_v59 = vpack.c.bf16 %v859_v58, %v859_v58  ;;  %v962_v21 = vrot.slane %v859_v58, 4  ;;  %v933_v24 = vrot.slane %v859_v58, 6 }
 0xa96   :  { %v862_v61 = vrot.slane %v860_v59, 2 }
 0xa98   :  { %5070 = vmatmul.mubr.msk.bf16.vlgmr.msra.gmra.mrb[20].mxu0 %vm270_vm3, %v862_v61 }
 0xa99   :  { %5074 = vmatpush3.bf16.msra.mxu0 %v6057_v48  ;;  %5077 = vmatprep.mubr.msk.bf16.mxu0 %vm5816_vm8, %v5815_v47 }
 0xa9a   :  { %5075 = vmatprep.subr.bf16.mxu0 %v5815_v47 }
 0xa9d   :  { %5076 = vmatpush3.bf16.msra.mxu0 %v6065_v49 }
 0xa9e   :  { %5089 = vmatprep.subr.bf16.mxu0 %v5815_v47 }
 0xb6b   :  { %v900_v60 = vpop.f32.mrb[20].mxu0 }
 0xb6c   :  { %v901_v55 = vadd.f32 %v6105_v15, %v900_v60  ;;  %v5071_v62 = vpop.f32.mrb[21].mxu0 }
 0xb6d   :  { %v903_v63 = vpop.f32.mrb[22].mxu0 }
 0xb6e   :  { %946 = vrot.lane.b32.xlu0 %v901_v55, %s5812_s21  ;;  %v5072_v0 = vpop.f32.mrb[23].mxu0  ;;  %v907_v1 = vrot.slane %v901_v55, 2  ;;  %v939_v2 = vadd.f32 %v901_v55, %v6112_v23 }
 0xb70   :  { %916 = vrot.lane.b32.xlu1 %v907_v1, %s5812_s21  ;;  %v909_v3 = vadd.f32 %v907_v1, %v6110_v22  ;;  %v4810_v4 = vmul.f32 -1.442695, %v939_v2 }
 0xb72   :  { %v4809_v5 = vmul.f32 -1.442695, %v909_v3  ;;  %5441 = vpow2.f32 %v4810_v4 }
 0xb74   :  { %5443 = vpow2.f32 %v4809_v5 }
 0xb7c   :  { %v5442_v7 = vpop.eup %5441 }
 0xb7d   :  { %v943_v11 = vadd.f32 1.0, %v5442_v7 }
 0xb7e   :  { %v5444_v9 = vpop.eup %5443 }
 0xb7f   :  { %v913_v12 = vadd.f32 1.0, %v5444_v9  ;;  %5445 = vrcp.f32 %v943_v11 }
 0xb81   :  { %5447 = vrcp.f32 %v913_v12 }
 0xb89   :  { %v5446_v13 = vpop.eup %5445 }
 0xb8a   :  { %v956_v32 = vsub.f32 1.0, %v5446_v13 }
 0xb8b   :  { %v5448_v18 = vpop.eup %5447 }
 0xb8c   :  { %v926_v40 = vsub.f32 1.0, %v5448_v18 }
 0xbe0   :  { %v947_v16 = vpop.permute.xlu0 %946 }
 0xbe1   :  { %v949_v17 = vmul.f32 %v5446_v13, %v947_v16 }
 0xbe2   :  { %v917_v19 = vpop.permute.xlu1 %916 }
 0xbe3   :  { %v919_v20 = vmul.f32 %v5448_v18, %v917_v19  ;;  %951 = vrot.lane.b32.xlu0 %v949_v17, %s5813_s26 }
 0xbe5   :  { %921 = vrot.lane.b32.xlu1 %v919_v20, %s5813_s26 }
 0xbe9   :  { %963 = vrot.lane.b32.xlu1 %v962_v21, %s5817_s7 }
 0xbed   :  { %934 = vrot.lane.b32.xlu1 %v933_v24, %s5818_s30 }
 0xc55   :  { %v952_v25 = vpop.permute.xlu0 %951 }
 0xc56   :  { %v954_v26 = vadd.f32 %v952_v25, %v6112_v23 }
 0xc57   :  { %v922_v27 = vpop.permute.xlu1 %921 }
 0xc58   :  { %5449 = vtanh.f32 %v954_v26  ;;  %v924_v28 = vadd.f32 %v922_v27, %v6110_v22 }
 0xc5a   :  { %5451 = vtanh.f32 %v924_v28 }
 0xc5b   :  { %v964_v31 = vpop.permute.xlu1 %963 }
 0xc5c   :  { %v966_v35 = vmul.f32 %v5446_v13, %v964_v31 }
 0xc5f   :  { %v935_v34 = vpop.permute.xlu1 %934 }
 0xc60   :  { %v937_v44 = vmul.f32 %v5448_v18, %v935_v34 }
 0xc62   :  { %v5450_v29 = vpop.eup %5449 }
 0xc63   :  { %958 = vrot.lane.b32.xlu0 %v5450_v29, %s5819_s2 }
 0xc64   :  { %v5452_v30 = vpop.eup %5451 }
 0xc67   :  { %928 = vrot.lane.b32.xlu0 %v5452_v30, %s5819_s2 }
 0xcd5   :  { %v959_v33 = vpop.permute.xlu0 %958 }
 0xcd6   :  { %v961_v38 = vmul.f32 %v959_v33, %v956_v32 }
 0xcd8   :  { %v6220_v39 = vadd.f32 %v966_v35, %v961_v38 }
 0xcd9   :  { %v929_v42 = vpop.permute.xlu0 %928 }
 0xcda   :  { %v931_v45 = vmul.f32 %v929_v42, %v926_v40  ;;  %v973_v37 = vrot.slane %v6220_v39, 2 }
 0xcdc   :  { %v938_v43 = vadd.f32 %v937_v44, %v931_v45  ;;  %974 = vrot.lane.b32.xlu1 %v973_v37, %s5820_s0 }
 0xcde   :  { %969 = vrot.lane.b32.xlu0 %v938_v43, %s5819_s2  ;;  %v6227_v50 = vsel %vm205_vm5, %v6197_v52, %v938_v43 }
 0xd4e   :  { %v975_v51 = vpop.permute.xlu1 %974 }
 0xd50   :  { %v970_v56 = vpop.permute.xlu0 %969 }
 0xd51   :  { %v977_v57 = vsel %vm621_vm9, %v970_v56, %v975_v51 }
 0xd52   :  { %v978_v58 = vpack.c.bf16 %v977_v57, %v977_v57  ;;  %v1049_v19 = vrot.slane %v977_v57, 6 }
 0xd54   :  { %v980_v59 = vrot.slane %v978_v58, 3 }
 0xd56   :  { %5078 = vmatmul.mubr.msk.bf16.vlgmr.msra.gmra.mrb[24].mxu0 %vm270_vm3, %v980_v59 }
 0xd57   :  { %5090 = vmatpush3.bf16.msra.mxu0 %v6057_v48  ;;  %5093 = vmatprep.mubr.msk.bf16.mxu0 %vm5816_vm8, %v5815_v47 }
 0xd58   :  { %5091 = vmatprep.subr.bf16.mxu0 %v5815_v47 }
 0xd5b   :  { %5092 = vmatpush3.bf16.msra.mxu0 %v6065_v49 }
 0xd5c   :  { %5105 = vmatprep.subr.bf16.mxu0 %v5815_v47 }
 0xe29   :  { %v1018_v52 = vpop.f32.mrb[24].mxu0 }
 0xe2a   :  { %v1019_v61 = vadd.f32 %v6105_v15, %v1018_v52  ;;  %v5079_v60 = vpop.f32.mrb[25].mxu0 }
 0xe2b   :  { %v1021_v55 = vpop.f32.mrb[26].mxu0 }
 0xe2c   :  { %1032 = vrot.lane.b32.xlu1 %v1019_v61, %s5812_s21  ;;  %v5080_v62 = vpop.f32.mrb[27].mxu0  ;;  %v1055_v63 = vrot.slane %v1019_v61, 2  ;;  %v1024_v0 = vadd.f32 %v1019_v61, %v6100_v14 }
 0xe2e   :  { %1064 = vrot.lane.b32.xlu0 %v1055_v63, %s5812_s21  ;;  %v1057_v1 = vadd.f32 %v1055_v63, %v6098_v10  ;;  %v4812_v2 = vmul.f32 -1.442695, %v1024_v0 }
 0xe30   :  { %v4813_v3 = vmul.f32 -1.442695, %v1057_v1  ;;  %5453 = vpow2.f32 %v4812_v2 }
 0xe32   :  { %5455 = vpow2.f32 %v4813_v3 }
 0xe3a   :  { %v5454_v4 = vpop.eup %5453 }
 0xe3b   :  { %v1028_v7 = vadd.f32 1.0, %v5454_v4 }
 0xe3c   :  { %v5456_v5 = vpop.eup %5455 }
 0xe3d   :  { %v1061_v9 = vadd.f32 1.0, %v5456_v5  ;;  %5457 = vrcp.f32 %v1028_v7 }
 0xe3f   :  { %5459 = vrcp.f32 %v1061_v9 }
 0xe47   :  { %v5458_v11 = vpop.eup %5457 }
 0xe48   :  { %v1042_v38 = vsub.f32 1.0, %v5458_v11 }
 0xe49   :  { %v5460_v16 = vpop.eup %5459 }
 0xe4a   :  { %v1074_v29 = vsub.f32 1.0, %v5460_v16 }
 0xe9e   :  { %v1033_v12 = vpop.permute.xlu1 %1032 }
 0xe9f   :  { %v1035_v13 = vmul.f32 %v5458_v11, %v1033_v12 }
 0xea0   :  { %v1065_v17 = vpop.permute.xlu0 %1064 }
 0xea1   :  { %v1067_v18 = vmul.f32 %v5460_v16, %v1065_v17  ;;  %1037 = vrot.lane.b32.xlu1 %v1035_v13, %s5813_s26 }
 0xea3   :  { %1069 = vrot.lane.b32.xlu0 %v1067_v18, %s5813_s26 }
 0xea5   :  { %1080 = vrot.lane.b32.xlu1 %v977_v57, %s5817_s7 }
 0xea9   :  { %1050 = vrot.lane.b32.xlu1 %v1049_v19, %s5818_s30 }
 0xf13   :  { %v1038_v20 = vpop.permute.xlu1 %1037 }
 0xf14   :  { %v1040_v25 = vadd.f32 %v1038_v20, %v6100_v14 }
 0xf15   :  { %v1070_v21 = vpop.permute.xlu0 %1069 }
 0xf16   :  { %v1072_v24 = vadd.f32 %v1070_v21, %v6098_v10 }
 0xf17   :  { %v1081_v28 = vpop.permute.xlu1 %1080 }
 0xf18   :  { %5461 = vtanh.f32 %v1072_v24  ;;  %v1083_v31 = vmul.f32 %v5460_v16, %v1081_v28 }
 0xf19   :  { %5463 = vtanh.f32 %v1040_v25 }
 0xf1b   :  { %v1051_v33 = vpop.permute.xlu1 %1050 }
 0xf1c   :  { %v1053_v40 = vmul.f32 %v5458_v11, %v1051_v33 }
 0xf22   :  { %v5462_v26 = vpop.eup %5461 }
 0xf23   :  { %1076 = vrot.lane.b32.xlu0 %v5462_v26, %s5819_s2  ;;  %v5464_v27 = vpop.eup %5463 }
 0xf27   :  { %1044 = vrot.lane.b32.xlu0 %v5464_v27, %s5819_s2 }
 0xf95   :  { %v1077_v30 = vpop.permute.xlu0 %1076 }
 0xf96   :  { %v1079_v32 = vmul.f32 %v1077_v30, %v1074_v29 }
 0xf98   :  { %v6250_v35 = vadd.f32 %v1083_v31, %v1079_v32 }
 0xf99   :  { %v1045_v34 = vpop.permute.xlu0 %1044 }
 0xf9a   :  { %v1047_v42 = vmul.f32 %v1045_v34, %v1042_v38  ;;  %v1090_v44 = vrot.slane %v6250_v35, 6 }
 0xf9c   :  { %v6253_v45 = vadd.f32 %v1053_v40, %v1047_v42  ;;  %1091 = vrot.lane.b32.xlu1 %v1090_v44, %s5820_s0 }
 0xf9e   :  { %1086 = vrot.lane.b32.xlu0 %v6253_v45, %s5819_s2 }
0x100e   :  { %v1092_v37 = vpop.permute.xlu1 %1091 }
0x1010   :  { %v1087_v43 = vpop.permute.xlu0 %1086 }
0x1011   :  { %v1094_v51 = vsel %vm621_vm9, %v1087_v43, %v1092_v37 }
0x1012   :  { %v1095_v56 = vpack.c.bf16 %v1094_v51, %v1094_v51  ;;  %v1197_v17 = vrot.slane %v1094_v51, 4  ;;  %v1166_v18 = vrot.slane %v1094_v51, 6 }
0x1014   :  { %5086 = vmatmul.mubr.msk.bf16.vlgmr.msra.gmra.mrb[8].mxu1 %vm270_vm3, %v1095_v56 }
0x1015   :  { %5098 = vmatpush3.bf16.msra.mxu1 %v6057_v48  ;;  %5101 = vmatprep.mubr.msk.bf16.mxu1 %vm5816_vm8, %v5815_v47 }
0x1016   :  { %5099 = vmatprep.subr.bf16.mxu1 %v5815_v47 }
0x1019   :  { %5100 = vmatpush3.bf16.msra.mxu1 %v6065_v49 }
0x101a   :  { %5113 = vmatprep.subr.bf16.mxu1 %v5815_v47 }
0x10e7   :  { %v1133_v57 = vpop.f32.mrb[8].mxu1 }
0x10e8   :  { %v1134_v58 = vadd.f32 %v6105_v15, %v1133_v57  ;;  %v5087_v59 = vpop.f32.mrb[9].mxu1 }
0x10e9   :  { %v1136_v52 = vpop.f32.mrb[10].mxu1 }
0x10ea   :  { %v1140_v61 = vrot.slane %v1134_v58, 6  ;;  %v1172_v60 = vrot.slane %v1134_v58, 4  ;;  %v5088_v55 = vpop.f32.mrb[11].mxu1 }
0x10ec   :  { %1181 = vrot.lane.b32.xlu0 %v1172_v60, %s5812_s21  ;;  %1149 = vrot.lane.b32.xlu1 %v1140_v61, %s5812_s21  ;;  %v1142_v62 = vadd.f32 %v1140_v61, %v6100_v14  ;;  %v1174_v63 = vadd.f32 %v1172_v60, %v6098_v10 }
0x10ee   :  { %v4815_v0 = vmul.f32 -1.442695, %v1142_v62  ;;  %v4816_v1 = vmul.f32 -1.442695, %v1174_v63 }
0x10f0   :  { %5465 = vpow2.f32 %v4815_v0 }
0x10f1   :  { %5467 = vpow2.f32 %v4816_v1 }
0x10fa   :  { %v5466_v2 = vpop.eup %5465 }
0x10fb   :  { %v5468_v3 = vpop.eup %5467  ;;  %v1146_v4 = vadd.f32 1.0, %v5466_v2 }
0x10fc   :  { %v1178_v5 = vadd.f32 1.0, %v5468_v3 }
0x10fd   :  { %5469 = vrcp.f32 %v1146_v4 }
0x10fe   :  { %5471 = vrcp.f32 %v1178_v5 }
0x1107   :  { %v5470_v7 = vpop.eup %5469 }
0x1108   :  { %v5472_v9 = vpop.eup %5471  ;;  %v1159_v38 = vsub.f32 1.0, %v5470_v7 }
0x1109   :  { %v1191_v28 = vsub.f32 1.0, %v5472_v9 }
0x115e   :  { %v1182_v11 = vpop.permute.xlu0 %1181  ;;  %v1150_v12 = vpop.permute.xlu1 %1149 }
0x115f   :  { %v1184_v13 = vmul.f32 %v5472_v9, %v1182_v11  ;;  %v1152_v16 = vmul.f32 %v5470_v7, %v1150_v12 }
0x1161   :  { %1186 = vrot.lane.b32.xlu0 %v1184_v13, %s5813_s26  ;;  %1154 = vrot.lane.b32.xlu1 %v1152_v16, %s5813_s26 }
0x1165   :  { %1198 = vrot.lane.b32.xlu1 %v1197_v17, %s5817_s7 }
0x1169   :  { %1167 = vrot.lane.b32.xlu1 %v1166_v18, %s5818_s30 }
0x11d3   :  { %v1187_v19 = vpop.permute.xlu0 %1186  ;;  %v1155_v20 = vpop.permute.xlu1 %1154 }
0x11d4   :  { %v1189_v21 = vadd.f32 %v1187_v19, %v6098_v10  ;;  %v1157_v24 = vadd.f32 %v1155_v20, %v6100_v14 }
0x11d6   :  { %5473 = vtanh.f32 %v1189_v21 }
0x11d7   :  { %5475 = vtanh.f32 %v1157_v24  ;;  %v1199_v27 = vpop.permute.xlu1 %1198 }
0x11d8   :  { %v1201_v30 = vmul.f32 %v5472_v9, %v1199_v27 }
0x11db   :  { %v1168_v32 = vpop.permute.xlu1 %1167 }
0x11dc   :  { %v1170_v40 = vmul.f32 %v5470_v7, %v1168_v32 }
0x11e0   :  { %v5474_v25 = vpop.eup %5473 }
0x11e1   :  { %1193 = vrot.lane.b32.xlu0 %v5474_v25, %s5819_s2  ;;  %v5476_v26 = vpop.eup %5475 }
0x11e5   :  { %1161 = vrot.lane.b32.xlu0 %v5476_v26, %s5819_s2 }
0x1253   :  { %v1194_v29 = vpop.permute.xlu0 %1193 }
0x1254   :  { %v1196_v31 = vmul.f32 %v1194_v29, %v1191_v28 }
0x1256   :  { %v6279_v33 = vadd.f32 %v1201_v30, %v1196_v31 }
0x1257   :  { %v1162_v34 = vpop.permute.xlu0 %1161 }
0x1258   :  { %v1164_v42 = vmul.f32 %v1162_v34, %v1159_v38  ;;  %v1208_v44 = vrot.slane %v6279_v33, 2 }
0x125a   :  { %v6282_v37 = vadd.f32 %v1170_v40, %v1164_v42  ;;  %1209 = vrot.lane.b32.xlu1 %v1208_v44, %s5820_s0 }
0x125c   :  { %1204 = vrot.lane.b32.xlu0 %v6282_v37, %s5819_s2 }
0x12cc   :  { %v1210_v43 = vpop.permute.xlu1 %1209 }
0x12ce   :  { %v1205_v51 = vpop.permute.xlu0 %1204 }
0x12cf   :  { %v1212_v56 = vsel %vm621_vm9, %v1205_v51, %v1210_v43  ;;  %v2387_v51 = vsel %vm248_vm4, %v6253_v45, %v6282_v37  ;;  %v6333_v45 = vld [vmem:[%s7322_s8 + $0x8] sm:$0xff]  }
0x12d0   :  { %v1213_v57 = vpack.c.bf16 %v1212_v56, %v1212_v56  ;;  %v1286_v17 = vrot.slane %v1212_v56, 6 }
0x12d2   :  { %v1215_v58 = vrot.slane %v1213_v57, 1 }
0x12d4   :  { %5094 = vmatmul.mubr.msk.bf16.vlgmr.msra.gmra.mrb[28].mxu0 %vm270_vm3, %v1215_v58 }
0x12d5   :  { %5106 = vmatpush3.bf16.msra.mxu0 %v6057_v48  ;;  %5109 = vmatprep.mubr.msk.bf16.mxu0 %vm5816_vm8, %v5815_v47 }
0x12d6   :  { %5107 = vmatprep.subr.bf16.mxu0 %v5815_v47 }
0x12d9   :  { %5108 = vmatpush3.bf16.msra.mxu0 %v6065_v49 }
0x12da   :  { %5121 = vmatprep.subr.bf16.mxu0 %v5815_v47 }
0x13a7   :  { %v1253_v59 = vpop.f32.mrb[28].mxu0 }
0x13a8   :  { %v1254_v52 = vadd.f32 %v6105_v15, %v1253_v59  ;;  %v5095_v61 = vpop.f32.mrb[29].mxu0 }
0x13a9   :  { %v1256_v60 = vpop.f32.mrb[30].mxu0 }
0x13aa   :  { %v1260_v55 = vrot.slane %v1254_v52, 4  ;;  %v1292_v62 = vrot.slane %v1254_v52, 6  ;;  %v5096_v63 = vpop.f32.mrb[31].mxu0  ;;  %v6324_v60 = vld [vmem:[%s7322_s8] sm:$0xff]  }
0x13ac   :  { %1301 = vrot.lane.b32.xlu0 %v1292_v62, %s5812_s21  ;;  %1269 = vrot.lane.b32.xlu1 %v1260_v55, %s5812_s21  ;;  %v1262_v48 = vadd.f32 %v1260_v55, %v6100_v14  ;;  %v1294_v0 = vadd.f32 %v1292_v62, %v6098_v10 }
0x13ae   :  { %v4818_v1 = vmul.f32 -1.442695, %v1262_v48  ;;  %v4819_v49 = vmul.f32 -1.442695, %v1294_v0 }
0x13b0   :  { %5477 = vpow2.f32 %v4818_v1 }
0x13b1   :  { %5479 = vpow2.f32 %v4819_v49 }
0x13ba   :  { %v5478_v2 = vpop.eup %5477 }
0x13bb   :  { %v5480_v3 = vpop.eup %5479  ;;  %v1266_v4 = vadd.f32 1.0, %v5478_v2 }
0x13bc   :  { %v1298_v5 = vadd.f32 1.0, %v5480_v3 }
0x13bd   :  { %5481 = vrcp.f32 %v1266_v4 }
0x13be   :  { %5483 = vrcp.f32 %v1298_v5 }
0x13c7   :  { %v5482_v7 = vpop.eup %5481 }
0x13c8   :  { %v5484_v9 = vpop.eup %5483  ;;  %v1279_v38 = vsub.f32 1.0, %v5482_v7 }
0x13c9   :  { %v1311_v27 = vsub.f32 1.0, %v5484_v9 }
0x141e   :  { %v1302_v11 = vpop.permute.xlu0 %1301  ;;  %v1270_v12 = vpop.permute.xlu1 %1269 }
0x141f   :  { %v1304_v13 = vmul.f32 %v5484_v9, %v1302_v11  ;;  %v1272_v16 = vmul.f32 %v5482_v7, %v1270_v12 }
0x1421   :  { %1306 = vrot.lane.b32.xlu0 %v1304_v13, %s5813_s26  ;;  %1274 = vrot.lane.b32.xlu1 %v1272_v16, %s5813_s26 }
0x1425   :  { %1317 = vrot.lane.b32.xlu1 %v1212_v56, %s5817_s7 }
0x1429   :  { %1287 = vrot.lane.b32.xlu1 %v1286_v17, %s5818_s30 }
0x1493   :  { %v1307_v18 = vpop.permute.xlu0 %1306  ;;  %v1275_v19 = vpop.permute.xlu1 %1274 }
0x1494   :  { %v1309_v20 = vadd.f32 %v1307_v18, %v6098_v10  ;;  %v1277_v21 = vadd.f32 %v1275_v19, %v6100_v14 }
0x1496   :  { %5485 = vtanh.f32 %v1309_v20 }
0x1497   :  { %5487 = vtanh.f32 %v1277_v21  ;;  %v1318_v26 = vpop.permute.xlu1 %1317 }
0x1498   :  { %v1320_v29 = vmul.f32 %v5484_v9, %v1318_v26 }
0x149b   :  { %v1288_v31 = vpop.permute.xlu1 %1287 }
0x149c   :  { %v1290_v40 = vmul.f32 %v5482_v7, %v1288_v31 }
0x14a0   :  { %v5486_v24 = vpop.eup %5485 }
0x14a1   :  { %1313 = vrot.lane.b32.xlu0 %v5486_v24, %s5819_s2  ;;  %v5488_v25 = vpop.eup %5487 }
0x14a5   :  { %1281 = vrot.lane.b32.xlu0 %v5488_v25, %s5819_s2 }
0x1513   :  { %v1314_v28 = vpop.permute.xlu0 %1313 }
0x1514   :  { %v1316_v30 = vmul.f32 %v1314_v28, %v1311_v27 }
0x1516   :  { %v6308_v32 = vadd.f32 %v1320_v29, %v1316_v30 }
0x1517   :  { %v1282_v34 = vpop.permute.xlu0 %1281 }
0x1518   :  { %v1284_v42 = vmul.f32 %v1282_v34, %v1279_v38  ;;  %v1327_v44 = vrot.slane %v6308_v32, 6 }
0x151a   :  { %v1291_v43 = vadd.f32 %v1290_v40, %v1284_v42  ;;  %1328 = vrot.lane.b32.xlu1 %v1327_v44, %s5820_s0 }
0x151c   :  { %1323 = vrot.lane.b32.xlu0 %v1291_v43, %s5819_s2  ;;  %v6317_v56 = vsel %vm188_vm2, %v2387_v51, %v1291_v43 }
0x158c   :  { %v1329_v57 = vpop.permute.xlu1 %1328 }
0x158e   :  { %v1324_v58 = vpop.permute.xlu0 %1323 }
0x158f   :  { %v1331_v59 = vsel %vm621_vm9, %v1324_v58, %v1329_v57 }
0x1590   :  { %v1332_v52 = vpack.c.bf16 %v1331_v59, %v1331_v59  ;;  %v1434_v18 = vrot.slane %v1331_v59, 4  ;;  %v1405_v19 = vrot.slane %v1331_v59, 6 }
0x1592   :  { %v1334_v61 = vrot.slane %v1332_v52, 2 }
0x1594   :  { %5102 = vmatmul.mubr.msk.bf16.vlgmr.msra.gmra.mrb[12].mxu1 %vm270_vm3, %v1334_v61 }
0x1595   :  { %5114 = vmatpush3.bf16.msra.mxu1 %v6324_v60  ;;  %5117 = vmatprep.mubr.msk.bf16.mxu1 %vm5816_vm8, %v5815_v47 }
0x1596   :  { %5115 = vmatprep.subr.bf16.mxu1 %v5815_v47 }
0x1599   :  { %5116 = vmatpush3.bf16.msra.mxu1 %v6333_v45 }
0x159a   :  { %5129 = vmatprep.subr.bf16.mxu1 %v5815_v47 }
0x1667   :  { %v1372_v37 = vpop.f32.mrb[12].mxu1 }
0x1668   :  { %v1373_v55 = vadd.f32 %v6105_v15, %v1372_v37  ;;  %v5103_v62 = vpop.f32.mrb[13].mxu1 }
0x1669   :  { %v1375_v63 = vpop.f32.mrb[14].mxu1 }
0x166a   :  { %1418 = vrot.lane.b32.xlu0 %v1373_v55, %s5812_s21  ;;  %v5104_v48 = vpop.f32.mrb[15].mxu1  ;;  %v1379_v0 = vrot.slane %v1373_v55, 2  ;;  %v1411_v1 = vadd.f32 %v1373_v55, %v6098_v10  ;;  %v6370_v63 = vld [vmem:[%s7326_s9] ss:$0 sm:$0xff] }
0x166c   :  { %1388 = vrot.lane.b32.xlu1 %v1379_v0, %s5812_s21  ;;  %v1381_v49 = vadd.f32 %v1379_v0, %v6100_v14  ;;  %v4822_v2 = vmul.f32 -1.442695, %v1411_v1 }
0x166e   :  { %v4821_v3 = vmul.f32 -1.442695, %v1381_v49  ;;  %5489 = vpow2.f32 %v4822_v2 }
0x1670   :  { %5491 = vpow2.f32 %v4821_v3 }
0x1678   :  { %v5490_v4 = vpop.eup %5489 }
0x1679   :  { %v1415_v7 = vadd.f32 1.0, %v5490_v4 }
0x167a   :  { %v5492_v5 = vpop.eup %5491 }
0x167b   :  { %v1385_v15 = vadd.f32 1.0, %v5492_v5  ;;  %5493 = vrcp.f32 %v1415_v7 }
0x167d   :  { %5495 = vrcp.f32 %v1385_v15 }
0x1685   :  { %v5494_v9 = vpop.eup %5493 }
0x1686   :  { %v1428_v29 = vsub.f32 1.0, %v5494_v9 }
0x1687   :  { %v5496_v13 = vpop.eup %5495 }
0x1688   :  { %v1398_v42 = vsub.f32 1.0, %v5496_v13 }
0x16dc   :  { %v1419_v11 = vpop.permute.xlu0 %1418 }
0x16dd   :  { %v1421_v12 = vmul.f32 %v5494_v9, %v1419_v11 }
0x16de   :  { %v1389_v16 = vpop.permute.xlu1 %1388 }
0x16df   :  { %v1391_v17 = vmul.f32 %v5496_v13, %v1389_v16  ;;  %1423 = vrot.lane.b32.xlu0 %v1421_v12, %s5813_s26 }
0x16e1   :  { %1393 = vrot.lane.b32.xlu1 %v1391_v17, %s5813_s26 }
0x16e5   :  { %1435 = vrot.lane.b32.xlu1 %v1434_v18, %s5817_s7 }
0x16e9   :  { %1406 = vrot.lane.b32.xlu1 %v1405_v19, %s5818_s30 }
0x1751   :  { %v1424_v20 = vpop.permute.xlu0 %1423 }
0x1752   :  { %v1426_v21 = vadd.f32 %v1424_v20, %v6098_v10 }
0x1753   :  { %v1394_v24 = vpop.permute.xlu1 %1393 }
0x1754   :  { %5497 = vtanh.f32 %v1426_v21  ;;  %v1396_v25 = vadd.f32 %v1394_v24, %v6100_v14 }
0x1756   :  { %5499 = vtanh.f32 %v1396_v25 }
0x1757   :  { %v1436_v28 = vpop.permute.xlu1 %1435 }
0x1758   :  { %v1438_v31 = vmul.f32 %v5494_v9, %v1436_v28 }
0x175b   :  { %v1407_v34 = vpop.permute.xlu1 %1406 }
0x175c   :  { %v1409_v43 = vmul.f32 %v5496_v13, %v1407_v34 }
0x175e   :  { %v5498_v26 = vpop.eup %5497 }
0x175f   :  { %1430 = vrot.lane.b32.xlu0 %v5498_v26, %s5819_s2 }
0x1760   :  { %v5500_v27 = vpop.eup %5499 }
0x1763   :  { %1400 = vrot.lane.b32.xlu0 %v5500_v27, %s5819_s2 }
0x17d1   :  { %v1431_v30 = vpop.permute.xlu0 %1430 }
0x17d2   :  { %v1433_v38 = vmul.f32 %v1431_v30, %v1428_v29 }
0x17d4   :  { %v6350_v40 = vadd.f32 %v1438_v31, %v1433_v38 }
0x17d5   :  { %v1401_v44 = vpop.permute.xlu0 %1400 }
0x17d6   :  { %v1403_v51 = vmul.f32 %v1401_v44, %v1398_v42  ;;  %v1445_v57 = vrot.slane %v6350_v40, 2 }
0x17d8   :  { %v1410_v58 = vadd.f32 %v1409_v43, %v1403_v51  ;;  %1446 = vrot.lane.b32.xlu1 %v1445_v57, %s5820_s0 }
0x17da   :  { %1441 = vrot.lane.b32.xlu0 %v1410_v58, %s5819_s2  ;;  %v6357_v59 = vsel %vm205_vm5, %v6317_v56, %v1410_v58 }
0x184a   :  { %v1447_v52 = vpop.permute.xlu1 %1446 }
0x184c   :  { %v1442_v61 = vpop.permute.xlu0 %1441 }
0x184d   :  { %v1449_v37 = vsel %vm621_vm9, %v1442_v61, %v1447_v52 }
0x184e   :  { %v1450_v55 = vpack.c.bf16 %v1449_v37, %v1449_v37  ;;  %v1521_v21 = vrot.slane %v1449_v37, 6 }
0x1850   :  { %v1452_v62 = vrot.slane %v1450_v55, 3 }
0x1852   :  { %5110 = vmatmul.mubr.msk.bf16.vlgmr.msra.gmra.mrb[32].mxu0 %vm270_vm3, %v1452_v62 }
0x1853   :  { %5122 = vmatpush3.bf16.msra.mxu0 %v6324_v60  ;;  %5125 = vmatprep.mubr.msk.bf16.mxu0 %vm5816_vm8, %v5815_v47 }
0x1854   :  { %5123 = vmatprep.subr.bf16.mxu0 %v5815_v47 }
0x1857   :  { %5124 = vmatpush3.bf16.msra.mxu0 %v6333_v45 }
0x1858   :  { %5137 = vmatprep.subr.bf16.mxu0 %v5815_v47 }
0x1925   :  { %v1490_v56 = vpop.f32.mrb[32].mxu0 }
0x1926   :  { %v1491_v48 = vadd.f32 %v6370_v63, %v1490_v56  ;;  %v5111_v0 = vpop.f32.mrb[33].mxu0 }
0x1927   :  { %v1493_v1 = vpop.f32.mrb[34].mxu0 }
0x1928   :  { %1504 = vrot.lane.b32.xlu1 %v1491_v48, %s5812_s21  ;;  %v5112_v49 = vpop.f32.mrb[35].mxu0  ;;  %v1527_v2 = vrot.slane %v1491_v48, 2  ;;  %v1496_v3 = vadd.f32 %v1491_v48, %v6098_v10 }
0x192a   :  { %1536 = vrot.lane.b32.xlu0 %v1527_v2, %s5812_s21  ;;  %v1529_v4 = vadd.f32 %v1527_v2, %v6100_v14  ;;  %v4824_v5 = vmul.f32 -1.442695, %v1496_v3 }
0x192c   :  { %v4825_v7 = vmul.f32 -1.442695, %v1529_v4  ;;  %5501 = vpow2.f32 %v4824_v5 }
0x192e   :  { %5503 = vpow2.f32 %v4825_v7 }
0x1936   :  { %v5502_v15 = vpop.eup %5501 }
0x1937   :  { %v1500_v11 = vadd.f32 1.0, %v5502_v15 }
0x1938   :  { %v5504_v9 = vpop.eup %5503 }
0x1939   :  { %v1533_v12 = vadd.f32 1.0, %v5504_v9  ;;  %5505 = vrcp.f32 %v1500_v11 }
0x193b   :  { %5507 = vrcp.f32 %v1533_v12 }
0x1943   :  { %v5506_v13 = vpop.eup %5505 }
0x1944   :  { %v1514_v51 = vsub.f32 1.0, %v5506_v13 }
0x1945   :  { %v5508_v18 = vpop.eup %5507 }
0x1946   :  { %v1546_v31 = vsub.f32 1.0, %v5508_v18 }
0x199a   :  { %v1505_v16 = vpop.permute.xlu1 %1504 }
0x199b   :  { %v1507_v17 = vmul.f32 %v5506_v13, %v1505_v16 }
0x199c   :  { %v1537_v19 = vpop.permute.xlu0 %1536 }
0x199d   :  { %v1539_v20 = vmul.f32 %v5508_v18, %v1537_v19  ;;  %1509 = vrot.lane.b32.xlu1 %v1507_v17, %s5813_s26 }
0x199f   :  { %1541 = vrot.lane.b32.xlu0 %v1539_v20, %s5813_s26 }
0x19a1   :  { %1552 = vrot.lane.b32.xlu1 %v1449_v37, %s5817_s7 }
0x19a5   :  { %1522 = vrot.lane.b32.xlu1 %v1521_v21, %s5818_s30 }
0x1a0f   :  { %v1510_v24 = vpop.permute.xlu1 %1509 }
0x1a10   :  { %v1512_v27 = vadd.f32 %v1510_v24, %v6098_v10 }
0x1a11   :  { %v1542_v25 = vpop.permute.xlu0 %1541 }
0x1a12   :  { %v1544_v26 = vadd.f32 %v1542_v25, %v6100_v14 }
0x1a13   :  { %v1553_v30 = vpop.permute.xlu1 %1552 }
0x1a14   :  { %5509 = vtanh.f32 %v1544_v26  ;;  %v1555_v34 = vmul.f32 %v5508_v18, %v1553_v30 }
0x1a15   :  { %5511 = vtanh.f32 %v1512_v27 }
0x1a17   :  { %v1523_v44 = vpop.permute.xlu1 %1522 }
0x1a18   :  { %v1525_v58 = vmul.f32 %v5506_v13, %v1523_v44 }
0x1a1e   :  { %v5510_v28 = vpop.eup %5509 }
0x1a1f   :  { %1548 = vrot.lane.b32.xlu0 %v5510_v28, %s5819_s2  ;;  %v5512_v29 = vpop.eup %5511 }
0x1a23   :  { %1516 = vrot.lane.b32.xlu0 %v5512_v29, %s5819_s2 }
0x1a91   :  { %v1549_v38 = vpop.permute.xlu0 %1548 }
0x1a92   :  { %v1551_v42 = vmul.f32 %v1549_v38, %v1546_v31 }
0x1a94   :  { %v6385_v43 = vadd.f32 %v1555_v34, %v1551_v42 }
0x1a95   :  { %v1517_v57 = vpop.permute.xlu0 %1516 }
0x1a96   :  { %v1519_v52 = vmul.f32 %v1517_v57, %v1514_v51  ;;  %v1562_v61 = vrot.slane %v6385_v43, 6 }
0x1a98   :  { %v6388_v37 = vadd.f32 %v1525_v58, %v1519_v52  ;;  %1563 = vrot.lane.b32.xlu1 %v1562_v61, %s5820_s0 }
0x1a9a   :  { %1558 = vrot.lane.b32.xlu0 %v6388_v37, %s5819_s2 }
0x1b0a   :  { %v1564_v55 = vpop.permute.xlu1 %1563 }
0x1b0c   :  { %v1559_v62 = vpop.permute.xlu0 %1558 }
0x1b0d   :  { %v1566_v56 = vsel %vm621_vm9, %v1559_v62, %v1564_v55 }
0x1b0e   :  { %v1567_v48 = vpack.c.bf16 %v1566_v56, %v1566_v56  ;;  %v1669_v26 = vrot.slane %v1566_v56, 4  ;;  %v1638_v27 = vrot.slane %v1566_v56, 6 }
0x1b10   :  { %5118 = vmatmul.mubr.msk.bf16.vlgmr.msra.gmra.mrb[16].mxu1 %vm270_vm3, %v1567_v48 }
0x1b11   :  { %5130 = vmatpush3.bf16.msra.mxu1 %v6324_v60  ;;  %5133 = vmatprep.mubr.msk.bf16.mxu1 %vm5816_vm8, %v5815_v47 }
0x1b12   :  { %5131 = vmatprep.subr.bf16.mxu1 %v5815_v47 }
0x1b15   :  { %5132 = vmatpush3.bf16.msra.mxu1 %v6333_v45 }
0x1b16   :  { %5145 = vmatprep.subr.bf16.mxu1 %v5815_v47 }
0x1be3   :  { %v1605_v0 = vpop.f32.mrb[16].mxu1 }
0x1be4   :  { %v1606_v1 = vadd.f32 %v6370_v63, %v1605_v0  ;;  %v5119_v49 = vpop.f32.mrb[17].mxu1 }
0x1be5   :  { %v1608_v2 = vpop.f32.mrb[18].mxu1 }
0x1be6   :  { %v1612_v3 = vrot.slane %v1606_v1, 6  ;;  %v1644_v4 = vrot.slane %v1606_v1, 4  ;;  %v5120_v5 = vpop.f32.mrb[19].mxu1 }
0x1be8   :  { %1653 = vrot.lane.b32.xlu0 %v1644_v4, %s5812_s21  ;;  %1621 = vrot.lane.b32.xlu1 %v1612_v3, %s5812_s21  ;;  %v1614_v7 = vadd.f32 %v1612_v3, %v6098_v10  ;;  %v1646_v15 = vadd.f32 %v1644_v4, %v6100_v14 }
0x1bea   :  { %v4827_v9 = vmul.f32 -1.442695, %v1614_v7  ;;  %v4828_v11 = vmul.f32 -1.442695, %v1646_v15 }
0x1bec   :  { %5513 = vpow2.f32 %v4827_v9 }
0x1bed   :  { %5515 = vpow2.f32 %v4828_v11 }
0x1bf6   :  { %v5514_v12 = vpop.eup %5513 }
0x1bf7   :  { %v5516_v13 = vpop.eup %5515  ;;  %v1618_v16 = vadd.f32 1.0, %v5514_v12 }
0x1bf8   :  { %v1650_v17 = vadd.f32 1.0, %v5516_v13 }
0x1bf9   :  { %5517 = vrcp.f32 %v1618_v16 }
0x1bfa   :  { %5519 = vrcp.f32 %v1650_v17 }
0x1c03   :  { %v5518_v18 = vpop.eup %5517 }
0x1c04   :  { %v5520_v19 = vpop.eup %5519  ;;  %v1631_v55 = vsub.f32 1.0, %v5518_v18 }
0x1c05   :  { %v1663_v44 = vsub.f32 1.0, %v5520_v19 }
0x1c5a   :  { %v1654_v20 = vpop.permute.xlu0 %1653  ;;  %v1622_v21 = vpop.permute.xlu1 %1621 }
0x1c5b   :  { %v1656_v24 = vmul.f32 %v5520_v19, %v1654_v20  ;;  %v1624_v25 = vmul.f32 %v5518_v18, %v1622_v21 }
0x1c5d   :  { %1658 = vrot.lane.b32.xlu0 %v1656_v24, %s5813_s26  ;;  %1626 = vrot.lane.b32.xlu1 %v1624_v25, %s5813_s26 }
0x1c61   :  { %1670 = vrot.lane.b32.xlu1 %v1669_v26, %s5817_s7 }
0x1c65   :  { %1639 = vrot.lane.b32.xlu1 %v1638_v27, %s5818_s30 }
0x1ccf   :  { %v1659_v28 = vpop.permute.xlu0 %1658  ;;  %v1627_v29 = vpop.permute.xlu1 %1626 }
0x1cd0   :  { %v1661_v30 = vadd.f32 %v1659_v28, %v6100_v14  ;;  %v1629_v31 = vadd.f32 %v1627_v29, %v6098_v10 }
0x1cd2   :  { %5521 = vtanh.f32 %v1661_v30 }
0x1cd3   :  { %5523 = vtanh.f32 %v1629_v31  ;;  %v1671_v42 = vpop.permute.xlu1 %1670 }
0x1cd4   :  { %v1673_v57 = vmul.f32 %v5520_v19, %v1671_v42 }
0x1cd7   :  { %v1640_v52 = vpop.permute.xlu1 %1639 }
0x1cd8   :  { %v1642_v56 = vmul.f32 %v5518_v18, %v1640_v52 }
0x1cdc   :  { %v5522_v38 = vpop.eup %5521 }
0x1cdd   :  { %1665 = vrot.lane.b32.xlu0 %v5522_v38, %s5819_s2  ;;  %v5524_v34 = vpop.eup %5523 }
0x1ce1   :  { %1633 = vrot.lane.b32.xlu0 %v5524_v34, %s5819_s2 }
0x1d4f   :  { %v1666_v51 = vpop.permute.xlu0 %1665 }
0x1d50   :  { %v1668_v58 = vmul.f32 %v1666_v51, %v1663_v44 }
0x1d52   :  { %v6414_v61 = vadd.f32 %v1673_v57, %v1668_v58 }
0x1d53   :  { %v1634_v62 = vpop.permute.xlu0 %1633 }
0x1d54   :  { %v1680_v48 = vrot.slane %v6414_v61, 2  ;;  %v1636_v0 = vmul.f32 %v1634_v62, %v1631_v55 }
0x1d56   :  { %v6417_v1 = vadd.f32 %v1642_v56, %v1636_v0  ;;  %1681 = vrot.lane.b32.xlu1 %v1680_v48, %s5820_s0 }
0x1d58   :  { %1676 = vrot.lane.b32.xlu0 %v6417_v1, %s5819_s2 }
0x1dc8   :  { %v1682_v49 = vpop.permute.xlu1 %1681 }
0x1dca   :  { %v1677_v2 = vpop.permute.xlu0 %1676 }
0x1dcb   :  { %v1684_v3 = vsel %vm621_vm9, %v1677_v2, %v1682_v49 }
0x1dcc   :  { %v1685_v4 = vpack.c.bf16 %v1684_v3, %v1684_v3  ;;  %v1758_v34 = vrot.slane %v1684_v3, 6 }
0x1dce   :  { %v1687_v5 = vrot.slane %v1685_v4, 1 }
0x1dd0   :  { %5126 = vmatmul.mubr.msk.bf16.vlgmr.msra.gmra.mrb[36].mxu0 %vm270_vm3, %v1687_v5 }
0x1dd1   :  { %5138 = vmatpush3.bf16.msra.mxu0 %v6324_v60  ;;  %5141 = vmatprep.mubr.msk.bf16.mxu0 %vm5816_vm8, %v5815_v47 }
0x1dd2   :  { %5139 = vmatprep.subr.bf16.mxu0 %v5815_v47 }
0x1dd5   :  { %5140 = vmatpush3.bf16.msra.mxu0 %v6333_v45 }
0x1dd6   :  { %5153 = vmatprep.subr.bf16.mxu0 %v5815_v47 }
0x1ea3   :  { %v1725_v7 = vpop.f32.mrb[36].mxu0 }
0x1ea4   :  { %v1726_v15 = vadd.f32 %v6370_v63, %v1725_v7  ;;  %v5127_v9 = vpop.f32.mrb[37].mxu0 }
0x1ea5   :  { %v1728_v11 = vpop.f32.mrb[38].mxu0 }
0x1ea6   :  { %v1732_v12 = vrot.slane %v1726_v15, 4  ;;  %v1764_v13 = vrot.slane %v1726_v15, 6  ;;  %v5128_v16 = vpop.f32.mrb[39].mxu0  ;;  %v2390_v11 = vsel %vm248_vm4, %v6388_v37, %v6417_v1 }
0x1ea8   :  { %1773 = vrot.lane.b32.xlu0 %v1764_v13, %s5812_s21  ;;  %1741 = vrot.lane.b32.xlu1 %v1732_v12, %s5812_s21  ;;  %v1734_v17 = vadd.f32 %v1732_v12, %v6098_v10  ;;  %v1766_v18 = vadd.f32 %v1764_v13, %v6100_v14 }
0x1eaa   :  { %v4830_v19 = vmul.f32 -1.442695, %v1734_v17  ;;  %v4831_v20 = vmul.f32 -1.442695, %v1766_v18 }
0x1eac   :  { %5525 = vpow2.f32 %v4830_v19 }
0x1ead   :  { %5527 = vpow2.f32 %v4831_v20 }
0x1eb6   :  { %v5526_v21 = vpop.eup %5525 }
0x1eb7   :  { %v5528_v24 = vpop.eup %5527  ;;  %v1738_v25 = vadd.f32 1.0, %v5526_v21 }
0x1eb8   :  { %v1770_v26 = vadd.f32 1.0, %v5528_v24 }
0x1eb9   :  { %5529 = vrcp.f32 %v1738_v25 }
0x1eba   :  { %5531 = vrcp.f32 %v1770_v26 }
0x1ec3   :  { %v5530_v27 = vpop.eup %5529 }
0x1ec4   :  { %v5532_v28 = vpop.eup %5531 }
0x1ec5   :  { %v1783_v62 = vsub.f32 1.0, %v5532_v28 }
0x1f1a   :  { %v1774_v29 = vpop.permute.xlu0 %1773  ;;  %v1742_v30 = vpop.permute.xlu1 %1741 }
0x1f1b   :  { %v1776_v31 = vmul.f32 %v5532_v28, %v1774_v29  ;;  %v1744_v38 = vmul.f32 %v5530_v27, %v1742_v30 }
0x1f1d   :  { %1778 = vrot.lane.b32.xlu0 %v1776_v31, %s5813_s26  ;;  %1746 = vrot.lane.b32.xlu1 %v1744_v38, %s5813_s26 }
0x1f21   :  { %1789 = vrot.lane.b32.xlu1 %v1684_v3, %s5817_s7  ;;  %v1751_v3 = vsub.f32 1.0, %v5530_v27 }
0x1f25   :  { %1759 = vrot.lane.b32.xlu1 %v1758_v34, %s5818_s30 }
0x1f8f   :  { %v1779_v42 = vpop.permute.xlu0 %1778  ;;  %v1747_v44 = vpop.permute.xlu1 %1746 }
0x1f90   :  { %v1781_v51 = vadd.f32 %v1779_v42, %v6100_v14  ;;  %v1749_v57 = vadd.f32 %v1747_v44, %v6098_v10 }
0x1f92   :  { %5533 = vtanh.f32 %v1781_v51 }
0x1f93   :  { %5535 = vtanh.f32 %v1749_v57  ;;  %v1790_v55 = vpop.permute.xlu1 %1789 }
0x1f94   :  { %v1792_v48 = vmul.f32 %v5532_v28, %v1790_v55 }
0x1f97   :  { %v1760_v49 = vpop.permute.xlu1 %1759 }
0x1f98   :  { %v1762_v5 = vmul.f32 %v5530_v27, %v1760_v49 }
0x1f9c   :  { %v5534_v58 = vpop.eup %5533 }
0x1f9d   :  { %1785 = vrot.lane.b32.xlu0 %v5534_v58, %s5819_s2  ;;  %v5536_v52 = vpop.eup %5535 }
0x1fa1   :  { %1753 = vrot.lane.b32.xlu0 %v5536_v52, %s5819_s2 }
0x200f   :  { %v1786_v56 = vpop.permute.xlu0 %1785 }
0x2010   :  { %v1788_v0 = vmul.f32 %v1786_v56, %v1783_v62 }
0x2012   :  { %v6443_v2 = vadd.f32 %v1792_v48, %v1788_v0 }
0x2013   :  { %v1754_v4 = vpop.permute.xlu0 %1753 }
0x2014   :  { %v1799_v7 = vrot.slane %v6443_v2, 6  ;;  %v1756_v15 = vmul.f32 %v1754_v4, %v1751_v3 }
0x2016   :  { %v1763_v9 = vadd.f32 %v1762_v5, %v1756_v15  ;;  %1800 = vrot.lane.b32.xlu1 %v1799_v7, %s5820_s0 }
0x2018   :  { %1795 = vrot.lane.b32.xlu0 %v1763_v9, %s5819_s2  ;;  %v6452_v12 = vsel %vm188_vm2, %v2390_v11, %v1763_v9 }
0x2088   :  { %v1801_v13 = vpop.permute.xlu1 %1800 }
0x208a   :  { %v1796_v16 = vpop.permute.xlu0 %1795 }
0x208b   :  { %v1803_v17 = vsel %vm621_vm9, %v1796_v16, %v1801_v13 }
0x208c   :  { %v1804_v18 = vpack.c.bf16 %v1803_v17, %v1803_v17  ;;  %v1906_v55 = vrot.slane %v1803_v17, 4  ;;  %v1877_v62 = vrot.slane %v1803_v17, 6 }
0x208e   :  { %v1806_v19 = vrot.slane %v1804_v18, 2 }
0x2090   :  { %5134 = vmatmul.mubr.msk.bf16.vlgmr.msra.gmra.mrb[20].mxu1 %vm270_vm3, %v1806_v19 }
0x2091   :  { %5146 = vmatpush3.bf16.msra.mxu1 %v6324_v60  ;;  %5149 = vmatprep.mubr.msk.bf16.mxu1 %vm5816_vm8, %v5815_v47 }
0x2092   :  { %5147 = vmatprep.subr.bf16.mxu1 %v5815_v47 }
0x2095   :  { %5148 = vmatpush3.bf16.msra.mxu1 %v6333_v45 }
0x2096   :  { %5161 = vmatprep.subr.bf16.mxu1 %v5815_v47 }
0x2163   :  { %v1844_v37 = vpop.f32.mrb[20].mxu1 }
0x2164   :  { %v1845_v1 = vadd.f32 %v6370_v63, %v1844_v37  ;;  %v5135_v20 = vpop.f32.mrb[21].mxu1 }
0x2165   :  { %v1847_v21 = vpop.f32.mrb[22].mxu1 }
0x2166   :  { %v1851_v24 = vrot.slane %v1845_v1, 2  ;;  %1890 = vrot.lane.b32.xlu0 %v1845_v1, %s5812_s21  ;;  %v5136_v25 = vpop.f32.mrb[23].mxu1  ;;  %v1883_v26 = vadd.f32 %v1845_v1, %v6100_v14 }
0x2168   :  { %1860 = vrot.lane.b32.xlu1 %v1851_v24, %s5812_s21  ;;  %v1853_v27 = vadd.f32 %v1851_v24, %v6098_v10  ;;  %v4834_v28 = vmul.f32 -1.442695, %v1883_v26 }
0x216a   :  { %v4833_v29 = vmul.f32 -1.442695, %v1853_v27  ;;  %5537 = vpow2.f32 %v4834_v28 }
0x216c   :  { %5539 = vpow2.f32 %v4833_v29 }
0x2174   :  { %v5538_v30 = vpop.eup %5537 }
0x2175   :  { %v1887_v38 = vadd.f32 1.0, %v5538_v30 }
0x2176   :  { %v5540_v31 = vpop.eup %5539 }
0x2177   :  { %v1857_v34 = vadd.f32 1.0, %v5540_v31  ;;  %5541 = vrcp.f32 %v1887_v38 }
0x2179   :  { %5543 = vrcp.f32 %v1857_v34 }
0x2181   :  { %v5542_v42 = vpop.eup %5541 }
0x2182   :  { %v1900_v7 = vsub.f32 1.0, %v5542_v42 }
0x2183   :  { %v5544_v57 = vpop.eup %5543 }
0x21d8   :  { %v1891_v44 = vpop.permute.xlu0 %1890 }
0x21d9   :  { %v1893_v51 = vmul.f32 %v5542_v42, %v1891_v44 }
0x21da   :  { %v1861_v58 = vpop.permute.xlu1 %1860 }
0x21db   :  { %v1863_v52 = vmul.f32 %v5544_v57, %v1861_v58  ;;  %1895 = vrot.lane.b32.xlu0 %v1893_v51, %s5813_s26 }
0x21dd   :  { %1865 = vrot.lane.b32.xlu1 %v1863_v52, %s5813_s26 }
0x21e1   :  { %1907 = vrot.lane.b32.xlu1 %v1906_v55, %s5817_s7 }
0x21e5   :  { %1878 = vrot.lane.b32.xlu1 %v1877_v62, %s5818_s30 }
0x224d   :  { %v1896_v56 = vpop.permute.xlu0 %1895 }
0x224e   :  { %v1898_v48 = vadd.f32 %v1896_v56, %v6100_v14  ;;  %v1870_v14 = vsub.f32 1.0, %v5544_v57 }
0x224f   :  { %v1866_v0 = vpop.permute.xlu1 %1865 }
0x2250   :  { %5545 = vtanh.f32 %v1898_v48  ;;  %v1868_v49 = vadd.f32 %v1866_v0, %v6098_v10 }
0x2252   :  { %5547 = vtanh.f32 %v1868_v49 }
0x2253   :  { %v1908_v5 = vpop.permute.xlu1 %1907 }
0x2254   :  { %v1910_v9 = vmul.f32 %v5542_v42, %v1908_v5 }
0x2257   :  { %v1879_v13 = vpop.permute.xlu1 %1878 }
0x2258   :  { %v1881_v18 = vmul.f32 %v5544_v57, %v1879_v13 }
0x225a   :  { %v5546_v3 = vpop.eup %5545 }
0x225b   :  { %1902 = vrot.lane.b32.xlu0 %v5546_v3, %s5819_s2 }
0x225c   :  { %v5548_v4 = vpop.eup %5547 }
0x225f   :  { %1872 = vrot.lane.b32.xlu0 %v5548_v4, %s5819_s2 }
0x22cd   :  { %v1903_v15 = vpop.permute.xlu0 %1902 }
0x22ce   :  { %v1905_v11 = vmul.f32 %v1903_v15, %v1900_v7 }
0x22d0   :  { %v6475_v16 = vadd.f32 %v1910_v9, %v1905_v11 }
0x22d1   :  { %v1873_v17 = vpop.permute.xlu0 %1872 }
0x22d2   :  { %v1917_v10 = vrot.slane %v6475_v16, 2  ;;  %v1875_v19 = vmul.f32 %v1873_v17, %v1870_v14 }
0x22d4   :  { %v1882_v37 = vadd.f32 %v1881_v18, %v1875_v19  ;;  %1918 = vrot.lane.b32.xlu1 %v1917_v10, %s5820_s0 }
0x22d6   :  { %1913 = vrot.lane.b32.xlu0 %v1882_v37, %s5819_s2  ;;  %v6482_v1 = vsel %vm205_vm5, %v6452_v12, %v1882_v37 }
0x2346   :  { %v1919_v20 = vpop.permute.xlu1 %1918 }
0x2348   :  { %v1914_v21 = vpop.permute.xlu0 %1913 }
0x2349   :  { %v1921_v24 = vsel %vm621_vm9, %v1914_v21, %v1919_v20 }
0x234a   :  { %v1922_v25 = vpack.c.bf16 %v1921_v24, %v1921_v24  ;;  %v1993_v3 = vrot.slane %v1921_v24, 6 }
0x234c   :  { %v1924_v26 = vrot.slane %v1922_v25, 3 }
0x234e   :  { %5142 = vmatmul.mubr.msk.bf16.vlgmr.msra.gmra.mrb[40].mxu0 %vm270_vm3, %v1924_v26 }
0x234f   :  { %5154 = vmatpush3.bf16.msra.mxu0 %v6324_v60  ;;  %5157 = vmatprep.mubr.msk.bf16.mxu0 %vm5816_vm8, %v5815_v47 }
0x2350   :  { %5155 = vmatprep.subr.bf16.mxu0 %v5815_v47 }
0x2353   :  { %5156 = vmatpush3.bf16.msra.mxu0 %v6333_v45 }
0x2354   :  { %2672 = vmatprep.subr.bf16.mxu0 %v5811_v8 }
0x2421   :  { %v1962_v12 = vpop.f32.mrb[40].mxu0 }
0x2422   :  { %v1963_v27 = vadd.f32 %v6370_v63, %v1962_v12  ;;  %v5143_v28 = vpop.f32.mrb[41].mxu0 }
0x2423   :  { %v1965_v29 = vpop.f32.mrb[42].mxu0 }
0x2424   :  { %v1999_v30 = vrot.slane %v1963_v27, 2  ;;  %1976 = vrot.lane.b32.xlu1 %v1963_v27, %s5812_s21  ;;  %v5144_v31 = vpop.f32.mrb[43].mxu0  ;;  %v1968_v38 = vadd.f32 %v1963_v27, %v6112_v23 }
0x2426   :  { %2008 = vrot.lane.b32.xlu0 %v1999_v30, %s5812_s21  ;;  %v2001_v34 = vadd.f32 %v1999_v30, %v6110_v22  ;;  %v4836_v42 = vmul.f32 -1.442695, %v1968_v38 }
0x2428   :  { %v4837_v44 = vmul.f32 -1.442695, %v2001_v34  ;;  %5549 = vpow2.f32 %v4836_v42 }
0x242a   :  { %5551 = vpow2.f32 %v4837_v44 }
0x2432   :  { %v5550_v51 = vpop.eup %5549 }
0x2433   :  { %v1972_v58 = vadd.f32 1.0, %v5550_v51 }
0x2434   :  { %v5552_v57 = vpop.eup %5551 }
0x2435   :  { %v2005_v52 = vadd.f32 1.0, %v5552_v57  ;;  %5553 = vrcp.f32 %v1972_v58 }
0x2437   :  { %5555 = vrcp.f32 %v2005_v52 }
0x243f   :  { %v5554_v55 = vpop.eup %5553 }
0x2440   :  { %v1986_v20 = vsub.f32 1.0, %v5554_v55 }
0x2441   :  { %v5556_v48 = vpop.eup %5555 }
0x2442   :  { %v2018_v14 = vsub.f32 1.0, %v5556_v48 }
0x2496   :  { %v1977_v62 = vpop.permute.xlu1 %1976 }
0x2497   :  { %v1979_v56 = vmul.f32 %v5554_v55, %v1977_v62 }
0x2498   :  { %v2009_v0 = vpop.permute.xlu0 %2008 }
0x2499   :  { %v2011_v49 = vmul.f32 %v5556_v48, %v2009_v0  ;;  %1981 = vrot.lane.b32.xlu1 %v1979_v56, %s5813_s26 }
0x249b   :  { %2013 = vrot.lane.b32.xlu0 %v2011_v49, %s5813_s26 }
0x249d   :  { %2024 = vrot.lane.b32.xlu1 %v1921_v24, %s5817_s7 }
0x24a1   :  { %1994 = vrot.lane.b32.xlu1 %v1993_v3, %s5818_s30 }
0x250b   :  { %v1982_v4 = vpop.permute.xlu1 %1981 }
0x250c   :  { %v1984_v15 = vadd.f32 %v1982_v4, %v6112_v23 }
0x250d   :  { %v2014_v5 = vpop.permute.xlu0 %2013 }
0x250e   :  { %v2016_v7 = vadd.f32 %v2014_v5, %v6110_v22 }
0x250f   :  { %v2025_v13 = vpop.permute.xlu1 %2024 }
0x2510   :  { %5557 = vtanh.f32 %v2016_v7  ;;  %v2027_v18 = vmul.f32 %v5556_v48, %v2025_v13 }
0x2511   :  { %5559 = vtanh.f32 %v1984_v15 }
0x2513   :  { %v1995_v19 = vpop.permute.xlu1 %1994 }
0x2514   :  { %v1997_v24 = vmul.f32 %v5554_v55, %v1995_v19 }
0x251a   :  { %v5558_v9 = vpop.eup %5557 }
0x251b   :  { %2020 = vrot.lane.b32.xlu0 %v5558_v9, %s5819_s2  ;;  %v5560_v11 = vpop.eup %5559 }
0x251f   :  { %1988 = vrot.lane.b32.xlu0 %v5560_v11, %s5819_s2 }
0x258d   :  { %v2021_v17 = vpop.permute.xlu0 %2020 }
0x258e   :  { %v2023_v10 = vmul.f32 %v2021_v17, %v2018_v14 }
0x2590   :  { %v6505_v37 = vadd.f32 %v2027_v18, %v2023_v10 }
0x2591   :  { %v1989_v21 = vpop.permute.xlu0 %1988 }
0x2592   :  { %v2034_v25 = vrot.slane %v6505_v37, 6  ;;  %v1991_v26 = vmul.f32 %v1989_v21, %v1986_v20 }
0x2594   :  { %v6508_v12 = vadd.f32 %v1997_v24, %v1991_v26  ;;  %2035 = vrot.lane.b32.xlu1 %v2034_v25, %s5820_s0 }
0x2596   :  { %2030 = vrot.lane.b32.xlu0 %v6508_v12, %s5819_s2 }
0x2606   :  { %v2036_v27 = vpop.permute.xlu1 %2035 }
0x2608   :  { %v2031_v28 = vpop.permute.xlu0 %2030 }
0x2609   :  { %v2038_v29 = vsel %vm621_vm9, %v2031_v28, %v2036_v27 }
0x260a   :  { %v2039_v30 = vpack.c.bf16 %v2038_v29, %v2038_v29  ;;  %v2141_v15 = vrot.slane %v2038_v29, 4  ;;  %v2110_v9 = vrot.slane %v2038_v29, 6 }
0x260c   :  { %5150 = vmatmul.mubr.msk.bf16.vlgmr.msra.gmra.mrb[24].mxu1 %vm270_vm3, %v2039_v30 }
0x260d   :  { %5162 = vmatpush3.bf16.msra.mxu1 %v6324_v60  ;;  %5165 = vmatprep.mubr.msk.bf16.mxu1 %vm5816_vm8, %v5815_v47 }
0x260e   :  { %5163 = vmatprep.subr.bf16.mxu1 %v5815_v47 }
0x2611   :  { %5164 = vmatpush3.bf16.msra.mxu1 %v6333_v45 }
0x26df   :  { %v2077_v31 = vpop.f32.mrb[24].mxu1 }
0x26e0   :  { %v2078_v38 = vadd.f32 %v6370_v63, %v2077_v31  ;;  %v5151_v34 = vpop.f32.mrb[25].mxu1 }
0x26e1   :  { %v2080_v42 = vpop.f32.mrb[26].mxu1 }
0x26e2   :  { %v2084_v44 = vrot.slane %v2078_v38, 6  ;;  %v2116_v51 = vrot.slane %v2078_v38, 4  ;;  %v5152_v57 = vpop.f32.mrb[27].mxu1 }
0x26e4   :  { %2125 = vrot.lane.b32.xlu0 %v2116_v51, %s5812_s21  ;;  %2093 = vrot.lane.b32.xlu1 %v2084_v44, %s5812_s21  ;;  %v2086_v60 = vadd.f32 %v2084_v44, %v6112_v23  ;;  %v2118_v58 = vadd.f32 %v2116_v51, %v6110_v22 }
0x26e6   :  { %v4839_v52 = vmul.f32 -1.442695, %v2086_v60  ;;  %v4840_v55 = vmul.f32 -1.442695, %v2118_v58 }
0x26e8   :  { %5561 = vpow2.f32 %v4839_v52 }
0x26e9   :  { %5563 = vpow2.f32 %v4840_v55 }
0x26f2   :  { %v5562_v45 = vpop.eup %5561 }
0x26f3   :  { %v5564_v62 = vpop.eup %5563  ;;  %v2090_v56 = vadd.f32 1.0, %v5562_v45 }
0x26f4   :  { %v2122_v48 = vadd.f32 1.0, %v5564_v62 }
0x26f5   :  { %5565 = vrcp.f32 %v2090_v56 }
0x26f6   :  { %5567 = vrcp.f32 %v2122_v48 }
0x26ff   :  { %v5566_v0 = vpop.eup %5565 }
0x2700   :  { %v5568_v49 = vpop.eup %5567  ;;  %v2103_v28 = vsub.f32 1.0, %v5566_v0 }
0x2701   :  { %v2135_v20 = vsub.f32 1.0, %v5568_v49 }
0x2756   :  { %v2126_v3 = vpop.permute.xlu0 %2125  ;;  %v2094_v4 = vpop.permute.xlu1 %2093 }
0x2757   :  { %v2128_v5 = vmul.f32 %v5568_v49, %v2126_v3  ;;  %v2096_v7 = vmul.f32 %v5566_v0, %v2094_v4 }
0x2759   :  { %2130 = vrot.lane.b32.xlu0 %v2128_v5, %s5813_s26  ;;  %2098 = vrot.lane.b32.xlu1 %v2096_v7, %s5813_s26 }
0x275d   :  { %2142 = vrot.lane.b32.xlu1 %v2141_v15, %s5817_s7 }
0x2761   :  { %2111 = vrot.lane.b32.xlu1 %v2110_v9, %s5818_s30 }
0x27cb   :  { %v2131_v11 = vpop.permute.xlu0 %2130  ;;  %v2099_v13 = vpop.permute.xlu1 %2098 }
0x27cc   :  { %v2133_v14 = vadd.f32 %v2131_v11, %v6110_v22  ;;  %v2101_v17 = vadd.f32 %v2099_v13, %v6112_v23 }
0x27ce   :  { %5569 = vtanh.f32 %v2133_v14 }
0x27cf   :  { %5571 = vtanh.f32 %v2101_v17  ;;  %v2143_v19 = vpop.permute.xlu1 %2142 }
0x27d0   :  { %v2145_v24 = vmul.f32 %v5568_v49, %v2143_v19 }
0x27d3   :  { %v2112_v26 = vpop.permute.xlu1 %2111 }
0x27d4   :  { %v2114_v30 = vmul.f32 %v5566_v0, %v2112_v26 }
0x27d8   :  { %v5570_v18 = vpop.eup %5569 }
0x27d9   :  { %2137 = vrot.lane.b32.xlu0 %v5570_v18, %s5819_s2  ;;  %v5572_v10 = vpop.eup %5571 }
0x27dd   :  { %2105 = vrot.lane.b32.xlu0 %v5572_v10, %s5819_s2 }
0x284b   :  { %v2138_v21 = vpop.permute.xlu0 %2137 }
0x284c   :  { %v2140_v25 = vmul.f32 %v2138_v21, %v2135_v20 }
0x284e   :  { %v6533_v27 = vadd.f32 %v2145_v24, %v2140_v25 }
0x284f   :  { %v2106_v29 = vpop.permute.xlu0 %2105 }
0x2850   :  { %v2152_v31 = vrot.slane %v6533_v27, 2  ;;  %v2108_v38 = vmul.f32 %v2106_v29, %v2103_v28 }
0x2852   :  { %v6536_v34 = vadd.f32 %v2114_v30, %v2108_v38  ;;  %2153 = vrot.lane.b32.xlu1 %v2152_v31, %s5820_s0 }
0x2854   :  { %2148 = vrot.lane.b32.xlu0 %v6536_v34, %s5819_s2 }
0x28c4   :  { %v2154_v42 = vpop.permute.xlu1 %2153 }
0x28c6   :  { %v2149_v44 = vpop.permute.xlu0 %2148 }
0x28c7   :  { %v2156_v51 = vsel %vm621_vm9, %v2149_v44, %v2154_v42 }
0x28c8   :  { %v2157_v57 = vpack.c.bf16 %v2156_v51, %v2156_v51  ;;  %v2230_v19 = vrot.slane %v2156_v51, 6 }
0x28ca   :  { %v2159_v60 = vrot.slane %v2157_v57, 1 }
0x28cc   :  { %5158 = vmatmul.mubr.msk.bf16.vlgmr.msra.gmra.mrb[44].mxu0 %vm270_vm3, %v2159_v60 }
0x299f   :  { %v2197_v58 = vpop.f32.mrb[44].mxu0 }
0x29a0   :  { %v2198_v52 = vadd.f32 %v6370_v63, %v2197_v58  ;;  %v5159_v55 = vpop.f32.mrb[45].mxu0 }
0x29a1   :  { %v2200_v45 = vpop.f32.mrb[46].mxu0 }
0x29a2   :  { %v2204_v62 = vrot.slane %v2198_v52, 4  ;;  %v2236_v56 = vrot.slane %v2198_v52, 6  ;;  %v5160_v48 = vpop.f32.mrb[47].mxu0 }
0x29a4   :  { %2245 = vrot.lane.b32.xlu0 %v2236_v56, %s5812_s21  ;;  %2213 = vrot.lane.b32.xlu1 %v2204_v62, %s5812_s21  ;;  %v2206_v0 = vadd.f32 %v2204_v62, %v6112_v23  ;;  %v2238_v49 = vadd.f32 %v2236_v56, %v6110_v22  ;;  %v2393_v62 = vsel %vm248_vm4, %v6508_v12, %v6536_v34 }
0x29a6   :  { %v4842_v3 = vmul.f32 -1.442695, %v2206_v0  ;;  %v4843_v4 = vmul.f32 -1.442695, %v2238_v49 }
0x29a8   :  { %5573 = vpow2.f32 %v4842_v3 }
0x29a9   :  { %5575 = vpow2.f32 %v4843_v4 }
0x29b2   :  { %v5574_v5 = vpop.eup %5573 }
0x29b3   :  { %v5576_v7 = vpop.eup %5575  ;;  %v2210_v15 = vadd.f32 1.0, %v5574_v5 }
0x29b4   :  { %v2242_v9 = vadd.f32 1.0, %v5576_v7 }
0x29b5   :  { %5577 = vrcp.f32 %v2210_v15 }
0x29b6   :  { %5579 = vrcp.f32 %v2242_v9 }
0x29bf   :  { %v5578_v11 = vpop.eup %5577 }
0x29c0   :  { %v5580_v13 = vpop.eup %5579  ;;  %v2223_v57 = vsub.f32 1.0, %v5578_v11 }
0x29c1   :  { %v2255_v30 = vsub.f32 1.0, %v5580_v13 }
0x2a16   :  { %v2246_v14 = vpop.permute.xlu0 %2245  ;;  %v2214_v17 = vpop.permute.xlu1 %2213 }
0x2a17   :  { %v2248_v18 = vmul.f32 %v5580_v13, %v2246_v14  ;;  %v2216_v10 = vmul.f32 %v5578_v11, %v2214_v17 }
0x2a19   :  { %2250 = vrot.lane.b32.xlu0 %v2248_v18, %s5813_s26  ;;  %2218 = vrot.lane.b32.xlu1 %v2216_v10, %s5813_s26 }
0x2a1d   :  { %2261 = vrot.lane.b32.xlu1 %v2156_v51, %s5817_s7 }
0x2a21   :  { %2231 = vrot.lane.b32.xlu1 %v2230_v19, %s5818_s30 }
0x2a8b   :  { %v2251_v20 = vpop.permute.xlu0 %2250  ;;  %v2219_v21 = vpop.permute.xlu1 %2218 }
0x2a8c   :  { %v2253_v24 = vadd.f32 %v2251_v20, %v6110_v22  ;;  %v2221_v25 = vadd.f32 %v2219_v21, %v6112_v23 }
0x2a8e   :  { %5581 = vtanh.f32 %v2253_v24 }
0x2a8f   :  { %5583 = vtanh.f32 %v2221_v25  ;;  %v2262_v29 = vpop.permute.xlu1 %2261 }
0x2a90   :  { %v2264_v38 = vmul.f32 %v5580_v13, %v2262_v29 }
0x2a93   :  { %v2232_v44 = vpop.permute.xlu1 %2231 }
0x2a94   :  { %v2234_v58 = vmul.f32 %v5578_v11, %v2232_v44 }
0x2a98   :  { %v5582_v26 = vpop.eup %5581 }
0x2a99   :  { %2257 = vrot.lane.b32.xlu0 %v5582_v26, %s5819_s2  ;;  %v5584_v28 = vpop.eup %5583 }
0x2a9d   :  { %2225 = vrot.lane.b32.xlu0 %v5584_v28, %s5819_s2 }
0x2b0b   :  { %v2258_v31 = vpop.permute.xlu0 %2257 }
0x2b0c   :  { %v2260_v42 = vmul.f32 %v2258_v31, %v2255_v30 }
0x2b0e   :  { %v6556_v51 = vadd.f32 %v2264_v38, %v2260_v42 }
0x2b0f   :  { %v2226_v60 = vpop.permute.xlu0 %2225 }
0x2b10   :  { %v2271_v52 = vrot.slane %v6556_v51, 6  ;;  %v2228_v55 = vmul.f32 %v2226_v60, %v2223_v57 }
0x2b12   :  { %v2235_v45 = vadd.f32 %v2234_v58, %v2228_v55  ;;  %2272 = vrot.lane.b32.xlu1 %v2271_v52, %s5820_s0 }
0x2b14   :  { %2267 = vrot.lane.b32.xlu0 %v2235_v45, %s5819_s2  ;;  %v6565_v56 = vsel %vm188_vm2, %v2393_v62, %v2235_v45 }
0x2b84   :  { %v2273_v48 = vpop.permute.xlu1 %2272 }
0x2b86   :  { %v2268_v0 = vpop.permute.xlu0 %2267 }
0x2b87   :  { %v2275_v49 = vsel %vm621_vm9, %v2268_v0, %v2273_v48 }
0x2b88   :  { %v2276_v3 = vpack.c.bf16 %v2275_v49, %v2275_v49  ;;  %v2378_v29 = vrot.slane %v2275_v49, 4  ;;  %v2349_v30 = vrot.slane %v2275_v49, 6 }
0x2b8a   :  { %v2278_v4 = vrot.slane %v2276_v3, 2 }
0x2b8c   :  { %5166 = vmatmul.mubr.msk.bf16.vlgmr.msra.gmra.mrb[28].mxu1 %vm270_vm3, %v2278_v4 }
0x2c5f   :  { %v2316_v5 = vpop.f32.mrb[28].mxu1 }
0x2c60   :  { %v2317_v7 = vadd.f32 %v6370_v63, %v2316_v5  ;;  %v5167_v15 = vpop.f32.mrb[29].mxu1 }
0x2c61   :  { %v2319_v9 = vpop.f32.mrb[30].mxu1 }
0x2c62   :  { %v2323_v11 = vrot.slane %v2317_v7, 2  ;;  %2362 = vrot.lane.b32.xlu0 %v2317_v7, %s5812_s21  ;;  %v5168_v12 = vpop.f32.mrb[31].mxu1  ;;  %v2355_v34 = vadd.f32 %v2317_v7, %v6110_v22 }
0x2c64   :  { %2332 = vrot.lane.b32.xlu1 %v2323_v11, %s5812_s21  ;;  %v2325_v13 = vadd.f32 %v2323_v11, %v6112_v23  ;;  %v4846_v14 = vmul.f32 -1.442695, %v2355_v34  ;;  %v4847_v34 = vld [vmem:[%s7328_s10] ss:$0 sm:$0xff] }
0x2c66   :  { %v4845_v17 = vmul.f32 -1.442695, %v2325_v13  ;;  %5585 = vpow2.f32 %v4846_v14 }
0x2c68   :  { %5587 = vpow2.f32 %v4845_v17  ;;  %v4848_v17 = vld [vmem:[%s7329_s11] ss:$0 sm:$0xff] }
0x2c70   :  { %v5586_v18 = vpop.eup %5585 }
0x2c71   :  { %v2359_v19 = vadd.f32 1.0, %v5586_v18 }
0x2c72   :  { %v5588_v10 = vpop.eup %5587 }
0x2c73   :  { %v2329_v63 = vadd.f32 1.0, %v5588_v10  ;;  %5589 = vrcp.f32 %v2359_v19 }
0x2c75   :  { %5591 = vrcp.f32 %v2329_v63 }
0x2c7d   :  { %v5590_v20 = vpop.eup %5589 }
0x2c7e   :  { %v2372_v52 = vsub.f32 1.0, %v5590_v20 }
0x2c7f   :  { %v5592_v25 = vpop.eup %5591 }
0x2c80   :  { %v2342_v0 = vsub.f32 1.0, %v5592_v25 }
0x2cd4   :  { %v2363_v21 = vpop.permute.xlu0 %2362 }
0x2cd5   :  { %v2365_v24 = vmul.f32 %v5590_v20, %v2363_v21 }
0x2cd6   :  { %v2333_v26 = vpop.permute.xlu1 %2332 }
0x2cd7   :  { %v2335_v28 = vmul.f32 %v5592_v25, %v2333_v26  ;;  %2367 = vrot.lane.b32.xlu0 %v2365_v24, %s5813_s26 }
0x2cd9   :  { %2337 = vrot.lane.b32.xlu1 %v2335_v28, %s5813_s26 }
0x2cdd   :  { %2379 = vrot.lane.b32.xlu1 %v2378_v29, %s5817_s7 }
0x2ce1   :  { %2350 = vrot.lane.b32.xlu1 %v2349_v30, %s5818_s30 }
0x2ce5   :  { %2414 = vrot.lane.b32.xlu1 %v6357_v59, %s5819_s2  ;;  %v2399_v59 = vsel %vm248_vm4, %v6475_v16, %v6443_v2 }
0x2d49   :  { %v2368_v31 = vpop.permute.xlu0 %2367 }
0x2d4a   :  { %v2370_v38 = vadd.f32 %v2368_v31, %v6110_v22  ;;  %v2400_v22 = vsel %vm188_vm2, %v2399_v59, %v6414_v61 }
0x2d4b   :  { %v2338_v42 = vpop.permute.xlu1 %2337 }
0x2d4c   :  { %5593 = vtanh.f32 %v2370_v38  ;;  %v2340_v44 = vadd.f32 %v2338_v42, %v6112_v23  ;;  %v2401_v23 = vsel %vm205_vm5, %v2400_v22, %v6385_v43  ;;  %v2402_v43 = vsel %vm248_vm4, %v6350_v40, %v6308_v32 }
0x2d4d   :  { %v2403_v5 = vsel %vm188_vm2, %v2402_v43, %v6279_v33 }
0x2d4e   :  { %5595 = vtanh.f32 %v2340_v44  ;;  %v2404_v32 = vsel %vm205_vm5, %v2403_v5, %v6250_v35  ;;  %v5396_v35 = vld [vmem:[%s7327_s12 + $0x28] sm:$0xff]  }
0x2d4f   :  { %v2380_v58 = vpop.permute.xlu1 %2379 }
0x2d50   :  { %v2382_v45 = vmul.f32 %v5590_v20, %v2380_v58 }
0x2d53   :  { %v2351_v62 = vpop.permute.xlu1 %2350 }
0x2d54   :  { %v2353_v16 = vmul.f32 %v5592_v25, %v2351_v62 }
0x2d56   :  { %v5594_v57 = vpop.eup %5593 }
0x2d57   :  { %2374 = vrot.lane.b32.xlu0 %v5594_v57, %s5819_s2  ;;  %v2415_v12 = vpop.permute.xlu1 %2414 }
0x2d58   :  { %v5596_v60 = vpop.eup %5595 }
0x2d5b   :  { %2344 = vrot.lane.b32.xlu0 %v5596_v60, %s5819_s2 }
0x2d5f   :  { %2412 = vrot.lane.b32.xlu0 %v6227_v50, %s5819_s2 }
0x2d63   :  { %2416 = vrot.lane.b32.xlu0 %v6482_v1, %s5819_s2 }
0x2d67   :  { %2430 = vrot.lane.b32.xlu0 %v2401_v23, %s5820_s0  ;;  %v5399_v23 = vld [vmem:[%s7327_s12 + $0x40] sm:$0xff]  }
0x2dc9   :  { %v2375_v55 = vpop.permute.xlu0 %2374 }
0x2dca   :  { %v2377_v50 = vmul.f32 %v2375_v55, %v2372_v52 }
0x2dcc   :  { %v2383_v48 = vadd.f32 %v2382_v45, %v2377_v50 }
0x2dcd   :  { %v2345_v2 = vpop.permute.xlu0 %2344 }
0x2dce   :  { %v2347_v49 = vmul.f32 %v2345_v2, %v2342_v0  ;;  %v2396_v1 = vsel %vm248_vm4, %v2383_v48, %v6556_v51  ;;  %v2405_v51 = vsel %vm248_vm4, %v6220_v39, %v6188_v41  ;;  %v5392_v41 = vld [vmem:[%s7327_s12 + $0x8] sm:$0xff]   ;;  %v5395_v39 = vld [vmem:[%s7327_s12 + $0x20] sm:$0xff]  }
0x2dcf   :  { %v2397_v61 = vsel %vm188_vm2, %v2396_v1, %v6533_v27  ;;  %v2406_v40 = vsel %vm188_vm2, %v2405_v51, %v6159_v46  ;;  %v5393_v46 = vld [vmem:[%s7327_s12 + $0x10] sm:$0xff]   ;;  %v5400_v48 = vld [vmem:[%s7327_s12 + $0x48] sm:$0xff]  }
0x2dd0   :  { %v2354_v3 = vadd.f32 %v2353_v16, %v2347_v49  ;;  %v2398_v4 = vsel %vm205_vm5, %v2397_v61, %v6505_v37  ;;  %v2407_v33 = vsel %vm205_vm5, %v2406_v40, %v6129_v54  ;;  %v5391_v37 = vld [vmem:[%s7327_s12] sm:$0xff]   ;;  %v5394_v54 = vld [vmem:[%s7327_s12 + $0x18] sm:$0xff]   ;;  %v5397_v27 = vld [vmem:[%s7327_s12 + $0x30] sm:$0xff]  }
0x2dd1   :  { %2428 = vrot.lane.b32.xlu1 %v2398_v4, %s5820_s0  ;;  %2673 = vmatpush1.bf16.msra.mxu0 %v5391_v37  ;;  %v2413_v15 = vpop.permute.xlu0 %2412 }
0x2dd2   :  { %v2395_v7 = vsel %vm205_vm5, %v6565_v56, %v2354_v3  ;;  %2674 = vmatprep.subr.bf16.mxu0 %v5811_v8  ;;  %v5398_v56 = vld [vmem:[%s7327_s12 + $0x38] sm:$0xff]  }
0x2dd3   :  { %2418 = vrot.lane.b32.xlu0 %v2395_v7, %s5819_s2 }
0x2dd5   :  { %2432 = vrot.lane.b32.xlu1 %v2404_v32, %s5820_s0  ;;  %2675 = vmatpush1.bf16.msra.mxu0 %v5392_v41  ;;  %v2417_v9 = vpop.permute.xlu0 %2416 }
0x2dd6   :  { %2676 = vmatprep.subr.bf16.mxu0 %v5811_v8 }
0x2dd9   :  { %2434 = vrot.lane.b32.xlu1 %v2407_v33, %s5820_s0  ;;  %2677 = vmatpush1.bf16.msra.mxu0 %v5393_v46  ;;  %v2431_v11 = vpop.permute.xlu0 %2430 }
0x2dda   :  { %2678 = vmatprep.subr.bf16.mxu0 %v5811_v8  ;;  %v2441_v13 = vsel %vm621_vm9, %v2415_v12, %v2431_v11 }
0x2ddb   :  { %v2451_v14 = vmul.f32 %v4847_v34, %v2441_v13 }
0x2ddd   :  { %2679 = vmatpush1.bf16.msra.mxu0 %v5394_v54  ;;  %v2461_v18 = vadd.f32 %v4848_v17, %v2451_v14 }
0x2dde   :  { %2680 = vmatprep.subr.bf16.mxu0 %v5811_v8 }
0x2ddf   :  { %5597 = vtanh.f32 %v2461_v18 }
0x2de1   :  { %2681 = vmatpush1.bf16.msra.mxu0 %v5395_v39 }
0x2de2   :  { %2682 = vmatprep.subr.bf16.mxu0 %v5811_v8 }
0x2de5   :  { %2683 = vmatpush1.bf16.msra.mxu0 %v5396_v35 }
0x2de6   :  { %2684 = vmatprep.subr.bf16.mxu0 %v5811_v8 }
0x2de9   :  { %2685 = vmatpush1.bf16.msra.mxu0 %v5397_v27  ;;  %v5598_v42 = vpop.eup %5597 }
0x2dea   :  { %2686 = vmatprep.subr.bf16.mxu0 %v5811_v8  ;;  %v2506_v57 = vrot.slane %v5598_v42, 4 }
0x2ded   :  { %2687 = vmatpush1.bf16.msra.mxu0 %v5398_v56 }
0x2dee   :  { %2688 = vmatprep.subr.bf16.mxu0 %v5811_v8 }
0x2df1   :  { %2689 = vmatpush1.bf16.msra.mxu0 %v5399_v23 }
0x2df2   :  { %2690 = vmatprep.subr.bf16.mxu0 %v5811_v8 }
0x2df5   :  { %2691 = vmatpush1.bf16.msra.mxu0 %v5400_v48 }
0x2df6   :  { %5217 = vmatprep.subr.bf16.mxu0 %v5815_v47 }
0x2e43   :  { %v2429_v10 = vpop.permute.xlu1 %2428 }
0x2e44   :  { %v2440_v19 = vsel %vm621_vm9, %v2413_v15, %v2429_v10 }
0x2e45   :  { %v2450_v63 = vmul.f32 %v4847_v34, %v2440_v19  ;;  %v2419_v26 = vpop.permute.xlu0 %2418 }
0x2e47   :  { %v2460_v20 = vadd.f32 %v4848_v17, %v2450_v63  ;;  %v2433_v21 = vpop.permute.xlu1 %2432 }
0x2e48   :  { %v2442_v24 = vsel %vm621_vm9, %v2417_v9, %v2433_v21 }
0x2e49   :  { %5599 = vtanh.f32 %v2460_v20  ;;  %v2452_v25 = vmul.f32 %v4847_v34, %v2442_v24 }
0x2e4b   :  { %v2462_v28 = vadd.f32 %v4848_v17, %v2452_v25  ;;  %v2435_v29 = vpop.permute.xlu1 %2434 }
0x2e4c   :  { %v2443_v30 = vsel %vm621_vm9, %v2419_v26, %v2435_v29 }
0x2e4d   :  { %5601 = vtanh.f32 %v2462_v28  ;;  %v2453_v31 = vmul.f32 %v4847_v34, %v2443_v30 }
0x2e4f   :  { %v2463_v38 = vadd.f32 %v4848_v17, %v2453_v31 }
0x2e51   :  { %5603 = vtanh.f32 %v2463_v38 }
0x2e53   :  { %v5600_v44 = vpop.eup %5599 }
0x2e54   :  { %v2505_v60 = vrot.slane %v5600_v44, 4 }
0x2e56   :  { %v6665_v59 = vsel %vm188_vm2, %v2505_v60, %v2506_v57  ;;  %v6668_v22 = vsel %vm188_vm2, 0.0, %v2505_v60 }
0x2e57   :  { %v5602_v58 = vpop.eup %5601  ;;  %v2542_v55 = vrot.slane %v6668_v22, 4  ;;  %v2543_v45 = vrot.slane %v6665_v59, 4  ;;  %v2521_v50 = vrot.slane %v6668_v22, 2  ;;  %v2522_v62 = vrot.slane %v6665_v59, 2 }
0x2e58   :  { %v2508_v52 = vrot.slane %v5602_v58, 4  ;;  %v2563_v3 = vrot.slane %v6668_v22, 6  ;;  %v2564_v51 = vrot.slane %v6665_v59, 6 }
0x2e59   :  { %v2544_v8 = vsel %vm188_vm2, %v2542_v55, %v2543_v45  ;;  %v2523_v5 = vsel %vm205_vm5, %v2521_v50, %v2522_v62 }
0x2e5a   :  { %v6682_v0 = vsel %vm188_vm2, %v2506_v57, %v2508_v52  ;;  %v2565_v15 = vsel %vm248_vm4, %v2563_v3, %v2564_v51 }
0x2e5b   :  { %v5604_v2 = vpop.eup %5603  ;;  %v2597_v16 = vpack.c.bf16 %v6682_v0, %v6665_v59  ;;  %v2545_v49 = vrot.slane %v6682_v0, 4  ;;  %v2524_v1 = vrot.slane %v6682_v0, 2  ;;  %v2566_v43 = vrot.slane %v6682_v0, 6 }
0x2e5c   :  { %v2510_v61 = vrot.slane %v5604_v2, 4 }
0x2e5d   :  { %4860 = vmatprep.mubr.msk.bf16.mxu0 %vm270_vm3, %v2597_v16  ;;  %v2546_v4 = vsel %vm188_vm2, %v2543_v45, %v2545_v49  ;;  %v2525_v7 = vsel %vm205_vm5, %v2522_v62, %v2524_v1  ;;  %v2567_v41 = vsel %vm248_vm4, %v2564_v51, %v2566_v43  ;;  %v4849_v51 = vld [vmem:[%s7332_s13] ss:$0 sm:$0xff] }
0x2e5e   :  { %v2511_v32 = vsel %vm188_vm2, %v2508_v52, %v2510_v61  ;;  %v2518_v40 = vsel %vm188_vm2, %v2510_v61, 0.0  ;;  %v5351_v33 = vpack.i.bf16 %v2546_v4, %v2544_v8  ;;  %v5346_v37 = vpack.i.bf16 %v2525_v7, %v2523_v5  ;;  %v5402_v4 = vld [vmem:[%s7330_s14 + $0x8] sm:$0xff]   ;;  %v6740_v5 = vld [vmem:[%s7331_s16] sm:$0xff]  }
0x2e5f   :  { %v2526_v46 = vrot.slane %v2511_v32, 2  ;;  %v2528_v54 = vrot.slane %v2518_v40, 2  ;;  %v2547_v39 = vrot.slane %v2511_v32, 4  ;;  %v2549_v35 = vrot.slane %v2518_v40, 4  ;;  %v6748_v7 = vld [vmem:[%s7331_s16 + $0x8] sm:$0xff]  }
0x2e60   :  { %5352 = vrot.lane.b32.xlu1 %v5351_v33, %s5814_s27  ;;  %5347 = vrot.lane.b32.xlu0 %v5346_v37, %s5813_s26  ;;  %v2568_v27 = vrot.slane %v2511_v32, 6  ;;  %v2570_v56 = vrot.slane %v2518_v40, 6  ;;  %v5356_v12 = vpack.i.bf16 %v2567_v41, %v2565_v15  ;;  %v2599_v50 = vpack.c.bf16 %v2518_v40, %v2511_v32 }
0x2e61   :  { %v2527_v9 = vsel %vm205_vm5, %v2524_v1, %v2526_v46  ;;  %v2529_v11 = vsel %vm205_vm5, %v2526_v46, %v2528_v54  ;;  %v2548_v13 = vsel %vm188_vm2, %v2545_v49, %v2547_v39  ;;  %v2550_v14 = vsel %vm188_vm2, %v2547_v39, %v2549_v35 }
0x2e62   :  { %v5361_v34 = vpack.i.bf16 %v2529_v11, %v2527_v9  ;;  %v2569_v17 = vsel %vm248_vm4, %v2566_v43, %v2568_v27  ;;  %v2571_v18 = vsel %vm248_vm4, %v2568_v27, %v2570_v56  ;;  %v5366_v10 = vpack.i.bf16 %v2550_v14, %v2548_v13 }
0x2e63   :  { %v5371_v19 = vpack.i.bf16 %v2571_v18, %v2569_v17  ;;  %v4862_v17 = vld [vmem:[%s7333_s15] ss:$0 sm:$0xff] }
0x2e64   :  { %5357 = vrot.lane.b32.xlu0 %v5356_v12, %s5812_s21  ;;  %5362 = vrot.lane.b32.xlu1 %v5361_v34, %s5813_s26 }
0x2e68   :  { %5367 = vrot.lane.b32.xlu0 %v5366_v10, %s5814_s27  ;;  %5372 = vrot.lane.b32.xlu1 %v5371_v19, %s5812_s21 }
0x2ed2   :  { %v5348_v63 = vpop.permute.xlu0 %5347  ;;  %v5353_v20 = vpop.permute.xlu1 %5352 }
0x2ed3   :  { %v5350_v21 = vunpack.i.h.bf16 %v5348_v63  ;;  %v5349_v24 = vunpack.i.l.bf16 %v5348_v63  ;;  %v5355_v25 = vunpack.i.h.bf16 %v5353_v20  ;;  %v5354_v26 = vunpack.i.l.bf16 %v5353_v20 }
0x2ed5   :  { %v2585_v28 = vsel %vm270_vm3, %v6665_v59, %v5350_v21  ;;  %v2584_v29 = vsel %vm270_vm3, %v6668_v22, %v5349_v24  ;;  %v6781_v21 = vld [vmem:[%s7334_s17] ss:$0 sm:$0xff] }
0x2ed6   :  { %v5358_v30 = vpop.permute.xlu0 %5357  ;;  %v5363_v31 = vpop.permute.xlu1 %5362  ;;  %v2589_v44 = vsel %vm275_vm6, %v2585_v28, %v5355_v25  ;;  %v2588_v57 = vsel %vm275_vm6, %v2584_v29, %v5354_v26 }
0x2ed7   :  { %v5360_v38 = vunpack.i.h.bf16 %v5358_v30  ;;  %v5359_v42 = vunpack.i.l.bf16 %v5358_v30  ;;  %v5365_v60 = vunpack.i.h.bf16 %v5363_v31  ;;  %v5364_v23 = vunpack.i.l.bf16 %v5363_v31 }
0x2ed9   :  { %v2592_v58 = vsel %vm280_vm7, %v2588_v57, %v5359_v42  ;;  %v2593_v52 = vsel %vm280_vm7, %v2589_v44, %v5360_v38  ;;  %v2587_v16 = vsel %vm270_vm3, %v2511_v32, %v5365_v60  ;;  %v2586_v49 = vsel %vm270_vm3, %v6682_v0, %v5364_v23  ;;  %v5401_v0 = vld [vmem:[%s7330_s14] sm:$0xff]  }
0x2eda   :  { %v5368_v55 = vpop.permute.xlu0 %5367  ;;  %v5373_v45 = vpop.permute.xlu1 %5372  ;;  %v2596_v59 = vpack.c.bf16 %v2593_v52, %v2592_v58  ;;  %5169 = vmatprep.subr.bf16.mxu1 %v5401_v0 }
0x2edb   :  { %v5370_v62 = vunpack.i.h.bf16 %v5368_v55  ;;  %v5369_v22 = vunpack.i.l.bf16 %v5368_v55  ;;  %v5375_v48 = vunpack.i.h.bf16 %v5373_v45  ;;  %v5374_v2 = vunpack.i.l.bf16 %v5373_v45  ;;  %5170 = vmatpush3.bf16.msra.mxu1 %v5401_v0 }
0x2edc   :  { %2705 = vmatmul.mubr.bf16.vlgmr.msra.gmra.mrb[48].mxu0 %v2596_v59  ;;  %5171 = vmatprep.subr.bf16.mxu1 %v5402_v4 }
0x2edd   :  { %4861 = vmatprep.mubr.msk.bf16.mxu0 %vm270_vm3, %v2599_v50  ;;  %v2590_v1 = vsel %vm275_vm6, %v2586_v49, %v5369_v22  ;;  %v2591_v43 = vsel %vm275_vm6, %v2587_v16, %v5370_v62  ;;  %5218 = vmatpush3.bf16.msra.mxu0 %v6740_v5 }
0x2ede   :  { %v2594_v61 = vsel %vm280_vm7, %v2590_v1, %v5374_v2  ;;  %v2595_v8 = vsel %vm280_vm7, %v2591_v43, %v5375_v48  ;;  %5219 = vmatprep.subr.bf16.mxu0 %v5815_v47 }
0x2edf   :  { %v2598_v3 = vpack.c.bf16 %v2595_v8, %v2594_v61  ;;  %5172 = vmatpush3.bf16.msra.mxu1 %v5402_v4 }
0x2ee0   :  { %5177 = vmatprep.subr.bf16.mxu1 %v5815_v47 }
0x2ee1   :  { %5220 = vmatpush3.bf16.msra.mxu0 %v6748_v7 }
0x2ee2   :  { %5233 = vmatprep.subr.bf16.mxu0 %v5815_v47 }
0x2ee4   :  { %2713 = vmatmul.mubr.bf16.gmra.mrb[52].mxu0 %v2598_v3 }
0x2ee5   :  { %5221 = vmatprep.mubr.msk.bf16.mxu0 %vm5816_vm8, %v5815_v47 }
0x2faf   :  { %v2706_v32 = vpop.f32.mrb[48].mxu0 }
0x2fb0   :  { %v2707_v40 = vadd.f32 %v4849_v51, %v2706_v32  ;;  %v2708_v33 = vpop.f32.mrb[49].mxu0 }
0x2fb1   :  { %v2709_v37 = vpop.f32.mrb[50].mxu0 }
0x2fb2   :  { %v2710_v41 = vadd.f32 %v4849_v51, %v2709_v37  ;;  %v2711_v46 = vpop.f32.mrb[51].mxu0  ;;  %v2721_v54 = vmax.f32 %v2707_v40, 0.0 }
0x2fb4   :  { %v2722_v39 = vmax.f32 %v2710_v41, 0.0 }
0x2fb6   :  { %v2725_v35 = vpack.c.bf16 %v2722_v39, %v2721_v54 }
0x2fb7   :  { %v2714_v27 = vpop.f32.mrb[52].mxu0 }
0x2fb8   :  { %v2715_v56 = vadd.f32 %v4849_v51, %v2714_v27  ;;  %v2716_v15 = vpop.f32.mrb[53].mxu0  ;;  %5173 = vmatprep.mubr.msk.bf16.mxu1 %vm270_vm3, %v2725_v35 }
0x2fb9   :  { %v2717_v9 = vpop.f32.mrb[54].mxu0 }
0x2fba   :  { %v2718_v11 = vadd.f32 %v4849_v51, %v2717_v9  ;;  %v2719_v12 = vpop.f32.mrb[55].mxu0  ;;  %v2723_v34 = vmax.f32 %v2715_v56, 0.0 }
0x2fbc   :  { %v2724_v13 = vmax.f32 %v2718_v11, 0.0 }
0x2fbe   :  { %v2726_v14 = vpack.c.bf16 %v2724_v13, %v2723_v34 }
0x2fc0   :  { %5174 = vmatmul.mubr.msk.bf16.vlgmr.msra.gmra.mrb[32].mxu1 %vm270_vm3, %v2726_v14 }
0x2fc1   :  { %5178 = vmatpush3.bf16.msra.mxu1 %v6740_v5  ;;  %5181 = vmatprep.mubr.msk.bf16.mxu1 %vm5816_vm8, %v5815_v47 }
0x2fc2   :  { %5179 = vmatprep.subr.bf16.mxu1 %v5815_v47 }
0x2fc5   :  { %5180 = vmatpush3.bf16.msra.mxu1 %v6748_v7 }
0x2fc6   :  { %5185 = vmatprep.subr.bf16.mxu1 %v5815_v47 }
0x2fc8   :  { %5182 = vmatmul.mubr.msk.bf16.vlgmr.msra.gmra.mrb[36].mxu1 %vm270_vm3, %v6083_v6 }
0x2fc9   :  { %5186 = vmatpush3.bf16.msra.mxu1 %v6740_v5  ;;  %5189 = vmatprep.mubr.msk.bf16.mxu1 %vm5816_vm8, %v5815_v47 }
0x2fca   :  { %5187 = vmatprep.subr.bf16.mxu1 %v5815_v47 }
0x2fcd   :  { %5188 = vmatpush3.bf16.msra.mxu1 %v6748_v7 }
0x2fce   :  { %5193 = vmatprep.subr.bf16.mxu1 %v5815_v47 }
0x3093   :  { %v5175_v18 = vpop.f32.mrb[32].mxu1 }
0x3094   :  { %v6774_v10 = vadd.f32 %v5175_v18, %v4862_v17  ;;  %v2785_v19 = vpop.f32.mrb[33].mxu1 }
0x3095   :  { %v5176_v6 = vpop.f32.mrb[34].mxu1  ;;  %v6786_v31 = vadd.f32 %v4862_v17, %v2785_v19 }
0x3096   :  { %v2788_v63 = vpop.f32.mrb[35].mxu1  ;;  %v6788_v38 = vadd.f32 %v5176_v6, %v4862_v17 }
0x3097   :  { %v6776_v20 = vadd.f32 %v4862_v17, %v2788_v63 }
0x309b   :  { %v2852_v24 = vpop.f32.mrb[36].mxu1 }
0x309c   :  { %v2853_v25 = vadd.f32 %v6781_v21, %v2852_v24  ;;  %v5183_v26 = vpop.f32.mrb[37].mxu1 }
0x309d   :  { %v2855_v28 = vpop.f32.mrb[38].mxu1 }
0x309e   :  { %v2884_v29 = vrot.slane %v2853_v25, 2  ;;  %2866 = vrot.lane.b32.xlu1 %v2853_v25, %s5812_s21  ;;  %v5184_v30 = vpop.f32.mrb[39].mxu1  ;;  %v2858_v42 = vadd.f32 %v2853_v25, %v6786_v31 }
0x30a0   :  { %2893 = vrot.lane.b32.xlu0 %v2884_v29, %s5812_s21  ;;  %v2886_v44 = vadd.f32 %v2884_v29, %v6788_v38  ;;  %v4871_v57 = vmul.f32 -1.442695, %v2858_v42 }
0x30a2   :  { %v4872_v60 = vmul.f32 -1.442695, %v2886_v44  ;;  %5605 = vpow2.f32 %v4871_v57 }
0x30a4   :  { %5607 = vpow2.f32 %v4872_v60 }
0x30ac   :  { %v5606_v23 = vpop.eup %5605 }
0x30ad   :  { %v2862_v52 = vadd.f32 1.0, %v5606_v23 }
0x30ae   :  { %v5608_v58 = vpop.eup %5607 }
0x30af   :  { %v2890_v55 = vadd.f32 1.0, %v5608_v58  ;;  %5609 = vrcp.f32 %v2862_v52 }
0x30b1   :  { %5611 = vrcp.f32 %v2890_v55 }
0x30b9   :  { %v5610_v45 = vpop.eup %5609 }
0x30ba   :  { %v2876_v8 = vsub.f32 1.0, %v5610_v45  ;;  %v2882_v0 = vmul.f32 %v5610_v45, %v6127_v53 }
0x30bb   :  { %v5612_v62 = vpop.eup %5611 }
0x30bc   :  { %v2903_v51 = vsub.f32 1.0, %v5612_v62  ;;  %v2909_v33 = vmul.f32 %v5612_v62, %v6124_v36 }
0x3110   :  { %v2867_v59 = vpop.permute.xlu1 %2866 }
0x3111   :  { %v2869_v50 = vmul.f32 %v5610_v45, %v2867_v59 }
0x3112   :  { %v2894_v22 = vpop.permute.xlu0 %2893 }
0x3113   :  { %v2896_v48 = vmul.f32 %v5612_v62, %v2894_v22  ;;  %2871 = vrot.lane.b32.xlu1 %v2869_v50, %s5813_s26 }
0x3115   :  { %2898 = vrot.lane.b32.xlu0 %v2896_v48, %s5813_s26 }
0x3185   :  { %v2872_v2 = vpop.permute.xlu1 %2871 }
0x3186   :  { %v2874_v16 = vadd.f32 %v2872_v2, %v6786_v31 }
0x3187   :  { %v2899_v49 = vpop.permute.xlu0 %2898 }
0x3188   :  { %5613 = vtanh.f32 %v2874_v16  ;;  %v2901_v1 = vadd.f32 %v2899_v49, %v6788_v38 }
0x318a   :  { %5615 = vtanh.f32 %v2901_v1 }
0x3192   :  { %v5614_v43 = vpop.eup %5613 }
0x3193   :  { %2878 = vrot.lane.b32.xlu1 %v5614_v43, %s5819_s2 }
0x3194   :  { %v5616_v61 = vpop.eup %5615 }
0x3195   :  { %2905 = vrot.lane.b32.xlu0 %v5616_v61, %s5819_s2 }
0x3205   :  { %v2879_v3 = vpop.permute.xlu1 %2878 }
0x3206   :  { %v2881_v4 = vmul.f32 %v2879_v3, %v2876_v8 }
0x3207   :  { %v2906_v32 = vpop.permute.xlu0 %2905 }
0x3208   :  { %v6799_v40 = vadd.f32 %v2882_v0, %v2881_v4  ;;  %v2908_v37 = vmul.f32 %v2906_v32, %v2903_v51 }
0x320a   :  { %v6802_v41 = vadd.f32 %v2909_v33, %v2908_v37  ;;  %2912 = vrot.lane.b32.xlu0 %v6799_v40, %s5819_s2 }
0x320c   :  { %v2916_v46 = vrot.slane %v6802_v41, 6 }
0x320e   :  { %2917 = vrot.lane.b32.xlu1 %v2916_v46, %s5820_s0 }
0x327c   :  { %v2913_v54 = vpop.permute.xlu0 %2912 }
0x3280   :  { %v2918_v39 = vpop.permute.xlu1 %2917 }
0x3281   :  { %v2920_v53 = vsel %vm621_vm9, %v2913_v54, %v2918_v39 }
0x3282   :  { %v2921_v35 = vpack.c.bf16 %v2920_v53, %v2920_v53  ;;  %v3023_v42 = vrot.slane %v2920_v53, 4  ;;  %v2992_v44 = vrot.slane %v2920_v53, 6 }
0x3284   :  { %5190 = vmatmul.mubr.msk.bf16.vlgmr.msra.gmra.mrb[40].mxu1 %vm270_vm3, %v2921_v35 }
0x3285   :  { %5194 = vmatpush3.bf16.msra.mxu1 %v6740_v5  ;;  %5197 = vmatprep.mubr.msk.bf16.mxu1 %vm5816_vm8, %v5815_v47 }
0x3286   :  { %5195 = vmatprep.subr.bf16.mxu1 %v5815_v47 }
0x3289   :  { %5196 = vmatpush3.bf16.msra.mxu1 %v6748_v7 }
0x328a   :  { %5201 = vmatprep.subr.bf16.mxu1 %v5815_v47 }
0x3357   :  { %v2959_v36 = vpop.f32.mrb[40].mxu1 }
0x3358   :  { %v2960_v27 = vadd.f32 %v6781_v21, %v2959_v36  ;;  %v5191_v56 = vpop.f32.mrb[41].mxu1 }
0x3359   :  { %v2962_v15 = vpop.f32.mrb[42].mxu1 }
0x335a   :  { %v2966_v9 = vrot.slane %v2960_v27, 6  ;;  %v2998_v11 = vrot.slane %v2960_v27, 4  ;;  %v5192_v12 = vpop.f32.mrb[43].mxu1 }
0x335c   :  { %3007 = vrot.lane.b32.xlu0 %v2998_v11, %s5812_s21  ;;  %2975 = vrot.lane.b32.xlu1 %v2966_v9, %s5812_s21  ;;  %v2968_v34 = vadd.f32 %v2966_v9, %v6786_v31  ;;  %v3000_v13 = vadd.f32 %v2998_v11, %v6788_v38 }
0x335e   :  { %v4874_v14 = vmul.f32 -1.442695, %v2968_v34  ;;  %v4875_v17 = vmul.f32 -1.442695, %v3000_v13 }
0x3360   :  { %5617 = vpow2.f32 %v4874_v14 }
0x3361   :  { %5619 = vpow2.f32 %v4875_v17 }
0x336a   :  { %v5618_v18 = vpop.eup %5617 }
0x336b   :  { %v5620_v19 = vpop.eup %5619  ;;  %v2972_v6 = vadd.f32 1.0, %v5618_v18 }
0x336c   :  { %v3004_v63 = vadd.f32 1.0, %v5620_v19 }
0x336d   :  { %5621 = vrcp.f32 %v2972_v6 }
0x336e   :  { %5623 = vrcp.f32 %v3004_v63 }
0x3377   :  { %v5622_v24 = vpop.eup %5621 }
0x3378   :  { %v5624_v25 = vpop.eup %5623  ;;  %v2985_v16 = vsub.f32 1.0, %v5622_v24 }
0x3379   :  { %v3017_v59 = vsub.f32 1.0, %v5624_v25 }
0x33ce   :  { %v3008_v26 = vpop.permute.xlu0 %3007  ;;  %v2976_v28 = vpop.permute.xlu1 %2975 }
0x33cf   :  { %v3010_v29 = vmul.f32 %v5624_v25, %v3008_v26  ;;  %v2978_v30 = vmul.f32 %v5622_v24, %v2976_v28 }
0x33d1   :  { %3012 = vrot.lane.b32.xlu0 %v3010_v29, %s5813_s26  ;;  %2980 = vrot.lane.b32.xlu1 %v2978_v30, %s5813_s26 }
0x33d5   :  { %3024 = vrot.lane.b32.xlu1 %v3023_v42, %s5817_s7 }
0x33d9   :  { %2993 = vrot.lane.b32.xlu1 %v2992_v44, %s5818_s30 }
0x3443   :  { %v3013_v57 = vpop.permute.xlu0 %3012  ;;  %v2981_v60 = vpop.permute.xlu1 %2980 }
0x3444   :  { %v3015_v23 = vadd.f32 %v3013_v57, %v6788_v38  ;;  %v2983_v58 = vadd.f32 %v2981_v60, %v6786_v31 }
0x3446   :  { %5625 = vtanh.f32 %v3015_v23 }
0x3447   :  { %5627 = vtanh.f32 %v2983_v58  ;;  %v3025_v45 = vpop.permute.xlu1 %3024 }
0x3448   :  { %v3027_v62 = vmul.f32 %v5624_v25, %v3025_v45 }
0x344b   :  { %v2994_v48 = vpop.permute.xlu1 %2993 }
0x344c   :  { %v2996_v1 = vmul.f32 %v5622_v24, %v2994_v48 }
0x3450   :  { %v5626_v52 = vpop.eup %5625 }
0x3451   :  { %3019 = vrot.lane.b32.xlu0 %v5626_v52, %s5819_s2  ;;  %v5628_v55 = vpop.eup %5627 }
0x3455   :  { %2987 = vrot.lane.b32.xlu0 %v5628_v55, %s5819_s2 }
0x34c3   :  { %v3020_v50 = vpop.permute.xlu0 %3019 }
0x34c4   :  { %v3022_v22 = vmul.f32 %v3020_v50, %v3017_v59 }
0x34c6   :  { %v6829_v2 = vadd.f32 %v3027_v62, %v3022_v22 }
0x34c7   :  { %v2988_v49 = vpop.permute.xlu0 %2987 }
0x34c8   :  { %v3034_v43 = vrot.slane %v6829_v2, 2  ;;  %v2990_v61 = vmul.f32 %v2988_v49, %v2985_v16 }
0x34ca   :  { %v6832_v8 = vadd.f32 %v2996_v1, %v2990_v61  ;;  %3035 = vrot.lane.b32.xlu1 %v3034_v43, %s5820_s0 }
0x34cc   :  { %3030 = vrot.lane.b32.xlu0 %v6832_v8, %s5819_s2  ;;  %v4682_v48 = vsel %vm248_vm4, %v6799_v40, %v6832_v8 }
0x353c   :  { %v3036_v3 = vpop.permute.xlu1 %3035 }
0x353e   :  { %v3031_v0 = vpop.permute.xlu0 %3030 }
0x353f   :  { %v3038_v4 = vsel %vm621_vm9, %v3031_v0, %v3036_v3 }
0x3540   :  { %v3039_v51 = vpack.c.bf16 %v3038_v4, %v3038_v4  ;;  %v3112_v63 = vrot.slane %v3038_v4, 6 }
0x3542   :  { %v3041_v32 = vrot.slane %v3039_v51, 1 }
0x3544   :  { %5198 = vmatmul.mubr.msk.bf16.vlgmr.msra.gmra.mrb[44].mxu1 %vm270_vm3, %v3041_v32 }
0x3545   :  { %5202 = vmatpush3.bf16.msra.mxu1 %v6740_v5  ;;  %5205 = vmatprep.mubr.msk.bf16.mxu1 %vm5816_vm8, %v5815_v47 }
0x3546   :  { %5203 = vmatprep.subr.bf16.mxu1 %v5815_v47 }
0x3549   :  { %5204 = vmatpush3.bf16.msra.mxu1 %v6748_v7 }
0x354a   :  { %5209 = vmatprep.subr.bf16.mxu1 %v5815_v47 }
0x3617   :  { %v3079_v33 = vpop.f32.mrb[44].mxu1 }
0x3618   :  { %v3080_v37 = vadd.f32 %v6781_v21, %v3079_v33  ;;  %v5199_v46 = vpop.f32.mrb[45].mxu1 }
0x3619   :  { %v3082_v54 = vpop.f32.mrb[46].mxu1 }
0x361a   :  { %v3086_v39 = vrot.slane %v3080_v37, 4  ;;  %v3118_v53 = vrot.slane %v3080_v37, 6  ;;  %v5200_v35 = vpop.f32.mrb[47].mxu1 }
0x361c   :  { %3127 = vrot.lane.b32.xlu0 %v3118_v53, %s5812_s21  ;;  %3095 = vrot.lane.b32.xlu1 %v3086_v39, %s5812_s21  ;;  %v3088_v36 = vadd.f32 %v3086_v39, %v6786_v31  ;;  %v3120_v27 = vadd.f32 %v3118_v53, %v6788_v38 }
0x361e   :  { %v4877_v56 = vmul.f32 -1.442695, %v3088_v36  ;;  %v4878_v15 = vmul.f32 -1.442695, %v3120_v27 }
0x3620   :  { %5629 = vpow2.f32 %v4877_v56 }
0x3621   :  { %5631 = vpow2.f32 %v4878_v15 }
0x362a   :  { %v5630_v9 = vpop.eup %5629 }
0x362b   :  { %v5632_v11 = vpop.eup %5631  ;;  %v3092_v12 = vadd.f32 1.0, %v5630_v9 }
0x362c   :  { %v3124_v34 = vadd.f32 1.0, %v5632_v11 }
0x362d   :  { %5633 = vrcp.f32 %v3092_v12 }
0x362e   :  { %5635 = vrcp.f32 %v3124_v34 }
0x3637   :  { %v5634_v13 = vpop.eup %5633 }
0x3638   :  { %v5636_v14 = vpop.eup %5635  ;;  %v3105_v55 = vsub.f32 1.0, %v5634_v13 }
0x3639   :  { %v3137_v44 = vsub.f32 1.0, %v5636_v14 }
0x368e   :  { %v3128_v17 = vpop.permute.xlu0 %3127  ;;  %v3096_v18 = vpop.permute.xlu1 %3095 }
0x368f   :  { %v3130_v19 = vmul.f32 %v5636_v14, %v3128_v17  ;;  %v3098_v6 = vmul.f32 %v5634_v13, %v3096_v18 }
0x3691   :  { %3132 = vrot.lane.b32.xlu0 %v3130_v19, %s5813_s26  ;;  %3100 = vrot.lane.b32.xlu1 %v3098_v6, %s5813_s26 }
0x3695   :  { %3143 = vrot.lane.b32.xlu1 %v3038_v4, %s5817_s7 }
0x3699   :  { %3113 = vrot.lane.b32.xlu1 %v3112_v63, %s5818_s30 }
0x3703   :  { %v3133_v24 = vpop.permute.xlu0 %3132  ;;  %v3101_v25 = vpop.permute.xlu1 %3100 }
0x3704   :  { %v3135_v26 = vadd.f32 %v3133_v24, %v6788_v38  ;;  %v3103_v28 = vadd.f32 %v3101_v25, %v6786_v31 }
0x3706   :  { %5637 = vtanh.f32 %v3135_v26 }
0x3707   :  { %5639 = vtanh.f32 %v3103_v28  ;;  %v3144_v42 = vpop.permute.xlu1 %3143 }
0x3708   :  { %v3146_v60 = vmul.f32 %v5636_v14, %v3144_v42 }
0x370b   :  { %v3114_v58 = vpop.permute.xlu1 %3113 }
0x370c   :  { %v3116_v59 = vmul.f32 %v5634_v13, %v3114_v58 }
0x3710   :  { %v5638_v29 = vpop.eup %5637 }
0x3711   :  { %3139 = vrot.lane.b32.xlu0 %v5638_v29, %s5819_s2  ;;  %v5640_v30 = vpop.eup %5639 }
0x3715   :  { %3107 = vrot.lane.b32.xlu0 %v5640_v30, %s5819_s2 }
0x3783   :  { %v3140_v57 = vpop.permute.xlu0 %3139 }
0x3784   :  { %v3142_v23 = vmul.f32 %v3140_v57, %v3137_v44 }
0x3786   :  { %v6858_v52 = vadd.f32 %v3146_v60, %v3142_v23 }
0x3787   :  { %v3108_v45 = vpop.permute.xlu0 %3107 }
0x3788   :  { %v3153_v50 = vrot.slane %v6858_v52, 6  ;;  %v3110_v62 = vmul.f32 %v3108_v45, %v3105_v55 }
0x378a   :  { %v3117_v22 = vadd.f32 %v3116_v59, %v3110_v62  ;;  %3154 = vrot.lane.b32.xlu1 %v3153_v50, %s5820_s0 }
0x378c   :  { %3149 = vrot.lane.b32.xlu0 %v3117_v22, %s5819_s2  ;;  %v6867_v16 = vsel %vm188_vm2, %v4682_v48, %v3117_v22 }
0x37fc   :  { %v3155_v49 = vpop.permute.xlu1 %3154 }
0x37fe   :  { %v3150_v1 = vpop.permute.xlu0 %3149 }
0x37ff   :  { %v3157_v43 = vsel %vm621_vm9, %v3150_v1, %v3155_v49 }
0x3800   :  { %v3158_v61 = vpack.c.bf16 %v3157_v43, %v3157_v43  ;;  %v3260_v34 = vrot.slane %v3157_v43, 4  ;;  %v3231_v13 = vrot.slane %v3157_v43, 6 }
0x3802   :  { %v3160_v3 = vrot.slane %v3158_v61, 2 }
0x3804   :  { %5206 = vmatmul.mubr.msk.bf16.vlgmr.msra.gmra.mrb[48].mxu1 %vm270_vm3, %v3160_v3 }
0x3805   :  { %5210 = vmatpush3.bf16.msra.mxu1 %v6740_v5  ;;  %5213 = vmatprep.mubr.msk.bf16.mxu1 %vm5816_vm8, %v5815_v47 }
0x3806   :  { %5211 = vmatprep.subr.bf16.mxu1 %v5815_v47 }
0x3809   :  { %5212 = vmatpush3.bf16.msra.mxu1 %v6748_v7 }
0x380a   :  { %5225 = vmatprep.subr.bf16.mxu1 %v5815_v47 }
0x38d7   :  { %v3198_v40 = vpop.f32.mrb[48].mxu1 }
0x38d8   :  { %v3199_v8 = vadd.f32 %v6781_v21, %v3198_v40  ;;  %v5207_v0 = vpop.f32.mrb[49].mxu1 }
0x38d9   :  { %v3201_v4 = vpop.f32.mrb[50].mxu1 }
0x38da   :  { %v3205_v51 = vrot.slane %v3199_v8, 2  ;;  %3244 = vrot.lane.b32.xlu0 %v3199_v8, %s5812_s21  ;;  %v5208_v32 = vpop.f32.mrb[51].mxu1  ;;  %v3237_v33 = vadd.f32 %v3199_v8, %v6788_v38 }
0x38dc   :  { %3214 = vrot.lane.b32.xlu1 %v3205_v51, %s5812_s21  ;;  %v3207_v37 = vadd.f32 %v3205_v51, %v6786_v31  ;;  %v4881_v46 = vmul.f32 -1.442695, %v3237_v33 }
0x38de   :  { %v4880_v54 = vmul.f32 -1.442695, %v3207_v37  ;;  %5641 = vpow2.f32 %v4881_v46 }
0x38e0   :  { %5643 = vpow2.f32 %v4880_v54 }
0x38e8   :  { %v5642_v39 = vpop.eup %5641 }
0x38e9   :  { %v3241_v35 = vadd.f32 1.0, %v5642_v39 }
0x38ea   :  { %v5644_v53 = vpop.eup %5643 }
0x38eb   :  { %v3211_v36 = vadd.f32 1.0, %v5644_v53  ;;  %5645 = vrcp.f32 %v3241_v35 }
0x38ed   :  { %5647 = vrcp.f32 %v3211_v36 }
0x38f5   :  { %v5646_v27 = vpop.eup %5645 }
0x38f6   :  { %v3254_v25 = vsub.f32 1.0, %v5646_v27 }
0x38f7   :  { %v5648_v9 = vpop.eup %5647 }
0x38f8   :  { %v3224_v44 = vsub.f32 1.0, %v5648_v9 }
0x394c   :  { %v3245_v56 = vpop.permute.xlu0 %3244 }
0x394d   :  { %v3247_v15 = vmul.f32 %v5646_v27, %v3245_v56 }
0x394e   :  { %v3215_v11 = vpop.permute.xlu1 %3214 }
0x394f   :  { %v3217_v12 = vmul.f32 %v5648_v9, %v3215_v11  ;;  %3249 = vrot.lane.b32.xlu0 %v3247_v15, %s5813_s26 }
0x3951   :  { %3219 = vrot.lane.b32.xlu1 %v3217_v12, %s5813_s26 }
0x3955   :  { %3261 = vrot.lane.b32.xlu1 %v3260_v34, %s5817_s7 }
0x3959   :  { %3232 = vrot.lane.b32.xlu1 %v3231_v13, %s5818_s30 }
0x39c1   :  { %v3250_v14 = vpop.permute.xlu0 %3249 }
0x39c2   :  { %v3252_v17 = vadd.f32 %v3250_v14, %v6788_v38 }
0x39c3   :  { %v3220_v18 = vpop.permute.xlu1 %3219 }
0x39c4   :  { %5649 = vtanh.f32 %v3252_v17  ;;  %v3222_v19 = vadd.f32 %v3220_v18, %v6786_v31 }
0x39c6   :  { %5651 = vtanh.f32 %v3222_v19 }
0x39c7   :  { %v3262_v24 = vpop.permute.xlu1 %3261 }
0x39c8   :  { %v3264_v28 = vmul.f32 %v5646_v27, %v3262_v24 }
0x39cb   :  { %v3233_v30 = vpop.permute.xlu1 %3232 }
0x39cc   :  { %v3235_v60 = vmul.f32 %v5648_v9, %v3233_v30 }
0x39ce   :  { %v5650_v6 = vpop.eup %5649 }
0x39cf   :  { %3256 = vrot.lane.b32.xlu0 %v5650_v6, %s5819_s2 }
0x39d0   :  { %v5652_v63 = vpop.eup %5651 }
0x39d3   :  { %3226 = vrot.lane.b32.xlu0 %v5652_v63, %s5819_s2 }
0x3a41   :  { %v3257_v26 = vpop.permute.xlu0 %3256 }
0x3a42   :  { %v3259_v29 = vmul.f32 %v3257_v26, %v3254_v25 }
0x3a44   :  { %v6890_v42 = vadd.f32 %v3264_v28, %v3259_v29 }
0x3a45   :  { %v3227_v57 = vpop.permute.xlu0 %3226 }
0x3a46   :  { %v3271_v23 = vrot.slane %v6890_v42, 2  ;;  %v3229_v58 = vmul.f32 %v3227_v57, %v3224_v44 }
0x3a48   :  { %v3236_v55 = vadd.f32 %v3235_v60, %v3229_v58  ;;  %3272 = vrot.lane.b32.xlu1 %v3271_v23, %s5820_s0 }
0x3a4a   :  { %3267 = vrot.lane.b32.xlu0 %v3236_v55, %s5819_s2  ;;  %v6897_v45 = vsel %vm205_vm5, %v6867_v16, %v3236_v55 }
0x3aba   :  { %v3273_v59 = vpop.permute.xlu1 %3272 }
0x3abc   :  { %v3268_v50 = vpop.permute.xlu0 %3267 }
0x3abd   :  { %v3275_v62 = vsel %vm621_vm9, %v3268_v50, %v3273_v59 }
0x3abe   :  { %v3276_v22 = vpack.c.bf16 %v3275_v62, %v3275_v62  ;;  %v3347_v27 = vrot.slane %v3275_v62, 6 }
0x3ac0   :  { %v3278_v48 = vrot.slane %v3276_v22, 3 }
0x3ac2   :  { %5214 = vmatmul.mubr.msk.bf16.vlgmr.msra.gmra.mrb[52].mxu1 %vm270_vm3, %v3278_v48 }
0x3ac3   :  { %5226 = vmatpush3.bf16.msra.mxu1 %v6740_v5  ;;  %5229 = vmatprep.mubr.msk.bf16.mxu1 %vm5816_vm8, %v5815_v47 }
0x3ac4   :  { %5227 = vmatprep.subr.bf16.mxu1 %v5815_v47 }
0x3ac7   :  { %5228 = vmatpush3.bf16.msra.mxu1 %v6748_v7 }
0x3ac8   :  { %5241 = vmatprep.subr.bf16.mxu1 %v5815_v47 }
0x3b95   :  { %v3316_v16 = vpop.f32.mrb[52].mxu1 }
0x3b96   :  { %v3317_v49 = vadd.f32 %v6781_v21, %v3316_v16  ;;  %v5215_v1 = vpop.f32.mrb[53].mxu1 }
0x3b97   :  { %v3319_v43 = vpop.f32.mrb[54].mxu1 }
0x3b98   :  { %v3353_v61 = vrot.slane %v3317_v49, 2  ;;  %3330 = vrot.lane.b32.xlu1 %v3317_v49, %s5812_s21  ;;  %v5216_v3 = vpop.f32.mrb[55].mxu1  ;;  %v3322_v40 = vadd.f32 %v3317_v49, %v6776_v20 }
0x3b9a   :  { %3362 = vrot.lane.b32.xlu0 %v3353_v61, %s5812_s21  ;;  %v3355_v8 = vadd.f32 %v3353_v61, %v6774_v10  ;;  %v4883_v0 = vmul.f32 -1.442695, %v3322_v40 }
0x3b9c   :  { %v4884_v4 = vmul.f32 -1.442695, %v3355_v8  ;;  %5653 = vpow2.f32 %v4883_v0 }
0x3b9e   :  { %5655 = vpow2.f32 %v4884_v4 }
0x3ba6   :  { %v5654_v51 = vpop.eup %5653 }
0x3ba7   :  { %v3326_v33 = vadd.f32 1.0, %v5654_v51 }
0x3ba8   :  { %v5656_v32 = vpop.eup %5655 }
0x3ba9   :  { %v3359_v37 = vadd.f32 1.0, %v5656_v32  ;;  %5657 = vrcp.f32 %v3326_v33 }
0x3bab   :  { %5659 = vrcp.f32 %v3359_v37 }
0x3bb3   :  { %v5658_v46 = vpop.eup %5657 }
0x3bb4   :  { %v3340_v24 = vsub.f32 1.0, %v5658_v46 }
0x3bb5   :  { %v5660_v53 = vpop.eup %5659 }
0x3bb6   :  { %v3372_v14 = vsub.f32 1.0, %v5660_v53 }
0x3c0a   :  { %v3331_v54 = vpop.permute.xlu1 %3330 }
0x3c0b   :  { %v3333_v39 = vmul.f32 %v5658_v46, %v3331_v54 }
0x3c0c   :  { %v3363_v35 = vpop.permute.xlu0 %3362 }
0x3c0d   :  { %v3365_v36 = vmul.f32 %v5660_v53, %v3363_v35  ;;  %3335 = vrot.lane.b32.xlu1 %v3333_v39, %s5813_s26 }
0x3c0f   :  { %3367 = vrot.lane.b32.xlu0 %v3365_v36, %s5813_s26 }
0x3c11   :  { %3378 = vrot.lane.b32.xlu1 %v3275_v62, %s5817_s7 }
0x3c15   :  { %3348 = vrot.lane.b32.xlu1 %v3347_v27, %s5818_s30 }
0x3c7f   :  { %v3336_v56 = vpop.permute.xlu1 %3335 }
0x3c80   :  { %v3338_v11 = vadd.f32 %v3336_v56, %v6776_v20 }
0x3c81   :  { %v3368_v15 = vpop.permute.xlu0 %3367 }
0x3c82   :  { %v3370_v9 = vadd.f32 %v3368_v15, %v6774_v10 }
0x3c83   :  { %v3379_v13 = vpop.permute.xlu1 %3378 }
0x3c84   :  { %5661 = vtanh.f32 %v3370_v9  ;;  %v3381_v18 = vmul.f32 %v5660_v53, %v3379_v13 }
0x3c85   :  { %5663 = vtanh.f32 %v3338_v11 }
0x3c87   :  { %v3349_v6 = vpop.permute.xlu1 %3348 }
0x3c88   :  { %v3351_v26 = vmul.f32 %v5658_v46, %v3349_v6 }
0x3c8e   :  { %v5662_v12 = vpop.eup %5661 }
0x3c8f   :  { %3374 = vrot.lane.b32.xlu0 %v5662_v12, %s5819_s2  ;;  %v5664_v34 = vpop.eup %5663 }
0x3c93   :  { %3342 = vrot.lane.b32.xlu0 %v5664_v34, %s5819_s2 }
0x3d01   :  { %v3375_v17 = vpop.permute.xlu0 %3374 }
0x3d02   :  { %v3377_v19 = vmul.f32 %v3375_v17, %v3372_v14 }
0x3d04   :  { %v6920_v63 = vadd.f32 %v3381_v18, %v3377_v19 }
0x3d05   :  { %v3343_v25 = vpop.permute.xlu0 %3342 }
0x3d06   :  { %v3388_v28 = vrot.slane %v6920_v63, 6  ;;  %v3345_v29 = vmul.f32 %v3343_v25, %v3340_v24 }
0x3d08   :  { %v6923_v30 = vadd.f32 %v3351_v26, %v3345_v29  ;;  %3389 = vrot.lane.b32.xlu1 %v3388_v28, %s5820_s0 }
0x3d0a   :  { %3384 = vrot.lane.b32.xlu0 %v6923_v30, %s5819_s2 }
0x3d7a   :  { %v3390_v44 = vpop.permute.xlu1 %3389 }
0x3d7c   :  { %v3385_v57 = vpop.permute.xlu0 %3384 }
0x3d7d   :  { %v3392_v60 = vsel %vm621_vm9, %v3385_v57, %v3390_v44 }
0x3d7e   :  { %v3393_v23 = vpack.c.bf16 %v3392_v60, %v3392_v60  ;;  %v3495_v46 = vrot.slane %v3392_v60, 4  ;;  %v3464_v54 = vrot.slane %v3392_v60, 6 }
0x3d80   :  { %5222 = vmatmul.mubr.msk.bf16.vlgmr.msra.gmra.mrb[56].mxu0 %vm270_vm3, %v3393_v23 }
0x3d81   :  { %5234 = vmatpush3.bf16.msra.mxu0 %v6740_v5  ;;  %5237 = vmatprep.mubr.msk.bf16.mxu0 %vm5816_vm8, %v5815_v47 }
0x3d82   :  { %5235 = vmatprep.subr.bf16.mxu0 %v5815_v47 }
0x3d85   :  { %5236 = vmatpush3.bf16.msra.mxu0 %v6748_v7 }
0x3d86   :  { %5249 = vmatprep.subr.bf16.mxu0 %v5815_v47 }
0x3e53   :  { %v3431_v58 = vpop.f32.mrb[56].mxu0 }
0x3e54   :  { %v3432_v55 = vadd.f32 %v6781_v21, %v3431_v58  ;;  %v5223_v59 = vpop.f32.mrb[57].mxu0 }
0x3e55   :  { %v3434_v50 = vpop.f32.mrb[58].mxu0 }
0x3e56   :  { %v3438_v62 = vrot.slane %v3432_v55, 6  ;;  %v3470_v22 = vrot.slane %v3432_v55, 4  ;;  %v5224_v48 = vpop.f32.mrb[59].mxu0 }
0x3e58   :  { %3479 = vrot.lane.b32.xlu0 %v3470_v22, %s5812_s21  ;;  %3447 = vrot.lane.b32.xlu1 %v3438_v62, %s5812_s21  ;;  %v3440_v16 = vadd.f32 %v3438_v62, %v6776_v20  ;;  %v3472_v49 = vadd.f32 %v3470_v22, %v6774_v10 }
0x3e5a   :  { %v4886_v1 = vmul.f32 -1.442695, %v3440_v16  ;;  %v4887_v43 = vmul.f32 -1.442695, %v3472_v49 }
0x3e5c   :  { %5665 = vpow2.f32 %v4886_v1 }
0x3e5d   :  { %5667 = vpow2.f32 %v4887_v43 }
0x3e66   :  { %v5666_v61 = vpop.eup %5665 }
0x3e67   :  { %v5668_v3 = vpop.eup %5667  ;;  %v3444_v40 = vadd.f32 1.0, %v5666_v61 }
0x3e68   :  { %v3476_v8 = vadd.f32 1.0, %v5668_v3 }
0x3e69   :  { %5669 = vrcp.f32 %v3444_v40 }
0x3e6a   :  { %5671 = vrcp.f32 %v3476_v8 }
0x3e73   :  { %v5670_v0 = vpop.eup %5669 }
0x3e74   :  { %v5672_v4 = vpop.eup %5671  ;;  %v3457_v17 = vsub.f32 1.0, %v5670_v0 }
0x3e75   :  { %v3489_v9 = vsub.f32 1.0, %v5672_v4 }
0x3eca   :  { %v3480_v51 = vpop.permute.xlu0 %3479  ;;  %v3448_v32 = vpop.permute.xlu1 %3447 }
0x3ecb   :  { %v3482_v33 = vmul.f32 %v5672_v4, %v3480_v51  ;;  %v3450_v37 = vmul.f32 %v5670_v0, %v3448_v32 }
0x3ecd   :  { %3484 = vrot.lane.b32.xlu0 %v3482_v33, %s5813_s26  ;;  %3452 = vrot.lane.b32.xlu1 %v3450_v37, %s5813_s26 }
0x3ed1   :  { %3496 = vrot.lane.b32.xlu1 %v3495_v46, %s5817_s7 }
0x3ed5   :  { %3465 = vrot.lane.b32.xlu1 %v3464_v54, %s5818_s30 }
0x3f3f   :  { %v3485_v39 = vpop.permute.xlu0 %3484  ;;  %v3453_v53 = vpop.permute.xlu1 %3452 }
0x3f40   :  { %v3487_v35 = vadd.f32 %v3485_v39, %v6774_v10  ;;  %v3455_v36 = vadd.f32 %v3453_v53, %v6776_v20 }
0x3f42   :  { %5673 = vtanh.f32 %v3487_v35 }
0x3f43   :  { %5675 = vtanh.f32 %v3455_v36  ;;  %v3497_v15 = vpop.permute.xlu1 %3496 }
0x3f44   :  { %v3499_v12 = vmul.f32 %v5672_v4, %v3497_v15 }
0x3f47   :  { %v3466_v13 = vpop.permute.xlu1 %3465 }
0x3f48   :  { %v3468_v19 = vmul.f32 %v5670_v0, %v3466_v13 }
0x3f4c   :  { %v5674_v27 = vpop.eup %5673 }
0x3f4d   :  { %3491 = vrot.lane.b32.xlu0 %v5674_v27, %s5819_s2  ;;  %v5676_v56 = vpop.eup %5675 }
0x3f51   :  { %3459 = vrot.lane.b32.xlu0 %v5676_v56, %s5819_s2 }
0x3fbf   :  { %v3492_v11 = vpop.permute.xlu0 %3491 }
0x3fc0   :  { %v3494_v34 = vmul.f32 %v3492_v11, %v3489_v9 }
0x3fc2   :  { %v6949_v14 = vadd.f32 %v3499_v12, %v3494_v34 }
0x3fc3   :  { %v3460_v18 = vpop.permute.xlu0 %3459 }
0x3fc4   :  { %v3506_v6 = vrot.slane %v6949_v14, 2  ;;  %v3462_v24 = vmul.f32 %v3460_v18, %v3457_v17 }
0x3fc6   :  { %v6952_v25 = vadd.f32 %v3468_v19, %v3462_v24  ;;  %3507 = vrot.lane.b32.xlu1 %v3506_v6, %s5820_s0 }
0x3fc8   :  { %3502 = vrot.lane.b32.xlu0 %v6952_v25, %s5819_s2  ;;  %v4685_v19 = vsel %vm248_vm4, %v6923_v30, %v6952_v25  ;;  %v7003_v30 = vld [vmem:[%s7331_s16 + $0x8] sm:$0xff]  }
0x4038   :  { %v3508_v26 = vpop.permute.xlu1 %3507 }
0x403a   :  { %v3503_v28 = vpop.permute.xlu0 %3502 }
0x403b   :  { %v3510_v29 = vsel %vm621_vm9, %v3503_v28, %v3508_v26 }
0x403c   :  { %v3511_v44 = vpack.c.bf16 %v3510_v29, %v3510_v29  ;;  %v3584_v51 = vrot.slane %v3510_v29, 6 }
0x403e   :  { %v3513_v57 = vrot.slane %v3511_v44, 1 }
0x4040   :  { %5230 = vmatmul.mubr.msk.bf16.vlgmr.msra.gmra.mrb[56].mxu1 %vm270_vm3, %v3513_v57  ;;  %v6994_v57 = vld [vmem:[%s7331_s16] sm:$0xff]  }
0x4041   :  { %5242 = vmatpush3.bf16.msra.mxu1 %v6740_v5  ;;  %5245 = vmatprep.mubr.msk.bf16.mxu1 %vm5816_vm8, %v5815_v47 }
0x4042   :  { %5243 = vmatprep.subr.bf16.mxu1 %v5815_v47 }
0x4045   :  { %5244 = vmatpush3.bf16.msra.mxu1 %v6748_v7 }
0x4046   :  { %5257 = vmatprep.subr.bf16.mxu1 %v5815_v47 }
0x4113   :  { %v3551_v60 = vpop.f32.mrb[56].mxu1 }
0x4114   :  { %v3552_v23 = vadd.f32 %v6781_v21, %v3551_v60  ;;  %v5231_v58 = vpop.f32.mrb[57].mxu1 }
0x4115   :  { %v3554_v55 = vpop.f32.mrb[58].mxu1 }
0x4116   :  { %v3558_v59 = vrot.slane %v3552_v23, 4  ;;  %v3590_v50 = vrot.slane %v3552_v23, 6  ;;  %v5232_v62 = vpop.f32.mrb[59].mxu1 }
0x4118   :  { %3599 = vrot.lane.b32.xlu0 %v3590_v50, %s5812_s21  ;;  %3567 = vrot.lane.b32.xlu1 %v3558_v59, %s5812_s21  ;;  %v3560_v5 = vadd.f32 %v3558_v59, %v6776_v20  ;;  %v3592_v22 = vadd.f32 %v3590_v50, %v6774_v10 }
0x411a   :  { %v4889_v48 = vmul.f32 -1.442695, %v3560_v5  ;;  %v4890_v7 = vmul.f32 -1.442695, %v3592_v22 }
0x411c   :  { %5677 = vpow2.f32 %v4889_v48 }
0x411d   :  { %5679 = vpow2.f32 %v4890_v7 }
0x4126   :  { %v5678_v16 = vpop.eup %5677 }
0x4127   :  { %v5680_v49 = vpop.eup %5679  ;;  %v3564_v1 = vadd.f32 1.0, %v5678_v16 }
0x4128   :  { %v3596_v43 = vadd.f32 1.0, %v5680_v49 }
0x4129   :  { %5681 = vrcp.f32 %v3564_v1 }
0x412a   :  { %5683 = vrcp.f32 %v3596_v43 }
0x4133   :  { %v5682_v61 = vpop.eup %5681 }
0x4134   :  { %v5684_v3 = vpop.eup %5683  ;;  %v3577_v11 = vsub.f32 1.0, %v5682_v61 }
0x4135   :  { %v3609_v35 = vsub.f32 1.0, %v5684_v3 }
0x418a   :  { %v3600_v40 = vpop.permute.xlu0 %3599  ;;  %v3568_v8 = vpop.permute.xlu1 %3567 }
0x418b   :  { %v3602_v0 = vmul.f32 %v5684_v3, %v3600_v40  ;;  %v3570_v4 = vmul.f32 %v5682_v61, %v3568_v8 }
0x418d   :  { %3604 = vrot.lane.b32.xlu0 %v3602_v0, %s5813_s26  ;;  %3572 = vrot.lane.b32.xlu1 %v3570_v4, %s5813_s26 }
0x4191   :  { %3615 = vrot.lane.b32.xlu1 %v3510_v29, %s5817_s7 }
0x4195   :  { %3585 = vrot.lane.b32.xlu1 %v3584_v51, %s5818_s30 }
0x41ff   :  { %v3605_v32 = vpop.permute.xlu0 %3604  ;;  %v3573_v33 = vpop.permute.xlu1 %3572 }
0x4200   :  { %v3607_v37 = vadd.f32 %v3605_v32, %v6774_v10  ;;  %v3575_v46 = vadd.f32 %v3573_v33, %v6776_v20 }
0x4202   :  { %5685 = vtanh.f32 %v3607_v37 }
0x4203   :  { %5687 = vtanh.f32 %v3575_v46  ;;  %v3616_v53 = vpop.permute.xlu1 %3615 }
0x4204   :  { %v3618_v27 = vmul.f32 %v5684_v3, %v3616_v53 }
0x4207   :  { %v3586_v15 = vpop.permute.xlu1 %3585 }
0x4208   :  { %v3588_v34 = vmul.f32 %v5682_v61, %v3586_v15 }
0x420c   :  { %v5686_v54 = vpop.eup %5685 }
0x420d   :  { %3611 = vrot.lane.b32.xlu0 %v5686_v54, %s5819_s2  ;;  %v5688_v39 = vpop.eup %5687 }
0x4211   :  { %3579 = vrot.lane.b32.xlu0 %v5688_v39, %s5819_s2 }
0x427f   :  { %v3612_v36 = vpop.permute.xlu0 %3611 }
0x4280   :  { %v3614_v56 = vmul.f32 %v3612_v36, %v3609_v35 }
0x4282   :  { %v6978_v9 = vadd.f32 %v3618_v27, %v3614_v56 }
0x4283   :  { %v3580_v12 = vpop.permute.xlu0 %3579 }
0x4284   :  { %v3625_v13 = vrot.slane %v6978_v9, 6  ;;  %v3582_v17 = vmul.f32 %v3580_v12, %v3577_v11 }
0x4286   :  { %v3589_v18 = vadd.f32 %v3588_v34, %v3582_v17  ;;  %3626 = vrot.lane.b32.xlu1 %v3625_v13, %s5820_s0 }
0x4288   :  { %3621 = vrot.lane.b32.xlu0 %v3589_v18, %s5819_s2  ;;  %v6987_v6 = vsel %vm188_vm2, %v4685_v19, %v3589_v18 }
0x42f8   :  { %v3627_v24 = vpop.permute.xlu1 %3626 }
0x42fa   :  { %v3622_v26 = vpop.permute.xlu0 %3621 }
0x42fb   :  { %v3629_v28 = vsel %vm621_vm9, %v3622_v26, %v3627_v24 }
0x42fc   :  { %v3630_v29 = vpack.c.bf16 %v3629_v28, %v3629_v28  ;;  %v3732_v8 = vrot.slane %v3629_v28, 4  ;;  %v3703_v0 = vrot.slane %v3629_v28, 6 }
0x42fe   :  { %v3632_v44 = vrot.slane %v3630_v29, 2 }
0x4300   :  { %5238 = vmatmul.mubr.msk.bf16.vlgmr.msra.gmra.mrb[60].mxu0 %vm270_vm3, %v3632_v44  ;;  %v7040_v44 = vld [vmem:[%s7334_s17] ss:$0 sm:$0xff] }
0x4301   :  { %5250 = vmatpush3.bf16.msra.mxu0 %v6994_v57  ;;  %5253 = vmatprep.mubr.msk.bf16.mxu0 %vm5816_vm8, %v5815_v47 }
0x4302   :  { %5251 = vmatprep.subr.bf16.mxu0 %v5815_v47 }
0x4305   :  { %5252 = vmatpush3.bf16.msra.mxu0 %v7003_v30 }
0x4306   :  { %5265 = vmatprep.subr.bf16.mxu0 %v5815_v47 }
0x43d3   :  { %v3670_v25 = vpop.f32.mrb[60].mxu0 }
0x43d4   :  { %v3671_v60 = vadd.f32 %v6781_v21, %v3670_v25  ;;  %v5239_v23 = vpop.f32.mrb[61].mxu0 }
0x43d5   :  { %v3673_v58 = vpop.f32.mrb[62].mxu0 }
0x43d6   :  { %v3677_v55 = vrot.slane %v3671_v60, 2  ;;  %3716 = vrot.lane.b32.xlu0 %v3671_v60, %s5812_s21  ;;  %v5240_v59 = vpop.f32.mrb[63].mxu0  ;;  %v3709_v50 = vadd.f32 %v3671_v60, %v6774_v10 }
0x43d8   :  { %3686 = vrot.lane.b32.xlu1 %v3677_v55, %s5812_s21  ;;  %v3679_v62 = vadd.f32 %v3677_v55, %v6776_v20  ;;  %v4893_v5 = vmul.f32 -1.442695, %v3709_v50 }
0x43da   :  { %v4892_v22 = vmul.f32 -1.442695, %v3679_v62  ;;  %5689 = vpow2.f32 %v4893_v5 }
0x43dc   :  { %5691 = vpow2.f32 %v4892_v22 }
0x43e4   :  { %v5690_v48 = vpop.eup %5689 }
0x43e5   :  { %v3713_v16 = vadd.f32 1.0, %v5690_v48 }
0x43e6   :  { %v5692_v7 = vpop.eup %5691 }
0x43e7   :  { %v3683_v21 = vadd.f32 1.0, %v5692_v7  ;;  %5693 = vrcp.f32 %v3713_v16 }
0x43e9   :  { %5695 = vrcp.f32 %v3683_v21 }
0x43f1   :  { %v5694_v49 = vpop.eup %5693 }
0x43f2   :  { %v3726_v39 = vsub.f32 1.0, %v5694_v49 }
0x43f3   :  { %v5696_v61 = vpop.eup %5695 }
0x43f4   :  { %v3696_v15 = vsub.f32 1.0, %v5696_v61 }
0x4448   :  { %v3717_v1 = vpop.permute.xlu0 %3716 }
0x4449   :  { %v3719_v43 = vmul.f32 %v5694_v49, %v3717_v1 }
0x444a   :  { %v3687_v3 = vpop.permute.xlu1 %3686 }
0x444b   :  { %v3689_v40 = vmul.f32 %v5696_v61, %v3687_v3  ;;  %3721 = vrot.lane.b32.xlu0 %v3719_v43, %s5813_s26 }
0x444d   :  { %3691 = vrot.lane.b32.xlu1 %v3689_v40, %s5813_s26 }
0x4451   :  { %3733 = vrot.lane.b32.xlu1 %v3732_v8, %s5817_s7 }
0x4455   :  { %3704 = vrot.lane.b32.xlu1 %v3703_v0, %s5818_s30 }
0x44bd   :  { %v3722_v4 = vpop.permute.xlu0 %3721 }
0x44be   :  { %v3724_v51 = vadd.f32 %v3722_v4, %v6774_v10 }
0x44bf   :  { %v3692_v32 = vpop.permute.xlu1 %3691 }
0x44c0   :  { %5697 = vtanh.f32 %v3724_v51  ;;  %v3694_v33 = vadd.f32 %v3692_v32, %v6776_v20 }
0x44c2   :  { %5699 = vtanh.f32 %v3694_v33 }
0x44c3   :  { %v3734_v54 = vpop.permute.xlu1 %3733 }
0x44c4   :  { %v3736_v35 = vmul.f32 %v5694_v49, %v3734_v54 }
0x44c7   :  { %v3705_v27 = vpop.permute.xlu1 %3704 }
0x44c8   :  { %v3707_v12 = vmul.f32 %v5696_v61, %v3705_v27 }
0x44ca   :  { %v5698_v37 = vpop.eup %5697 }
0x44cb   :  { %3728 = vrot.lane.b32.xlu0 %v5698_v37, %s5819_s2 }
0x44cc   :  { %v5700_v46 = vpop.eup %5699 }
0x44cf   :  { %3698 = vrot.lane.b32.xlu0 %v5700_v46, %s5819_s2 }
0x453d   :  { %v3729_v53 = vpop.permute.xlu0 %3728 }
0x453e   :  { %v3731_v36 = vmul.f32 %v3729_v53, %v3726_v39 }
0x4540   :  { %v7020_v56 = vadd.f32 %v3736_v35, %v3731_v36 }
0x4541   :  { %v3699_v11 = vpop.permute.xlu0 %3698 }
0x4542   :  { %v3743_v34 = vrot.slane %v7020_v56, 2  ;;  %v3701_v13 = vmul.f32 %v3699_v11, %v3696_v15 }
0x4544   :  { %v3708_v17 = vadd.f32 %v3707_v12, %v3701_v13  ;;  %3744 = vrot.lane.b32.xlu1 %v3743_v34, %s5820_s0 }
0x4546   :  { %3739 = vrot.lane.b32.xlu0 %v3708_v17, %s5819_s2  ;;  %v7027_v18 = vsel %vm205_vm5, %v6987_v6, %v3708_v17 }
0x45b6   :  { %v3745_v19 = vpop.permute.xlu1 %3744 }
0x45b8   :  { %v3740_v24 = vpop.permute.xlu0 %3739 }
0x45b9   :  { %v3747_v26 = vsel %vm621_vm9, %v3740_v24, %v3745_v19 }
0x45ba   :  { %v3748_v28 = vpack.c.bf16 %v3747_v26, %v3747_v26  ;;  %v3819_v40 = vrot.slane %v3747_v26, 6 }
0x45bc   :  { %v3750_v29 = vrot.slane %v3748_v28, 3 }
0x45be   :  { %5246 = vmatmul.mubr.msk.bf16.vlgmr.msra.gmra.mrb[60].mxu1 %vm270_vm3, %v3750_v29 }
0x45bf   :  { %5258 = vmatpush3.bf16.msra.mxu1 %v6994_v57  ;;  %5261 = vmatprep.mubr.msk.bf16.mxu1 %vm5816_vm8, %v5815_v47 }
0x45c0   :  { %5259 = vmatprep.subr.bf16.mxu1 %v5815_v47 }
0x45c3   :  { %5260 = vmatpush3.bf16.msra.mxu1 %v7003_v30 }
0x45c4   :  { %5273 = vmatprep.subr.bf16.mxu1 %v5815_v47 }
0x4691   :  { %v3788_v6 = vpop.f32.mrb[60].mxu1 }
0x4692   :  { %v3789_v25 = vadd.f32 %v7040_v44, %v3788_v6  ;;  %v5247_v60 = vpop.f32.mrb[61].mxu1 }
0x4693   :  { %v3791_v23 = vpop.f32.mrb[62].mxu1 }
0x4694   :  { %v3825_v58 = vrot.slane %v3789_v25, 2  ;;  %3802 = vrot.lane.b32.xlu1 %v3789_v25, %s5812_s21  ;;  %v5248_v55 = vpop.f32.mrb[63].mxu1  ;;  %v3794_v59 = vadd.f32 %v3789_v25, %v6774_v10 }
0x4696   :  { %3834 = vrot.lane.b32.xlu0 %v3825_v58, %s5812_s21  ;;  %v3827_v50 = vadd.f32 %v3825_v58, %v6776_v20  ;;  %v4895_v62 = vmul.f32 -1.442695, %v3794_v59 }
0x4698   :  { %v4896_v5 = vmul.f32 -1.442695, %v3827_v50  ;;  %5701 = vpow2.f32 %v4895_v62 }
0x469a   :  { %5703 = vpow2.f32 %v4896_v5 }
0x46a2   :  { %v5702_v22 = vpop.eup %5701 }
0x46a3   :  { %v3798_v7 = vadd.f32 1.0, %v5702_v22 }
0x46a4   :  { %v5704_v48 = vpop.eup %5703 }
0x46a5   :  { %v3831_v16 = vadd.f32 1.0, %v5704_v48  ;;  %5705 = vrcp.f32 %v3798_v7 }
0x46a7   :  { %5707 = vrcp.f32 %v3831_v16 }
0x46af   :  { %v5706_v21 = vpop.eup %5705 }
0x46b0   :  { %v3812_v27 = vsub.f32 1.0, %v5706_v21 }
0x46b1   :  { %v5708_v43 = vpop.eup %5707 }
0x46b2   :  { %v3844_v46 = vsub.f32 1.0, %v5708_v43 }
0x4706   :  { %v3803_v49 = vpop.permute.xlu1 %3802 }
0x4707   :  { %v3805_v1 = vmul.f32 %v5706_v21, %v3803_v49 }
0x4708   :  { %v3835_v61 = vpop.permute.xlu0 %3834 }
0x4709   :  { %v3837_v3 = vmul.f32 %v5708_v43, %v3835_v61  ;;  %3807 = vrot.lane.b32.xlu1 %v3805_v1, %s5813_s26 }
0x470b   :  { %3839 = vrot.lane.b32.xlu0 %v3837_v3, %s5813_s26 }
0x470d   :  { %3850 = vrot.lane.b32.xlu1 %v3747_v26, %s5817_s7 }
0x4711   :  { %3820 = vrot.lane.b32.xlu1 %v3819_v40, %s5818_s30 }
0x477b   :  { %v3808_v8 = vpop.permute.xlu1 %3807 }
0x477c   :  { %v3810_v51 = vadd.f32 %v3808_v8, %v6774_v10 }
0x477d   :  { %v3840_v0 = vpop.permute.xlu0 %3839 }
0x477e   :  { %v3842_v4 = vadd.f32 %v3840_v0, %v6776_v20 }
0x477f   :  { %v3851_v37 = vpop.permute.xlu1 %3850 }
0x4780   :  { %5709 = vtanh.f32 %v3842_v4  ;;  %v3853_v39 = vmul.f32 %v5708_v43, %v3851_v37 }
0x4781   :  { %5711 = vtanh.f32 %v3810_v51 }
0x4783   :  { %v3821_v35 = vpop.permute.xlu1 %3820 }
0x4784   :  { %v3823_v11 = vmul.f32 %v5706_v21, %v3821_v35 }
0x478a   :  { %v5710_v32 = vpop.eup %5709 }
0x478b   :  { %3846 = vrot.lane.b32.xlu0 %v5710_v32, %s5819_s2  ;;  %v5712_v33 = vpop.eup %5711 }
0x478f   :  { %3814 = vrot.lane.b32.xlu0 %v5712_v33, %s5819_s2 }
0x47fd   :  { %v3847_v54 = vpop.permute.xlu0 %3846 }
0x47fe   :  { %v3849_v53 = vmul.f32 %v3847_v54, %v3844_v46 }
0x4800   :  { %v7055_v36 = vadd.f32 %v3853_v39, %v3849_v53 }
0x4801   :  { %v3815_v15 = vpop.permute.xlu0 %3814 }
0x4802   :  { %v3860_v12 = vrot.slane %v7055_v36, 6  ;;  %v3817_v34 = vmul.f32 %v3815_v15, %v3812_v27 }
0x4804   :  { %v7058_v13 = vadd.f32 %v3823_v11, %v3817_v34  ;;  %3861 = vrot.lane.b32.xlu1 %v3860_v12, %s5820_s0 }
0x4806   :  { %3856 = vrot.lane.b32.xlu0 %v7058_v13, %s5819_s2 }
0x4876   :  { %v3862_v17 = vpop.permute.xlu1 %3861 }
0x4878   :  { %v3857_v19 = vpop.permute.xlu0 %3856 }
0x4879   :  { %v3864_v24 = vsel %vm621_vm9, %v3857_v19, %v3862_v17 }
0x487a   :  { %v3865_v26 = vpack.c.bf16 %v3864_v24, %v3864_v24  ;;  %v3967_v3 = vrot.slane %v3864_v24, 4  ;;  %v3936_v40 = vrot.slane %v3864_v24, 6 }
0x487c   :  { %5254 = vmatmul.mubr.msk.bf16.vlgmr.msra.gmra.mrb[64].mxu0 %vm270_vm3, %v3865_v26 }
0x487d   :  { %5266 = vmatpush3.bf16.msra.mxu0 %v6994_v57  ;;  %5269 = vmatprep.mubr.msk.bf16.mxu0 %vm5816_vm8, %v5815_v47 }
0x487e   :  { %5267 = vmatprep.subr.bf16.mxu0 %v5815_v47 }
0x4881   :  { %5268 = vmatpush3.bf16.msra.mxu0 %v7003_v30 }
0x4882   :  { %5281 = vmatprep.subr.bf16.mxu0 %v5815_v47 }
0x494f   :  { %v3903_v28 = vpop.f32.mrb[64].mxu0 }
0x4950   :  { %v3904_v29 = vadd.f32 %v7040_v44, %v3903_v28  ;;  %v5255_v6 = vpop.f32.mrb[65].mxu0 }
0x4951   :  { %v3906_v25 = vpop.f32.mrb[66].mxu0 }
0x4952   :  { %v3910_v60 = vrot.slane %v3904_v29, 6  ;;  %v3942_v23 = vrot.slane %v3904_v29, 4  ;;  %v5256_v58 = vpop.f32.mrb[67].mxu0 }
0x4954   :  { %3951 = vrot.lane.b32.xlu0 %v3942_v23, %s5812_s21  ;;  %3919 = vrot.lane.b32.xlu1 %v3910_v60, %s5812_s21  ;;  %v3912_v55 = vadd.f32 %v3910_v60, %v6774_v10  ;;  %v3944_v59 = vadd.f32 %v3942_v23, %v6776_v20 }
0x4956   :  { %v4898_v50 = vmul.f32 -1.442695, %v3912_v55  ;;  %v4899_v62 = vmul.f32 -1.442695, %v3944_v59 }
0x4958   :  { %5713 = vpow2.f32 %v4898_v50 }
0x4959   :  { %5715 = vpow2.f32 %v4899_v62 }
0x4962   :  { %v5714_v5 = vpop.eup %5713 }
0x4963   :  { %v5716_v22 = vpop.eup %5715  ;;  %v3916_v48 = vadd.f32 1.0, %v5714_v5 }
0x4964   :  { %v3948_v7 = vadd.f32 1.0, %v5716_v22 }
0x4965   :  { %5717 = vrcp.f32 %v3916_v48 }
0x4966   :  { %5719 = vrcp.f32 %v3948_v7 }
0x496f   :  { %v5718_v16 = vpop.eup %5717 }
0x4970   :  { %v5720_v21 = vpop.eup %5719  ;;  %v3929_v15 = vsub.f32 1.0, %v5718_v16 }
0x4971   :  { %v3961_v46 = vsub.f32 1.0, %v5720_v21 }
0x49c6   :  { %v3952_v49 = vpop.permute.xlu0 %3951  ;;  %v3920_v1 = vpop.permute.xlu1 %3919 }
0x49c7   :  { %v3954_v43 = vmul.f32 %v5720_v21, %v3952_v49  ;;  %v3922_v61 = vmul.f32 %v5718_v16, %v3920_v1 }
0x49c9   :  { %3956 = vrot.lane.b32.xlu0 %v3954_v43, %s5813_s26  ;;  %3924 = vrot.lane.b32.xlu1 %v3922_v61, %s5813_s26 }
0x49cd   :  { %3968 = vrot.lane.b32.xlu1 %v3967_v3, %s5817_s7 }
0x49d1   :  { %3937 = vrot.lane.b32.xlu1 %v3936_v40, %s5818_s30 }
0x4a3b   :  { %v3957_v8 = vpop.permute.xlu0 %3956  ;;  %v3925_v0 = vpop.permute.xlu1 %3924 }
0x4a3c   :  { %v3959_v4 = vadd.f32 %v3957_v8, %v6776_v20  ;;  %v3927_v51 = vadd.f32 %v3925_v0, %v6774_v10 }
0x4a3e   :  { %5721 = vtanh.f32 %v3959_v4 }
0x4a3f   :  { %5723 = vtanh.f32 %v3927_v51  ;;  %v3969_v37 = vpop.permute.xlu1 %3968 }
0x4a40   :  { %v3971_v39 = vmul.f32 %v5720_v21, %v3969_v37 }
0x4a43   :  { %v3938_v35 = vpop.permute.xlu1 %3937 }
0x4a44   :  { %v3940_v12 = vmul.f32 %v5718_v16, %v3938_v35 }
0x4a48   :  { %v5722_v32 = vpop.eup %5721 }
0x4a49   :  { %3963 = vrot.lane.b32.xlu0 %v5722_v32, %s5819_s2  ;;  %v5724_v33 = vpop.eup %5723 }
0x4a4d   :  { %3931 = vrot.lane.b32.xlu0 %v5724_v33, %s5819_s2 }
0x4abb   :  { %v3964_v54 = vpop.permute.xlu0 %3963 }
0x4abc   :  { %v3966_v53 = vmul.f32 %v3964_v54, %v3961_v46 }
0x4abe   :  { %v7084_v27 = vadd.f32 %v3971_v39, %v3966_v53 }
0x4abf   :  { %v3932_v11 = vpop.permute.xlu0 %3931 }
0x4ac0   :  { %v3978_v34 = vrot.slane %v7084_v27, 2  ;;  %v3934_v17 = vmul.f32 %v3932_v11, %v3929_v15 }
0x4ac2   :  { %v7087_v19 = vadd.f32 %v3940_v12, %v3934_v17  ;;  %3979 = vrot.lane.b32.xlu1 %v3978_v34, %s5820_s0 }
0x4ac4   :  { %3974 = vrot.lane.b32.xlu0 %v7087_v19, %s5819_s2 }
0x4b34   :  { %v3980_v24 = vpop.permute.xlu1 %3979 }
0x4b36   :  { %v3975_v26 = vpop.permute.xlu0 %3974 }
0x4b37   :  { %v3982_v28 = vsel %vm621_vm9, %v3975_v26, %v3980_v24 }
0x4b38   :  { %v3983_v29 = vpack.c.bf16 %v3982_v28, %v3982_v28  ;;  %v4056_v0 = vrot.slane %v3982_v28, 6 }
0x4b3a   :  { %v3985_v6 = vrot.slane %v3983_v29, 1 }
0x4b3c   :  { %5262 = vmatmul.mubr.msk.bf16.vlgmr.msra.gmra.mrb[64].mxu1 %vm270_vm3, %v3985_v6  ;;  %v4688_v6 = vsel %vm248_vm4, %v7058_v13, %v7087_v19 }
0x4b3d   :  { %5274 = vmatpush3.bf16.msra.mxu1 %v6994_v57  ;;  %5277 = vmatprep.mubr.msk.bf16.mxu1 %vm5816_vm8, %v5815_v47 }
0x4b3e   :  { %5275 = vmatprep.subr.bf16.mxu1 %v5815_v47 }
0x4b41   :  { %5276 = vmatpush3.bf16.msra.mxu1 %v7003_v30 }
0x4b42   :  { %5289 = vmatprep.subr.bf16.mxu1 %v5815_v47 }
0x4c0f   :  { %v4023_v25 = vpop.f32.mrb[64].mxu1 }
0x4c10   :  { %v4024_v60 = vadd.f32 %v7040_v44, %v4023_v25  ;;  %v5263_v23 = vpop.f32.mrb[65].mxu1 }
0x4c11   :  { %v4026_v58 = vpop.f32.mrb[66].mxu1 }
0x4c12   :  { %v4030_v55 = vrot.slane %v4024_v60, 4  ;;  %v4062_v59 = vrot.slane %v4024_v60, 6  ;;  %v5264_v50 = vpop.f32.mrb[67].mxu1 }
0x4c14   :  { %4071 = vrot.lane.b32.xlu0 %v4062_v59, %s5812_s21  ;;  %4039 = vrot.lane.b32.xlu1 %v4030_v55, %s5812_s21  ;;  %v4032_v62 = vadd.f32 %v4030_v55, %v6774_v10  ;;  %v4064_v5 = vadd.f32 %v4062_v59, %v6776_v20 }
0x4c16   :  { %v4901_v22 = vmul.f32 -1.442695, %v4032_v62  ;;  %v4902_v48 = vmul.f32 -1.442695, %v4064_v5 }
0x4c18   :  { %5725 = vpow2.f32 %v4901_v22 }
0x4c19   :  { %5727 = vpow2.f32 %v4902_v48 }
0x4c22   :  { %v5726_v7 = vpop.eup %5725 }
0x4c23   :  { %v5728_v16 = vpop.eup %5727  ;;  %v4036_v21 = vadd.f32 1.0, %v5726_v7 }
0x4c24   :  { %v4068_v49 = vadd.f32 1.0, %v5728_v16 }
0x4c25   :  { %5729 = vrcp.f32 %v4036_v21 }
0x4c26   :  { %5731 = vrcp.f32 %v4068_v49 }
0x4c2f   :  { %v5730_v1 = vpop.eup %5729 }
0x4c30   :  { %v5732_v43 = vpop.eup %5731  ;;  %v4049_v34 = vsub.f32 1.0, %v5730_v1 }
0x4c31   :  { %v4081_v39 = vsub.f32 1.0, %v5732_v43 }
0x4c86   :  { %v4072_v61 = vpop.permute.xlu0 %4071  ;;  %v4040_v3 = vpop.permute.xlu1 %4039 }
0x4c87   :  { %v4074_v40 = vmul.f32 %v5732_v43, %v4072_v61  ;;  %v4042_v8 = vmul.f32 %v5730_v1, %v4040_v3 }
0x4c89   :  { %4076 = vrot.lane.b32.xlu0 %v4074_v40, %s5813_s26  ;;  %4044 = vrot.lane.b32.xlu1 %v4042_v8, %s5813_s26 }
0x4c8d   :  { %4087 = vrot.lane.b32.xlu1 %v3982_v28, %s5817_s7 }
0x4c91   :  { %4057 = vrot.lane.b32.xlu1 %v4056_v0, %s5818_s30 }
0x4cfb   :  { %v4077_v4 = vpop.permute.xlu0 %4076  ;;  %v4045_v51 = vpop.permute.xlu1 %4044 }
0x4cfc   :  { %v4079_v32 = vadd.f32 %v4077_v4, %v6776_v20  ;;  %v4047_v33 = vadd.f32 %v4045_v51, %v6774_v10 }
0x4cfe   :  { %5733 = vtanh.f32 %v4079_v32 }
0x4cff   :  { %5735 = vtanh.f32 %v4047_v33  ;;  %v4088_v54 = vpop.permute.xlu1 %4087 }
0x4d00   :  { %v4090_v35 = vmul.f32 %v5732_v43, %v4088_v54 }
0x4d03   :  { %v4058_v11 = vpop.permute.xlu1 %4057 }
0x4d04   :  { %v4060_v24 = vmul.f32 %v5730_v1, %v4058_v11 }
0x4d08   :  { %v5734_v37 = vpop.eup %5733 }
0x4d09   :  { %4083 = vrot.lane.b32.xlu0 %v5734_v37, %s5819_s2  ;;  %v5736_v46 = vpop.eup %5735 }
0x4d0d   :  { %4051 = vrot.lane.b32.xlu0 %v5736_v46, %s5819_s2 }
0x4d7b   :  { %v4084_v53 = vpop.permute.xlu0 %4083 }
0x4d7c   :  { %v4086_v15 = vmul.f32 %v4084_v53, %v4081_v39 }
0x4d7e   :  { %v7113_v12 = vadd.f32 %v4090_v35, %v4086_v15 }
0x4d7f   :  { %v4052_v17 = vpop.permute.xlu0 %4051 }
0x4d80   :  { %v4097_v26 = vrot.slane %v7113_v12, 6  ;;  %v4054_v28 = vmul.f32 %v4052_v17, %v4049_v34 }
0x4d82   :  { %v4061_v29 = vadd.f32 %v4060_v24, %v4054_v28  ;;  %4098 = vrot.lane.b32.xlu1 %v4097_v26, %s5820_s0 }
0x4d84   :  { %4093 = vrot.lane.b32.xlu0 %v4061_v29, %s5819_s2  ;;  %v7122_v25 = vsel %vm188_vm2, %v4688_v6, %v4061_v29 }
0x4df4   :  { %v4099_v60 = vpop.permute.xlu1 %4098 }
0x4df6   :  { %v4094_v23 = vpop.permute.xlu0 %4093 }
0x4df7   :  { %v4101_v58 = vsel %vm621_vm9, %v4094_v23, %v4099_v60 }
0x4df8   :  { %v4102_v55 = vpack.c.bf16 %v4101_v58, %v4101_v58  ;;  %v4204_v32 = vrot.slane %v4101_v58, 4  ;;  %v4175_v33 = vrot.slane %v4101_v58, 6 }
0x4dfa   :  { %v4104_v59 = vrot.slane %v4102_v55, 2 }
0x4dfc   :  { %5270 = vmatmul.mubr.msk.bf16.vlgmr.msra.gmra.mrb[68].mxu0 %vm270_vm3, %v4104_v59 }
0x4dfd   :  { %5282 = vmatpush3.bf16.msra.mxu0 %v6994_v57  ;;  %5285 = vmatprep.mubr.msk.bf16.mxu0 %vm5816_vm8, %v5815_v47 }
0x4dfe   :  { %5283 = vmatprep.subr.bf16.mxu0 %v5815_v47 }
0x4e01   :  { %5284 = vmatpush3.bf16.msra.mxu0 %v7003_v30 }
0x4e02   :  { %5297 = vmatprep.subr.bf16.mxu0 %v5815_v47 }
0x4ecf   :  { %v4142_v13 = vpop.f32.mrb[68].mxu0 }
0x4ed0   :  { %v4143_v19 = vadd.f32 %v7040_v44, %v4142_v13  ;;  %v5271_v50 = vpop.f32.mrb[69].mxu0 }
0x4ed1   :  { %v4145_v62 = vpop.f32.mrb[70].mxu0 }
0x4ed2   :  { %v4149_v5 = vrot.slane %v4143_v19, 2  ;;  %4188 = vrot.lane.b32.xlu0 %v4143_v19, %s5812_s21  ;;  %v5272_v22 = vpop.f32.mrb[71].mxu0  ;;  %v4181_v48 = vadd.f32 %v4143_v19, %v6776_v20 }
0x4ed4   :  { %4158 = vrot.lane.b32.xlu1 %v4149_v5, %s5812_s21  ;;  %v4151_v7 = vadd.f32 %v4149_v5, %v6774_v10  ;;  %v4905_v16 = vmul.f32 -1.442695, %v4181_v48 }
0x4ed6   :  { %v4904_v21 = vmul.f32 -1.442695, %v4151_v7  ;;  %5737 = vpow2.f32 %v4905_v16 }
0x4ed8   :  { %5739 = vpow2.f32 %v4904_v21 }
0x4ee0   :  { %v5738_v49 = vpop.eup %5737 }
0x4ee1   :  { %v4185_v43 = vadd.f32 1.0, %v5738_v49 }
0x4ee2   :  { %v5740_v1 = vpop.eup %5739 }
0x4ee3   :  { %v4155_v61 = vadd.f32 1.0, %v5740_v1  ;;  %5741 = vrcp.f32 %v4185_v43 }
0x4ee5   :  { %5743 = vrcp.f32 %v4155_v61 }
0x4eed   :  { %v5742_v3 = vpop.eup %5741 }
0x4eee   :  { %v4198_v11 = vsub.f32 1.0, %v5742_v3 }
0x4eef   :  { %v5744_v0 = vpop.eup %5743 }
0x4f44   :  { %v4189_v40 = vpop.permute.xlu0 %4188 }
0x4f45   :  { %v4191_v8 = vmul.f32 %v5742_v3, %v4189_v40 }
0x4f46   :  { %v4159_v4 = vpop.permute.xlu1 %4158 }
0x4f47   :  { %v4161_v51 = vmul.f32 %v5744_v0, %v4159_v4  ;;  %4193 = vrot.lane.b32.xlu0 %v4191_v8, %s5813_s26 }
0x4f49   :  { %4163 = vrot.lane.b32.xlu1 %v4161_v51, %s5813_s26 }
0x4f4d   :  { %4205 = vrot.lane.b32.xlu1 %v4204_v32, %s5817_s7 }
0x4f51   :  { %4176 = vrot.lane.b32.xlu1 %v4175_v33, %s5818_s30 }
0x4fb9   :  { %v4194_v37 = vpop.permute.xlu0 %4193 }
0x4fba   :  { %v4196_v46 = vadd.f32 %v4194_v37, %v6776_v20  ;;  %v4168_v20 = vsub.f32 1.0, %v5744_v0 }
0x4fbb   :  { %v4164_v54 = vpop.permute.xlu1 %4163 }
0x4fbc   :  { %5745 = vtanh.f32 %v4196_v46  ;;  %v4166_v39 = vadd.f32 %v4164_v54, %v6774_v10 }
0x4fbe   :  { %5747 = vtanh.f32 %v4166_v39 }
0x4fbf   :  { %v4206_v15 = vpop.permute.xlu1 %4205 }
0x4fc0   :  { %v4208_v17 = vmul.f32 %v5742_v3, %v4206_v15 }
0x4fc3   :  { %v4177_v26 = vpop.permute.xlu1 %4176 }
0x4fc4   :  { %v4179_v6 = vmul.f32 %v5744_v0, %v4177_v26 }
0x4fc6   :  { %v5746_v53 = vpop.eup %5745 }
0x4fc7   :  { %4200 = vrot.lane.b32.xlu0 %v5746_v53, %s5819_s2 }
0x4fc8   :  { %v5748_v35 = vpop.eup %5747 }
0x4fcb   :  { %4170 = vrot.lane.b32.xlu0 %v5748_v35, %s5819_s2 }
0x5039   :  { %v4201_v34 = vpop.permute.xlu0 %4200 }
0x503a   :  { %v4203_v24 = vmul.f32 %v4201_v34, %v4198_v11 }
0x503c   :  { %v7145_v28 = vadd.f32 %v4208_v17, %v4203_v24 }
0x503d   :  { %v4171_v29 = vpop.permute.xlu0 %4170 }
0x503e   :  { %v4215_v10 = vrot.slane %v7145_v28, 2  ;;  %v4173_v60 = vmul.f32 %v4171_v29, %v4168_v20 }
0x5040   :  { %v4180_v23 = vadd.f32 %v4179_v6, %v4173_v60  ;;  %4216 = vrot.lane.b32.xlu1 %v4215_v10, %s5820_s0 }
0x5042   :  { %4211 = vrot.lane.b32.xlu0 %v4180_v23, %s5819_s2  ;;  %v7152_v58 = vsel %vm205_vm5, %v7122_v25, %v4180_v23 }
0x50b2   :  { %v4217_v55 = vpop.permute.xlu1 %4216 }
0x50b4   :  { %v4212_v59 = vpop.permute.xlu0 %4211 }
0x50b5   :  { %v4219_v13 = vsel %vm621_vm9, %v4212_v59, %v4217_v55 }
0x50b6   :  { %v4220_v19 = vpack.c.bf16 %v4219_v13, %v4219_v13  ;;  %v4291_v37 = vrot.slane %v4219_v13, 6 }
0x50b8   :  { %v4222_v50 = vrot.slane %v4220_v19, 3 }
0x50ba   :  { %5278 = vmatmul.mubr.msk.bf16.vlgmr.msra.gmra.mrb[68].mxu1 %vm270_vm3, %v4222_v50 }
0x50bb   :  { %5290 = vmatpush3.bf16.msra.mxu1 %v6994_v57  ;;  %5293 = vmatprep.mubr.msk.bf16.mxu1 %vm5816_vm8, %v5815_v47 }
0x50bc   :  { %5291 = vmatprep.subr.bf16.mxu1 %v5815_v47 }
0x50bf   :  { %5292 = vmatpush3.bf16.msra.mxu1 %v7003_v30 }
0x518d   :  { %v4260_v62 = vpop.f32.mrb[68].mxu1 }
0x518e   :  { %v4261_v25 = vadd.f32 %v7040_v44, %v4260_v62  ;;  %v5279_v5 = vpop.f32.mrb[69].mxu1 }
0x518f   :  { %v4263_v22 = vpop.f32.mrb[70].mxu1 }
0x5190   :  { %v4297_v48 = vrot.slane %v4261_v25, 2  ;;  %4274 = vrot.lane.b32.xlu1 %v4261_v25, %s5812_s21  ;;  %v5280_v7 = vpop.f32.mrb[71].mxu1  ;;  %v4266_v16 = vadd.f32 %v4261_v25, %v6788_v38 }
0x5192   :  { %4306 = vrot.lane.b32.xlu0 %v4297_v48, %s5812_s21  ;;  %v4299_v21 = vadd.f32 %v4297_v48, %v6786_v31  ;;  %v4907_v49 = vmul.f32 -1.442695, %v4266_v16 }
0x5194   :  { %v4908_v1 = vmul.f32 -1.442695, %v4299_v21  ;;  %5749 = vpow2.f32 %v4907_v49 }
0x5196   :  { %5751 = vpow2.f32 %v4908_v1 }
0x519e   :  { %v5750_v43 = vpop.eup %5749 }
0x519f   :  { %v4270_v3 = vadd.f32 1.0, %v5750_v43 }
0x51a0   :  { %v5752_v61 = vpop.eup %5751 }
0x51a1   :  { %v4303_v40 = vadd.f32 1.0, %v5752_v61  ;;  %5753 = vrcp.f32 %v4270_v3 }
0x51a3   :  { %5755 = vrcp.f32 %v4303_v40 }
0x51ab   :  { %v5754_v8 = vpop.eup %5753 }
0x51ac   :  { %v4284_v6 = vsub.f32 1.0, %v5754_v8 }
0x51ad   :  { %v5756_v51 = vpop.eup %5755 }
0x51ae   :  { %v4316_v34 = vsub.f32 1.0, %v5756_v51 }
0x5202   :  { %v4275_v0 = vpop.permute.xlu1 %4274 }
0x5203   :  { %v4277_v4 = vmul.f32 %v5754_v8, %v4275_v0 }
0x5204   :  { %v4307_v32 = vpop.permute.xlu0 %4306 }
0x5205   :  { %v4309_v33 = vmul.f32 %v5756_v51, %v4307_v32  ;;  %4279 = vrot.lane.b32.xlu1 %v4277_v4, %s5813_s26 }
0x5207   :  { %4311 = vrot.lane.b32.xlu0 %v4309_v33, %s5813_s26 }
0x5209   :  { %4322 = vrot.lane.b32.xlu1 %v4219_v13, %s5817_s7 }
0x520d   :  { %4292 = vrot.lane.b32.xlu1 %v4291_v37, %s5818_s30 }
0x5277   :  { %v4280_v46 = vpop.permute.xlu1 %4279 }
0x5278   :  { %v4282_v53 = vadd.f32 %v4280_v46, %v6788_v38 }
0x5279   :  { %v4312_v54 = vpop.permute.xlu0 %4311 }
0x527a   :  { %v4314_v39 = vadd.f32 %v4312_v54, %v6786_v31 }
0x527b   :  { %v4323_v11 = vpop.permute.xlu1 %4322 }
0x527c   :  { %5757 = vtanh.f32 %v4314_v39  ;;  %v4325_v24 = vmul.f32 %v5756_v51, %v4323_v11 }
0x527d   :  { %5759 = vtanh.f32 %v4282_v53 }
0x527f   :  { %v4293_v20 = vpop.permute.xlu1 %4292 }
0x5280   :  { %v4295_v60 = vmul.f32 %v5754_v8, %v4293_v20 }
0x5286   :  { %v5758_v35 = vpop.eup %5757 }
0x5287   :  { %4318 = vrot.lane.b32.xlu0 %v5758_v35, %s5819_s2  ;;  %v5760_v15 = vpop.eup %5759 }
0x528b   :  { %4286 = vrot.lane.b32.xlu0 %v5760_v15, %s5819_s2 }
0x52f9   :  { %v4319_v17 = vpop.permute.xlu0 %4318 }
0x52fa   :  { %v4321_v26 = vmul.f32 %v4319_v17, %v4316_v34 }
0x52fc   :  { %v7174_v29 = vadd.f32 %v4325_v24, %v4321_v26 }
0x52fd   :  { %v4287_v10 = vpop.permute.xlu0 %4286 }
0x52fe   :  { %v4332_v23 = vrot.slane %v7174_v29, 6  ;;  %v4289_v55 = vmul.f32 %v4287_v10, %v4284_v6 }
0x5300   :  { %v7177_v59 = vadd.f32 %v4295_v60, %v4289_v55  ;;  %4333 = vrot.lane.b32.xlu1 %v4332_v23, %s5820_s0 }
0x5302   :  { %4328 = vrot.lane.b32.xlu0 %v7177_v59, %s5819_s2 }
0x5372   :  { %v4334_v13 = vpop.permute.xlu1 %4333 }
0x5374   :  { %v4329_v19 = vpop.permute.xlu0 %4328 }
0x5375   :  { %v4336_v50 = vsel %vm621_vm9, %v4329_v19, %v4334_v13 }
0x5376   :  { %v4337_v62 = vpack.c.bf16 %v4336_v50, %v4336_v50  ;;  %v4439_v33 = vrot.slane %v4336_v50, 4  ;;  %v4408_v37 = vrot.slane %v4336_v50, 6 }
0x5378   :  { %5286 = vmatmul.mubr.msk.bf16.vlgmr.msra.gmra.mrb[72].mxu0 %vm270_vm3, %v4337_v62 }
0x5379   :  { %5298 = vmatpush3.bf16.msra.mxu0 %v6994_v57  ;;  %5301 = vmatprep.mubr.msk.bf16.mxu0 %vm5816_vm8, %v5815_v47 }
0x537a   :  { %5299 = vmatprep.subr.bf16.mxu0 %v5815_v47 }
0x537d   :  { %5300 = vmatpush3.bf16.msra.mxu0 %v7003_v30 }
0x544b   :  { %v4375_v25 = vpop.f32.mrb[72].mxu0 }
0x544c   :  { %v4376_v5 = vadd.f32 %v7040_v44, %v4375_v25  ;;  %v5287_v22 = vpop.f32.mrb[73].mxu0 }
0x544d   :  { %v4378_v48 = vpop.f32.mrb[74].mxu0 }
0x544e   :  { %v4382_v7 = vrot.slane %v4376_v5, 6  ;;  %v4414_v16 = vrot.slane %v4376_v5, 4  ;;  %v5288_v21 = vpop.f32.mrb[75].mxu0 }
0x5450   :  { %4423 = vrot.lane.b32.xlu0 %v4414_v16, %s5812_s21  ;;  %4391 = vrot.lane.b32.xlu1 %v4382_v7, %s5812_s21  ;;  %v4384_v57 = vadd.f32 %v4382_v7, %v6788_v38  ;;  %v4416_v49 = vadd.f32 %v4414_v16, %v6786_v31 }
0x5452   :  { %v4910_v1 = vmul.f32 -1.442695, %v4384_v57  ;;  %v4911_v47 = vmul.f32 -1.442695, %v4416_v49 }
0x5454   :  { %5761 = vpow2.f32 %v4910_v1 }
0x5455   :  { %5763 = vpow2.f32 %v4911_v47 }
0x545e   :  { %v5762_v30 = vpop.eup %5761 }
0x545f   :  { %v5764_v43 = vpop.eup %5763  ;;  %v4388_v61 = vadd.f32 1.0, %v5762_v30 }
0x5460   :  { %v4420_v3 = vadd.f32 1.0, %v5764_v43 }
0x5461   :  { %5765 = vrcp.f32 %v4388_v61 }
0x5462   :  { %5767 = vrcp.f32 %v4420_v3 }
0x546b   :  { %v5766_v40 = vpop.eup %5765 }
0x546c   :  { %v5768_v8 = vpop.eup %5767  ;;  %v4401_v10 = vsub.f32 1.0, %v5766_v40 }
0x546d   :  { %v4433_v34 = vsub.f32 1.0, %v5768_v8 }
0x54c2   :  { %v4424_v0 = vpop.permute.xlu0 %4423  ;;  %v4392_v4 = vpop.permute.xlu1 %4391 }
0x54c3   :  { %v4426_v51 = vmul.f32 %v5768_v8, %v4424_v0  ;;  %v4394_v32 = vmul.f32 %v5766_v40, %v4392_v4 }
0x54c5   :  { %4428 = vrot.lane.b32.xlu0 %v4426_v51, %s5813_s26  ;;  %4396 = vrot.lane.b32.xlu1 %v4394_v32, %s5813_s26 }
0x54c9   :  { %4440 = vrot.lane.b32.xlu1 %v4439_v33, %s5817_s7 }
0x54cd   :  { %4409 = vrot.lane.b32.xlu1 %v4408_v37, %s5818_s30 }
0x5537   :  { %v4429_v46 = vpop.permute.xlu0 %4428  ;;  %v4397_v54 = vpop.permute.xlu1 %4396 }
0x5538   :  { %v4431_v39 = vadd.f32 %v4429_v46, %v6786_v31  ;;  %v4399_v53 = vadd.f32 %v4397_v54, %v6788_v38 }
0x553a   :  { %5769 = vtanh.f32 %v4431_v39 }
0x553b   :  { %5771 = vtanh.f32 %v4399_v53  ;;  %v4441_v11 = vpop.permute.xlu1 %4440 }
0x553c   :  { %v4443_v24 = vmul.f32 %v5768_v8, %v4441_v11 }
0x553f   :  { %v4410_v20 = vpop.permute.xlu1 %4409 }
0x5540   :  { %v4412_v23 = vmul.f32 %v5766_v40, %v4410_v20 }
0x5544   :  { %v5770_v35 = vpop.eup %5769 }
0x5545   :  { %4435 = vrot.lane.b32.xlu0 %v5770_v35, %s5819_s2  ;;  %v5772_v15 = vpop.eup %5771 }
0x5549   :  { %4403 = vrot.lane.b32.xlu0 %v5772_v15, %s5819_s2 }
0x55b7   :  { %v4436_v17 = vpop.permute.xlu0 %4435 }
0x55b8   :  { %v4438_v26 = vmul.f32 %v4436_v17, %v4433_v34 }
0x55ba   :  { %v7202_v6 = vadd.f32 %v4443_v24, %v4438_v26 }
0x55bb   :  { %v4404_v60 = vpop.permute.xlu0 %4403 }
0x55bc   :  { %v4450_v55 = vrot.slane %v7202_v6, 2  ;;  %v4406_v13 = vmul.f32 %v4404_v60, %v4401_v10 }
0x55be   :  { %v7205_v19 = vadd.f32 %v4412_v23, %v4406_v13  ;;  %4451 = vrot.lane.b32.xlu1 %v4450_v55, %s5820_s0 }
0x55c0   :  { %4446 = vrot.lane.b32.xlu0 %v7205_v19, %s5819_s2 }
0x5630   :  { %v4452_v50 = vpop.permute.xlu1 %4451 }
0x5632   :  { %v4447_v62 = vpop.permute.xlu0 %4446 }
0x5633   :  { %v4454_v25 = vsel %vm621_vm9, %v4447_v62, %v4452_v50 }
0x5634   :  { %v4455_v5 = vpack.c.bf16 %v4454_v25, %v4454_v25  ;;  %v4528_v54 = vrot.slane %v4454_v25, 6 }
0x5636   :  { %v4457_v22 = vrot.slane %v4455_v5, 1 }
0x5638   :  { %5294 = vmatmul.mubr.msk.bf16.vlgmr.msra.gmra.mrb[72].mxu1 %vm270_vm3, %v4457_v22  ;;  %v4691_v22 = vsel %vm248_vm4, %v7177_v59, %v7205_v19 }
0x570b   :  { %v4495_v48 = vpop.f32.mrb[72].mxu1 }
0x570c   :  { %v4496_v7 = vadd.f32 %v7040_v44, %v4495_v48  ;;  %v5295_v16 = vpop.f32.mrb[73].mxu1 }
0x570d   :  { %v4498_v21 = vpop.f32.mrb[74].mxu1 }
0x570e   :  { %v4502_v57 = vrot.slane %v4496_v7, 4  ;;  %v4534_v49 = vrot.slane %v4496_v7, 6  ;;  %v5296_v1 = vpop.f32.mrb[75].mxu1 }
0x5710   :  { %4543 = vrot.lane.b32.xlu0 %v4534_v49, %s5812_s21  ;;  %4511 = vrot.lane.b32.xlu1 %v4502_v57, %s5812_s21  ;;  %v4504_v47 = vadd.f32 %v4502_v57, %v6788_v38  ;;  %v4536_v30 = vadd.f32 %v4534_v49, %v6786_v31 }
0x5712   :  { %v4913_v43 = vmul.f32 -1.442695, %v4504_v47  ;;  %v4914_v61 = vmul.f32 -1.442695, %v4536_v30 }
0x5714   :  { %5773 = vpow2.f32 %v4913_v43 }
0x5715   :  { %5775 = vpow2.f32 %v4914_v61 }
0x571e   :  { %v5774_v3 = vpop.eup %5773 }
0x571f   :  { %v5776_v40 = vpop.eup %5775  ;;  %v4508_v8 = vadd.f32 1.0, %v5774_v3 }
0x5720   :  { %v4540_v0 = vadd.f32 1.0, %v5776_v40 }
0x5721   :  { %5777 = vrcp.f32 %v4508_v8 }
0x5722   :  { %5779 = vrcp.f32 %v4540_v0 }
0x572b   :  { %v5778_v4 = vpop.eup %5777 }
0x572c   :  { %v5780_v51 = vpop.eup %5779  ;;  %v4521_v55 = vsub.f32 1.0, %v5778_v4 }
0x572d   :  { %v4553_v24 = vsub.f32 1.0, %v5780_v51 }
0x5782   :  { %v4544_v32 = vpop.permute.xlu0 %4543  ;;  %v4512_v33 = vpop.permute.xlu1 %4511 }
0x5783   :  { %v4546_v37 = vmul.f32 %v5780_v51, %v4544_v32  ;;  %v4514_v46 = vmul.f32 %v5778_v4, %v4512_v33 }
0x5785   :  { %4548 = vrot.lane.b32.xlu0 %v4546_v37, %s5813_s26  ;;  %4516 = vrot.lane.b32.xlu1 %v4514_v46, %s5813_s26 }
0x5789   :  { %4559 = vrot.lane.b32.xlu1 %v4454_v25, %s5817_s7 }
0x578d   :  { %4529 = vrot.lane.b32.xlu1 %v4528_v54, %s5818_s30 }
0x57f7   :  { %v4549_v39 = vpop.permute.xlu0 %4548  ;;  %v4517_v53 = vpop.permute.xlu1 %4516 }
0x57f8   :  { %v4551_v35 = vadd.f32 %v4549_v39, %v6786_v31  ;;  %v4519_v15 = vadd.f32 %v4517_v53, %v6788_v38 }
0x57fa   :  { %5781 = vtanh.f32 %v4551_v35 }
0x57fb   :  { %5783 = vtanh.f32 %v4519_v15  ;;  %v4560_v17 = vpop.permute.xlu1 %4559  ;;  %v4697_v15 = vsel %vm248_vm4, %v7145_v28, %v7113_v12 }
0x57fc   :  { %v4562_v20 = vmul.f32 %v5780_v51, %v4560_v17 }
0x57ff   :  { %v4530_v60 = vpop.permute.xlu1 %4529 }
0x5800   :  { %v4532_v50 = vmul.f32 %v5778_v4, %v4530_v60 }
0x5804   :  { %v5782_v11 = vpop.eup %5781 }
0x5805   :  { %4555 = vrot.lane.b32.xlu0 %v5782_v11, %s5819_s2  ;;  %v5784_v34 = vpop.eup %5783  ;;  %v4698_v11 = vsel %vm188_vm2, %v4697_v15, %v7084_v27 }
0x5809   :  { %4523 = vrot.lane.b32.xlu0 %v5784_v34, %s5819_s2  ;;  %v4699_v34 = vsel %vm205_vm5, %v4698_v11, %v7055_v36  ;;  %v4918_v36 = vld [vmem:[%s7335_s18] ss:$0 sm:$0xff] }
0x5877   :  { %v4556_v26 = vpop.permute.xlu0 %4555 }
0x5878   :  { %v4558_v10 = vmul.f32 %v4556_v26, %v4553_v24 }
0x587a   :  { %v7225_v23 = vadd.f32 %v4562_v20, %v4558_v10 }
0x587b   :  { %v4524_v13 = vpop.permute.xlu0 %4523 }
0x587c   :  { %v4569_v62 = vrot.slane %v7225_v23, 6  ;;  %v4526_v25 = vmul.f32 %v4524_v13, %v4521_v55 }
0x587e   :  { %v4533_v5 = vadd.f32 %v4532_v50, %v4526_v25  ;;  %4570 = vrot.lane.b32.xlu1 %v4569_v62, %s5820_s0 }
0x5880   :  { %4565 = vrot.lane.b32.xlu0 %v4533_v5, %s5819_s2  ;;  %v7234_v48 = vsel %vm188_vm2, %v4691_v22, %v4533_v5 }
0x58f0   :  { %v4571_v7 = vpop.permute.xlu1 %4570 }
0x58f2   :  { %v4566_v16 = vpop.permute.xlu0 %4565 }
0x58f3   :  { %v4573_v21 = vsel %vm621_vm9, %v4566_v16, %v4571_v7 }
0x58f4   :  { %v4574_v57 = vpack.c.bf16 %v4573_v21, %v4573_v21  ;;  %v4676_v53 = vrot.slane %v4573_v21, 4  ;;  %v4647_v35 = vrot.slane %v4573_v21, 6 }
0x58f6   :  { %v4576_v49 = vrot.slane %v4574_v57, 2 }
0x58f8   :  { %5302 = vmatmul.mubr.msk.bf16.vlgmr.msra.gmra.mrb[76].mxu0 %vm270_vm3, %v4576_v49 }
0x59cb   :  { %v4614_v1 = vpop.f32.mrb[76].mxu0 }
0x59cc   :  { %v4615_v47 = vadd.f32 %v7040_v44, %v4614_v1  ;;  %v5303_v30 = vpop.f32.mrb[77].mxu0 }
0x59cd   :  { %v4617_v43 = vpop.f32.mrb[78].mxu0 }
0x59ce   :  { %v4621_v61 = vrot.slane %v4615_v47, 2  ;;  %4660 = vrot.lane.b32.xlu0 %v4615_v47, %s5812_s21  ;;  %v5304_v59 = vpop.f32.mrb[79].mxu0  ;;  %v4653_v19 = vadd.f32 %v4615_v47, %v6786_v31  ;;  %v4703_v43 = vsel %vm248_vm4, %v6890_v42, %v6858_v52 }
0x59d0   :  { %4630 = vrot.lane.b32.xlu1 %v4621_v61, %s5812_s21  ;;  %v4623_v3 = vadd.f32 %v4621_v61, %v6788_v38  ;;  %v4917_v40 = vmul.f32 -1.442695, %v4653_v19 }
0x59d2   :  { %v4916_v8 = vmul.f32 -1.442695, %v4623_v3  ;;  %5785 = vpow2.f32 %v4917_v40 }
0x59d4   :  { %5787 = vpow2.f32 %v4916_v8 }
0x59dc   :  { %v5786_v0 = vpop.eup %5785 }
0x59dd   :  { %v4657_v51 = vadd.f32 1.0, %v5786_v0 }
0x59de   :  { %v5788_v4 = vpop.eup %5787 }
0x59df   :  { %v4627_v44 = vadd.f32 1.0, %v5788_v4  ;;  %5789 = vrcp.f32 %v4657_v51 }
0x59e1   :  { %5791 = vrcp.f32 %v4627_v44 }
0x59e9   :  { %v5790_v32 = vpop.eup %5789 }
0x59ea   :  { %v4670_v62 = vsub.f32 1.0, %v5790_v32 }
0x59eb   :  { %v5792_v46 = vpop.eup %5791 }
0x59ec   :  { %v4640_v16 = vsub.f32 1.0, %v5792_v46 }
0x5a40   :  { %v4661_v33 = vpop.permute.xlu0 %4660 }
0x5a41   :  { %v4663_v37 = vmul.f32 %v5790_v32, %v4661_v33 }
0x5a42   :  { %v4631_v54 = vpop.permute.xlu1 %4630 }
0x5a43   :  { %v4633_v39 = vmul.f32 %v5792_v46, %v4631_v54  ;;  %4665 = vrot.lane.b32.xlu0 %v4663_v37, %s5813_s26 }
0x5a45   :  { %4635 = vrot.lane.b32.xlu1 %v4633_v39, %s5813_s26 }
0x5a49   :  { %4677 = vrot.lane.b32.xlu1 %v4676_v53, %s5817_s7 }
0x5a4d   :  { %4648 = vrot.lane.b32.xlu1 %v4647_v35, %s5818_s30 }
0x5a51   :  { %4712 = vrot.lane.b32.xlu1 %v7027_v18, %s5819_s2 }
0x5a55   :  { %4728 = vrot.lane.b32.xlu1 %v4699_v34, %s5820_s0 }
0x5ab5   :  { %v4666_v17 = vpop.permute.xlu0 %4665 }
0x5ab6   :  { %v4668_v24 = vadd.f32 %v4666_v17, %v6786_v31  ;;  %v4919_v31 = vld [vmem:[%s7336_s19] ss:$0 sm:$0xff] }
0x5ab7   :  { %v4636_v26 = vpop.permute.xlu1 %4635 }
0x5ab8   :  { %5793 = vtanh.f32 %v4668_v24  ;;  %v4638_v20 = vadd.f32 %v4636_v26, %v6788_v38 }
0x5aba   :  { %5795 = vtanh.f32 %v4638_v20 }
0x5abb   :  { %v4678_v10 = vpop.permute.xlu1 %4677 }
0x5abc   :  { %v4680_v5 = vmul.f32 %v5790_v32, %v4678_v10 }
0x5abf   :  { %v4649_v12 = vpop.permute.xlu1 %4648 }
0x5ac0   :  { %v4651_v57 = vmul.f32 %v5792_v46, %v4649_v12 }
0x5ac2   :  { %v5794_v28 = vpop.eup %5793 }
0x5ac3   :  { %4672 = vrot.lane.b32.xlu0 %v5794_v28, %s5819_s2  ;;  %v4713_v18 = vpop.permute.xlu1 %4712 }
0x5ac4   :  { %v5796_v27 = vpop.eup %5795 }
0x5ac7   :  { %4642 = vrot.lane.b32.xlu0 %v5796_v27, %s5819_s2  ;;  %v4729_v60 = vpop.permute.xlu1 %4728 }
0x5ac8   :  { %v4739_v38 = vsel %vm621_vm9, %v4713_v18, %v4729_v60 }
0x5ac9   :  { %v4749_v55 = vmul.f32 %v4918_v36, %v4739_v38 }
0x5acb   :  { %v4759_v13 = vadd.f32 %v4919_v31, %v4749_v55  ;;  %4710 = vrot.lane.b32.xlu0 %v6897_v45, %s5819_s2  ;;  %v4700_v45 = vsel %vm248_vm4, %v7020_v56, %v6978_v9 }
0x5acc   :  { %v4701_v9 = vsel %vm188_vm2, %v4700_v45, %v6949_v14 }
0x5acd   :  { %5797 = vtanh.f32 %v4759_v13 }
0x5acf   :  { %4714 = vrot.lane.b32.xlu0 %v7152_v58, %s5819_s2 }
0x5ad7   :  { %v5798_v50 = vpop.eup %5797 }
0x5ad8   :  { %4767 = vst.msk [vmem:[%s7337_s20 + $0x8] sm:$0xff] %vm270_vm3, %v5798_v50 }
0x5b35   :  { %v4673_v25 = vpop.permute.xlu0 %4672 }
0x5b36   :  { %v4675_v22 = vmul.f32 %v4673_v25, %v4670_v62 }
0x5b38   :  { %v4681_v7 = vadd.f32 %v4680_v5, %v4675_v22 }
0x5b39   :  { %v4643_v21 = vpop.permute.xlu0 %4642 }
0x5b3a   :  { %v4694_v58 = vsel %vm248_vm4, %v4681_v7, %v7225_v23  ;;  %v4645_v49 = vmul.f32 %v4643_v21, %v4640_v16 }
0x5b3b   :  { %v4695_v1 = vsel %vm188_vm2, %v4694_v58, %v7202_v6  ;;  %v4704_v6 = vsel %vm188_vm2, %v4703_v43, %v6829_v2 }
0x5b3c   :  { %v4652_v47 = vadd.f32 %v4651_v57, %v4645_v49  ;;  %v4696_v30 = vsel %vm205_vm5, %v4695_v1, %v7174_v29  ;;  %v4702_v29 = vsel %vm205_vm5, %v4701_v9, %v6920_v63  ;;  %v4705_v52 = vsel %vm205_vm5, %v4704_v6, %v6802_v41 }
0x5b3d   :  { %4726 = vrot.lane.b32.xlu0 %v4696_v30, %s5820_s0  ;;  %v4711_v42 = vpop.permute.xlu0 %4710 }
0x5b3e   :  { %v4693_v56 = vsel %vm205_vm5, %v7234_v48, %v4652_v47 }
0x5b3f   :  { %4716 = vrot.lane.b32.xlu1 %v4693_v56, %s5819_s2 }
0x5b41   :  { %4730 = vrot.lane.b32.xlu0 %v4702_v29, %s5820_s0  ;;  %v4715_v14 = vpop.permute.xlu0 %4714 }
0x5b43   :  { %4732 = vrot.lane.b32.xlu1 %v4705_v52, %s5820_s0 }
0x5baf   :  { %v4727_v23 = vpop.permute.xlu0 %4726 }
0x5bb0   :  { %v4738_v48 = vsel %vm621_vm9, %v4711_v42, %v4727_v23 }
0x5bb1   :  { %v4748_v61 = vmul.f32 %v4918_v36, %v4738_v48  ;;  %v4717_v59 = vpop.permute.xlu1 %4716 }
0x5bb3   :  { %v4758_v19 = vadd.f32 %v4919_v31, %v4748_v61  ;;  %v4731_v3 = vpop.permute.xlu0 %4730 }
0x5bb4   :  { %v4740_v2 = vsel %vm621_vm9, %v4715_v14, %v4731_v3 }
0x5bb5   :  { %5799 = vtanh.f32 %v4758_v19  ;;  %v4750_v63 = vmul.f32 %v4918_v36, %v4740_v2  ;;  %v4733_v40 = vpop.permute.xlu1 %4732 }
0x5bb6   :  { %v4741_v8 = vsel %vm621_vm9, %v4717_v59, %v4733_v40 }
0x5bb7   :  { %v4760_v0 = vadd.f32 %v4919_v31, %v4750_v63  ;;  %v4751_v41 = vmul.f32 %v4918_v36, %v4741_v8 }
0x5bb9   :  { %5801 = vtanh.f32 %v4760_v0  ;;  %v4761_v4 = vadd.f32 %v4919_v31, %v4751_v41 }
0x5bbb   :  { %5803 = vtanh.f32 %v4761_v4 }
0x5bbf   :  { %v5800_v51 = vpop.eup %5799 }
0x5bc0   :  { %4766 = vst.msk [vmem:[%s7337_s20] sm:$0xff] %vm270_vm3, %v5800_v51 }
0x5bc3   :  { %v5802_v44 = vpop.eup %5801 }
0x5bc4   :  { %4768 = vst.msk [vmem:[%s7337_s20 + $0x10] sm:$0xff] %vm270_vm3, %v5802_v44 }
0x5bc5   :  { %v5804_v32 = vpop.eup %5803 }
0x5bc6   :  { %4769 = vst.msk [vmem:[%s7337_s20 + $0x18] sm:$0xff] %vm270_vm3, %v5804_v32 }

</bundles_post_ra>
